<compile_context>
chip_gen: v6e
topology: v6e:2x2x1
jax: 0.10.0
libtpu: 0.0.40
codegen_flags: <defaults>
</compile_context>

<pallas_src>
import math
from functools import partial

import numpy as np
import jax
import jax.numpy as jnp
from jax import lax
from jax.experimental import pallas as pl
from jax.experimental.pallas import tpu as pltpu

MAX_CLICKS = 48          # semantic click-slot count hard-coded in MultiScaleAtt
S_PAD = 64               # padded slot count (sublane friendly); extra slots always masked


def _round_up(x, m):
    return ((x + m - 1) // m) * m


def _vmem_limit_bytes():
    """Generation-aware scoped-VMEM cap (v5e/v6e: ~77 MiB, v7x: ~38 MiB); safe fallback."""
    try:
        cap = int(pltpu.get_tpu_info().vmem_capacity_bytes)
        return max(32 << 20, min(cap * 6 // 10, 100 << 20))
    except Exception:
        return 32 << 20


# --------------------------- fusion (two 3x3 convs) --------------------------
def _conv3x3_flat(src_ref, w_ref, b_ref, *, nrows, base, W, lmask, rmask):
    """3x3 conv (zero padding) over flat rows as 9 shifted bf16 matmuls, f32 accumulation.

    Output row i sums src rows base + i + (dh-1)*W + (dw-1).  Column wrap across image rows
    is handled by zeroing the dw=0 / dw=2 partial sums on rows whose column is 0 / W-1
    (one where per dw-group instead of one per tap).  Bias added once at the end.
    """
    acc = None
    for dw in range(3):
        part = None
        for dh in range(3):
            off = base + (dh - 1) * W + (dw - 1)            # static Python int
            a = src_ref[pl.ds(off, nrows), :]               # bf16 operand
            d = jnp.dot(a, w_ref[dh * 3 + dw], preferred_element_type=jnp.float32)
            part = d if part is None else part + d
        if dw == 0:
            part = jnp.where(lmask, part, 0.0)
        elif dw == 2:
            part = jnp.where(rmask, part, 0.0)
        acc = part if acc is None else acc + part
    return acc + b_ref[...]


def _fusion_kernel(xin_ref, w1_ref, b1_ref, w2_ref, b2_ref, o_ref, pad_ref, *,
                   H, W, T, H1, HIN):
    """conv3x3+BN+ReLU -> conv3x3+BN+ReLU fused on one HW tile; f1 stays in bf16 VMEM.

    xin_ref: (T + 2*HIN, Cin) bf16 halo'd input window (rows outside the image are zero).
    pad_ref: (T + 2*H1, Cmid) bf16 scratch holding conv1's output tile + halo.
    o_ref:   (T, Cout) f32 output tile.
    """
    HW = H * W
    T1 = T + 2 * H1
    t = pl.program_id(1)

    # column masks are tile-invariant because T % W == 0
    i1 = lax.broadcasted_iota(jnp.int32, (T1, 1), 0)
    col1 = (i1 + ((-H1) % W)) % W
    i2 = lax.broadcasted_iota(jnp.int32, (T, 1), 0)
    col2 = i2 % W

    # conv1 + ReLU over the f1 tile (output tile plus H1-row halo each side)
    f1 = jnp.maximum(
        _conv3x3_flat(xin_ref, w1_ref, b1_ref, nrows=T1, base=HIN - H1, W=W,
                      lmask=col1 != 0, rmask=col1 != (W - 1)), 0.0)
    # rows outside the image must be zero: this is conv2's zero padding.  The whole scratch
    # (halo included) is rewritten every grid step, so no separate zero-init pass is needed.
    g = t * T - H1 + i1
    f1 = jnp.where((g >= 0) & (g < HW), f1, 0.0)
    pad_ref[...] = f1.astype(pad_ref.dtype)

    # conv2 + ReLU over the output tile
    f2 = jnp.maximum(
        _conv3x3_flat(pad_ref, w2_ref, b2_ref, nrows=T, base=H1, W=W,
                      lmask=col2 != 0, rmask=col2 != (W - 1)), 0.0)
    o_ref[...] = f2.astype(o_ref.dtype)


def _pick_fusion_tile(H, W, target_rows):
    """Largest T = th*W (th | H) with T % 8 == 0 and T <= target_rows; fallback: whole image."""
    HW = H * W
    if HW <= target_rows:
        return HW
    best = HW
    for th in range(1, H + 1):
        if H % th:
            continue
        t = th * W
        if t % 8 == 0 and t <= target_rows:
            best = t
    return best


def fusion_convs(cat_flat, w1, b1, w2, b2, *, H, W, out_dim, tile_rows, vmem_limit):
    """cat_flat: (B, H*W, Cin) f32  ->  (B, H*W, out_dim) f32, both 3x3 convs fused per tile."""
    B, HW, Cin = cat_flat.shape
    T = _pick_fusion_tile(H, W, tile_rows)
    n_tiles = HW // T
    H1 = _round_up(W + 1, 8)          # f1 halo rows needed by conv2's taps
    HIN = 2 * H1                      # input halo rows needed by the fused conv1+conv2 window
    T_in = T + 2 * HIN
    T1 = T + 2 * H1
    pref = HIN
    Lpad = _round_up(pref + HW + HIN, 8)

    # bf16 padded slab (zero rows above/below the image), then overlapping halo'd windows.
    # NOTE: if W % 8 != 0, padding the image width to a multiple of 8 would keep the +-W
    # conv taps sublane-aligned; at W % 8 == 0 the dw==1 taps are already aligned.
    xp = jnp.pad(cat_flat.astype(jnp.bfloat16),
                 ((0, 0), (pref, Lpad - pref - HW), (0, 0)))
    xp_tiles = jnp.concatenate(
        [xp[:, t * T: t * T + T_in, :][:, None] for t in range(n_tiles)],
        axis=1).reshape(B * n_tiles, T_in, Cin)

    return pl.pallas_call(
        partial(_fusion_kernel, H=H, W=W, T=T, H1=H1, HIN=HIN),
        out_shape=jax.ShapeDtypeStruct((B, HW, out_dim), jnp.float32),
        grid=(B, n_tiles),
        in_specs=[
            pl.BlockSpec((None, T_in, Cin), lambda b, t: (b * n_tiles + t, 0, 0)),
            pl.BlockSpec((9, Cin, out_dim), lambda b, t: (0, 0, 0)),
            pl.BlockSpec((1, out_dim), lambda b, t: (0, 0)),
            pl.BlockSpec((9, out_dim, out_dim), lambda b, t: (0, 0, 0)),
            pl.BlockSpec((1, out_dim), lambda b, t: (0, 0)),
        ],
        out_specs=pl.BlockSpec((None, T, out_dim), lambda b, t: (b, t, 0)),
        scratch_shapes=[pltpu.VMEM((T1, out_dim), jnp.bfloat16)],
        compiler_params=pltpu.CompilerParams(
            dimension_semantics=("parallel", "parallel"),
            vmem_limit_bytes=vmem_limit),
    )(xp_tiles, w1, b1, w2, b2)


# ----------------------- attention + residual epilogue -----------------------
def _attention_kernel(n_ref, x_ref, wqk_ref, cq_ref, vsel_ref, val_ref, o_ref, *, gamma):
    n = n_ref[pl.program_id(0)]                        # valid clicks for this batch
    # energy = (x @ q_w + q_b) @ k_sel^T * scale, with the q projection + scale pre-folded
    # into wqk (Ch, S) and cq (1, S).  x arrives as bf16 (mem-bound kernel).
    energy = jnp.dot(x_ref[...], wqk_ref[...],
                     preferred_element_type=jnp.float32) + cq_ref[...]      # (tq, S)
    col = lax.broadcasted_iota(jnp.int32, energy.shape, 1)
    valid = col < n
    e = jnp.where(valid, energy, jnp.float32(-1e30))
    m = jnp.max(e, axis=-1, keepdims=True)
    p = jnp.where(valid, jnp.exp(e - m), 0.0)
    denom = jnp.sum(p, axis=-1, keepdims=True)
    inv = jnp.where(denom > 0.0, pl.reciprocal(denom, approx=True), 0.0)    # n==0 -> zero rows
    attn = p * inv
    out = jnp.dot(attn.astype(jnp.bfloat16), vsel_ref[...],
                  preferred_element_type=jnp.float32)                       # (tq, C)
    o_ref[...] = (gamma * out + val_ref[...]).astype(o_ref.dtype)


def attention_residual(n_counts, x_bf16, wqk, cq, v_sel, value_flat, *, gamma, tq, vmem_limit):
    B, HW, Ch = x_bf16.shape
    S = wqk.shape[-1]
    C = v_sel.shape[-1]
    # cdiv grid: rows in a partial last tile are computed on padded data and dropped on store.
    grid_spec = pltpu.PrefetchScalarGridSpec(
        num_scalar_prefetch=1,
        grid=(B, pl.cdiv(HW, tq)),
        in_specs=[
            pl.BlockSpec((None, tq, Ch), lambda b, t, n: (b, t, 0)),
            pl.BlockSpec((None, Ch, S), lambda b, t, n: (b, 0, 0)),
            pl.BlockSpec((None, 1, S), lambda b, t, n: (b, 0, 0)),
            pl.BlockSpec((None, S, C), lambda b, t, n: (b, 0, 0)),
            pl.BlockSpec((None, tq, C), lambda b, t, n: (b, t, 0)),
        ],
        out_specs=pl.BlockSpec((None, tq, C), lambda b, t, n: (b, t, 0)),
    )
    # TODO(synk): alias value_flat to the output (input_output_aliases) to drop the extra
    # HBM allocation once the operand-index-with-scalar-prefetch convention is verified.
    return pl.pallas_call(
        partial(_attention_kernel, gamma=gamma),
        out_shape=jax.ShapeDtypeStruct((B, HW, C), jnp.float32),
        grid_spec=grid_spec,
        compiler_params=pltpu.CompilerParams(
            dimension_semantics=("parallel", "parallel"),
            vmem_limit_bytes=vmem_limit),
    )(n_counts, x_bf16, wqk, cq, v_sel, value_flat)


# ------------------------------ JAX glue ------------------------------------
def _bilinear_resize(x, H_out, W_out):
    """F.interpolate(x, (H_out, W_out), mode='bilinear', align_corners=True), exact f32."""
    _, _, Hin, Win = x.shape

    def grid1d(out, inp):
        if inp == 1:
            z = jnp.zeros((out,), jnp.int32)
            return z, z, jnp.zeros((out,), jnp.float32)
        c = jnp.linspace(0.0, inp - 1.0, out)
        lo = jnp.clip(jnp.floor(c), 0, inp - 2).astype(jnp.int32)
        w = (c - lo.astype(jnp.float32)).astype(jnp.float32)
        return lo, lo + 1, w

    hlo, hhi, hw_ = grid1d(H_out, Hin)
    wlo, whi, ww_ = grid1d(W_out, Win)
    rows = (x[:, :, hlo, :] * (1.0 - hw_)[None, None, :, None]
            + x[:, :, hhi, :] * hw_[None, None, :, None])
    return (rows[:, :, :, wlo] * (1.0 - ww_)[None, None, None, :]
            + rows[:, :, :, whi] * ww_[None, None, None, :])


def _interp_matrix(out_size, in_size):
    """Interpolation matrix for bilinear resize with align_corners=True (reference only)."""
    if in_size == 1:
        return jnp.ones((out_size, 1), jnp.float32)
    if out_size == 1:
        return jnp.zeros((1, in_size), jnp.float32).at[0, 0].set(1.0)
    coords = jnp.linspace(0.0, in_size - 1.0, out_size)
    lo = jnp.clip(jnp.floor(coords).astype(jnp.int32), 0, in_size - 2)
    w = coords - lo.astype(jnp.float32)
    return (jax.nn.one_hot(lo, in_size) * (1.0 - w)[:, None]
            + jax.nn.one_hot(lo + 1, in_size) * w[:, None]).astype(jnp.float32)


def _fold_bn(w, b, g, beta, m, v, eps=1e-5):
    """Fold inference BatchNorm into a (..., Cout) weight / (Cout,) bias."""
    s = g / jnp.sqrt(v + eps)
    return w * s, (b - m) * s + beta


def _prepare_points(points, H, W, ratio):
    """Point masking + reduce_point compaction into S_PAD fixed slots."""
    y = points[:, :, 0]
    x = points[:, :, 1]
    invalid = (y >= H * ratio) | (x >= W * ratio)
    y = jnp.where(invalid, -1, y)
    x = jnp.where(invalid, -1, x)
    sel = jnp.floor_divide(y, ratio) * W + jnp.floor_divide(x, ratio)        # (B, P)
    # NOTE: matches PyTorch reduce_point (`points > 0` on the flat index): a click landing
    # exactly on flat index 0 is dropped.
    valid = sel > 0
    n = jnp.minimum(jnp.sum(valid.astype(jnp.int32), axis=-1), MAX_CLICKS)   # (B,)
    order = jnp.argsort(jnp.where(valid, 0, 1), axis=-1, stable=True)        # valid first
    sel_sorted = jnp.take_along_axis(sel, order, axis=-1)
    P = sel.shape[1]
    if P < S_PAD:
        sel_sorted = jnp.pad(sel_sorted, ((0, 0), (0, S_PAD - P)))
    idx = sel_sorted[:, :S_PAD]
    slot_valid = jnp.arange(S_PAD)[None, :] < n[:, None]
    idx = jnp.where(slot_valid, idx, 0).astype(jnp.int32)
    return idx, n.astype(jnp.int32)


# --------------------------- full forward pass ------------------------------
def multi_scale_att_forward(params, high, low, points, *, reduction, ratio, gamma,
                            fuse_tile_rows=1024):
    B, Ch, Hh, Wh = high.shape
    _, Cl, H, W = low.shape
    HW = H * W
    out_dim = params['fuse_b1'].shape[0]
    vmem_limit = _vmem_limit_bytes()

    # F.interpolate(high, (H, W), mode='bilinear', align_corners=True) — exact gather+lerp.
    x = _bilinear_resize(high, H, W)                                         # (B,Ch,H,W) f32
    x_flat = jnp.transpose(x, (0, 2, 3, 1)).reshape(B, HW, Ch)

    # fusion input: concat(x, low) channel-last, flattened row-major.
    low_flat = jnp.transpose(low, (0, 2, 3, 1)).reshape(B, HW, Cl)
    cat_flat = jnp.concatenate([x_flat, low_flat], axis=-1)                  # (B,HW,Ch+Cl) f32

    # fold eval-mode BN into the conv weights; bf16 MXU operands, f32 bias/acc.
    w1, b1 = _fold_bn(params['fuse_w1'], params['fuse_b1'], params['bn1_g'],
                      params['bn1_b'], params['bn1_m'], params['bn1_v'])
    w2, b2 = _fold_bn(params['fuse_w2'], params['fuse_b2'], params['bn2_g'],
                      params['bn2_b'], params['bn2_m'], params['bn2_v'])
    w1 = w1.reshape(9, Ch + Cl, out_dim).astype(jnp.bfloat16)
    w2 = w2.reshape(9, out_dim, out_dim).astype(jnp.bfloat16)
    b1 = b1.reshape(1, out_dim).astype(jnp.float32)
    b2 = b2.reshape(1, out_dim).astype(jnp.float32)

    value_flat = fusion_convs(cat_flat, w1, b1, w2, b2, H=H, W=W, out_dim=out_dim,
                              tile_rows=fuse_tile_rows, vmem_limit=vmem_limit)

    # click masking + compaction (torch.nonzero equivalent) -> fixed padded slots.
    idx, n = _prepare_points(points, H, W, ratio)

    # gather-then-project: the 1x1 convs commute with the row gather, so only the <=48
    # selected rows are projected (tiny f32 glue; HIGHEST precision is essentially free here).
    x_sel = jnp.take_along_axis(x_flat, idx[:, :, None], axis=1)             # (B,S,Ch)
    val_sel = jnp.take_along_axis(value_flat, idx[:, :, None], axis=1)       # (B,S,out)
    k_sel = jnp.einsum('bsc,cd->bsd', x_sel, params['k_w'],
                       precision=lax.Precision.HIGHEST) + params['k_b']      # (B,S,Ch//r)
    v_sel = jnp.einsum('bsc,cd->bsd', val_sel, params['v_w'],
                       precision=lax.Precision.HIGHEST) + params['v_b']      # (B,S,out)

    # fold query projection + softmax scale: energy = x @ wqk + cq
    scale = math.sqrt(reduction / Ch)
    wqk = scale * jnp.einsum('cd,bsd->bcs', params['q_w'], k_sel,
                             precision=lax.Precision.HIGHEST)                # (B,Ch,S)
    cq = scale * jnp.einsum('d,bsd->bs', params['q_b'], k_sel,
                            precision=lax.Precision.HIGHEST)                 # (B,S)

    tq = HW if HW <= 2048 else 2048                                          # 2048 % 8 == 0
    out_flat = attention_residual(
        n, x_flat.astype(jnp.bfloat16), wqk.astype(jnp.bfloat16),
        cq.reshape(B, 1, S_PAD).astype(jnp.float32),
        v_sel.astype(jnp.bfloat16), value_flat,
        gamma=gamma, tq=tq, vmem_limit=vmem_limit)
    return jnp.transpose(out_flat.reshape(B, H, W, out_dim), (0, 3, 1, 2))   # NCHW


# --------------------- pure JAX/numpy reference (for checking) --------------
def reference_forward(params, high, low, points, *, reduction, ratio, gamma):
    B, Ch, Hh, Wh = high.shape
    _, Cl, H, W = low.shape
    HW = H * W
    Ah = _interp_matrix(H, Hh)
    Aw = _interp_matrix(W, Wh)
    x = jnp.einsum('oh,bchw,pw->bcop', Ah, high, Aw, precision=lax.Precision.HIGHEST)
    cat = jnp.concatenate([x, low], axis=1)

    def conv3(inp, w, b):
        w_oihw = jnp.transpose(w, (3, 2, 0, 1))
        y = lax.conv_general_dilated(inp, w_oihw, (1, 1), ((1, 1), (1, 1)),
                                     precision=lax.Precision.HIGHEST)
        return y + b[None, :, None, None]

    def bn(inp, g, bta, m, v, eps=1e-5):
        return (inp - m[None, :, None, None]) * (g / jnp.sqrt(v + eps))[None, :, None, None] \
            + bta[None, :, None, None]

    f = jax.nn.relu(bn(conv3(cat, params['fuse_w1'], params['fuse_b1']),
                       params['bn1_g'], params['bn1_b'], params['bn1_m'], params['bn1_v']))
    value = jax.nn.relu(bn(conv3(f, params['fuse_w2'], params['fuse_b2']),
                           params['bn2_g'], params['bn2_b'], params['bn2_m'], params['bn2_v']))

    def conv1(inp, w, b):
        return jnp.einsum('bchw,cd->bdhw', inp, w,
                          precision=lax.Precision.HIGHEST) + b[None, :, None, None]

    proj_q = np.asarray(conv1(x, params['q_w'], params['q_b'])).reshape(B, -1, HW).transpose(0, 2, 1)
    proj_k = np.asarray(conv1(x, params['k_w'], params['k_b'])).reshape(B, -1, HW)
    proj_v = np.asarray(conv1(value, params['v_w'], params['v_b'])).reshape(B, -1, HW)

    pts = np.asarray(points).copy()
    pts[(pts[:, :, 0] >= H * ratio) | (pts[:, :, 1] >= W * ratio)] = -1
    sel = pts[:, :, 0] // ratio * W + pts[:, :, 1] // ratio
    C = Ch
    psk = np.zeros((B, C // reduction, MAX_CLICKS), np.float32)
    psv = np.zeros((B, C, MAX_CLICKS), np.float32)
    Ns = []
    for b in range(B):
        vp = sel[b][sel[b] > 0]
        n = vp.shape[0]
        Ns.append(n)
        if n == 0:
            continue
        psk[b, :, :n] = proj_k[b][:, vp]
        psv[b, :, :n] = proj_v[b][:, vp]
    energy = np.einsum('bnc,bcs->bns', proj_q, psk) * math.sqrt(reduction / C)
    attention = np.zeros_like(energy)
    for b, n in enumerate(Ns):
        if n == 0:
            continue
        e = energy[b, :, :n]
        e = e - e.max(-1, keepdims=True)
        p = np.exp(e)
        attention[b, :, :n] = p / p.sum(-1, keepdims=True)
    out = np.einsum('bcs,bns->bcn', psv, attention).reshape(B, C, H, W)
    return gamma * out + np.asarray(value)


# --------------------------------- main --------------------------------------
if __name__ == "__main__":
    B = 2
    high_dim, low_dim, out_dim = 128, 64, 128
    reduction, ratio = 4, 2
    Hh = Wh = 8          # high-level feature spatial size
    H = W = 16           # low-level feature spatial size

    key = jax.random.PRNGKey(0)
    ks = jax.random.split(key, 24)

    def rnd(k, shape, s=0.1):
        return jax.random.normal(k, shape, jnp.float32) * s

    params = {
        # 1x1 convs: weights stored as (Cin, Cout)
        'q_w': rnd(ks[0], (high_dim, high_dim // reduction)),
        'q_b': rnd(ks[1], (high_dim // reduction,)),
        'k_w': rnd(ks[2], (high_dim, high_dim // reduction)),
        'k_b': rnd(ks[3], (high_dim // reduction,)),
        'v_w': rnd(ks[4], (out_dim, out_dim)),
        'v_b': rnd(ks[5], (out_dim,)),
        # fusion 3x3 convs: weights stored as (kh, kw, Cin, Cout); BN in eval mode
        'fuse_w1': rnd(ks[6], (3, 3, high_dim + low_dim, out_dim), 0.05),
        'fuse_b1': rnd(ks[7], (out_dim,)),
        'bn1_g': 1.0 + rnd(ks[8], (out_dim,)),
        'bn1_b': rnd(ks[9], (out_dim,)),
        'bn1_m': rnd(ks[10], (out_dim,)),
        'bn1_v': jnp.abs(rnd(ks[11], (out_dim,))) + 1.0,
        'fuse_w2': rnd(ks[12], (3, 3, out_dim, out_dim), 0.05),
        'fuse_b2': rnd(ks[13], (out_dim,)),
        'bn2_g': 1.0 + rnd(ks[14], (out_dim,)),
        'bn2_b': rnd(ks[15], (out_dim,)),
        'bn2_m': rnd(ks[16], (out_dim,)),
        'bn2_v': jnp.abs(rnd(ks[17], (out_dim,))) + 1.0,
    }
    # PyTorch init is gamma = 0; use a nonzero deterministic value so the attention path matters.
    gamma = 0.5

    high = jax.random.normal(ks[20], (B, high_dim, Hh, Wh), jnp.float32)
    low = jax.random.normal(ks[21], (B, low_dim, H, W), jnp.float32)
    # points: (B, P, 2) = (y, x) clicks in high-res (ratio-scaled) coordinates;
    # includes out-of-range and -1 (padding) clicks to exercise the masking.
    points = jnp.array(
        [[[3, 5], [10, 20], [31, 31], [40, 2], [0, 0], [-1, -1], [7, 7], [12, 30]],
         [[1, 1], [25, 9], [33, 33], [-1, -1], [15, 16], [2, 28], [5, 40], [30, 0]]],
        dtype=jnp.int32)

    # fuse_tile_rows=128 exercises the multi-tile halo path even at this small test size.
    fwd = jax.jit(partial(multi_scale_att_forward,
                          reduction=reduction, ratio=ratio, gamma=gamma,
                          fuse_tile_rows=128))
    out = fwd(params, high, low, points)
    jax.block_until_ready(out)

    ref = reference_forward(params, high, low, points,
                            reduction=reduction, ratio=ratio, gamma=gamma)
    # bf16 MXU operands (f32 accumulation) vs. full-f32 reference.
    np.testing.assert_allclose(np.asarray(out), np.asarray(ref), atol=5e-2, rtol=3e-2)
    print("KERNEL_OK")
</pallas_src>

<mosaic_0001>
module attributes {stable_mosaic.version = 11 : i64} {
  func.func @_fusion_kernel(%arg0: i32, %arg1: i32, %arg2: memref<1x224x192xbf16, #tpu.memory_space<vmem>>, %arg3: memref<9x192x128xbf16, #tpu.memory_space<vmem>>, %arg4: memref<1x128xf32, #tpu.memory_space<vmem>>, %arg5: memref<9x128x128xbf16, #tpu.memory_space<vmem>>, %arg6: memref<1x128xf32, #tpu.memory_space<vmem>>, %arg7: memref<1x128x128xf32, #tpu.memory_space<vmem>>, %arg8: memref<176x128xbf16, #tpu.memory_space<vmem>>) attributes {dimension_semantics = [#tpu.dimension_semantics<parallel>, #tpu.dimension_semantics<parallel>], iteration_bounds = array<i64: 2, 2>, scalar_prefetch = 0 : i64, scratch_operands = 1 : i64, tpu.core_type = #tpu.core_type<tc>, window_params = [{transform_indices = @transform_0, window_bounds = array<i64: 1, 224, 192>}, {pipeline_mode = #tpu.pipeline_mode<synchronous>, transform_indices = @transform_1, window_bounds = array<i64: 9, 192, 128>}, {pipeline_mode = #tpu.pipeline_mode<synchronous>, transform_indices = @transform_2, window_bounds = array<i64: 1, 128>}, {pipeline_mode = #tpu.pipeline_mode<synchronous>, transform_indices = @transform_3, window_bounds = array<i64: 9, 128, 128>}, {pipeline_mode = #tpu.pipeline_mode<synchronous>, transform_indices = @transform_4, window_bounds = array<i64: 1, 128>}, {transform_indices = @transform_5, window_bounds = array<i64: 1, 128, 128>}]} {
    %0 = tpu.iota {dimensions = array<i32: 0>} : vector<176x1xi32>
    %c8_i32 = arith.constant 8 : i32
    %1 = vector.broadcast %c8_i32 : i32 to vector<176x1xi32>
    %2 = arith.addi %0, %1 : vector<176x1xi32>
    %c16_i32 = arith.constant 16 : i32
    %c0_i32 = arith.constant 0 : i32
    %3 = arith.cmpi eq, %c16_i32, %c0_i32 : i32
    %c1_i32 = arith.constant 1 : i32
    %4 = arith.select %3, %c1_i32, %c16_i32 : i32
    %5 = vector.broadcast %4 : i32 to vector<176x1xi32>
    %6 = arith.remsi %2, %5 : vector<176x1xi32>
    %c0_i32_0 = arith.constant 0 : i32
    %7 = vector.broadcast %c0_i32_0 : i32 to vector<176x1xi32>
    %8 = arith.cmpi ne, %6, %7 : vector<176x1xi32>
    %c0_i32_1 = arith.constant 0 : i32
    %9 = vector.broadcast %c0_i32_1 : i32 to vector<176x1xi32>
    %10 = arith.cmpi slt, %6, %9 : vector<176x1xi32>
    %c0_i32_2 = arith.constant 0 : i32
    %11 = arith.cmpi slt, %4, %c0_i32_2 : i32
    %12 = vector.broadcast %11 : i1 to vector<176x1xi1>
    %13 = vector.broadcast %12 : vector<176x1xi1> to vector<176x1xi1>
    %14 = arith.xori %10, %13 : vector<176x1xi1>
    %15 = arith.andi %14, %8 : vector<176x1xi1>
    %16 = vector.broadcast %4 : i32 to vector<176x1xi32>
    %17 = arith.addi %6, %16 : vector<176x1xi32>
    %18 = arith.select %15, %17, %6 : vector<176x1xi1>, vector<176x1xi32>
    %19 = tpu.iota {dimensions = array<i32: 0>} : vector<128x1xi32>
    %c16_i32_3 = arith.constant 16 : i32
    %c0_i32_4 = arith.constant 0 : i32
    %20 = arith.cmpi eq, %c16_i32_3, %c0_i32_4 : i32
    %c1_i32_5 = arith.constant 1 : i32
    %21 = arith.select %20, %c1_i32_5, %c16_i32_3 : i32
    %22 = vector.broadcast %21 : i32 to vector<128x1xi32>
    %23 = arith.remsi %19, %22 : vector<128x1xi32>
    %c0_i32_6 = arith.constant 0 : i32
    %24 = vector.broadcast %c0_i32_6 : i32 to vector<128x1xi32>
    %25 = arith.cmpi ne, %23, %24 : vector<128x1xi32>
    %c0_i32_7 = arith.constant 0 : i32
    %26 = vector.broadcast %c0_i32_7 : i32 to vector<128x1xi32>
    %27 = arith.cmpi slt, %23, %26 : vector<128x1xi32>
    %c0_i32_8 = arith.constant 0 : i32
    %28 = arith.cmpi slt, %21, %c0_i32_8 : i32
    %29 = vector.broadcast %28 : i1 to vector<128x1xi1>
    %30 = vector.broadcast %29 : vector<128x1xi1> to vector<128x1xi1>
    %31 = arith.xori %27, %30 : vector<128x1xi1>
    %32 = arith.andi %31, %25 : vector<128x1xi1>
    %33 = vector.broadcast %21 : i32 to vector<128x1xi32>
    %34 = arith.addi %23, %33 : vector<128x1xi32>
    %35 = arith.select %32, %34, %23 : vector<128x1xi1>, vector<128x1xi32>
    %c0_i32_9 = arith.constant 0 : i32
    %36 = vector.broadcast %c0_i32_9 : i32 to vector<176x1xi32>
    %37 = arith.cmpi ne, %18, %36 : vector<176x1xi32>
    %c15_i32 = arith.constant 15 : i32
    %38 = vector.broadcast %c15_i32 : i32 to vector<176x1xi32>
    %39 = arith.cmpi ne, %18, %38 : vector<176x1xi32>
    %c0 = arith.constant 0 : index
    %c7 = arith.constant 7 : index
    %c0_10 = arith.constant 0 : index
    %40 = vector.load %arg2[%c0, %c7, %c0_10] : memref<1x224x192xbf16, #tpu.memory_space<vmem>>, vector<1x176x192xbf16>
    %41 = vector.shape_cast %40 : vector<1x176x192xbf16> to vector<176x192xbf16>
    %c0_11 = arith.constant 0 : index
    %c0_12 = arith.constant 0 : index
    %c0_13 = arith.constant 0 : index
    %42 = vector.load %arg3[%c0_11, %c0_12, %c0_13] : memref<9x192x128xbf16, #tpu.memory_space<vmem>>, vector<1x192x128xbf16>
    %43 = vector.shape_cast %42 : vector<1x192x128xbf16> to vector<192x128xbf16>
    %cst = arith.constant dense<0.000000e+00> : vector<176x128xf32>
    %44 = tpu.matmul %41, %43, %cst {dimension_numbers = #tpu.dot_dimension_numbers<[1], [0], [0], [1], [0, 0, 1, 1], [], []>} : vector<176x192xbf16>, vector<192x128xbf16>, vector<176x128xf32> -> vector<176x128xf32>
    %c0_14 = arith.constant 0 : index
    %c23 = arith.constant 23 : index
    %c0_15 = arith.constant 0 : index
    %45 = vector.load %arg2[%c0_14, %c23, %c0_15] : memref<1x224x192xbf16, #tpu.memory_space<vmem>>, vector<1x176x192xbf16>
    %46 = vector.shape_cast %45 : vector<1x176x192xbf16> to vector<176x192xbf16>
    %c3 = arith.constant 3 : index
    %c0_16 = arith.constant 0 : index
    %c0_17 = arith.constant 0 : index
    %47 = vector.load %arg3[%c3, %c0_16, %c0_17] : memref<9x192x128xbf16, #tpu.memory_space<vmem>>, vector<1x192x128xbf16>
    %48 = vector.shape_cast %47 : vector<1x192x128xbf16> to vector<192x128xbf16>
    %cst_18 = arith.constant dense<0.000000e+00> : vector<176x128xf32>
    %49 = tpu.matmul %46, %48, %cst_18 {dimension_numbers = #tpu.dot_dimension_numbers<[1], [0], [0], [1], [0, 0, 1, 1], [], []>} : vector<176x192xbf16>, vector<192x128xbf16>, vector<176x128xf32> -> vector<176x128xf32>
    %50 = arith.addf %44, %49 : vector<176x128xf32>
    %c0_19 = arith.constant 0 : index
    %c39 = arith.constant 39 : index
    %c0_20 = arith.constant 0 : index
    %51 = vector.load %arg2[%c0_19, %c39, %c0_20] : memref<1x224x192xbf16, #tpu.memory_space<vmem>>, vector<1x176x192xbf16>
    %52 = vector.shape_cast %51 : vector<1x176x192xbf16> to vector<176x192xbf16>
    %c6 = arith.constant 6 : index
    %c0_21 = arith.constant 0 : index
    %c0_22 = arith.constant 0 : index
    %53 = vector.load %arg3[%c6, %c0_21, %c0_22] : memref<9x192x128xbf16, #tpu.memory_space<vmem>>, vector<1x192x128xbf16>
    %54 = vector.shape_cast %53 : vector<1x192x128xbf16> to vector<192x128xbf16>
    %cst_23 = arith.constant dense<0.000000e+00> : vector<176x128xf32>
    %55 = tpu.matmul %52, %54, %cst_23 {dimension_numbers = #tpu.dot_dimension_numbers<[1], [0], [0], [1], [0, 0, 1, 1], [], []>} : vector<176x192xbf16>, vector<192x128xbf16>, vector<176x128xf32> -> vector<176x128xf32>
    %56 = arith.addf %50, %55 : vector<176x128xf32>
    %cst_24 = arith.constant 0.000000e+00 : f32
    %57 = vector.shape_cast %37 : vector<176x1xi1> to vector<176x1xi1>
    %58 = vector.broadcast %57 : vector<176x1xi1> to vector<176x128xi1>
    %59 = vector.broadcast %cst_24 : f32 to vector<176x128xf32>
    %60 = arith.select %58, %56, %59 : vector<176x128xi1>, vector<176x128xf32>
    %c0_25 = arith.constant 0 : index
    %c8 = arith.constant 8 : index
    %c0_26 = arith.constant 0 : index
    %61 = vector.load %arg2[%c0_25, %c8, %c0_26] : memref<1x224x192xbf16, #tpu.memory_space<vmem>>, vector<1x176x192xbf16>
    %62 = vector.shape_cast %61 : vector<1x176x192xbf16> to vector<176x192xbf16>
    %c1 = arith.constant 1 : index
    %c0_27 = arith.constant 0 : index
    %c0_28 = arith.constant 0 : index
    %63 = vector.load %arg3[%c1, %c0_27, %c0_28] : memref<9x192x128xbf16, #tpu.memory_space<vmem>>, vector<1x192x128xbf16>
    %64 = vector.shape_cast %63 : vector<1x192x128xbf16> to vector<192x128xbf16>
    %cst_29 = arith.constant dense<0.000000e+00> : vector<176x128xf32>
    %65 = tpu.matmul %62, %64, %cst_29 {dimension_numbers = #tpu.dot_dimension_numbers<[1], [0], [0], [1], [0, 0, 1, 1], [], []>} : vector<176x192xbf16>, vector<192x128xbf16>, vector<176x128xf32> -> vector<176x128xf32>
    %c0_30 = arith.constant 0 : index
    %c24 = arith.constant 24 : index
    %c0_31 = arith.constant 0 : index
    %66 = vector.load %arg2[%c0_30, %c24, %c0_31] : memref<1x224x192xbf16, #tpu.memory_space<vmem>>, vector<1x176x192xbf16>
    %67 = vector.shape_cast %66 : vector<1x176x192xbf16> to vector<176x192xbf16>
    %c4 = arith.constant 4 : index
    %c0_32 = arith.constant 0 : index
    %c0_33 = arith.constant 0 : index
    %68 = vector.load %arg3[%c4, %c0_32, %c0_33] : memref<9x192x128xbf16, #tpu.memory_space<vmem>>, vector<1x192x128xbf16>
    %69 = vector.shape_cast %68 : vector<1x192x128xbf16> to vector<192x128xbf16>
    %cst_34 = arith.constant dense<0.000000e+00> : vector<176x128xf32>
    %70 = tpu.matmul %67, %69, %cst_34 {dimension_numbers = #tpu.dot_dimension_numbers<[1], [0], [0], [1], [0, 0, 1, 1], [], []>} : vector<176x192xbf16>, vector<192x128xbf16>, vector<176x128xf32> -> vector<176x128xf32>
    %71 = arith.addf %65, %70 : vector<176x128xf32>
    %c0_35 = arith.constant 0 : index
    %c40 = arith.constant 40 : index
    %c0_36 = arith.constant 0 : index
    %72 = vector.load %arg2[%c0_35, %c40, %c0_36] : memref<1x224x192xbf16, #tpu.memory_space<vmem>>, vector<1x176x192xbf16>
    %73 = vector.shape_cast %72 : vector<1x176x192xbf16> to vector<176x192xbf16>
    %c7_37 = arith.constant 7 : index
    %c0_38 = arith.constant 0 : index
    %c0_39 = arith.constant 0 : index
    %74 = vector.load %arg3[%c7_37, %c0_38, %c0_39] : memref<9x192x128xbf16, #tpu.memory_space<vmem>>, vector<1x192x128xbf16>
    %75 = vector.shape_cast %74 : vector<1x192x128xbf16> to vector<192x128xbf16>
    %cst_40 = arith.constant dense<0.000000e+00> : vector<176x128xf32>
    %76 = tpu.matmul %73, %75, %cst_40 {dimension_numbers = #tpu.dot_dimension_numbers<[1], [0], [0], [1], [0, 0, 1, 1], [], []>} : vector<176x192xbf16>, vector<192x128xbf16>, vector<176x128xf32> -> vector<176x128xf32>
    %77 = arith.addf %71, %76 : vector<176x128xf32>
    %78 = arith.addf %60, %77 : vector<176x128xf32>
    %c0_41 = arith.constant 0 : index
    %c9 = arith.constant 9 : index
    %c0_42 = arith.constant 0 : index
    %79 = vector.load %arg2[%c0_41, %c9, %c0_42] : memref<1x224x192xbf16, #tpu.memory_space<vmem>>, vector<1x176x192xbf16>
    %80 = vector.shape_cast %79 : vector<1x176x192xbf16> to vector<176x192xbf16>
    %c2 = arith.constant 2 : index
    %c0_43 = arith.constant 0 : index
    %c0_44 = arith.constant 0 : index
    %81 = vector.load %arg3[%c2, %c0_43, %c0_44] : memref<9x192x128xbf16, #tpu.memory_space<vmem>>, vector<1x192x128xbf16>
    %82 = vector.shape_cast %81 : vector<1x192x128xbf16> to vector<192x128xbf16>
    %cst_45 = arith.constant dense<0.000000e+00> : vector<176x128xf32>
    %83 = tpu.matmul %80, %82, %cst_45 {dimension_numbers = #tpu.dot_dimension_numbers<[1], [0], [0], [1], [0, 0, 1, 1], [], []>} : vector<176x192xbf16>, vector<192x128xbf16>, vector<176x128xf32> -> vector<176x128xf32>
    %c0_46 = arith.constant 0 : index
    %c25 = arith.constant 25 : index
    %c0_47 = arith.constant 0 : index
    %84 = vector.load %arg2[%c0_46, %c25, %c0_47] : memref<1x224x192xbf16, #tpu.memory_space<vmem>>, vector<1x176x192xbf16>
    %85 = vector.shape_cast %84 : vector<1x176x192xbf16> to vector<176x192xbf16>
    %c5 = arith.constant 5 : index
    %c0_48 = arith.constant 0 : index
    %c0_49 = arith.constant 0 : index
    %86 = vector.load %arg3[%c5, %c0_48, %c0_49] : memref<9x192x128xbf16, #tpu.memory_space<vmem>>, vector<1x192x128xbf16>
    %87 = vector.shape_cast %86 : vector<1x192x128xbf16> to vector<192x128xbf16>
    %cst_50 = arith.constant dense<0.000000e+00> : vector<176x128xf32>
    %88 = tpu.matmul %85, %87, %cst_50 {dimension_numbers = #tpu.dot_dimension_numbers<[1], [0], [0], [1], [0, 0, 1, 1], [], []>} : vector<176x192xbf16>, vector<192x128xbf16>, vector<176x128xf32> -> vector<176x128xf32>
    %89 = arith.addf %83, %88 : vector<176x128xf32>
    %c0_51 = arith.constant 0 : index
    %c41 = arith.constant 41 : index
    %c0_52 = arith.constant 0 : index
    %90 = vector.load %arg2[%c0_51, %c41, %c0_52] : memref<1x224x192xbf16, #tpu.memory_space<vmem>>, vector<1x176x192xbf16>
    %91 = vector.shape_cast %90 : vector<1x176x192xbf16> to vector<176x192xbf16>
    %c8_53 = arith.constant 8 : index
    %c0_54 = arith.constant 0 : index
    %c0_55 = arith.constant 0 : index
    %92 = vector.load %arg3[%c8_53, %c0_54, %c0_55] : memref<9x192x128xbf16, #tpu.memory_space<vmem>>, vector<1x192x128xbf16>
    %93 = vector.shape_cast %92 : vector<1x192x128xbf16> to vector<192x128xbf16>
    %cst_56 = arith.constant dense<0.000000e+00> : vector<176x128xf32>
    %94 = tpu.matmul %91, %93, %cst_56 {dimension_numbers = #tpu.dot_dimension_numbers<[1], [0], [0], [1], [0, 0, 1, 1], [], []>} : vector<176x192xbf16>, vector<192x128xbf16>, vector<176x128xf32> -> vector<176x128xf32>
    %95 = arith.addf %89, %94 : vector<176x128xf32>
    %cst_57 = arith.constant 0.000000e+00 : f32
    %96 = vector.shape_cast %39 : vector<176x1xi1> to vector<176x1xi1>
    %97 = vector.broadcast %96 : vector<176x1xi1> to vector<176x128xi1>
    %98 = vector.broadcast %cst_57 : f32 to vector<176x128xf32>
    %99 = arith.select %97, %95, %98 : vector<176x128xi1>, vector<176x128xf32>
    %100 = arith.addf %78, %99 : vector<176x128xf32>
    %c0_58 = arith.constant 0 : index
    %c0_59 = arith.constant 0 : index
    %101 = vector.load %arg4[%c0_58, %c0_59] : memref<1x128xf32, #tpu.memory_space<vmem>>, vector<1x128xf32>
    %102 = vector.broadcast %101 : vector<1x128xf32> to vector<176x128xf32>
    %103 = arith.addf %100, %102 : vector<176x128xf32>
    %cst_60 = arith.constant 0.000000e+00 : f32
    %104 = vector.broadcast %cst_60 : f32 to vector<176x128xf32>
    %105 = arith.maximumf %103, %104 : vector<176x128xf32>
    %c128_i32 = arith.constant 128 : i32
    %106 = arith.muli %arg1, %c128_i32 : i32
    %c24_i32 = arith.constant 24 : i32
    %107 = arith.subi %106, %c24_i32 : i32
    %108 = vector.broadcast %107 : i32 to vector<176x1xi32>
    %109 = arith.addi %108, %0 : vector<176x1xi32>
    %c0_i32_61 = arith.constant 0 : i32
    %110 = vector.broadcast %c0_i32_61 : i32 to vector<176x1xi32>
    %111 = arith.cmpi sge, %109, %110 : vector<176x1xi32>
    %c256_i32 = arith.constant 256 : i32
    %112 = vector.broadcast %c256_i32 : i32 to vector<176x1xi32>
    %113 = arith.cmpi slt, %109, %112 : vector<176x1xi32>
    %114 = arith.andi %111, %113 : vector<176x1xi1>
    %cst_62 = arith.constant 0.000000e+00 : f32
    %115 = vector.shape_cast %114 : vector<176x1xi1> to vector<176x1xi1>
    %116 = vector.broadcast %115 : vector<176x1xi1> to vector<176x128xi1>
    %117 = vector.broadcast %cst_62 : f32 to vector<176x128xf32>
    %118 = arith.select %116, %105, %117 : vector<176x128xi1>, vector<176x128xf32>
    %119 = arith.truncf %118 : vector<176x128xf32> to vector<176x128xbf16>
    %c0_63 = arith.constant 0 : index
    %c0_64 = arith.constant 0 : index
    %120 = vector.load %arg8[%c0_63, %c0_64] : memref<176x128xbf16, #tpu.memory_space<vmem>>, vector<176x128xbf16>
    tpu.vector_store %arg8[%c0_63, %c0_64], %119 {strides = array<i32>} : memref<176x128xbf16, #tpu.memory_space<vmem>>, vector<176x128xbf16>,
    %c0_i32_65 = arith.constant 0 : i32
    %121 = vector.broadcast %c0_i32_65 : i32 to vector<128x1xi32>
    %122 = arith.cmpi ne, %35, %121 : vector<128x1xi32>
    %c15_i32_66 = arith.constant 15 : i32
    %123 = vector.broadcast %c15_i32_66 : i32 to vector<128x1xi32>
    %124 = arith.cmpi ne, %35, %123 : vector<128x1xi32>
    %c7_67 = arith.constant 7 : index
    %c0_68 = arith.constant 0 : index
    %125 = vector.load %arg8[%c7_67, %c0_68] : memref<176x128xbf16, #tpu.memory_space<vmem>>, vector<128x128xbf16>
    %c0_69 = arith.constant 0 : index
    %c0_70 = arith.constant 0 : index
    %c0_71 = arith.constant 0 : index
    %126 = vector.load %arg5[%c0_69, %c0_70, %c0_71] : memref<9x128x128xbf16, #tpu.memory_space<vmem>>, vector<1x128x128xbf16>
    %127 = vector.shape_cast %126 : vector<1x128x128xbf16> to vector<128x128xbf16>
    %cst_72 = arith.constant dense<0.000000e+00> : vector<128x128xf32>
    %128 = tpu.matmul %125, %127, %cst_72 {dimension_numbers = #tpu.dot_dimension_numbers<[1], [0], [0], [1], [0, 0, 1, 1], [], []>} : vector<128x128xbf16>, vector<128x128xbf16>, vector<128x128xf32> -> vector<128x128xf32>
    %c23_73 = arith.constant 23 : index
    %c0_74 = arith.constant 0 : index
    %129 = vector.load %arg8[%c23_73, %c0_74] : memref<176x128xbf16, #tpu.memory_space<vmem>>, vector<128x128xbf16>
    %c3_75 = arith.constant 3 : index
    %c0_76 = arith.constant 0 : index
    %c0_77 = arith.constant 0 : index
    %130 = vector.load %arg5[%c3_75, %c0_76, %c0_77] : memref<9x128x128xbf16, #tpu.memory_space<vmem>>, vector<1x128x128xbf16>
    %131 = vector.shape_cast %130 : vector<1x128x128xbf16> to vector<128x128xbf16>
    %cst_78 = arith.constant dense<0.000000e+00> : vector<128x128xf32>
    %132 = tpu.matmul %129, %131, %cst_78 {dimension_numbers = #tpu.dot_dimension_numbers<[1], [0], [0], [1], [0, 0, 1, 1], [], []>} : vector<128x128xbf16>, vector<128x128xbf16>, vector<128x128xf32> -> vector<128x128xf32>
    %133 = arith.addf %128, %132 : vector<128x128xf32>
    %c39_79 = arith.constant 39 : index
    %c0_80 = arith.constant 0 : index
    %134 = vector.load %arg8[%c39_79, %c0_80] : memref<176x128xbf16, #tpu.memory_space<vmem>>, vector<128x128xbf16>
    %c6_81 = arith.constant 6 : index
    %c0_82 = arith.constant 0 : index
    %c0_83 = arith.constant 0 : index
    %135 = vector.load %arg5[%c6_81, %c0_82, %c0_83] : memref<9x128x128xbf16, #tpu.memory_space<vmem>>, vector<1x128x128xbf16>
    %136 = vector.shape_cast %135 : vector<1x128x128xbf16> to vector<128x128xbf16>
    %cst_84 = arith.constant dense<0.000000e+00> : vector<128x128xf32>
    %137 = tpu.matmul %134, %136, %cst_84 {dimension_numbers = #tpu.dot_dimension_numbers<[1], [0], [0], [1], [0, 0, 1, 1], [], []>} : vector<128x128xbf16>, vector<128x128xbf16>, vector<128x128xf32> -> vector<128x128xf32>
    %138 = arith.addf %133, %137 : vector<128x128xf32>
    %cst_85 = arith.constant 0.000000e+00 : f32
    %139 = vector.shape_cast %122 : vector<128x1xi1> to vector<128x1xi1>
    %140 = vector.broadcast %139 : vector<128x1xi1> to vector<128x128xi1>
    %141 = vector.broadcast %cst_85 : f32 to vector<128x128xf32>
    %142 = arith.select %140, %138, %141 : vector<128x128xi1>, vector<128x128xf32>
    %c8_86 = arith.constant 8 : index
    %c0_87 = arith.constant 0 : index
    %143 = vector.load %arg8[%c8_86, %c0_87] : memref<176x128xbf16, #tpu.memory_space<vmem>>, vector<128x128xbf16>
    %c1_88 = arith.constant 1 : index
    %c0_89 = arith.constant 0 : index
    %c0_90 = arith.constant 0 : index
    %144 = vector.load %arg5[%c1_88, %c0_89, %c0_90] : memref<9x128x128xbf16, #tpu.memory_space<vmem>>, vector<1x128x128xbf16>
    %145 = vector.shape_cast %144 : vector<1x128x128xbf16> to vector<128x128xbf16>
    %cst_91 = arith.constant dense<0.000000e+00> : vector<128x128xf32>
    %146 = tpu.matmul %143, %145, %cst_91 {dimension_numbers = #tpu.dot_dimension_numbers<[1], [0], [0], [1], [0, 0, 1, 1], [], []>} : vector<128x128xbf16>, vector<128x128xbf16>, vector<128x128xf32> -> vector<128x128xf32>
    %c24_92 = arith.constant 24 : index
    %c0_93 = arith.constant 0 : index
    %147 = vector.load %arg8[%c24_92, %c0_93] : memref<176x128xbf16, #tpu.memory_space<vmem>>, vector<128x128xbf16>
    %c4_94 = arith.constant 4 : index
    %c0_95 = arith.constant 0 : index
    %c0_96 = arith.constant 0 : index
    %148 = vector.load %arg5[%c4_94, %c0_95, %c0_96] : memref<9x128x128xbf16, #tpu.memory_space<vmem>>, vector<1x128x128xbf16>
    %149 = vector.shape_cast %148 : vector<1x128x128xbf16> to vector<128x128xbf16>
    %cst_97 = arith.constant dense<0.000000e+00> : vector<128x128xf32>
    %150 = tpu.matmul %147, %149, %cst_97 {dimension_numbers = #tpu.dot_dimension_numbers<[1], [0], [0], [1], [0, 0, 1, 1], [], []>} : vector<128x128xbf16>, vector<128x128xbf16>, vector<128x128xf32> -> vector<128x128xf32>
    %151 = arith.addf %146, %150 : vector<128x128xf32>
    %c40_98 = arith.constant 40 : index
    %c0_99 = arith.constant 0 : index
    %152 = vector.load %arg8[%c40_98, %c0_99] : memref<176x128xbf16, #tpu.memory_space<vmem>>, vector<128x128xbf16>
    %c7_100 = arith.constant 7 : index
    %c0_101 = arith.constant 0 : index
    %c0_102 = arith.constant 0 : index
    %153 = vector.load %arg5[%c7_100, %c0_101, %c0_102] : memref<9x128x128xbf16, #tpu.memory_space<vmem>>, vector<1x128x128xbf16>
    %154 = vector.shape_cast %153 : vector<1x128x128xbf16> to vector<128x128xbf16>
    %cst_103 = arith.constant dense<0.000000e+00> : vector<128x128xf32>
    %155 = tpu.matmul %152, %154, %cst_103 {dimension_numbers = #tpu.dot_dimension_numbers<[1], [0], [0], [1], [0, 0, 1, 1], [], []>} : vector<128x128xbf16>, vector<128x128xbf16>, vector<128x128xf32> -> vector<128x128xf32>
    %156 = arith.addf %151, %155 : vector<128x128xf32>
    %157 = arith.addf %142, %156 : vector<128x128xf32>
    %c9_104 = arith.constant 9 : index
    %c0_105 = arith.constant 0 : index
    %158 = vector.load %arg8[%c9_104, %c0_105] : memref<176x128xbf16, #tpu.memory_space<vmem>>, vector<128x128xbf16>
    %c2_106 = arith.constant 2 : index
    %c0_107 = arith.constant 0 : index
    %c0_108 = arith.constant 0 : index
    %159 = vector.load %arg5[%c2_106, %c0_107, %c0_108] : memref<9x128x128xbf16, #tpu.memory_space<vmem>>, vector<1x128x128xbf16>
    %160 = vector.shape_cast %159 : vector<1x128x128xbf16> to vector<128x128xbf16>
    %cst_109 = arith.constant dense<0.000000e+00> : vector<128x128xf32>
    %161 = tpu.matmul %158, %160, %cst_109 {dimension_numbers = #tpu.dot_dimension_numbers<[1], [0], [0], [1], [0, 0, 1, 1], [], []>} : vector<128x128xbf16>, vector<128x128xbf16>, vector<128x128xf32> -> vector<128x128xf32>
    %c25_110 = arith.constant 25 : index
    %c0_111 = arith.constant 0 : index
    %162 = vector.load %arg8[%c25_110, %c0_111] : memref<176x128xbf16, #tpu.memory_space<vmem>>, vector<128x128xbf16>
    %c5_112 = arith.constant 5 : index
    %c0_113 = arith.constant 0 : index
    %c0_114 = arith.constant 0 : index
    %163 = vector.load %arg5[%c5_112, %c0_113, %c0_114] : memref<9x128x128xbf16, #tpu.memory_space<vmem>>, vector<1x128x128xbf16>
    %164 = vector.shape_cast %163 : vector<1x128x128xbf16> to vector<128x128xbf16>
    %cst_115 = arith.constant dense<0.000000e+00> : vector<128x128xf32>
    %165 = tpu.matmul %162, %164, %cst_115 {dimension_numbers = #tpu.dot_dimension_numbers<[1], [0], [0], [1], [0, 0, 1, 1], [], []>} : vector<128x128xbf16>, vector<128x128xbf16>, vector<128x128xf32> -> vector<128x128xf32>
    %166 = arith.addf %161, %165 : vector<128x128xf32>
    %c41_116 = arith.constant 41 : index
    %c0_117 = arith.constant 0 : index
    %167 = vector.load %arg8[%c41_116, %c0_117] : memref<176x128xbf16, #tpu.memory_space<vmem>>, vector<128x128xbf16>
    %c8_118 = arith.constant 8 : index
    %c0_119 = arith.constant 0 : index
    %c0_120 = arith.constant 0 : index
    %168 = vector.load %arg5[%c8_118, %c0_119, %c0_120] : memref<9x128x128xbf16, #tpu.memory_space<vmem>>, vector<1x128x128xbf16>
    %169 = vector.shape_cast %168 : vector<1x128x128xbf16> to vector<128x128xbf16>
    %cst_121 = arith.constant dense<0.000000e+00> : vector<128x128xf32>
    %170 = tpu.matmul %167, %169, %cst_121 {dimension_numbers = #tpu.dot_dimension_numbers<[1], [0], [0], [1], [0, 0, 1, 1], [], []>} : vector<128x128xbf16>, vector<128x128xbf16>, vector<128x128xf32> -> vector<128x128xf32>
    %171 = arith.addf %166, %170 : vector<128x128xf32>
    %cst_122 = arith.constant 0.000000e+00 : f32
    %172 = vector.shape_cast %124 : vector<128x1xi1> to vector<128x1xi1>
    %173 = vector.broadcast %172 : vector<128x1xi1> to vector<128x128xi1>
    %174 = vector.broadcast %cst_122 : f32 to vector<128x128xf32>
    %175 = arith.select %173, %171, %174 : vector<128x128xi1>, vector<128x128xf32>
    %176 = arith.addf %157, %175 : vector<128x128xf32>
    %c0_123 = arith.constant 0 : index
    %c0_124 = arith.constant 0 : index
    %177 = vector.load %arg6[%c0_123, %c0_124] : memref<1x128xf32, #tpu.memory_space<vmem>>, vector<1x128xf32>
    %178 = vector.broadcast %177 : vector<1x128xf32> to vector<128x128xf32>
    %179 = arith.addf %176, %178 : vector<128x128xf32>
    %cst_125 = arith.constant 0.000000e+00 : f32
    %180 = vector.broadcast %cst_125 : f32 to vector<128x128xf32>
    %181 = arith.maximumf %179, %180 : vector<128x128xf32>
    %c0_126 = arith.constant 0 : index
    %c0_127 = arith.constant 0 : index
    %c0_128 = arith.constant 0 : index
    %182 = vector.load %arg7[%c0_126, %c0_127, %c0_128] : memref<1x128x128xf32, #tpu.memory_space<vmem>>, vector<1x128x128xf32>
    %183 = vector.shape_cast %182 : vector<1x128x128xf32> to vector<128x128xf32>
    %184 = vector.shape_cast %181 : vector<128x128xf32> to vector<1x128x128xf32>
    tpu.vector_store %arg7[%c0_126, %c0_127, %c0_128], %184 {strides = array<i32>} : memref<1x128x128xf32, #tpu.memory_space<vmem>>, vector<1x128x128xf32>,
    return
  }
  func.func @transform_0(%arg0: i32, %arg1: i32) -> (i32, i32, i32) {
    %c2_i32 = arith.constant 2 : i32
    %0 = arith.muli %arg0, %c2_i32 : i32
    %1 = arith.addi %0, %arg1 : i32
    %c0_i32 = arith.constant 0 : i32
    %c0_i32_0 = arith.constant 0 : i32
    %c0_i32_1 = arith.constant 0 : i32
    return %1, %c0_i32, %c0_i32_0 : i32, i32, i32
  }
  func.func @transform_1(%arg0: i32, %arg1: i32) -> (i32, i32, i32) {
    %c0_i32 = arith.constant 0 : i32
    %c0_i32_0 = arith.constant 0 : i32
    %c0_i32_1 = arith.constant 0 : i32
    %c0_i32_2 = arith.constant 0 : i32
    return %c0_i32, %c0_i32_0, %c0_i32_1 : i32, i32, i32
  }
  func.func @transform_2(%arg0: i32, %arg1: i32) -> (i32, i32) {
    %c0_i32 = arith.constant 0 : i32
    %c0_i32_0 = arith.constant 0 : i32
    %c0_i32_1 = arith.constant 0 : i32
    return %c0_i32, %c0_i32_0 : i32, i32
  }
  func.func @transform_3(%arg0: i32, %arg1: i32) -> (i32, i32, i32) {
    %c0_i32 = arith.constant 0 : i32
    %c0_i32_0 = arith.constant 0 : i32
    %c0_i32_1 = arith.constant 0 : i32
    %c0_i32_2 = arith.constant 0 : i32
    return %c0_i32, %c0_i32_0, %c0_i32_1 : i32, i32, i32
  }
  func.func @transform_4(%arg0: i32, %arg1: i32) -> (i32, i32) {
    %c0_i32 = arith.constant 0 : i32
    %c0_i32_0 = arith.constant 0 : i32
    %c0_i32_1 = arith.constant 0 : i32
    return %c0_i32, %c0_i32_0 : i32, i32
  }
  func.func @transform_5(%arg0: i32, %arg1: i32) -> (i32, i32, i32) {
    %c0_i32 = arith.constant 0 : i32
    %c0_i32_0 = arith.constant 0 : i32
    return %arg0, %arg1, %c0_i32 : i32, i32, i32
  }
}

module attributes {stable_mosaic.version = 11 : i64} {
  func.func @_attention_kernel(%arg0: i32, %arg1: i32, %arg2: memref<2xi32, #tpu.memory_space<smem>>, %arg3: memref<1x256x128xbf16, #tpu.memory_space<vmem>>, %arg4: memref<1x128x64xbf16, #tpu.memory_space<vmem>>, %arg5: memref<1x1x64xf32, #tpu.memory_space<vmem>>, %arg6: memref<1x64x128xbf16, #tpu.memory_space<vmem>>, %arg7: memref<1x256x128xf32, #tpu.memory_space<vmem>>, %arg8: memref<1x256x128xf32, #tpu.memory_space<vmem>>) attributes {dimension_semantics = [#tpu.dimension_semantics<parallel>, #tpu.dimension_semantics<parallel>], iteration_bounds = array<i64: 2, 1>, scalar_prefetch = 1 : i64, scratch_operands = 0 : i64, tpu.core_type = #tpu.core_type<tc>, window_params = [{transform_indices = @transform_0, window_bounds = array<i64: 1, 256, 128>}, {transform_indices = @transform_1, window_bounds = array<i64: 1, 128, 64>}, {transform_indices = @transform_2, window_bounds = array<i64: 1, 1, 64>}, {transform_indices = @transform_3, window_bounds = array<i64: 1, 64, 128>}, {transform_indices = @transform_4, window_bounds = array<i64: 1, 256, 128>}, {transform_indices = @transform_5, window_bounds = array<i64: 1, 256, 128>}]} {
    %0 = arith.index_cast %arg0 : i32 to index
    %1 = memref.load %arg2[%0] : memref<2xi32, #tpu.memory_space<smem>>
    %c0 = arith.constant 0 : index
    %c0_0 = arith.constant 0 : index
    %c0_1 = arith.constant 0 : index
    %2 = vector.load %arg3[%c0, %c0_0, %c0_1] : memref<1x256x128xbf16, #tpu.memory_space<vmem>>, vector<1x256x128xbf16>
    %3 = vector.shape_cast %2 : vector<1x256x128xbf16> to vector<256x128xbf16>
    %c0_2 = arith.constant 0 : index
    %c0_3 = arith.constant 0 : index
    %c0_4 = arith.constant 0 : index
    %4 = vector.load %arg4[%c0_2, %c0_3, %c0_4] : memref<1x128x64xbf16, #tpu.memory_space<vmem>>, vector<1x128x64xbf16>
    %5 = vector.shape_cast %4 : vector<1x128x64xbf16> to vector<128x64xbf16>
    %cst = arith.constant dense<0.000000e+00> : vector<256x64xf32>
    %6 = tpu.matmul %3, %5, %cst {dimension_numbers = #tpu.dot_dimension_numbers<[1], [0], [0], [1], [0, 0, 1, 1], [], []>} : vector<256x128xbf16>, vector<128x64xbf16>, vector<256x64xf32> -> vector<256x64xf32>
    %c0_5 = arith.constant 0 : index
    %c0_6 = arith.constant 0 : index
    %c0_7 = arith.constant 0 : index
    %7 = vector.load %arg5[%c0_5, %c0_6, %c0_7] : memref<1x1x64xf32, #tpu.memory_space<vmem>>, vector<1x1x64xf32>
    %8 = vector.shape_cast %7 : vector<1x1x64xf32> to vector<1x64xf32>
    %9 = vector.broadcast %8 : vector<1x64xf32> to vector<256x64xf32>
    %10 = arith.addf %6, %9 : vector<256x64xf32>
    %11 = tpu.iota {dimensions = array<i32: 1>} : vector<256x64xi32>
    %12 = vector.broadcast %1 : i32 to vector<256x64xi32>
    %13 = arith.cmpi slt, %11, %12 : vector<256x64xi32>
    %cst_8 = arith.constant -1.000000e+30 : f32
    %14 = vector.broadcast %cst_8 : f32 to vector<256x64xf32>
    %15 = arith.select %13, %10, %14 : vector<256x64xi1>, vector<256x64xf32>
    %cst_9 = arith.constant dense<0xFF800000> : vector<256xf32>
    %16 = vector.multi_reduction <maximumf>, %15, %cst_9 [1] : vector<256x64xf32> to vector<256xf32>
    %17 = vector.shape_cast %16 : vector<256xf32> to vector<256x1xf32>
    %18 = vector.broadcast %17 : vector<256x1xf32> to vector<256x64xf32>
    %19 = arith.subf %15, %18 : vector<256x64xf32>
    %20 = math.exp %19 : vector<256x64xf32>
    %cst_10 = arith.constant 0.000000e+00 : f32
    %21 = vector.broadcast %cst_10 : f32 to vector<256x64xf32>
    %22 = arith.select %13, %20, %21 : vector<256x64xi1>, vector<256x64xf32>
    %cst_11 = arith.constant dense<0.000000e+00> : vector<256xf32>
    %23 = vector.multi_reduction <add>, %22, %cst_11 [1] : vector<256x64xf32> to vector<256xf32>
    %24 = vector.shape_cast %23 : vector<256xf32> to vector<256x1xf32>
    %cst_12 = arith.constant 0.000000e+00 : f32
    %25 = vector.broadcast %cst_12 : f32 to vector<256x1xf32>
    %26 = arith.cmpf ogt, %24, %25 : vector<256x1xf32>
    %27 = tpu.reciprocal %24 {approx = true} : vector<256x1xf32> -> vector<256x1xf32>
    %cst_13 = arith.constant 0.000000e+00 : f32
    %28 = vector.broadcast %cst_13 : f32 to vector<256x1xf32>
    %29 = arith.select %26, %27, %28 : vector<256x1xi1>, vector<256x1xf32>
    %30 = vector.broadcast %29 : vector<256x1xf32> to vector<256x64xf32>
    %31 = arith.mulf %22, %30 : vector<256x64xf32>
    %32 = arith.truncf %31 : vector<256x64xf32> to vector<256x64xbf16>
    %c0_14 = arith.constant 0 : index
    %c0_15 = arith.constant 0 : index
    %c0_16 = arith.constant 0 : index
    %33 = vector.load %arg6[%c0_14, %c0_15, %c0_16] : memref<1x64x128xbf16, #tpu.memory_space<vmem>>, vector<1x64x128xbf16>
    %34 = vector.shape_cast %33 : vector<1x64x128xbf16> to vector<64x128xbf16>
    %cst_17 = arith.constant dense<0.000000e+00> : vector<256x128xf32>
    %35 = tpu.matmul %32, %34, %cst_17 {dimension_numbers = #tpu.dot_dimension_numbers<[1], [0], [0], [1], [0, 0, 1, 1], [], []>} : vector<256x64xbf16>, vector<64x128xbf16>, vector<256x128xf32> -> vector<256x128xf32>
    %cst_18 = arith.constant 5.000000e-01 : f32
    %36 = vector.broadcast %cst_18 : f32 to vector<256x128xf32>
    %37 = arith.mulf %36, %35 : vector<256x128xf32>
    %c0_19 = arith.constant 0 : index
    %c0_20 = arith.constant 0 : index
    %c0_21 = arith.constant 0 : index
    %38 = vector.load %arg7[%c0_19, %c0_20, %c0_21] : memref<1x256x128xf32, #tpu.memory_space<vmem>>, vector<1x256x128xf32>
    %39 = vector.shape_cast %38 : vector<1x256x128xf32> to vector<256x128xf32>
    %40 = arith.addf %37, %39 : vector<256x128xf32>
    %c0_22 = arith.constant 0 : index
    %c0_23 = arith.constant 0 : index
    %c0_24 = arith.constant 0 : index
    %41 = vector.load %arg8[%c0_22, %c0_23, %c0_24] : memref<1x256x128xf32, #tpu.memory_space<vmem>>, vector<1x256x128xf32>
    %42 = vector.shape_cast %41 : vector<1x256x128xf32> to vector<256x128xf32>
    %43 = vector.shape_cast %40 : vector<256x128xf32> to vector<1x256x128xf32>
    tpu.vector_store %arg8[%c0_22, %c0_23, %c0_24], %43 {strides = array<i32>} : memref<1x256x128xf32, #tpu.memory_space<vmem>>, vector<1x256x128xf32>,
    return
  }
  func.func @transform_0(%arg0: i32, %arg1: i32, %arg2: memref<2xi32, #tpu.memory_space<smem>>) -> (i32, i32, i32) {
    %c0_i32 = arith.constant 0 : i32
    %c0_i32_0 = arith.constant 0 : i32
    return %arg0, %arg1, %c0_i32 : i32, i32, i32
  }
  func.func @transform_1(%arg0: i32, %arg1: i32, %arg2: memref<2xi32, #tpu.memory_space<smem>>) -> (i32, i32, i32) {
    %c0_i32 = arith.constant 0 : i32
    %c0_i32_0 = arith.constant 0 : i32
    %c0_i32_1 = arith.constant 0 : i32
    return %arg0, %c0_i32, %c0_i32_0 : i32, i32, i32
  }
  func.func @transform_2(%arg0: i32, %arg1: i32, %arg2: memref<2xi32, #tpu.memory_space<smem>>) -> (i32, i32, i32) {
    %c0_i32 = arith.constant 0 : i32
    %c0_i32_0 = arith.constant 0 : i32
    %c0_i32_1 = arith.constant 0 : i32
    return %arg0, %c0_i32, %c0_i32_0 : i32, i32, i32
  }
  func.func @transform_3(%arg0: i32, %arg1: i32, %arg2: memref<2xi32, #tpu.memory_space<smem>>) -> (i32, i32, i32) {
    %c0_i32 = arith.constant 0 : i32
    %c0_i32_0 = arith.constant 0 : i32
    %c0_i32_1 = arith.constant 0 : i32
    return %arg0, %c0_i32, %c0_i32_0 : i32, i32, i32
  }
  func.func @transform_4(%arg0: i32, %arg1: i32, %arg2: memref<2xi32, #tpu.memory_space<smem>>) -> (i32, i32, i32) {
    %c0_i32 = arith.constant 0 : i32
    %c0_i32_0 = arith.constant 0 : i32
    return %arg0, %arg1, %c0_i32 : i32, i32, i32
  }
  func.func @transform_5(%arg0: i32, %arg1: i32, %arg2: memref<2xi32, #tpu.memory_space<smem>>) -> (i32, i32, i32) {
    %c0_i32 = arith.constant 0 : i32
    %c0_i32_0 = arith.constant 0 : i32
    return %arg0, %arg1, %c0_i32 : i32, i32, i32
  }
}

</mosaic_0001>

<bundles_post_ra>
// kernel: multi_scale_att_forward.3
= control target key start
LH: loop header
LB: loop body
LE: loop exit
PB: predicated region body
PF: predicated region fallthrough
CT: control target
= control target key end

     0   :  { %s3011_s0 = inlined_call_operand.vmem [shape: s32[2], index: 0, kind: input, shape index: {}]   ;;  %s3012_s1 = inlined_call_operand.vmem [shape: bf16[2,256,128], index: 1, kind: input, shape index: {}]   ;;  %s3013_s2 = inlined_call_operand.vmem [shape: bf16[2,128,64], index: 2, kind: input, shape index: {}]   ;;  %s3014_s3 = inlined_call_operand.vmem [shape: f32[2,1,64], index: 3, kind: input, shape index: {}]   ;;  %s3015_s4 = inlined_call_operand.vmem [shape: bf16[2,64,128], index: 4, kind: input, shape index: {}]   ;;  %s3016_s5 = inlined_call_operand.vmem [shape: f32[2,256,128], index: 5, kind: input, shape index: {}]   ;;  %s3017_s6 = inlined_call_operand.hbm [shape: f32[2,256,128], index: 6, kind: output, shape index: {}]  }
   0x1   :  { %s11_s23 = sshll.u32 %s3011_s0, 4  ;;  %s12_s23 = int_to_ptr.vmem [resolvable:$true] %s11_s23 }
   0x2   :  { %s2144_s24 = scalar_lea.vmem %s12_s23, 16  ;;  %p2149_p1 = scmp.lt.s32.totalorder %s12_s23, %s12_s23 }
   0x3   :  { %p2145_p0 = scmp.ne.s32.totalorder %s12_s23, %s2144_s24  ;;  %p2150_p2 = scmp.lt.s32.totalorder %s2144_s24, %s2144_s24 }
   0x5   :  { %p2151_p3 = por %p2150_p2, %p2149_p1 }
   0x7   :  { %p2152_p4 = pnand %p2151_p3, %p2145_p0 }
   0x9   :  { %2155 = shalt.err (!%p2152_p4)  }
   0xa   :  { %s2236_s25 = smov [#allocation3]  }
   0xb   :  { %14 = dma.vmem_to_smem %s12_s23, 16, %s2236_s25, [#allocation2] }
   0xc   :  { %2206 = dma.done.wait [#allocation2], 16 }
   0xd   :  { %2207 = vsyncadd [#allocation2], 4294967280 }
   0xe   :  { %16 = sfence }
   0xf   :  { %17 = vsyncpa [#allocation5], 0 }
  0x10   :  { %19 = vsyncpa [#allocation5 + $0x1], 0  ;;  %s2278_s26 = smov 0   ;;  %s2280_s27 = smov 0  }
  0x11   :  { %s2282_s0 = smov 0   ;;  %s2284_s28 = smov 0  }
  0x12   :  { %s2286_s29 = smov 0   ;;  %s2288_s30 = smov 0  }
  0x13 LB: > { %s1729_s7 = sadd.s32 4294967295, %s2234_s30   ;;  %s1730_s8 = sadd.s32 4294967294, %s2234_s30   ;;  %s2234_s30 = sphi %s2288_s30, %s25_s30   ;;  %s2230_s29 = sphi %s2286_s29, %s3026_s29   ;;  %s2226_s28 = sphi %s2284_s28, %s3025_s28   ;;  %s2222_s0 = sphi %s2282_s0, %s3024_s0   ;;  %s2218_s27 = sphi %s2280_s27, %s3023_s27   ;;  %s2214_s26 = sphi %s2278_s26, %s3022_s26  }
  0x14   : > { %s37_s9 = sadd.s32 1, %s2230_s29  ;;  %s180_s10 = sadd.s32 1, %s2222_s0 }
  0x15   : > { %p39_p5 = scmp.ge.s32.totalorder %s37_s9, 2  ;;  %p190_p6 = scmp.ne.s32.totalorder %s2222_s0, %s2218_s27 }
  0x16   : > { %p191_p7 = scmp.eq.s32.totalorder %s1729_s7, 1  ;;  %p196_p8 = scmp.ne.s32.totalorder %s2218_s27, %s2214_s26 }
  0x17   : > { %s3028_s9 = smov (%p39_p5, %s37_s9), 0  ;;  %p197_p10 = scmp.eq.s32.totalorder %s1730_s8, 1 }
  0x18   : > { %p2318_p9 = por %p191_p7, %p190_p6  ;;  %s175_s12 = ssub.s32 %s2230_s29, %s3028_s9 }
  0x19   : > { %p1733_p11 = scmp.ge.s32.totalorder %s2234_s30, 1  ;;  %p178_p12 = scmp.eq.s32.totalorder %s175_s12, 0 }
  0x1a   : > { %p2325_p13 = por %p197_p10, %p196_p8  ;;  %p263_p0 = scmp.lt.s32.totalorder %s2234_s30, 3 }
  0x1b   : > { %s2331_s14 = scalar_select %p178_p12, %s2222_s0, %s180_s10  }
  0x1c   : > { %p264_p1 = pnand %p1733_p11, %p263_p0 }
  0x1d   : > { %p318_p2 = scmp.lt.s32.totalorder (!%p264_p1), %s2226_s28, 1  ;;  %s352_s24 = sld [smem:[#allocation3 + %s2226_s28]] (!%p264_p1) }
  0x1e   : > { %267 = sbr.rel (%p264_p1) target bundleno = 867 (0x363), region = 40 }
  0x23   : > { %s2335_s15 = scalar_select %p318_p2, %s2226_s28, 1  ;;  %v713_v24 = vlaneseq  ;;  %v715_v26 = vstv %s352_s24  ;;  %vm749_vm1 = vcmask 523264  }
  0x24   : > { %s1797_s24 = sshll.u32 %s2226_s28, 12 }
  0x25   : > { %s1794_s16 = sshll.u32 %s2335_s15, 6  ;;  %s1793_s20 = sshll.u32 %s2335_s15, 7  ;;  %v714_v25 = vand.u32 127, %v713_v24 }
  0x26   : > { %s331_s19 = scalar_lea.vmem %s3013_s2, %s1794_s16  ;;  %s2345_s23 = scalar_lea.vmem %s3012_s1, %s1793_s20 }
  0x27   : > { %v1988_v0 = vld [vmem:[%s331_s19 + $0x38] sm:$0xff]   ;;  %v1989_v1 = vld [vmem:[%s331_s19 + $0x30] sm:$0xff]   ;;  %v1990_v2 = vld [vmem:[%s331_s19 + $0x28] sm:$0xff]   ;;  %s334_s8 = scalar_lea.vmem %s3014_s3, %s2335_s15  ;;  %vm2370_vm0 = vcmp.lt.s32.totalorder %v714_v25, %v715_v26  ;;  %s1795_s10 = sshll.u32 %s2335_s15, 5 }
  0x28   : > { %1842 = vmatprep.subr.bf16.mxu0 %v1988_v0  ;;  %v1991_v3 = vld [vmem:[%s331_s19 + $0x20] sm:$0xff]   ;;  %v1992_v5 = vld [vmem:[%s331_s19 + $0x18] sm:$0xff]   ;;  %v1993_v6 = vld [vmem:[%s331_s19 + $0x10] sm:$0xff]   ;;  %s2685_s17 = scalar_lea.vmem %s3015_s4, %s1795_s10  ;;  %s1796_s18 = sshll.u32 %s2335_s15, 8 }
  0x29   : > { %1843 = vmatpush3.bf16.msra.mxu0 %v1988_v0  ;;  %v1996_v4 = vld [vmem:[%s2345_s23] sm:$0xff]   ;;  %v1994_v7 = vld [vmem:[%s331_s19 + $0x8] sm:$0xff]   ;;  %v1998_v10 = vld [vmem:[%s2345_s23 + $0x10] sm:$0xff]   ;;  %s2885_s22 = scalar_lea.vmem %s3016_s5, %s1796_s18  ;;  %s2958_s10 = scalar_lea.hbm %s3017_s6, %s1797_s24 }
  0x2a   : > { %1844 = vmatprep.subr.bf16.mxu0 %v1989_v1  ;;  %1858 = vmatprep.mubr.bf16.mxu0 %v1996_v4  ;;  %v1995_v8 = vld [vmem:[%s331_s19] sm:$0xff]   ;;  %v1997_v9 = vld [vmem:[%s2345_s23 + $0x8] sm:$0xff]   ;;  %v1999_v11 = vld [vmem:[%s2345_s23 + $0x18] sm:$0xff]   ;;  %s314_s19 = sand.u32 1, %s2218_s27   ;;  %s2237_s16 = smov [#allocation4]  }
  0x2b   : > { %v2000_v12 = vld [vmem:[%s2345_s23 + $0x20] sm:$0xff]   ;;  %v2001_v13 = vld [vmem:[%s2345_s23 + $0x28] sm:$0xff]   ;;  %v2002_v14 = vld [vmem:[%s2345_s23 + $0x30] sm:$0xff]   ;;  %s2966_s28 = scalar_lea.sflag [#allocation5], %s314_s19 }
  0x2c   : > { %v2003_v15 = vld [vmem:[%s2345_s23 + $0x38] sm:$0xff]   ;;  %v2004_v16 = vld [vmem:[%s2345_s23 + $0x40] sm:$0xff]   ;;  %v2005_v17 = vld [vmem:[%s2345_s23 + $0x48] sm:$0xff]  }
  0x2d   : > { %1845 = vmatpush3.bf16.msra.mxu0 %v1989_v1  ;;  %v2006_v18 = vld [vmem:[%s2345_s23 + $0x50] sm:$0xff]   ;;  %v2007_v19 = vld [vmem:[%s2345_s23 + $0x58] sm:$0xff]   ;;  %v2008_v20 = vld [vmem:[%s2345_s23 + $0x60] sm:$0xff]  }
  0x2e   : > { %1846 = vmatprep.subr.bf16.mxu0 %v1990_v2  ;;  %v2009_v21 = vld [vmem:[%s2345_s23 + $0x68] sm:$0xff]   ;;  %v2010_v22 = vld [vmem:[%s2345_s23 + $0x70] sm:$0xff]   ;;  %v2011_v23 = vld [vmem:[%s2345_s23 + $0x78] sm:$0xff]   ;;  %s1734_s23 = sshll.u32 %s314_s19, 8 }
  0x2f   : > { %v2368_v27 = vld [vmem:[%s334_s8] ss:$0 sm:$0xff]  ;;  %s2892_s15 = scalar_lea.vmem [#allocation4], %s1734_s23 }
  0x30   : > { %s1599_s25 = sshll.u32 %s2892_s15, 4  ;;  %s2960_s25 = int_to_ptr.vmem [resolvable:$true] %s1599_s25 }
  0x31   : > { %1847 = vmatpush3.bf16.msra.mxu0 %v1990_v2  ;;  %s2156_s12 = scalar_lea.vmem %s2960_s25, 4096 }
  0x32   : > { %1848 = vmatprep.subr.bf16.mxu0 %v1991_v3  ;;  %p2157_p3 = scmp.ne.s32.totalorder %s2960_s25, %s2156_s12 }
  0x34   : > { %p2158_p4 = pnand %p2157_p3, %p2318_p9 }
  0x35   : > { %1849 = vmatpush3.bf16.msra.mxu0 %v1991_v3 }
  0x36   : > { %1850 = vmatprep.subr.bf16.mxu0 %v1992_v5  ;;  %p2159_p5 = pneg %p2158_p4 }
  0x39   : > { %1851 = vmatpush3.bf16.msra.mxu0 %v1992_v5 }
  0x3a   : > { %1852 = vmatprep.subr.bf16.mxu0 %v1993_v6 }
  0x3d   : > { %1853 = vmatpush3.bf16.msra.mxu0 %v1993_v6 }
  0x3e   : > { %1854 = vmatprep.subr.bf16.mxu0 %v1994_v7 }
  0x41   : > { %1855 = vmatpush3.bf16.msra.mxu0 %v1994_v7 }
  0x42   : > { %1856 = vmatprep.subr.bf16.mxu0 %v1995_v8 }
  0x45   : > { %1857 = vmatpush3.bf16.msra.mxu0 %v1995_v8 }
  0x48   : > { %1859 = vmatmul.mubr.bf16.vlgmr.msra.gmra.mxu0 %v1997_v9 }
  0x49   : > { %1862 = vmatprep.mubr.bf16.mxu0 %v1998_v10 }
  0x50   : > { %1863 = vmatmul.mubr.bf16.gmra.mxu0 %v1999_v11 }
  0x51   : > { %1866 = vmatprep.mubr.bf16.mxu0 %v2000_v12 }
  0x58   : > { %1867 = vmatmul.mubr.bf16.gmra.mxu0 %v2001_v13 }
  0x59   : > { %1870 = vmatprep.mubr.bf16.mxu0 %v2002_v14 }
  0x60   : > { %1871 = vmatmul.mubr.bf16.gmra.mxu0 %v2003_v15 }
  0x61   : > { %1874 = vmatprep.mubr.bf16.mxu0 %v2004_v16 }
  0x68   : > { %1875 = vmatmul.mubr.bf16.gmra.mxu0 %v2005_v17 }
  0x69   : > { %1878 = vmatprep.mubr.bf16.mxu0 %v2006_v18 }
  0x70   : > { %1879 = vmatmul.mubr.bf16.gmra.mxu0 %v2007_v19 }
  0x71   : > { %1882 = vmatprep.mubr.bf16.mxu0 %v2008_v20 }
  0x78   : > { %1883 = vmatmul.mubr.bf16.gmra.mxu0 %v2009_v21 }
  0x79   : > { %1886 = vmatprep.mubr.bf16.mxu0 %v2010_v22 }
  0x80   : > { %1887 = vmatmul.mubr.bf16.gmra.mxu0 %v2011_v23 }
 0x108   : > { %v1860_v28 = vpop.f32.mrf.mxu0 }
 0x109   : > { %v595_v30 = vadd.f32 %v1860_v28, %v2368_v27 }
 0x10a   : > { %v586_v31 = vpop.f32.mrf.mxu0 }
 0x10b   : > { %v587_v32 = vadd.f32 %v2368_v27, %v586_v31  ;;  %v2378_v33 = vsel %vm2370_vm0, %v595_v30, -1e+30 }
 0x10c   : > { %v1861_v34 = vpop.f32.mrf.mxu0  ;;  %v756_v35 = vsel %vm749_vm1, %v2378_v33, -inf }
 0x10d   : > { %v598_v36 = vadd.f32 %v1861_v34, %v2368_v27  ;;  %757 = vmax.xlane.f32.xlu1 %v756_v35  ;;  %v2385_v37 = vsel %vm2370_vm0, %v587_v32, -1e+30 }
 0x10e   : > { %v589_v38 = vpop.f32.mrf.mxu0  ;;  %v750_v39 = vsel %vm749_vm1, %v2385_v37, -inf }
 0x10f   : > { %v590_v40 = vadd.f32 %v2368_v27, %v589_v38  ;;  %751 = vmax.xlane.f32.xlu0 %v750_v39  ;;  %v2392_v41 = vsel %vm2370_vm0, %v598_v36, -1e+30 }
 0x110   : > { %v1864_v42 = vpop.f32.mrf.mxu0  ;;  %v759_v43 = vsel %vm749_vm1, %v2392_v41, -inf }
 0x111   : > { %760 = vmax.xlane.f32.xlu1 %v759_v43  ;;  %v2398_v44 = vsel %vm2370_vm0, %v590_v40, -1e+30  ;;  %v611_v47 = vadd.f32 %v1864_v42, %v2368_v27 }
 0x112   : > { %v602_v45 = vpop.f32.mrf.mxu0  ;;  %v753_v46 = vsel %vm749_vm1, %v2398_v44, -inf }
 0x113   : > { %v603_v48 = vadd.f32 %v2368_v27, %v602_v45  ;;  %754 = vmax.xlane.f32.xlu0 %v753_v46  ;;  %v2414_v55 = vsel %vm2370_vm0, %v611_v47, -1e+30 }
 0x114   : > { %v1865_v49 = vpop.f32.mrf.mxu0  ;;  %v768_v60 = vsel %vm749_vm1, %v2414_v55, -inf }
 0x115   : > { %v2406_v50 = vsel %vm2370_vm0, %v603_v48, -1e+30  ;;  %v614_v53 = vadd.f32 %v1865_v49, %v2368_v27 }
 0x116   : > { %v605_v51 = vpop.f32.mrf.mxu0  ;;  %v762_v52 = vsel %vm749_vm1, %v2406_v50, -inf }
 0x117   : > { %v606_v54 = vadd.f32 %v2368_v27, %v605_v51  ;;  %763 = vmax.xlane.f32.xlu0 %v762_v52  ;;  %v2428_v63 = vsel %vm2370_vm0, %v614_v53, -1e+30 }
 0x118   : > { %v1868_v56 = vpop.f32.mrf.mxu0  ;;  %v771_v3 = vsel %vm749_vm1, %v2428_v63, -inf }
 0x119   : > { %v2418_v57 = vsel %vm2370_vm0, %v606_v54, -1e+30  ;;  %v627_v61 = vadd.f32 %v1868_v56, %v2368_v27 }
 0x11a   : > { %v618_v58 = vpop.f32.mrf.mxu0  ;;  %v765_v59 = vsel %vm749_vm1, %v2418_v57, -inf }
 0x11b   : > { %v619_v62 = vadd.f32 %v2368_v27, %v618_v58  ;;  %766 = vmax.xlane.f32.xlu1 %v765_v59  ;;  %769 = vmax.xlane.f32.xlu0 %v768_v60  ;;  %v2442_v7 = vsel %vm2370_vm0, %v627_v61, -1e+30 }
 0x11c   : > { %v1869_v0 = vpop.f32.mrf.mxu0  ;;  %v780_v12 = vsel %vm749_vm1, %v2442_v7, -inf }
 0x11d   : > { %v2432_v1 = vsel %vm2370_vm0, %v619_v62, -1e+30  ;;  %v630_v5 = vadd.f32 %v1869_v0, %v2368_v27 }
 0x11e   : > { %v621_v2 = vpop.f32.mrf.mxu0  ;;  %v774_v4 = vsel %vm749_vm1, %v2432_v1, -inf }
 0x11f   : > { %v622_v6 = vadd.f32 %v2368_v27, %v621_v2  ;;  %772 = vmax.xlane.f32.xlu1 %v771_v3  ;;  %775 = vmax.xlane.f32.xlu0 %v774_v4  ;;  %v2456_v15 = vsel %vm2370_vm0, %v630_v5, -1e+30 }
 0x120   : > { %v1872_v8 = vpop.f32.mrf.mxu0  ;;  %v783_v19 = vsel %vm749_vm1, %v2456_v15, -inf }
 0x121   : > { %v2446_v9 = vsel %vm2370_vm0, %v622_v6, -1e+30  ;;  %v643_v13 = vadd.f32 %v1872_v8, %v2368_v27 }
 0x122   : > { %v634_v10 = vpop.f32.mrf.mxu0  ;;  %v777_v11 = vsel %vm749_vm1, %v2446_v9, -inf }
 0x123   : > { %v635_v14 = vadd.f32 %v2368_v27, %v634_v10  ;;  %778 = vmax.xlane.f32.xlu1 %v777_v11  ;;  %781 = vmax.xlane.f32.xlu0 %v780_v12  ;;  %v2470_v23 = vsel %vm2370_vm0, %v643_v13, -1e+30 }
 0x124   : > { %v1873_v16 = vpop.f32.mrf.mxu0  ;;  %v792_v30 = vsel %vm749_vm1, %v2470_v23, -inf }
 0x125   : > { %v2460_v17 = vsel %vm2370_vm0, %v635_v14, -1e+30  ;;  %v646_v21 = vadd.f32 %v1873_v16, %v2368_v27 }
 0x126   : > { %v637_v18 = vpop.f32.mrf.mxu0  ;;  %v786_v20 = vsel %vm749_vm1, %v2460_v17, -inf }
 0x127   : > { %v638_v22 = vadd.f32 %v2368_v27, %v637_v18  ;;  %784 = vmax.xlane.f32.xlu1 %v783_v19  ;;  %787 = vmax.xlane.f32.xlu0 %v786_v20  ;;  %v2484_v34 = vsel %vm2370_vm0, %v646_v21, -1e+30 }
 0x128   : > { %v1876_v24 = vpop.f32.mrf.mxu0  ;;  %v795_v39 = vsel %vm749_vm1, %v2484_v34, -inf }
 0x129   : > { %v2474_v25 = vsel %vm2370_vm0, %v638_v22, -1e+30  ;;  %v659_v31 = vadd.f32 %v1876_v24, %v2368_v27 }
 0x12a   : > { %v650_v26 = vpop.f32.mrf.mxu0  ;;  %v789_v28 = vsel %vm749_vm1, %v2474_v25, -inf }
 0x12b   : > { %v651_v32 = vadd.f32 %v2368_v27, %v650_v26  ;;  %790 = vmax.xlane.f32.xlu1 %v789_v28  ;;  %793 = vmax.xlane.f32.xlu0 %v792_v30  ;;  %v2498_v45 = vsel %vm2370_vm0, %v659_v31, -1e+30 }
 0x12c   : > { %v1877_v35 = vpop.f32.mrf.mxu0  ;;  %v804_v51 = vsel %vm749_vm1, %v2498_v45, -inf }
 0x12d   : > { %v2488_v36 = vsel %vm2370_vm0, %v651_v32, -1e+30  ;;  %v662_v42 = vadd.f32 %v1877_v35, %v2368_v27 }
 0x12e   : > { %v653_v38 = vpop.f32.mrf.mxu0  ;;  %v798_v40 = vsel %vm749_vm1, %v2488_v36, -inf }
 0x12f   : > { %v654_v43 = vadd.f32 %v2368_v27, %v653_v38  ;;  %796 = vmax.xlane.f32.xlu1 %v795_v39  ;;  %799 = vmax.xlane.f32.xlu0 %v798_v40  ;;  %v2512_v54 = vsel %vm2370_vm0, %v662_v42, -1e+30 }
 0x130   : > { %v1880_v46 = vpop.f32.mrf.mxu0  ;;  %v807_v60 = vsel %vm749_vm1, %v2512_v54, -inf }
 0x131   : > { %v2502_v47 = vsel %vm2370_vm0, %v654_v43, -1e+30  ;;  %v675_v52 = vadd.f32 %v1880_v46, %v2368_v27 }
 0x132   : > { %v666_v48 = vpop.f32.mrf.mxu0  ;;  %v801_v49 = vsel %vm749_vm1, %v2502_v47, -inf }
 0x133   : > { %v667_v53 = vadd.f32 %v2368_v27, %v666_v48  ;;  %802 = vmax.xlane.f32.xlu1 %v801_v49  ;;  %805 = vmax.xlane.f32.xlu0 %v804_v51  ;;  %v2526_v2 = vsel %vm2370_vm0, %v675_v52, -1e+30 }
 0x134   : > { %v1881_v56 = vpop.f32.mrf.mxu0  ;;  %v816_v8 = vsel %vm749_vm1, %v2526_v2, -inf }
 0x135   : > { %v2516_v58 = vsel %vm2370_vm0, %v667_v53, -1e+30  ;;  %v678_v62 = vadd.f32 %v1881_v56, %v2368_v27 }
 0x136   : > { %v669_v59 = vpop.f32.mrf.mxu0  ;;  %v810_v61 = vsel %vm749_vm1, %v2516_v58, -inf }
 0x137   : > { %v670_v0 = vadd.f32 %v2368_v27, %v669_v59  ;;  %808 = vmax.xlane.f32.xlu1 %v807_v60  ;;  %811 = vmax.xlane.f32.xlu0 %v810_v61  ;;  %v2540_v12 = vsel %vm2370_vm0, %v678_v62, -1e+30 }
 0x138   : > { %v1884_v3 = vpop.f32.mrf.mxu0  ;;  %v819_v18 = vsel %vm749_vm1, %v2540_v12, -inf }
 0x139   : > { %v2530_v4 = vsel %vm2370_vm0, %v670_v0, -1e+30  ;;  %v691_v10 = vadd.f32 %v1884_v3, %v2368_v27 }
 0x13a   : > { %v682_v5 = vpop.f32.mrf.mxu0  ;;  %v813_v6 = vsel %vm749_vm1, %v2530_v4, -inf }
 0x13b   : > { %v683_v11 = vadd.f32 %v2368_v27, %v682_v5  ;;  %814 = vmax.xlane.f32.xlu1 %v813_v6  ;;  %817 = vmax.xlane.f32.xlu0 %v816_v8  ;;  %v2554_v22 = vsel %vm2370_vm0, %v691_v10, -1e+30 }
 0x13c   : > { %v1885_v13 = vpop.f32.mrf.mxu0  ;;  %v828_v31 = vsel %vm749_vm1, %v2554_v22, -inf }
 0x13d   : > { %v2544_v14 = vsel %vm2370_vm0, %v683_v11, -1e+30  ;;  %v694_v20 = vadd.f32 %v1885_v13, %v2368_v27 }
 0x13e   : > { %v685_v16 = vpop.f32.mrf.mxu0  ;;  %v822_v19 = vsel %vm749_vm1, %v2544_v14, -inf }
 0x13f   : > { %v686_v21 = vadd.f32 %v2368_v27, %v685_v16  ;;  %820 = vmax.xlane.f32.xlu1 %v819_v18  ;;  %823 = vmax.xlane.f32.xlu0 %v822_v19  ;;  %v2568_v38 = vsel %vm2370_vm0, %v694_v20, -1e+30 }
 0x140   : > { %v1888_v24 = vpop.f32.mrf.mxu0  ;;  %v831_v43 = vsel %vm749_vm1, %v2568_v38, -inf }
 0x141   : > { %v2558_v26 = vsel %vm2370_vm0, %v686_v21, -1e+30  ;;  %v707_v32 = vadd.f32 %v1888_v24, %v2368_v27 }
 0x142   : > { %v698_v28 = vpop.f32.mrf.mxu0  ;;  %v825_v30 = vsel %vm749_vm1, %v2558_v26, -inf }
 0x143   : > { %v699_v35 = vadd.f32 %v2368_v27, %v698_v28  ;;  %826 = vmax.xlane.f32.xlu1 %v825_v30  ;;  %829 = vmax.xlane.f32.xlu0 %v828_v31  ;;  %v2582_v51 = vsel %vm2370_vm0, %v707_v32, -1e+30 }
 0x144   : > { %v1889_v39 = vpop.f32.mrf.mxu0  ;;  %v840_v56 = vsel %vm749_vm1, %v2582_v51, -inf }
 0x145   : > { %v2572_v40 = vsel %vm2370_vm0, %v699_v35, -1e+30  ;;  %v710_v48 = vadd.f32 %v1889_v39, %v2368_v27 }
 0x146   : > { %v701_v42 = vpop.f32.mrf.mxu0  ;;  %v834_v46 = vsel %vm749_vm1, %v2572_v40, -inf }
 0x147   : > { %v702_v49 = vadd.f32 %v2368_v27, %v701_v42  ;;  %832 = vmax.xlane.f32.xlu1 %v831_v43  ;;  %835 = vmax.xlane.f32.xlu0 %v834_v46  ;;  %v2594_v27 = vsel %vm2370_vm0, %v710_v48, -1e+30 }
 0x148   : > { %v843_v59 = vsel %vm749_vm1, %v2594_v27, -inf }
 0x149   : > { %v2586_v52 = vsel %vm2370_vm0, %v702_v49, -1e+30 }
 0x14a   : > { %v837_v53 = vsel %vm749_vm1, %v2586_v52, -inf }
 0x14b   : > { %838 = vmax.xlane.f32.xlu1 %v837_v53  ;;  %841 = vmax.xlane.f32.xlu0 %v840_v56 }
 0x14f   : > { %844 = vmax.xlane.f32.xlu1 %v843_v59 }
 0x196   : > { %v758_v60 = vpop.xlane.xlu1 %757 }
 0x197   : > { %v848_v61 = vsub.f32 %v2378_v33, %v758_v60 }
 0x198   : > { %v752_v62 = vpop.xlane.xlu0 %751 }
 0x199   : > { %v882_v0 = vmul.f32 1.442695, %v848_v61  ;;  %v846_v3 = vsub.f32 %v2385_v37, %v752_v62 }
 0x19a   : > { %v761_v5 = vpop.xlane.xlu1 %760 }
 0x19b   : > { %v878_v6 = vmul.f32 1.442695, %v846_v3  ;;  %v849_v8 = vsub.f32 %v2392_v41, %v761_v5  ;;  %2016 = vpow2.f32 %v882_v0 }
 0x19c   : > { %v755_v10 = vpop.xlane.xlu0 %754 }
 0x19d   : > { %2018 = vpow2.f32 %v878_v6  ;;  %v884_v11 = vmul.f32 1.442695, %v849_v8  ;;  %v847_v13 = vsub.f32 %v2398_v44, %v755_v10 }
 0x19f   : > { %v880_v16 = vmul.f32 1.442695, %v847_v13  ;;  %2020 = vpow2.f32 %v884_v11 }
 0x1a0   : > { %v764_v18 = vpop.xlane.xlu0 %763 }
 0x1a1   : > { %2022 = vpow2.f32 %v880_v16  ;;  %v850_v33 = vsub.f32 %v2406_v50, %v764_v18 }
 0x1a3   : > { %v886_v19 = vmul.f32 1.442695, %v850_v33 }
 0x1a4   : > { %v767_v20 = vpop.xlane.xlu1 %766  ;;  %v770_v21 = vpop.xlane.xlu0 %769 }
 0x1a5   : > { %2024 = vpow2.f32 %v886_v19  ;;  %v851_v37 = vsub.f32 %v2418_v57, %v767_v20  ;;  %v852_v41 = vsub.f32 %v2414_v55, %v770_v21 }
 0x1a7   : > { %v888_v24 = vmul.f32 1.442695, %v851_v37  ;;  %v890_v28 = vmul.f32 1.442695, %v852_v41 }
 0x1a8   : > { %v773_v30 = vpop.xlane.xlu1 %772  ;;  %v776_v31 = vpop.xlane.xlu0 %775 }
 0x1a9   : > { %v2017_v32 = vpop.eup %2016  ;;  %2026 = vpow2.f32 %v888_v24  ;;  %v853_v44 = vsub.f32 %v2428_v63, %v773_v30  ;;  %v854_v35 = vsub.f32 %v2432_v1, %v776_v31 }
 0x1aa   : > { %v2019_v39 = vpop.eup %2018  ;;  %2028 = vpow2.f32 %v890_v28  ;;  %v2617_v1 = vsel %vm2370_vm0, %v2017_v32, 0.0 }
 0x1ab   : > { %v892_v50 = vmul.f32 1.442695, %v853_v44  ;;  %v894_v42 = vmul.f32 1.442695, %v854_v35  ;;  %v2609_v43 = vsel %vm2370_vm0, %v2019_v39, 0.0 }
 0x1ac   : > { %v779_v57 = vpop.xlane.xlu1 %778  ;;  %v782_v55 = vpop.xlane.xlu0 %781  ;;  %v974_v46 = vsel %vm749_vm1, %v2609_v43, 0.0 }
 0x1ad   : > { %v2021_v48 = vpop.eup %2020  ;;  %2030 = vpow2.f32 %v892_v50  ;;  %v855_v49 = vsub.f32 %v2446_v9, %v779_v57  ;;  %v856_v63 = vsub.f32 %v2442_v7, %v782_v55  ;;  %975 = vadd.xlane.f32.xlu0 %v974_v46  ;;  %v980_v9 = vsel %vm749_vm1, %v2617_v1, 0.0 }
 0x1ae   : > { %v2023_v53 = vpop.eup %2022  ;;  %2032 = vpow2.f32 %v894_v42  ;;  %v2631_v5 = vsel %vm2370_vm0, %v2021_v48, 0.0 }
 0x1af   : > { %v896_v56 = vmul.f32 1.442695, %v855_v49  ;;  %v898_v59 = vmul.f32 1.442695, %v856_v63  ;;  %v2621_v60 = vsel %vm2370_vm0, %v2023_v53, 0.0 }
 0x1b0   : > { %v785_v61 = vpop.xlane.xlu1 %784  ;;  %v788_v62 = vpop.xlane.xlu0 %787  ;;  %v977_v7 = vsel %vm749_vm1, %v2621_v60, 0.0 }
 0x1b1   : > { %2034 = vpow2.f32 %v896_v56  ;;  %v857_v0 = vsub.f32 %v2456_v15, %v785_v61  ;;  %v858_v3 = vsub.f32 %v2460_v17, %v788_v62  ;;  %981 = vadd.xlane.f32.xlu0 %v980_v9  ;;  %978 = vadd.xlane.f32.xlu1 %v977_v7  ;;  %v983_v15 = vsel %vm749_vm1, %v2631_v5, 0.0 }
 0x1b2   : > { %v2025_v6 = vpop.eup %2024  ;;  %2036 = vpow2.f32 %v898_v59 }
 0x1b3   : > { %v900_v8 = vmul.f32 1.442695, %v857_v0  ;;  %v902_v10 = vmul.f32 1.442695, %v858_v3  ;;  %v2635_v11 = vsel %vm2370_vm0, %v2025_v6, 0.0  ;;  %v2012_v6 = vld [vmem:[%s2685_s17 + $0x18] sm:$0xff]  }
 0x1b4   : > { %v791_v13 = vpop.xlane.xlu1 %790  ;;  %v794_v16 = vpop.xlane.xlu0 %793  ;;  %v986_v17 = vsel %vm749_vm1, %v2635_v11, 0.0  ;;  %1890 = vmatprep.subr.bf16.mxu1 %v2012_v6 }
 0x1b5   : > { %2038 = vpow2.f32 %v900_v8  ;;  %v859_v18 = vsub.f32 %v2474_v25, %v791_v13  ;;  %v860_v33 = vsub.f32 %v2470_v23, %v794_v16  ;;  %984 = vadd.xlane.f32.xlu1 %v983_v15  ;;  %987 = vadd.xlane.f32.xlu0 %v986_v17 }
 0x1b6   : > { %v2027_v19 = vpop.eup %2026  ;;  %2040 = vpow2.f32 %v902_v10  ;;  %1891 = vmatpush3.bf16.msra.mxu1 %v2012_v6 }
 0x1b7   : > { %v2029_v20 = vpop.eup %2028  ;;  %v904_v21 = vmul.f32 1.442695, %v859_v18  ;;  %v906_v37 = vmul.f32 1.442695, %v860_v33  ;;  %v2645_v41 = vsel %vm2370_vm0, %v2027_v19, 0.0 }
 0x1b8   : > { %v797_v24 = vpop.xlane.xlu1 %796  ;;  %v800_v28 = vpop.xlane.xlu0 %799  ;;  %v989_v30 = vsel %vm749_vm1, %v2645_v41, 0.0  ;;  %v2651_v25 = vsel %vm2370_vm0, %v2029_v20, 0.0 }
 0x1b9   : > { %2042 = vpow2.f32 %v904_v21  ;;  %v861_v23 = vsub.f32 %v2484_v34, %v797_v24  ;;  %v862_v31 = vsub.f32 %v2488_v36, %v800_v28  ;;  %990 = vadd.xlane.f32.xlu1 %v989_v30  ;;  %v992_v32 = vsel %vm749_vm1, %v2651_v25, 0.0  ;;  %v2013_v21 = vld [vmem:[%s2685_s17 + $0x10] sm:$0xff]  }
 0x1ba   : > { %v2031_v44 = vpop.eup %2030  ;;  %2044 = vpow2.f32 %v906_v37  ;;  %993 = vadd.xlane.f32.xlu0 %v992_v32  ;;  %1892 = vmatprep.subr.bf16.mxu1 %v2013_v21 }
 0x1bb   : > { %v2033_v35 = vpop.eup %2032  ;;  %v908_v39 = vmul.f32 1.442695, %v861_v23  ;;  %v910_v50 = vmul.f32 1.442695, %v862_v31  ;;  %v2659_v42 = vsel %vm2370_vm0, %v2031_v44, 0.0  ;;  %1893 = vmatpush3.bf16.msra.mxu1 %v2013_v21 }
 0x1bc   : > { %v803_v57 = vpop.xlane.xlu1 %802  ;;  %v806_v55 = vpop.xlane.xlu0 %805  ;;  %v995_v34 = vsel %vm749_vm1, %v2659_v42, 0.0  ;;  %v2665_v36 = vsel %vm2370_vm0, %v2033_v35, 0.0 }
 0x1bd   : > { %2046 = vpow2.f32 %v908_v39  ;;  %v863_v46 = vsub.f32 %v2502_v47, %v803_v57  ;;  %v864_v48 = vsub.f32 %v2498_v45, %v806_v55  ;;  %996 = vadd.xlane.f32.xlu1 %v995_v34  ;;  %v998_v49 = vsel %vm749_vm1, %v2665_v36, 0.0 }
 0x1be   : > { %v2035_v63 = vpop.eup %2034  ;;  %2048 = vpow2.f32 %v910_v50  ;;  %999 = vadd.xlane.f32.xlu0 %v998_v49  ;;  %v2014_v50 = vld [vmem:[%s2685_s17 + $0x8] sm:$0xff]  }
 0x1bf   : > { %v2037_v53 = vpop.eup %2036  ;;  %v912_v56 = vmul.f32 1.442695, %v863_v46  ;;  %v914_v59 = vmul.f32 1.442695, %v864_v48  ;;  %v2673_v61 = vsel %vm2370_vm0, %v2035_v63, 0.0  ;;  %1894 = vmatprep.subr.bf16.mxu1 %v2014_v50 }
 0x1c0   : > { %v809_v62 = vpop.xlane.xlu1 %808  ;;  %v812_v9 = vpop.xlane.xlu0 %811  ;;  %v1001_v45 = vsel %vm749_vm1, %v2673_v61, 0.0  ;;  %v2680_v47 = vsel %vm2370_vm0, %v2037_v53, 0.0  ;;  %1895 = vmatpush3.bf16.msra.mxu1 %v2014_v50 }
 0x1c1   : > { %2050 = vpow2.f32 %v912_v56  ;;  %v865_v7 = vsub.f32 %v2512_v54, %v809_v62  ;;  %v866_v0 = vsub.f32 %v2516_v58, %v812_v9  ;;  %1002 = vadd.xlane.f32.xlu1 %v1001_v45  ;;  %v1004_v3 = vsel %vm749_vm1, %v2680_v47, 0.0  ;;  %v2015_v62 = vld [vmem:[%s2685_s17] sm:$0xff]   ;;  %s2160_s17 = sshll.u32 %s2237_s16, 4  ;;  %s2161_s17 = int_to_ptr.vmem [resolvable:$false] %s2160_s17 }
 0x1c2   : > { %v2039_v8 = vpop.eup %2038  ;;  %2052 = vpow2.f32 %v914_v59  ;;  %1005 = vadd.xlane.f32.xlu0 %v1004_v3  ;;  %1896 = vmatprep.subr.bf16.mxu1 %v2015_v62  ;;  %s2162_s18 = scalar_lea.vmem %s2161_s17, 8192  ;;  %p2163_p6 = scmp.lt.s32.totalorder %s2960_s25, %s2161_s17 }
 0x1c3   : > { %v2041_v10 = vpop.eup %2040  ;;  %v916_v13 = vmul.f32 1.442695, %v865_v7  ;;  %v918_v16 = vmul.f32 1.442695, %v866_v0  ;;  %v2694_v15 = vsel %vm2370_vm0, %v2039_v8, 0.0  ;;  %p2164_p7 = scmp.lt.s32.totalorder %s2162_s18, %s2156_s12 }
 0x1c4   : > { %v815_v54 = vpop.xlane.xlu1 %814  ;;  %v818_v17 = vpop.xlane.xlu0 %817  ;;  %v1007_v58 = vsel %vm749_vm1, %v2694_v15, 0.0  ;;  %v2700_v18 = vsel %vm2370_vm0, %v2041_v10, 0.0  ;;  %1897 = vmatpush3.bf16.msra.mxu1 %v2015_v62 }
 0x1c5   : > { %2054 = vpow2.f32 %v916_v13  ;;  %v867_v33 = vsub.f32 %v2530_v4, %v815_v54  ;;  %v868_v19 = vsub.f32 %v2526_v2, %v818_v17  ;;  %1008 = vadd.xlane.f32.xlu1 %v1007_v58  ;;  %v1010_v20 = vsel %vm749_vm1, %v2700_v18, 0.0  ;;  %p2165_p8 = por %p2164_p7, %p2163_p6 }
 0x1c6   : > { %v2043_v37 = vpop.eup %2042  ;;  %2056 = vpow2.f32 %v918_v16  ;;  %1011 = vadd.xlane.f32.xlu0 %v1010_v20 }
 0x1c7   : > { %v2045_v24 = vpop.eup %2044  ;;  %v920_v28 = vmul.f32 1.442695, %v867_v33  ;;  %v922_v30 = vmul.f32 1.442695, %v868_v19  ;;  %v2709_v23 = vsel %vm2370_vm0, %v2043_v37, 0.0  ;;  %p2166_p10 = pnand %p2165_p8, %p2159_p5 }
 0x1c8   : > { %v821_v4 = vpop.xlane.xlu1 %820  ;;  %v824_v31 = vpop.xlane.xlu0 %823  ;;  %v1013_v2 = vsel %vm749_vm1, %v2709_v23, 0.0  ;;  %v2715_v32 = vsel %vm2370_vm0, %v2045_v24, 0.0 }
 0x1c9   : > { %2058 = vpow2.f32 %v920_v28  ;;  %v869_v44 = vsub.f32 %v2540_v12, %v821_v4  ;;  %v870_v35 = vsub.f32 %v2544_v14, %v824_v31  ;;  %1014 = vadd.xlane.f32.xlu1 %v1013_v2  ;;  %v1016_v39 = vsel %vm749_vm1, %v2715_v32, 0.0 }
 0x1ca   : > { %v2047_v57 = vpop.eup %2046  ;;  %2060 = vpow2.f32 %v922_v30  ;;  %1017 = vadd.xlane.f32.xlu0 %v1016_v39 }
 0x1cb   : > { %v2049_v55 = vpop.eup %2048  ;;  %v924_v34 = vmul.f32 1.442695, %v869_v44  ;;  %v926_v46 = vmul.f32 1.442695, %v870_v35  ;;  %v2724_v48 = vsel %vm2370_vm0, %v2047_v57, 0.0 }
 0x1cc   : > { %v827_v12 = vpop.xlane.xlu1 %826  ;;  %v830_v49 = vpop.xlane.xlu0 %829  ;;  %v1019_v14 = vsel %vm749_vm1, %v2724_v48, 0.0  ;;  %v2730_v63 = vsel %vm2370_vm0, %v2049_v55, 0.0 }
 0x1cd   : > { %2062 = vpow2.f32 %v924_v34  ;;  %v871_v53 = vsub.f32 %v2558_v26, %v827_v12  ;;  %v872_v56 = vsub.f32 %v2554_v22, %v830_v49  ;;  %1020 = vadd.xlane.f32.xlu1 %v1019_v14  ;;  %v1022_v59 = vsel %vm749_vm1, %v2730_v63, 0.0 }
 0x1ce   : > { %v2051_v9 = vpop.eup %2050  ;;  %2064 = vpow2.f32 %v926_v46  ;;  %1023 = vadd.xlane.f32.xlu0 %v1022_v59 }
 0x1cf   : > { %v2053_v45 = vpop.eup %2052  ;;  %v928_v7 = vmul.f32 1.442695, %v871_v53  ;;  %v930_v0 = vmul.f32 1.442695, %v872_v56  ;;  %v2739_v3 = vsel %vm2370_vm0, %v2051_v9, 0.0 }
 0x1d0   : > { %v833_v6 = vpop.xlane.xlu1 %832  ;;  %v836_v26 = vpop.xlane.xlu0 %835  ;;  %v1025_v22 = vsel %vm749_vm1, %v2739_v3, 0.0  ;;  %v2745_v8 = vsel %vm2370_vm0, %v2053_v45, 0.0 }
 0x1d1   : > { %2066 = vpow2.f32 %v928_v7  ;;  %v873_v10 = vsub.f32 %v2568_v38, %v833_v6  ;;  %v874_v13 = vsub.f32 %v2572_v40, %v836_v26  ;;  %1026 = vadd.xlane.f32.xlu1 %v1025_v22  ;;  %v1028_v16 = vsel %vm749_vm1, %v2745_v8, 0.0 }
 0x1d2   : > { %v2055_v54 = vpop.eup %2054  ;;  %2068 = vpow2.f32 %v930_v0  ;;  %1029 = vadd.xlane.f32.xlu0 %v1028_v16 }
 0x1d3   : > { %v2057_v17 = vpop.eup %2056  ;;  %v932_v58 = vmul.f32 1.442695, %v873_v10  ;;  %v934_v33 = vmul.f32 1.442695, %v874_v13  ;;  %v2753_v19 = vsel %vm2370_vm0, %v2055_v54, 0.0 }
 0x1d4   : > { %v839_v20 = vpop.xlane.xlu1 %838  ;;  %v842_v21 = vpop.xlane.xlu0 %841  ;;  %v1031_v38 = vsel %vm749_vm1, %v2753_v19, 0.0  ;;  %v2759_v40 = vsel %vm2370_vm0, %v2057_v17, 0.0 }
 0x1d5   : > { %2070 = vpow2.f32 %v932_v58  ;;  %v875_v37 = vsub.f32 %v2586_v52, %v839_v20  ;;  %v876_v24 = vsub.f32 %v2582_v51, %v842_v21  ;;  %1032 = vadd.xlane.f32.xlu1 %v1031_v38  ;;  %v1034_v28 = vsel %vm749_vm1, %v2759_v40, 0.0 }
 0x1d6   : > { %v2059_v30 = vpop.eup %2058  ;;  %2072 = vpow2.f32 %v934_v33  ;;  %1035 = vadd.xlane.f32.xlu0 %v1034_v28 }
 0x1d7   : > { %v2061_v4 = vpop.eup %2060  ;;  %v936_v31 = vmul.f32 1.442695, %v875_v37  ;;  %v938_v2 = vmul.f32 1.442695, %v876_v24  ;;  %v2767_v44 = vsel %vm2370_vm0, %v2059_v30, 0.0 }
 0x1d8   : > { %v845_v35 = vpop.xlane.xlu1 %844  ;;  %v1037_v52 = vsel %vm749_vm1, %v2767_v44, 0.0  ;;  %v2773_v51 = vsel %vm2370_vm0, %v2061_v4, 0.0 }
 0x1d9   : > { %2074 = vpow2.f32 %v936_v31  ;;  %v877_v39 = vsub.f32 %v2594_v27, %v845_v35  ;;  %1038 = vadd.xlane.f32.xlu1 %v1037_v52  ;;  %v1040_v50 = vsel %vm749_vm1, %v2773_v51, 0.0 }
 0x1da   : > { %v2063_v57 = vpop.eup %2062  ;;  %2076 = vpow2.f32 %v938_v2  ;;  %1041 = vadd.xlane.f32.xlu0 %v1040_v50 }
 0x1db   : > { %v2065_v55 = vpop.eup %2064  ;;  %v940_v34 = vmul.f32 1.442695, %v877_v39  ;;  %v2780_v46 = vsel %vm2370_vm0, %v2063_v57, 0.0 }
 0x1dc   : > { %v1043_v12 = vsel %vm749_vm1, %v2780_v46, 0.0  ;;  %v2786_v49 = vsel %vm2370_vm0, %v2065_v55, 0.0 }
 0x1dd   : > { %2078 = vpow2.f32 %v940_v34  ;;  %1044 = vadd.xlane.f32.xlu1 %v1043_v12  ;;  %v1046_v27 = vsel %vm749_vm1, %v2786_v49, 0.0 }
 0x1de   : > { %v2067_v14 = vpop.eup %2066  ;;  %1047 = vadd.xlane.f32.xlu0 %v1046_v27 }
 0x1df   : > { %v2069_v53 = vpop.eup %2068  ;;  %v2792_v56 = vsel %vm2370_vm0, %v2067_v14, 0.0 }
 0x1e0   : > { %v1049_v59 = vsel %vm749_vm1, %v2792_v56, 0.0  ;;  %v2798_v62 = vsel %vm2370_vm0, %v2069_v53, 0.0 }
 0x1e1   : > { %1050 = vadd.xlane.f32.xlu1 %v1049_v59  ;;  %v1052_v9 = vsel %vm749_vm1, %v2798_v62, 0.0 }
 0x1e2   : > { %v2071_v45 = vpop.eup %2070  ;;  %1053 = vadd.xlane.f32.xlu0 %v1052_v9 }
 0x1e3   : > { %v2073_v7 = vpop.eup %2072  ;;  %v2804_v0 = vsel %vm2370_vm0, %v2071_v45, 0.0 }
 0x1e4   : > { %v1055_v6 = vsel %vm749_vm1, %v2804_v0, 0.0  ;;  %v2810_v26 = vsel %vm2370_vm0, %v2073_v7, 0.0 }
 0x1e5   : > { %1056 = vadd.xlane.f32.xlu1 %v1055_v6  ;;  %v1058_v22 = vsel %vm749_vm1, %v2810_v26, 0.0 }
 0x1e6   : > { %v2075_v10 = vpop.eup %2074  ;;  %1059 = vadd.xlane.f32.xlu0 %v1058_v22 }
 0x1e7   : > { %v2077_v13 = vpop.eup %2076  ;;  %v2816_v16 = vsel %vm2370_vm0, %v2075_v10, 0.0 }
 0x1e8   : > { %v1061_v54 = vsel %vm749_vm1, %v2816_v16, 0.0  ;;  %v2822_v17 = vsel %vm2370_vm0, %v2077_v13, 0.0 }
 0x1e9   : > { %1062 = vadd.xlane.f32.xlu1 %v1061_v54  ;;  %v1064_v58 = vsel %vm749_vm1, %v2822_v17, 0.0 }
 0x1ea   : > { %v2079_v33 = vpop.eup %2078  ;;  %1065 = vadd.xlane.f32.xlu0 %v1064_v58 }
 0x1eb   : > { %v2828_v20 = vsel %vm2370_vm0, %v2079_v33, 0.0 }
 0x1ec   : > { %v1067_v21 = vsel %vm749_vm1, %v2828_v20, 0.0 }
 0x1ed   : > { %1068 = vadd.xlane.f32.xlu1 %v1067_v21 }
 0x236   : > { %v976_v38 = vpop.xlane.xlu0 %975 }
 0x237   : > { %2080 = vrcp.f32 %v976_v38  ;;  %vm1070_vm2 = vcmp.gt.f32.partialorder %v976_v38, 0.0 }
 0x23a   : > { %v979_v37 = vpop.xlane.xlu1 %978  ;;  %v982_v24 = vpop.xlane.xlu0 %981 }
 0x23b   : > { %2082 = vrcp.f32 %v979_v37  ;;  %vm1071_vm3 = vcmp.gt.f32.partialorder %v979_v37, 0.0  ;;  %vm1072_vm4 = vcmp.gt.f32.partialorder %v982_v24, 0.0 }
 0x23c   : > { %2084 = vrcp.f32 %v982_v24 }
 0x23e   : > { %v985_v28 = vpop.xlane.xlu1 %984  ;;  %v988_v30 = vpop.xlane.xlu0 %987 }
 0x23f   : > { %2086 = vrcp.f32 %v985_v28  ;;  %vm1073_vm5 = vcmp.gt.f32.partialorder %v985_v28, 0.0  ;;  %vm1074_vm6 = vcmp.gt.f32.partialorder %v988_v30, 0.0 }
 0x240   : > { %2088 = vrcp.f32 %v988_v30 }
 0x242   : > { %v991_v4 = vpop.xlane.xlu1 %990 }
 0x243   : > { %2090 = vrcp.f32 %v991_v4  ;;  %v994_v31 = vpop.xlane.xlu0 %993  ;;  %vm1075_vm7 = vcmp.gt.f32.partialorder %v991_v4, 0.0 }
 0x244   : > { %v2081_v29 = vpop.eup %2080  ;;  %2092 = vrcp.f32 %v994_v31  ;;  %vm1076_vm8 = vcmp.gt.f32.partialorder %v994_v31, 0.0 }
 0x245   : > { %v1134_v35 = vsel %vm1070_vm2, %v2081_v29, 0.0 }
 0x246   : > { %v997_v2 = vpop.xlane.xlu1 %996  ;;  %v1166_v34 = vmul.f32 %v1134_v35, %v2609_v43 }
 0x247   : > { %2094 = vrcp.f32 %v997_v2  ;;  %v1000_v52 = vpop.xlane.xlu0 %999  ;;  %vm1077_vm9 = vcmp.gt.f32.partialorder %v997_v2, 0.0 }
 0x248   : > { %v2083_v39 = vpop.eup %2082  ;;  %2096 = vrcp.f32 %v1000_v52  ;;  %vm1078_vm10 = vcmp.gt.f32.partialorder %v1000_v52, 0.0 }
 0x249   : > { %v2085_v50 = vpop.eup %2084  ;;  %v1135_v57 = vsel %vm1071_vm3, %v2083_v39, 0.0 }
 0x24a   : > { %v1003_v55 = vpop.xlane.xlu1 %1002  ;;  %v1167_v12 = vmul.f32 %v1135_v57, %v2621_v60  ;;  %v1136_v27 = vsel %vm1072_vm4, %v2085_v50, 0.0 }
 0x24b   : > { %2098 = vrcp.f32 %v1003_v55  ;;  %v1006_v14 = vpop.xlane.xlu0 %1005  ;;  %v1168_v7 = vmul.f32 %v1136_v27, %v2617_v1  ;;  %vm1079_vm11 = vcmp.gt.f32.partialorder %v1003_v55, 0.0 }
 0x24c   : > { %v2087_v53 = vpop.eup %2086  ;;  %2100 = vrcp.f32 %v1006_v14  ;;  %v1198_v59 = vpack.c.bf16 %v1167_v12, %v1166_v34  ;;  %vm1080_vm12 = vcmp.gt.f32.partialorder %v1006_v14, 0.0 }
 0x24d   : > { %v2089_v9 = vpop.eup %2088  ;;  %v1137_v45 = vsel %vm1073_vm5, %v2087_v53, 0.0 }
 0x24e   : > { %v1169_v6 = vmul.f32 %v1137_v45, %v2631_v5  ;;  %v1009_v22 = vpop.xlane.xlu1 %1008  ;;  %1898 = vmatprep.mubr.msk.bf16.mxu1 %vm749_vm1, %v1198_v59  ;;  %v1138_v43 = vsel %vm1074_vm6, %v2089_v9, 0.0 }
 0x24f   : > { %2102 = vrcp.f32 %v1009_v22  ;;  %v1012_v60 = vpop.xlane.xlu0 %1011  ;;  %v1170_v33 = vmul.f32 %v1138_v43, %v2635_v11  ;;  %vm1081_vm13 = vcmp.gt.f32.partialorder %v1009_v22, 0.0 }
 0x250   : > { %v2091_v10 = vpop.eup %2090  ;;  %v1199_v13 = vpack.c.bf16 %v1169_v6, %v1168_v7  ;;  %2104 = vrcp.f32 %v1012_v60  ;;  %vm1082_vm14 = vcmp.gt.f32.partialorder %v1012_v60, 0.0 }
 0x251   : > { %v2093_v54 = vpop.eup %2092  ;;  %v1139_v58 = vsel %vm1075_vm7, %v2091_v10, 0.0 }
 0x252   : > { %v1171_v21 = vmul.f32 %v1139_v58, %v2645_v41  ;;  %v1015_v1 = vpop.xlane.xlu1 %1014  ;;  %1899 = vmatmul.mubr.msk.bf16.vlgmr.msra.gmra.mxu1 %vm749_vm1, %v1199_v13  ;;  %v1140_v5 = vsel %vm1076_vm8, %v2093_v54, 0.0 }
 0x253   : > { %2106 = vrcp.f32 %v1015_v1  ;;  %v1018_v38 = vpop.xlane.xlu0 %1017  ;;  %v1172_v4 = vmul.f32 %v1140_v5, %v2651_v25  ;;  %vm1083_vm15 = vcmp.gt.f32.partialorder %v1015_v1, 0.0 }
 0x254   : > { %v2095_v37 = vpop.eup %2094  ;;  %v1200_v24 = vpack.c.bf16 %v1171_v21, %v1170_v33  ;;  %2108 = vrcp.f32 %v1018_v38  ;;  %vm1084_vm0 = vcmp.gt.f32.partialorder %v1018_v38, 0.0 }
 0x255   : > { %v2097_v28 = vpop.eup %2096  ;;  %v1141_v30 = vsel %vm1077_vm9, %v2095_v37, 0.0 }
 0x256   : > { %v1173_v29 = vmul.f32 %v1141_v30, %v2659_v42  ;;  %v1021_v11 = vpop.xlane.xlu1 %1020  ;;  %1902 = vmatprep.mubr.msk.bf16.mxu1 %vm749_vm1, %v1200_v24  ;;  %v1142_v41 = vsel %vm1078_vm10, %v2097_v28, 0.0 }
 0x257   : > { %2110 = vrcp.f32 %v1021_v11  ;;  %v1024_v31 = vpop.xlane.xlu0 %1023  ;;  %v1174_v57 = vmul.f32 %v1142_v41, %v2665_v36  ;;  %vm1085_vm2 = vcmp.gt.f32.partialorder %v1021_v11, 0.0 }
 0x258   : > { %v2099_v35 = vpop.eup %2098  ;;  %v1201_v39 = vpack.c.bf16 %v1173_v29, %v1172_v4  ;;  %2112 = vrcp.f32 %v1024_v31  ;;  %vm1086_vm3 = vcmp.gt.f32.partialorder %v1024_v31, 0.0 }
 0x259   : > { %v2101_v50 = vpop.eup %2100  ;;  %v1143_v2 = vsel %vm1079_vm11, %v2099_v35, 0.0 }
 0x25a   : > { %v1175_v34 = vmul.f32 %v1143_v2, %v2673_v61  ;;  %v1027_v25 = vpop.xlane.xlu1 %1026  ;;  %1903 = vmatmul.mubr.msk.bf16.gmra.mxu1 %vm749_vm1, %v1201_v39  ;;  %v1144_v42 = vsel %vm1080_vm12, %v2101_v50, 0.0 }
 0x25b   : > { %2114 = vrcp.f32 %v1027_v25  ;;  %v1030_v52 = vpop.xlane.xlu0 %1029  ;;  %v1176_v59 = vmul.f32 %v1144_v42, %v2680_v47  ;;  %vm1087_vm4 = vcmp.gt.f32.partialorder %v1027_v25, 0.0 }
 0x25c   : > { %v2103_v12 = vpop.eup %2102  ;;  %v1202_v27 = vpack.c.bf16 %v1175_v34, %v1174_v57  ;;  %2116 = vrcp.f32 %v1030_v52  ;;  %vm1088_vm5 = vcmp.gt.f32.partialorder %v1030_v52, 0.0 }
 0x25d   : > { %v2105_v53 = vpop.eup %2104  ;;  %v1145_v55 = vsel %vm1081_vm13, %v2103_v12, 0.0 }
 0x25e   : > { %v1177_v9 = vmul.f32 %v1145_v55, %v2694_v15  ;;  %v1033_v36 = vpop.xlane.xlu1 %1032  ;;  %1906 = vmatprep.mubr.msk.bf16.mxu1 %vm749_vm1, %v1202_v27  ;;  %v1146_v61 = vsel %vm1082_vm14, %v2105_v53, 0.0 }
 0x25f   : > { %2118 = vrcp.f32 %v1033_v36  ;;  %v1036_v14 = vpop.xlane.xlu0 %1035  ;;  %v1178_v43 = vmul.f32 %v1146_v61, %v2700_v18  ;;  %vm1089_vm6 = vcmp.gt.f32.partialorder %v1033_v36, 0.0 }
 0x260   : > { %v2107_v45 = vpop.eup %2106  ;;  %v1203_v7 = vpack.c.bf16 %v1177_v9, %v1176_v59  ;;  %2120 = vrcp.f32 %v1036_v14  ;;  %vm1090_vm7 = vcmp.gt.f32.partialorder %v1036_v14, 0.0 }
 0x261   : > { %v2109_v6 = vpop.eup %2108  ;;  %v1147_v22 = vsel %vm1083_vm15, %v2107_v45, 0.0 }
 0x262   : > { %v1179_v10 = vmul.f32 %v1147_v22, %v2709_v23  ;;  %v1039_v47 = vpop.xlane.xlu1 %1038  ;;  %1907 = vmatmul.mubr.msk.bf16.gmra.mxu1 %vm749_vm1, %v1203_v7  ;;  %v1148_v15 = vsel %vm1084_vm0, %v2109_v6, 0.0 }
 0x263   : > { %2122 = vrcp.f32 %v1039_v47  ;;  %v1042_v60 = vpop.xlane.xlu0 %1041  ;;  %v1180_v21 = vmul.f32 %v1148_v15, %v2715_v32  ;;  %vm1091_vm8 = vcmp.gt.f32.partialorder %v1039_v47, 0.0 }
 0x264   : > { %v2111_v13 = vpop.eup %2110  ;;  %v1204_v54 = vpack.c.bf16 %v1179_v10, %v1178_v43  ;;  %2124 = vrcp.f32 %v1042_v60  ;;  %vm1092_vm9 = vcmp.gt.f32.partialorder %v1042_v60, 0.0 }
 0x265   : > { %v2113_v58 = vpop.eup %2112  ;;  %v1149_v33 = vsel %vm1085_vm2, %v2111_v13, 0.0 }
 0x266   : > { %v1181_v1 = vmul.f32 %v1149_v33, %v2724_v48  ;;  %v1045_v18 = vpop.xlane.xlu1 %1044  ;;  %1910 = vmatprep.mubr.msk.bf16.mxu1 %vm749_vm1, %v1204_v54  ;;  %v1150_v23 = vsel %vm1086_vm3, %v2113_v58, 0.0 }
 0x267   : > { %2126 = vrcp.f32 %v1045_v18  ;;  %v1048_v5 = vpop.xlane.xlu0 %1047  ;;  %v1182_v30 = vmul.f32 %v1150_v23, %v2730_v63  ;;  %vm1093_vm10 = vcmp.gt.f32.partialorder %v1045_v18, 0.0 }
 0x268   : > { %v2115_v38 = vpop.eup %2114  ;;  %v1205_v37 = vpack.c.bf16 %v1181_v1, %v1180_v21  ;;  %2128 = vrcp.f32 %v1048_v5  ;;  %vm1094_vm11 = vcmp.gt.f32.partialorder %v1048_v5, 0.0 }
 0x269   : > { %v2117_v24 = vpop.eup %2116  ;;  %v1151_v28 = vsel %vm1087_vm4, %v2115_v38, 0.0 }
 0x26a   : > { %v1183_v4 = vmul.f32 %v1151_v28, %v2739_v3  ;;  %v1051_v32 = vpop.xlane.xlu1 %1050  ;;  %1911 = vmatmul.mubr.msk.bf16.gmra.mxu1 %vm749_vm1, %v1205_v37  ;;  %v1152_v48 = vsel %vm1088_vm5, %v2117_v24, 0.0  ;;  %v1487_v24 = vld [vmem:[%s2885_s22] sm:$0xff] }
 0x26b   : > { %2130 = vrcp.f32 %v1051_v32  ;;  %v1054_v29 = vpop.xlane.xlu0 %1053  ;;  %v1184_v39 = vmul.f32 %v1152_v48, %v2745_v8  ;;  %vm1095_vm12 = vcmp.gt.f32.partialorder %v1051_v32, 0.0  ;;  %v1490_v32 = vld [vmem:[%s2885_s22 + $0x18] sm:$0xff] }
 0x26c   : > { %v2119_v11 = vpop.eup %2118  ;;  %v1206_v41 = vpack.c.bf16 %v1183_v4, %v1182_v30  ;;  %2132 = vrcp.f32 %v1054_v29  ;;  %vm1096_vm13 = vcmp.gt.f32.partialorder %v1054_v29, 0.0 }
 0x26d   : > { %v2121_v31 = vpop.eup %2120  ;;  %v1153_v35 = vsel %vm1089_vm6, %v2119_v11, 0.0 }
 0x26e   : > { %v1185_v50 = vmul.f32 %v1153_v35, %v2753_v19  ;;  %v1057_v63 = vpop.xlane.xlu1 %1056  ;;  %1914 = vmatprep.mubr.msk.bf16.mxu1 %vm749_vm1, %v1206_v41  ;;  %v1154_v3 = vsel %vm1090_vm7, %v2121_v31, 0.0  ;;  %v1488_v41 = vld [vmem:[%s2885_s22 + $0x8] sm:$0xff] }
 0x26f   : > { %2134 = vrcp.f32 %v1057_v63  ;;  %v1060_v2 = vpop.xlane.xlu0 %1059  ;;  %v1186_v52 = vmul.f32 %v1154_v3, %v2759_v40  ;;  %vm1097_vm14 = vcmp.gt.f32.partialorder %v1057_v63, 0.0 }
 0x270   : > { %v2123_v57 = vpop.eup %2122  ;;  %v1207_v34 = vpack.c.bf16 %v1185_v50, %v1184_v39  ;;  %2136 = vrcp.f32 %v1060_v2  ;;  %vm1098_vm15 = vcmp.gt.f32.partialorder %v1060_v2, 0.0  ;;  %v1493_v50 = vld [vmem:[%s2885_s22 + $0x30] sm:$0xff] }
 0x271   : > { %v2125_v25 = vpop.eup %2124  ;;  %v1155_v42 = vsel %vm1091_vm8, %v2123_v57, 0.0  ;;  %v1491_v57 = vld [vmem:[%s2885_s22 + $0x20] sm:$0xff] }
 0x272   : > { %v1187_v12 = vmul.f32 %v1155_v42, %v2767_v44  ;;  %v1063_v8 = vpop.xlane.xlu1 %1062  ;;  %1915 = vmatmul.mubr.msk.bf16.gmra.mxu1 %vm749_vm1, %v1207_v34  ;;  %v1156_v19 = vsel %vm1092_vm9, %v2125_v25, 0.0 }
 0x273   : > { %2138 = vrcp.f32 %v1063_v8  ;;  %v1066_v27 = vpop.xlane.xlu0 %1065  ;;  %v1188_v36 = vmul.f32 %v1156_v19, %v2773_v51  ;;  %vm1099_vm0 = vcmp.gt.f32.partialorder %v1063_v8, 0.0 }
 0x274   : > { %v2127_v53 = vpop.eup %2126  ;;  %v1208_v55 = vpack.c.bf16 %v1187_v12, %v1186_v52  ;;  %2140 = vrcp.f32 %v1066_v27  ;;  %vm1100_vm2 = vcmp.gt.f32.partialorder %v1066_v27, 0.0  ;;  %v1494_v52 = vld [vmem:[%s2885_s22 + $0x38] sm:$0xff]  ;;  %v1492_v27 = vld [vmem:[%s2885_s22 + $0x28] sm:$0xff] }
 0x275   : > { %v2129_v59 = vpop.eup %2128  ;;  %v1157_v9 = vsel %vm1093_vm10, %v2127_v53, 0.0 }
 0x276   : > { %v1189_v61 = vmul.f32 %v1157_v9, %v2780_v46  ;;  %v1069_v40 = vpop.xlane.xlu1 %1068  ;;  %1918 = vmatprep.mubr.msk.bf16.mxu1 %vm749_vm1, %v1208_v55  ;;  %v1158_v44 = vsel %vm1094_vm11, %v2129_v59, 0.0  ;;  %v1497_v9 = vld [vmem:[%s2885_s22 + $0x50] sm:$0xff] }
 0x277   : > { %2142 = vrcp.f32 %v1069_v40  ;;  %v1190_v22 = vmul.f32 %v1158_v44, %v2786_v49  ;;  %vm1101_vm3 = vcmp.gt.f32.partialorder %v1069_v40, 0.0  ;;  %v1495_v44 = vld [vmem:[%s2885_s22 + $0x40] sm:$0xff] }
 0x278   : > { %v2131_v14 = vpop.eup %2130  ;;  %v1209_v45 = vpack.c.bf16 %v1189_v61, %v1188_v36 }
 0x279   : > { %v2133_v7 = vpop.eup %2132  ;;  %v1159_v6 = vsel %vm1095_vm12, %v2131_v14, 0.0 }
 0x27a   : > { %v1191_v43 = vmul.f32 %v1159_v6, %v2792_v56  ;;  %1919 = vmatmul.mubr.msk.bf16.gmra.mxu1 %vm749_vm1, %v1209_v45  ;;  %v1160_v51 = vsel %vm1096_vm13, %v2133_v7, 0.0  ;;  %v1498_v6 = vld [vmem:[%s2885_s22 + $0x58] sm:$0xff] }
 0x27b   : > { %v1192_v60 = vmul.f32 %v1160_v51, %v2798_v62 }
 0x27c   : > { %v2135_v46 = vpop.eup %2134  ;;  %v1210_v10 = vpack.c.bf16 %v1191_v43, %v1190_v22 }
 0x27d   : > { %v2137_v47 = vpop.eup %2136  ;;  %v1161_v15 = vsel %vm1097_vm14, %v2135_v46, 0.0  ;;  %v1496_v46 = vld [vmem:[%s2885_s22 + $0x48] sm:$0xff] }
 0x27e   : > { %v1193_v13 = vmul.f32 %v1161_v15, %v2804_v0  ;;  %1922 = vmatprep.mubr.msk.bf16.mxu1 %vm749_vm1, %v1210_v10  ;;  %v1162_v54 = vsel %vm1098_vm15, %v2137_v47, 0.0 }
 0x27f   : > { %v1194_v21 = vmul.f32 %v1162_v54, %v2810_v26 }
 0x280   : > { %v2139_v49 = vpop.eup %2138  ;;  %v1211_v58 = vpack.c.bf16 %v1193_v13, %v1192_v60  ;;  %v1501_v60 = vld [vmem:[%s2885_s22 + $0x70] sm:$0xff] }
 0x281   : > { %v2141_v56 = vpop.eup %2140  ;;  %v1163_v33 = vsel %vm1099_vm0, %v2139_v49, 0.0 }
 0x282   : > { %v1195_v1 = vmul.f32 %v1163_v33, %v2816_v16  ;;  %1923 = vmatmul.mubr.msk.bf16.gmra.mxu1 %vm749_vm1, %v1211_v58  ;;  %v1164_v62 = vsel %vm1100_vm2, %v2141_v56, 0.0  ;;  %v1489_v16 = vld [vmem:[%s2885_s22 + $0x10] sm:$0xff]  ;;  %v1499_v58 = vld [vmem:[%s2885_s22 + $0x60] sm:$0xff] }
 0x283   : > { %v1196_v5 = vmul.f32 %v1164_v62, %v2822_v17 }
 0x284   : > { %v2143_v0 = vpop.eup %2142  ;;  %v1212_v18 = vpack.c.bf16 %v1195_v1, %v1194_v21  ;;  %v1502_v1 = vld [vmem:[%s2885_s22 + $0x78] sm:$0xff] }
 0x285   : > { %v1165_v23 = vsel %vm1101_vm3, %v2143_v0, 0.0 }
 0x286   : > { %v1197_v38 = vmul.f32 %v1165_v23, %v2828_v20  ;;  %1926 = vmatprep.mubr.msk.bf16.mxu1 %vm749_vm1, %v1212_v18  ;;  %v1500_v23 = vld [vmem:[%s2885_s22 + $0x68] sm:$0xff] }
 0x288   : > { %v1213_v37 = vpack.c.bf16 %v1197_v38, %v1196_v5 }
 0x28a   : > { %1927 = vmatmul.mubr.msk.bf16.gmra.mxu1 %vm749_vm1, %v1213_v37 }
 0x312   : > { %v1900_v26 = vpop.f32.mrf.mxu1 }
 0x313   : > { %v1457_v17 = vmul.f32 0.5, %v1900_v26  ;;  %v1505_v26 = vld [vmem:[%s2885_s22 + $0x90] sm:$0xff] }
 0x314   : > { %v1328_v20 = vpop.f32.mrf.mxu1 }
 0x315   : > { %v1521_v28 = vadd.f32 %v1489_v16, %v1457_v17  ;;  %v1455_v30 = vmul.f32 0.5, %v1328_v20 }
 0x316   : > { %v1901_v4 = vpop.f32.mrf.mxu1 }
 0x317   : > { %1553 = vst [vmem:[%s2892_s15 + $0x10] sm:$0xff] %v1521_v28  ;;  %v1519_v48 = vadd.f32 %v1487_v24, %v1455_v30  ;;  %v1458_v29 = vmul.f32 0.5, %v1901_v4  ;;  %v1503_v24 = vld [vmem:[%s2885_s22 + $0x80] sm:$0xff] }
 0x318   : > { %v1331_v11 = vpop.f32.mrf.mxu1 }
 0x319   : > { %1551 = vst [vmem:[%s2892_s15] sm:$0xff] %v1519_v48  ;;  %v1522_v31 = vadd.f32 %v1490_v32, %v1458_v29  ;;  %v1456_v35 = vmul.f32 0.5, %v1331_v11  ;;  %v1506_v32 = vld [vmem:[%s2885_s22 + $0x98] sm:$0xff] }
 0x31a   : > { %v1904_v39 = vpop.f32.mrf.mxu1 }
 0x31b   : > { %1554 = vst [vmem:[%s2892_s15 + $0x18] sm:$0xff] %v1522_v31  ;;  %v1520_v63 = vadd.f32 %v1488_v41, %v1456_v35  ;;  %v1461_v3 = vmul.f32 0.5, %v1904_v39  ;;  %v1504_v41 = vld [vmem:[%s2885_s22 + $0x88] sm:$0xff] }
 0x31c   : > { %v1344_v2 = vpop.f32.mrf.mxu1 }
 0x31d   : > { %1552 = vst [vmem:[%s2892_s15 + $0x8] sm:$0xff] %v1520_v63  ;;  %v1525_v34 = vadd.f32 %v1493_v50, %v1461_v3  ;;  %v1459_v25 = vmul.f32 0.5, %v1344_v2  ;;  %v1509_v50 = vld [vmem:[%s2885_s22 + $0xb0] sm:$0xff] }
 0x31e   : > { %v1905_v42 = vpop.f32.mrf.mxu1 }
 0x31f   : > { %1557 = vst [vmem:[%s2892_s15 + $0x30] sm:$0xff] %v1525_v34  ;;  %v1523_v12 = vadd.f32 %v1491_v57, %v1459_v25  ;;  %v1462_v8 = vmul.f32 0.5, %v1905_v42  ;;  %v1507_v57 = vld [vmem:[%s2885_s22 + $0xa0] sm:$0xff] }
 0x320   : > { %v1347_v19 = vpop.f32.mrf.mxu1 }
 0x321   : > { %1555 = vst [vmem:[%s2892_s15 + $0x20] sm:$0xff] %v1523_v12  ;;  %v1526_v53 = vadd.f32 %v1494_v52, %v1462_v8  ;;  %v1460_v55 = vmul.f32 0.5, %v1347_v19  ;;  %v1510_v52 = vld [vmem:[%s2885_s22 + $0xb8] sm:$0xff] }
 0x322   : > { %v1908_v59 = vpop.f32.mrf.mxu1 }
 0x323   : > { %1558 = vst [vmem:[%s2892_s15 + $0x38] sm:$0xff] %v1526_v53  ;;  %v1524_v36 = vadd.f32 %v1492_v27, %v1460_v55  ;;  %v1465_v61 = vmul.f32 0.5, %v1908_v59  ;;  %v1508_v27 = vld [vmem:[%s2885_s22 + $0xa8] sm:$0xff] }
 0x324   : > { %v1360_v40 = vpop.f32.mrf.mxu1 }
 0x325   : > { %1556 = vst [vmem:[%s2892_s15 + $0x28] sm:$0xff] %v1524_v36  ;;  %v1529_v14 = vadd.f32 %v1497_v9, %v1465_v61  ;;  %v1463_v45 = vmul.f32 0.5, %v1360_v40  ;;  %v1513_v9 = vld [vmem:[%s2885_s22 + $0xd0] sm:$0xff] }
 0x326   : > { %v1909_v7 = vpop.f32.mrf.mxu1 }
 0x327   : > { %1561 = vst [vmem:[%s2892_s15 + $0x50] sm:$0xff] %v1529_v14  ;;  %v1527_v22 = vadd.f32 %v1495_v44, %v1463_v45  ;;  %v1466_v43 = vmul.f32 0.5, %v1909_v7  ;;  %v1511_v44 = vld [vmem:[%s2885_s22 + $0xc0] sm:$0xff] }
 0x328   : > { %v1363_v51 = vpop.f32.mrf.mxu1 }
 0x329   : > { %1559 = vst [vmem:[%s2892_s15 + $0x40] sm:$0xff] %v1527_v22  ;;  %v1530_v10 = vadd.f32 %v1498_v6, %v1466_v43  ;;  %v1464_v47 = vmul.f32 0.5, %v1363_v51  ;;  %v1514_v6 = vld [vmem:[%s2885_s22 + $0xd8] sm:$0xff] }
 0x32a   : > { %v1912_v15 = vpop.f32.mrf.mxu1 }
 0x32b   : > { %1562 = vst [vmem:[%s2892_s15 + $0x58] sm:$0xff] %v1530_v10  ;;  %v1528_v13 = vadd.f32 %v1496_v46, %v1464_v47  ;;  %v1469_v54 = vmul.f32 0.5, %v1912_v15  ;;  %v1512_v46 = vld [vmem:[%s2885_s22 + $0xc8] sm:$0xff] }
 0x32c   : > { %v1376_v49 = vpop.f32.mrf.mxu1 }
 0x32d   : > { %1560 = vst [vmem:[%s2892_s15 + $0x48] sm:$0xff] %v1528_v13  ;;  %v1533_v56 = vadd.f32 %v1501_v60, %v1469_v54  ;;  %v1467_v33 = vmul.f32 0.5, %v1376_v49  ;;  %v1517_v60 = vld [vmem:[%s2885_s22 + $0xf0] sm:$0xff] }
 0x32e   : > { %v1913_v21 = vpop.f32.mrf.mxu1 }
 0x32f   : > { %1565 = vst [vmem:[%s2892_s15 + $0x70] sm:$0xff] %v1533_v56  ;;  %v1531_v62 = vadd.f32 %v1499_v58, %v1467_v33  ;;  %v1470_v0 = vmul.f32 0.5, %v1913_v21  ;;  %v1515_v58 = vld [vmem:[%s2885_s22 + $0xe0] sm:$0xff] }
 0x330   : > { %v1379_v18 = vpop.f32.mrf.mxu1 }
 0x331   : > { %1563 = vst [vmem:[%s2892_s15 + $0x60] sm:$0xff] %v1531_v62  ;;  %v1534_v5 = vadd.f32 %v1502_v1, %v1470_v0  ;;  %v1468_v38 = vmul.f32 0.5, %v1379_v18  ;;  %v1518_v1 = vld [vmem:[%s2885_s22 + $0xf8] sm:$0xff] }
 0x332   : > { %v1916_v37 = vpop.f32.mrf.mxu1 }
 0x333   : > { %1566 = vst [vmem:[%s2892_s15 + $0x78] sm:$0xff] %v1534_v5  ;;  %v1532_v16 = vadd.f32 %v1500_v23, %v1468_v38  ;;  %v1473_v17 = vmul.f32 0.5, %v1916_v37  ;;  %v1516_v23 = vld [vmem:[%s2885_s22 + $0xe8] sm:$0xff] }
 0x334   : > { %v1392_v20 = vpop.f32.mrf.mxu1 }
 0x335   : > { %1564 = vst [vmem:[%s2892_s15 + $0x68] sm:$0xff] %v1532_v16  ;;  %v1537_v28 = vadd.f32 %v1505_v26, %v1473_v17  ;;  %v1471_v30 = vmul.f32 0.5, %v1392_v20 }
 0x336   : > { %v1917_v4 = vpop.f32.mrf.mxu1 }
 0x337   : > { %1569 = vst [vmem:[%s2892_s15 + $0x90] sm:$0xff] %v1537_v28  ;;  %v1535_v48 = vadd.f32 %v1503_v24, %v1471_v30  ;;  %v1474_v29 = vmul.f32 0.5, %v1917_v4 }
 0x338   : > { %v1395_v11 = vpop.f32.mrf.mxu1 }
 0x339   : > { %1567 = vst [vmem:[%s2892_s15 + $0x80] sm:$0xff] %v1535_v48  ;;  %v1538_v31 = vadd.f32 %v1506_v32, %v1474_v29  ;;  %v1472_v35 = vmul.f32 0.5, %v1395_v11 }
 0x33a   : > { %v1920_v39 = vpop.f32.mrf.mxu1 }
 0x33b   : > { %1570 = vst [vmem:[%s2892_s15 + $0x98] sm:$0xff] %v1538_v31  ;;  %v1536_v63 = vadd.f32 %v1504_v41, %v1472_v35  ;;  %v1477_v3 = vmul.f32 0.5, %v1920_v39 }
 0x33c   : > { %v1408_v2 = vpop.f32.mrf.mxu1 }
 0x33d   : > { %1568 = vst [vmem:[%s2892_s15 + $0x88] sm:$0xff] %v1536_v63  ;;  %v1541_v34 = vadd.f32 %v1509_v50, %v1477_v3  ;;  %v1475_v25 = vmul.f32 0.5, %v1408_v2 }
 0x33e   : > { %v1921_v42 = vpop.f32.mrf.mxu1 }
 0x33f   : > { %1573 = vst [vmem:[%s2892_s15 + $0xb0] sm:$0xff] %v1541_v34  ;;  %v1539_v12 = vadd.f32 %v1507_v57, %v1475_v25  ;;  %v1478_v8 = vmul.f32 0.5, %v1921_v42 }
 0x340   : > { %v1411_v19 = vpop.f32.mrf.mxu1 }
 0x341   : > { %1571 = vst [vmem:[%s2892_s15 + $0xa0] sm:$0xff] %v1539_v12  ;;  %v1542_v53 = vadd.f32 %v1510_v52, %v1478_v8  ;;  %v1476_v55 = vmul.f32 0.5, %v1411_v19 }
 0x342   : > { %v1924_v59 = vpop.f32.mrf.mxu1 }
 0x343   : > { %1574 = vst [vmem:[%s2892_s15 + $0xb8] sm:$0xff] %v1542_v53  ;;  %v1540_v36 = vadd.f32 %v1508_v27, %v1476_v55  ;;  %v1481_v61 = vmul.f32 0.5, %v1924_v59 }
 0x344   : > { %v1424_v40 = vpop.f32.mrf.mxu1 }
 0x345   : > { %1572 = vst [vmem:[%s2892_s15 + $0xa8] sm:$0xff] %v1540_v36  ;;  %v1545_v14 = vadd.f32 %v1513_v9, %v1481_v61  ;;  %v1479_v45 = vmul.f32 0.5, %v1424_v40 }
 0x346   : > { %v1925_v7 = vpop.f32.mrf.mxu1 }
 0x347   : > { %1577 = vst [vmem:[%s2892_s15 + $0xd0] sm:$0xff] %v1545_v14  ;;  %v1543_v22 = vadd.f32 %v1511_v44, %v1479_v45  ;;  %v1482_v43 = vmul.f32 0.5, %v1925_v7 }
 0x348   : > { %v1427_v51 = vpop.f32.mrf.mxu1 }
 0x349   : > { %1575 = vst [vmem:[%s2892_s15 + $0xc0] sm:$0xff] %v1543_v22  ;;  %v1546_v10 = vadd.f32 %v1514_v6, %v1482_v43  ;;  %v1480_v47 = vmul.f32 0.5, %v1427_v51 }
 0x34a   : > { %v1928_v15 = vpop.f32.mrf.mxu1 }
 0x34b   : > { %1578 = vst [vmem:[%s2892_s15 + $0xd8] sm:$0xff] %v1546_v10  ;;  %v1544_v13 = vadd.f32 %v1512_v46, %v1480_v47  ;;  %v1485_v54 = vmul.f32 0.5, %v1928_v15 }
 0x34c   : > { %v1440_v49 = vpop.f32.mrf.mxu1 }
 0x34d   : > { %1576 = vst [vmem:[%s2892_s15 + $0xc8] sm:$0xff] %v1544_v13  ;;  %v1549_v56 = vadd.f32 %v1517_v60, %v1485_v54  ;;  %v1483_v33 = vmul.f32 0.5, %v1440_v49 }
 0x34e   : > { %v1929_v21 = vpop.f32.mrf.mxu1 }
 0x34f   : > { %1581 = vst [vmem:[%s2892_s15 + $0xf0] sm:$0xff] %v1549_v56  ;;  %v1547_v62 = vadd.f32 %v1515_v58, %v1483_v33  ;;  %v1486_v0 = vmul.f32 0.5, %v1929_v21 }
 0x350   : > { %v1443_v18 = vpop.f32.mrf.mxu1 }
 0x351   : > { %1579 = vst [vmem:[%s2892_s15 + $0xe0] sm:$0xff] %v1547_v62  ;;  %v1550_v5 = vadd.f32 %v1518_v1, %v1486_v0  ;;  %v1484_v38 = vmul.f32 0.5, %v1443_v18 }
 0x353   : > { %1582 = vst [vmem:[%s2892_s15 + $0xf8] sm:$0xff] %v1550_v5  ;;  %v1548_v37 = vadd.f32 %v1516_v23, %v1484_v38 }
 0x355   : > { %1580 = vst [vmem:[%s2892_s15 + $0xe8] sm:$0xff] %v1548_v37 }
 0x356   : > { %2169 = shalt.err (!%p2166_p10)
}
 0x357   : > { %s2170_s19 = scalar_lea.hbm %s2958_s10, 4096  ;;  %s2174_s22 = scalar_lea.hbm %s3017_s6, 8192 }
 0x358   : > { %p2171_p11 = scmp.ne.s32.totalorder %s2958_s10, %s2170_s19  ;;  %p2175_p1 = scmp.lt.s32.totalorder %s2958_s10, %s3017_s6 }
 0x359   : > { %p2176_p2 = scmp.lt.s32.totalorder %s2174_s22, %s2170_s19 }
 0x35a   : > { %p2172_p12 = pnand %p2171_p11, %p2318_p9 }
 0x35b   : > { %p2177_p3 = por %p2176_p2, %p2175_p1 }
 0x35c   : > { %p2173_p0 = pneg %p2172_p12 }
 0x35e   : > { %p2178_p4 = pnand %p2177_p3, %p2173_p0 }
 0x360   : > { %2181 = shalt.err (!%p2178_p4)
}
 0x361   : > { %s2238_s24 = smov 128   ;;  %s2239_s7 = smov 8  }
 0x362   : > { %1930 = dma.vmem_to_hbm [thread:$0]  (%p2318_p9), %s2960_s25, 4096, %s2958_s10, %s2966_s28, %s2238_s24, %s2238_s24, %s2239_s7  }
 0x363 PF: > { %p1936_p5 = scmp.ge.s32.totalorder %s2234_s30, 2  ;;  %s1614_s8 = sand.u32 1, %s2214_s26  }
 0x364   : > { %s1615_s12 = scalar_lea.sflag [#allocation5], %s1614_s8 }
 0x365   : > { %p1933_p6 = pnand %p1936_p5, %p2325_p13 }
 0x367   : > { %p1934_p7 = pneg %p1933_p6 }
 0x369   : > { %2209 = dma.done.wait (%p1934_p7), %s1615_s12, 4096  }
 0x36a   : > { %2211 = vsyncadd (%p1934_p7), %s1615_s12, 4294963200  ;;  %s25_s30 = sadd.s32 1, %s2234_s30   ;;  %s3022_s26 = smov %s2218_s27 }
 0x36b   : > { %p22_p8 = scmp.ge.s32.totalorder %s25_s30, 4   ;;  %s3023_s27 = smov %s2222_s0 }
 0x36c   : > { %s3024_s0 = smov %s2331_s14  ;;  %s3025_s28 = smov %s2230_s29 }
 0x36d   : > { %s3026_s29 = smov %s3028_s9  ;;  %24 = sbr.rel (!%p22_p8) target bundleno = 19 (0x13), region = 87 }
 0x372   :  { %1620 = vsyncpa [#allocation5], 1 }
 0x373   :  { %1622 = vsyncpa [#allocation5 + $0x1], 1 }

// kernel: multi_scale_att_forward.2
= control target key start
LH: loop header
LB: loop body
LE: loop exit
PB: predicated region body
PF: predicated region fallthrough
CT: control target
= control target key end

     0   :  { %s9324_s18 = smov 0   ;;  %s9326_s19 = smov 0   ;;  %s12179_s0 = inlined_call_operand.vmem [shape: bf16[4,224,192], index: 0, kind: input, shape index: {}]   ;;  %s12180_s1 = inlined_call_operand.vmem [shape: bf16[9,192,128], index: 1, kind: input, shape index: {}]   ;;  %s12181_s2 = inlined_call_operand.vmem [shape: f32[1,128], index: 2, kind: input, shape index: {}]   ;;  %s12182_s3 = inlined_call_operand.vmem [shape: bf16[9,128,128], index: 3, kind: input, shape index: {}]   ;;  %s12183_s4 = inlined_call_operand.vmem [shape: f32[1,128], index: 4, kind: input, shape index: {}]   ;;  %s12184_s5 = inlined_call_operand.vmem [shape: f32[2,256,128], index: 5, kind: output, shape index: {}]  }
   0x1   :  { %s9328_s20 = smov 0   ;;  %s9330_s21 = smov 0  }
   0x2   :  { %s9332_s22 = smov 0  }
   0x3 LB: > { %s24_s23 = sadd.s32 1, %s9283_s20  ;;  %s27_s24 = sadd.s32 1, %s9287_s21  ;;  %s9291_s22 = sphi %s9332_s22, %s15_s22   ;;  %s9287_s21 = sphi %s9330_s21, %s12430_s21   ;;  %s9283_s20 = sphi %s9328_s20, %s12429_s20   ;;  %s9279_s19 = sphi %s9326_s19, %s12428_s19   ;;  %s9275_s18 = sphi %s9324_s18, %s12427_s18  }
   0x4   : > { %p25_p0 = scmp.ge.s32.totalorder %s24_s23, 2  ;;  %p7501_p1 = scmp.ge.s32.totalorder %s9291_s22, 1 }
   0x5   : > { %p209_p2 = scmp.lt.s32.totalorder %s9291_s22, 5 }
   0x6   : > { %s12432_s23 = smov (%p25_p0, %s24_s23), 0  ;;  %s12434_s24 = smov (!%p25_p0, %s27_s24), %s9287_s21 }
   0x7   : > { %p210_p3 = pnand %p7501_p1, %p209_p2  ;;  %p29_p4 = scmp.ge.s32.totalorder %s12434_s24, 2 }
   0x9   : > { %s12436_s24 = smov (%p29_p4, %s12434_s24), 0  ;;  %213 = sbr.rel (%p210_p3) target bundleno = 1081 (0x439), region = 40 }
   0xe   : > { %v8905_v0 = vld [vmem:[%s12180_s1 + $0x158] sm:$0xff]   ;;  %v9293_v1 = vmov 0   ;;  %v8907_v3 = vld [vmem:[%s12180_s1 + $0x150] sm:$0xff]   ;;  %s7502_s8 = sshll.u32 %s9279_s19, 1  ;;  %v8909_v5 = vld [vmem:[%s12180_s1 + $0x148] sm:$0xff]   ;;  %vm1261_vm1 = vcmask 523264  }
   0xf   : > { %1295 = vmatprep.subr.bf16.mxu0 %v9293_v1  ;;  %1569 = vmatprep.subr.bf16.mxu1 %v9293_v1  ;;  %v8906_v2 = vld [vmem:[%s12180_s1 + $0x38] sm:$0xff]   ;;  %v8908_v4 = vld [vmem:[%s12180_s1 + $0x30] sm:$0xff]   ;;  %s244_s11 = sadd.s32 %s9275_s18, %s7502_s8  ;;  %v8910_v6 = vld [vmem:[%s12180_s1 + $0x28] sm:$0xff]   ;;  %vm963_vm0 = vsmask.f32 4352  ;;  %s8059_s17 = sshll.u32 %s9275_s18, 7 }
  0x10   : > { %1296 = vmatpush1.bf16.msra.mxu0 %v8905_v0  ;;  %1570 = vmatpush1.bf16.msra.mxu1 %v8906_v2  ;;  %p245_p5 = scmp.lt.s32.totalorder %s244_s11, 3  ;;  %v8911_v7 = vld [vmem:[%s12180_s1 + $0x140] sm:$0xff]   ;;  %v8913_v9 = vld [vmem:[%s12180_s1 + $0x138] sm:$0xff]   ;;  %v8915_v11 = vld [vmem:[%s12180_s1 + $0x130] sm:$0xff]   ;;  %vm3375_vm2 = vsmask.f32 7424 }
  0x11   : > { %1297 = vmatprep.subr.bf16.mxu0 %v9293_v1  ;;  %1571 = vmatprep.subr.bf16.mxu1 %v9293_v1  ;;  %v8912_v8 = vld [vmem:[%s12180_s1 + $0x20] sm:$0xff]   ;;  %v8914_v10 = vld [vmem:[%s12180_s1 + $0x18] sm:$0xff]   ;;  %v8916_v12 = vld [vmem:[%s12180_s1 + $0x10] sm:$0xff]   ;;  %s8060_s25 = sadd.s32 4294967272, %s8059_s17  ;;  %s7504_s27 = sshll.u32 %s9275_s18, 4 }
  0x12   : > { %s12438_s11 = smov (!%p245_p5, %s244_s11), 3  ;;  %v8917_v13 = vld [vmem:[%s12180_s1 + $0x128] sm:$0xff]   ;;  %v8919_v15 = vld [vmem:[%s12180_s1 + $0x120] sm:$0xff]   ;;  %v8921_v43 = vld [vmem:[%s12180_s1 + $0x178] sm:$0xff]   ;;  %p253_p6 = scmp.lt.s32.totalorder %s9279_s19, 1 }
  0x13   : > { %s8863_s29 = smul.u32 224, %s12438_s11  ;;  %v8918_v14 = vld [vmem:[%s12180_s1 + $0x8] sm:$0xff]   ;;  %v8920_v30 = vld [vmem:[%s12180_s1] sm:$0xff]   ;;  %v8922_v48 = vld [vmem:[%s12180_s1 + $0x58] sm:$0xff]   ;;  %p11892_p7 = scmp.lt.s32.totalorder %s7504_s27, 31 }
  0x14   : > { %1298 = vmatpush1.bf16.msra.mxu0 %v8907_v3  ;;  %1572 = vmatpush1.bf16.msra.mxu1 %v8908_v4  ;;  %v8923_v62 = vld [vmem:[%s12180_s1 + $0x170] sm:$0xff]   ;;  %s12440_s19 = smov (!%p253_p6, %s9279_s19), 1 }
  0x15   : > { %1299 = vmatprep.subr.bf16.mxu0 %v9293_v1  ;;  %1573 = vmatprep.subr.bf16.mxu1 %v9293_v1  ;;  %s9411_s12 = scalar_lea.vmem %s12179_s0, %s8863_s29  ;;  %v8924_v3 = vld [vmem:[%s12180_s1 + $0x50] sm:$0xff]   ;;  %s12442_s27 = smov (!%p11892_p7, %s7504_s27), 31 }
  0x16   : > { %v798_v16 = vld [vmem:[%s9411_s12 + $0x18] sm:$0xff]  ;;  %v799_v17 = vld [vmem:[%s9411_s12 + $0x20] sm:$0xff]  ;;  %v9427_v18 = vld [vmem:[%s9411_s12 + $0x28] sm:$0xff]  ;;  %s7505_s28 = sshll.u32 %s12440_s19, 5 }
  0x17   : > { %v842_v19 = vld [vmem:[%s9411_s12 + $0x10] sm:$0x88]  ;;  %v7534_v20 = vcombine.high %v799_v17, %v9427_v18  ;;  %v795_v21 = vld [vmem:[%s9411_s12] sm:$0x88]  ;;  %v796_v22 = vld [vmem:[%s9411_s12 + $0x8] sm:$0xff]  ;;  %v9433_v23 = vcombine.high %v798_v16, %v799_v17  ;;  %v9435_v24 = vcombine.low %v798_v16, %v799_v17  ;;  %v7533_v29 = vcombine.low %v799_v17, %v9427_v18  ;;  %s11980_s19 = sadd.s32 %s7505_s28, %s12442_s27 }
  0x18   : > { %1300 = vmatpush1.bf16.msra.mxu0 %v8909_v5  ;;  %1574 = vmatpush1.bf16.msra.mxu1 %v8910_v6  ;;  %v7532_v25 = vcombine.high %v842_v19, %v798_v16  ;;  %v797_v26 = vld [vmem:[%s9411_s12 + $0x10] sm:$0xff]  ;;  %v7579_v27 = vcombine.high %v795_v21, %v796_v22  ;;  %v7531_v28 = vcombine.low %v842_v19, %v798_v16  ;;  %v9460_v61 = vld [vmem:[%s9411_s12 + $0x38] sm:$0xff]  ;;  %s7506_s6 = sshll.u32 %s11980_s19, 3 }
  0x19   : > { %1301 = vmatprep.subr.bf16.mxu0 %v9293_v1  ;;  %1575 = vmatprep.subr.bf16.mxu1 %v9293_v1  ;;  %v990_v31 = vshrl.u32 %v7534_v20, 16  ;;  %v993_v32 = vshll.u32 %v7534_v20, 16  ;;  %v7581_v33 = vcombine.high %v797_v26, %v798_v16  ;;  %v7578_v34 = vcombine.low %v795_v21, %v796_v22  ;;  %v9457_v60 = vld [vmem:[%s9411_s12 + $0x30] sm:$0xff]  ;;  %s12025_s9 = scalar_lea.vmem %s12184_s5, %s7506_s6 }
  0x1a   : > { %v982_v35 = vshrl.u32 %v7532_v25, 16  ;;  %v985_v36 = vshll.u32 %v7532_v25, 16  ;;  %v1449_v37 = vshrl.u32 %v7579_v27, 16  ;;  %v1452_v38 = vshll.u32 %v7579_v27, 16 }
  0x1b   : > { %v992_v39 = vrot.slane %v990_v31, 3  ;;  %v995_v40 = vrot.slane %v993_v32, 4  ;;  %v1457_v41 = vshrl.u32 %v7581_v33, 16  ;;  %v1460_v42 = vshll.u32 %v7581_v33, 16 }
  0x1c   : > { %1302 = vmatpush1.bf16.msra.mxu0 %v8911_v7  ;;  %1576 = vmatpush1.bf16.msra.mxu1 %v8912_v8  ;;  %v984_v44 = vrot.slane %v982_v35, 3  ;;  %v987_v45 = vrot.slane %v985_v36, 4  ;;  %v1451_v46 = vrot.slane %v1449_v37, 3  ;;  %v1454_v47 = vrot.slane %v1452_v38, 4  ;;  %v9474_v7 = vld [vmem:[%s9411_s12 + $0x40] sm:$0xff]  ;;  %v8925_v8 = vld [vmem:[%s12180_s1 + $0x168] sm:$0xff]  }
  0x1d   : > { %1303 = vmatprep.subr.bf16.mxu0 %v9293_v1  ;;  %1577 = vmatprep.subr.bf16.mxu1 %v9293_v1  ;;  %v9451_v49 = vor.u32 %v995_v40, %v992_v39  ;;  %v1459_v50 = vrot.slane %v1457_v41, 3  ;;  %v1462_v51 = vrot.slane %v1460_v42, 4  ;;  %v973_v52 = vshrl.u32 %v7533_v29, 16  ;;  %v9507_v40 = vld [vmem:[%s9411_s12 + $0x50] sm:$0xff]  ;;  %v9510_v41 = vld [vmem:[%s9411_s12 + $0x58] sm:$0xff] }
  0x1e   : > { %v988_v53 = vor.u32 %v987_v45, %v984_v44  ;;  %v1455_v54 = vor.u32 %v1454_v47, %v1451_v46  ;;  %v965_v55 = vshrl.u32 %v7531_v28, 16  ;;  %v968_v56 = vshll.u32 %v7531_v28, 16 }
  0x1f   : > { %v9454_v57 = vor.u32 %v1462_v51, %v1459_v50  ;;  %v976_v58 = vshll.u32 %v7533_v29, 16  ;;  %v7580_v59 = vcombine.low %v797_v26, %v798_v16  ;;  %v1432_v0 = vshrl.u32 %v7578_v34, 16  ;;  %v8926_v16 = vld [vmem:[%s12180_s1 + $0x48] sm:$0xff]   ;;  %v8927_v29 = vld [vmem:[%s12180_s1 + $0x160] sm:$0xff]  }
  0x20   : > { %1304 = vmatpush1.bf16.msra.mxu0 %v8913_v9  ;;  %1578 = vmatpush1.bf16.msra.mxu1 %v8914_v10  ;;  %v997_v63 = vsel %vm963_vm0, %v988_v53, %v9451_v49  ;;  %v1435_v2 = vshll.u32 %v7578_v34, 16  ;;  %v967_v9 = vrot.slane %v965_v55, 3  ;;  %v970_v10 = vrot.slane %v968_v56, 4  ;;  %v8940_v55 = vld [vmem:[%s12180_s1 + $0x270] sm:$0xff]  }
  0x21   : > { %1305 = vmatprep.subr.bf16.mxu0 %v9293_v1  ;;  %1579 = vmatprep.subr.bf16.mxu1 %v9293_v1  ;;  %v1464_v4 = vsel %vm963_vm0, %v1455_v54, %v9454_v57  ;;  %v1440_v5 = vshrl.u32 %v7580_v59, 16  ;;  %v1443_v6 = vshll.u32 %v7580_v59, 16  ;;  %v7535_v21 = vcombine.low %v9457_v60, %v9460_v61  ;;  %v8953_v54 = vld [vmem:[%s12180_s1 + $0x1b8] sm:$0xff]  }
  0x22   : > { %7567 = vmatprep.mubr.msk.bf16.mxu0 %vm1261_vm1, %v997_v63  ;;  %7596 = vmatprep.mubr.msk.bf16.mxu1 %vm1261_vm1, %v1464_v4  ;;  %v1437_v17 = vrot.slane %v1435_v2, 4  ;;  %v971_v31 = vor.u32 %v970_v10, %v967_v9  ;;  %v7540_v51 = vcombine.high %v9507_v40, %v9510_v41  ;;  %v1466_v53 = vsel %vm963_vm0, %v9454_v57, %v9451_v49  ;;  %v9540_v63 = vld [vmem:[%s9411_s12 + $0x60] sm:$0xff]  ;;  %v9546_v2 = vld [vmem:[%s9411_s12 + $0x68] sm:$0xff]  ;;  %v9559_v10 = vld [vmem:[%s9411_s12 + $0x70] sm:$0xff] }
  0x23   : > { %v1442_v22 = vrot.slane %v1440_v5, 3  ;;  %v1445_v25 = vrot.slane %v1443_v6, 4  ;;  %v999_v33 = vshrl.u32 %v7535_v21, 16  ;;  %v1002_v34 = vshll.u32 %v7535_v21, 16  ;;  %v8943_v4 = vld [vmem:[%s12180_s1 + $0x268] sm:$0xff]  }
  0x24   : > { %1306 = vmatpush1.bf16.msra.mxu0 %v8915_v11  ;;  %1580 = vmatpush1.bf16.msra.mxu1 %v8916_v12  ;;  %v975_v11 = vrot.slane %v973_v52, 3  ;;  %v7536_v12 = vcombine.high %v9457_v60, %v9460_v61  ;;  %v1044_v57 = vshrl.u32 %v7540_v51, 16  ;;  %v7541_v21 = vcombine.low %v9540_v63, %v9546_v2 }
  0x25   : > { %1307 = vmatprep.subr.bf16.mxu0 %v9293_v1  ;;  %1581 = vmatprep.subr.bf16.mxu1 %v9293_v1  ;;  %v1446_v36 = vor.u32 %v1445_v25, %v1442_v22  ;;  %v1001_v44 = vrot.slane %v999_v33, 3  ;;  %v1004_v45 = vrot.slane %v1002_v34, 4  ;;  %v9577_v22 = vld [vmem:[%s9411_s12 + $0x80] sm:$0xff] }
  0x26   : > { %v1008_v19 = vshrl.u32 %v7536_v12, 16  ;;  %v1011_v20 = vshll.u32 %v7536_v12, 16 }
  0x27   : > { %v9535_v56 = vor.u32 %v1004_v45, %v1001_v44 }
  0x28   : > { %1308 = vmatpush1.bf16.msra.mxu0 %v8917_v13  ;;  %1582 = vmatpush1.bf16.msra.mxu1 %v8918_v14  ;;  %v9484_v13 = vld [vmem:[%s9411_s12 + $0x48] sm:$0xff]  ;;  %v978_v14 = vrot.slane %v976_v58, 4  ;;  %v1010_v27 = vrot.slane %v1008_v19, 3  ;;  %v1013_v28 = vrot.slane %v1011_v20, 4 }
  0x29   : > { %1309 = vmatprep.subr.bf16.mxu0 %v9293_v1  ;;  %1583 = vmatprep.subr.bf16.mxu1 %v9293_v1  ;;  %v7538_v26 = vcombine.high %v9474_v7, %v9484_v13  ;;  %v7537_v46 = vcombine.low %v9474_v7, %v9484_v13  ;;  %v8958_v20 = vld [vmem:[%s12180_s1 + $0x1a8] sm:$0xff]  }
  0x2a   : > { %v979_v32 = vor.u32 %v978_v14, %v975_v11  ;;  %v9504_v39 = vor.u32 %v1013_v28, %v1010_v27  ;;  %v9562_v11 = vld [vmem:[%s9411_s12 + $0x78] sm:$0xff]  ;;  %v1046_v14 = vrot.slane %v1044_v57, 3  ;;  %v9585_v27 = vld [vmem:[%s9411_s12 + $0x88] sm:$0xff] }
  0x2b   : > { %v1026_v37 = vshrl.u32 %v7538_v26, 16  ;;  %v1029_v38 = vshll.u32 %v7538_v26, 16  ;;  %v1017_v58 = vshrl.u32 %v7537_v46, 16  ;;  %v1020_v59 = vshll.u32 %v7537_v46, 16  ;;  %v9610_v46 = vld [vmem:[%s9411_s12 + $0x90] sm:$0xff] }
  0x2c   : > { %1310 = vmatpush1.bf16.msra.mxu0 %v8919_v15  ;;  %1584 = vmatpush1.bf16.msra.mxu1 %v8920_v30  ;;  %v1434_v15 = vrot.slane %v1432_v0, 3  ;;  %v8928_v30 = vld [vmem:[%s12180_s1 + $0x40] sm:$0xff]   ;;  %v980_v42 = vsel %vm963_vm0, %v971_v31, %v979_v32  ;;  %v1015_v52 = vsel %vm963_vm0, %v9451_v49, %v9504_v39  ;;  %v7539_v0 = vcombine.low %v9507_v40, %v9510_v41 }
  0x2d   : > { %1319 = vmatprep.subr.bf16.mxu0 %v9293_v1  ;;  %1593 = vmatprep.subr.bf16.mxu1 %v9293_v1  ;;  %v1031_v50 = vrot.slane %v1029_v38, 4  ;;  %v1006_v5 = vsel %vm963_vm0, %v979_v32, %v9535_v56  ;;  %v1465_v6 = vsel %vm963_vm0, %v1446_v36, %v979_v32  ;;  %v1022_v9 = vrot.slane %v1020_v59, 4  ;;  %v8960_v32 = vld [vmem:[%s12180_s1 + $0x1a0] sm:$0xff]  }
  0x2e   : > { %v1438_v35 = vor.u32 %v1437_v17, %v1434_v15  ;;  %v1035_v17 = vshrl.u32 %v7539_v0, 16  ;;  %v1038_v19 = vshll.u32 %v7539_v0, 16  ;;  %v7544_v26 = vcombine.high %v9559_v10, %v9562_v11 }
  0x2f   : > { %v7546_v38 = vcombine.high %v9577_v22, %v9585_v27 }
  0x30   : > { %1320 = vmatpush2.bf16.msra.mxu0 %v8921_v43  ;;  %1594 = vmatpush2.bf16.msra.mxu1 %v8922_v48  ;;  %v8937_v43 = vld [vmem:[%s12180_s1 + $0x278] sm:$0xff]   ;;  %v1447_v47 = vsel %vm963_vm0, %v1438_v35, %v1446_v36  ;;  %v1028_v48 = vrot.slane %v1026_v37, 3  ;;  %v1037_v33 = vrot.slane %v1035_v17, 3  ;;  %v1040_v34 = vrot.slane %v1038_v19, 4  ;;  %v8954_v19 = vld [vmem:[%s12180_s1 + $0x248] sm:$0xff]  }
  0x31   : > { %1321 = vmatprep.subr.bf16.mxu0 %v9293_v1  ;;  %1595 = vmatprep.subr.bf16.mxu1 %v9293_v1  ;;  %v7543_v35 = vcombine.low %v9559_v10, %v9562_v11  ;;  %v1053_v36 = vshrl.u32 %v7541_v21, 16  ;;  %v1056_v37 = vshll.u32 %v7541_v21, 16  ;;  %v1080_v44 = vshrl.u32 %v7544_v26, 16 }
  0x32   : > { %v1032_v49 = vor.u32 %v1031_v50, %v1028_v48  ;;  %v1083_v45 = vshll.u32 %v7544_v26, 16  ;;  %v1101_v57 = vshll.u32 %v7546_v38, 16 }
  0x33   : > { %v1058_v59 = vrot.slane %v1056_v37, 4  ;;  %v9668_v37 = vld [vmem:[%s9411_s12 + $0xb8] sm:$0xff] }
  0x34   : > { %1322 = vmatpush2.bf16.msra.mxu0 %v8923_v62  ;;  %1596 = vmatpush2.bf16.msra.mxu1 %v8924_v3  ;;  %v1047_v62 = vshll.u32 %v7540_v51, 16  ;;  %v8955_v3 = vld [vmem:[%s12180_s1 + $0x1b0] sm:$0xff]   ;;  %v9566_v12 = vsel %vm963_vm0, %v9504_v39, %v1032_v49  ;;  %v1041_v51 = vor.u32 %v1040_v34, %v1037_v33  ;;  %v1085_v0 = vrot.slane %v1083_v45, 4 }
  0x35   : > { %1323 = vmatprep.subr.bf16.mxu0 %v9293_v1  ;;  %1597 = vmatprep.subr.bf16.mxu1 %v9293_v1  ;;  %v1103_v21 = vrot.slane %v1101_v57, 4 }
  0x36   : > { %v1049_v15 = vrot.slane %v1047_v62, 4  ;;  %v1082_v62 = vrot.slane %v1080_v44, 3 }
  0x38   : > { %1324 = vmatpush2.bf16.msra.mxu0 %v8925_v8  ;;  %1598 = vmatpush2.bf16.msra.mxu1 %v8926_v16  ;;  %v1019_v8 = vrot.slane %v1017_v58, 3  ;;  %v7542_v16 = vcombine.high %v9540_v63, %v9546_v2  ;;  %v9588_v28 = vor.u32 %v1049_v15, %v1046_v14  ;;  %v1055_v58 = vrot.slane %v1053_v36, 3  ;;  %v9641_v15 = vld [vmem:[%s9411_s12 + $0xa0] sm:$0xff]  ;;  %v9665_v36 = vld [vmem:[%s9411_s12 + $0xb0] sm:$0xff] }
  0x39   : > { %1325 = vmatprep.subr.bf16.mxu0 %v9293_v1  ;;  %1599 = vmatprep.subr.bf16.mxu1 %v9293_v1 }
  0x3a   : > { %v1023_v25 = vor.u32 %v1022_v9, %v1019_v8  ;;  %v1065_v31 = vshll.u32 %v7542_v16, 16  ;;  %v8965_v8 = vld [vmem:[%s12180_s1 + $0x190] sm:$0xff]   ;;  %v1059_v26 = vor.u32 %v1058_v59, %v1055_v58  ;;  %v9703_v59 = vcombine.high %v9665_v36, %v9668_v37 }
  0x3c   : > { %1326 = vmatpush2.bf16.msra.mxu0 %v8927_v29  ;;  %1600 = vmatpush2.bf16.msra.mxu1 %v8928_v30  ;;  %v8945_v29 = vld [vmem:[%s12180_s1 + $0x260] sm:$0xff]   ;;  %v1062_v30 = vshrl.u32 %v7542_v16, 16  ;;  %v1067_v50 = vrot.slane %v1065_v31, 4  ;;  %v9644_v16 = vld [vmem:[%s9411_s12 + $0xa8] sm:$0xff]  ;;  %v9647_v17 = vsel %vm963_vm0, %v1023_v25, %v1041_v51  ;;  %v9686_v45 = vsel %vm963_vm0, %v1041_v51, %v1059_v26 }
  0x3d   : > { %2161 = vmatprep.subr.bf16.mxu0 %v9293_v1  ;;  %2558 = vmatprep.subr.bf16.mxu1 %v9293_v1  ;;  %v9679_v44 = vcombine.high %v9641_v15, %v9644_v16  ;;  %v8970_v51 = vld [vmem:[%s12180_s1 + $0x180] sm:$0xff]  }
  0x3e   : > { %v1064_v48 = vrot.slane %v1062_v30, 3 }
  0x3f   : > { %1328 = vmatmul.mubr.bf16.vlgmr.msra.gmra.mxu0 %v980_v42  ;;  %1602 = vmatmul.mubr.bf16.vlgmr.msra.gmra.mxu1 %v1447_v47  ;;  %v9604_v42 = vsel %vm963_vm0, %v9535_v56, %v1023_v25  ;;  %v9614_v47 = vsel %vm963_vm0, %v1032_v49, %v9588_v28  ;;  %v1098_v49 = vshrl.u32 %v7546_v38, 16  ;;  %v1690_v38 = vld [vmem:[%s9411_s12 + $0x20] sm:$0x88] }
  0x40   : > { %2162 = vmatpush1.bf16.msra.mxu0 %v8937_v43  ;;  %7568 = vmatprep.mubr.msk.bf16.mxu0 %vm1261_vm1, %v1015_v52  ;;  %v8948_v43 = vld [vmem:[%s12180_s1 + $0x258] sm:$0xff]  }
  0x41   : > { %7597 = vmatprep.mubr.msk.bf16.mxu1 %vm1261_vm1, %v1466_v53  ;;  %2163 = vmatprep.subr.bf16.mxu0 %v9293_v1  ;;  %v1074_v53 = vshll.u32 %v7543_v35, 16 }
  0x42   : > { %2559 = vmatpush1.bf16.msra.mxu1 %v8953_v54  ;;  %v9618_v54 = vld [vmem:[%s9411_s12 + $0x98] sm:$0xff] }
  0x43   : > { %2560 = vmatprep.subr.bf16.mxu1 %v9293_v1  ;;  %v1076_v14 = vrot.slane %v1074_v53, 4  ;;  %v8959_v53 = vld [vmem:[%s12180_s1 + $0x240] sm:$0xff]  }
  0x44   : > { %2164 = vmatpush1.bf16.msra.mxu0 %v8940_v55  ;;  %v8963_v55 = vld [vmem:[%s12180_s1 + $0x198] sm:$0xff]  }
  0x45   : > { %2165 = vmatprep.subr.bf16.mxu0 %v9293_v1 }
  0x46   : > { %2561 = vmatpush1.bf16.msra.mxu1 %v8955_v3  ;;  %v7545_v3 = vcombine.low %v9577_v22, %v9585_v27 }
  0x47   : > { %1336 = vmatmul.mubr.bf16.gmra.mxu0 %v1006_v5  ;;  %2562 = vmatprep.subr.bf16.mxu1 %v9293_v1 }
  0x48   : > { %1610 = vmatmul.mubr.bf16.gmra.mxu1 %v1465_v6  ;;  %7569 = vmatprep.mubr.msk.bf16.mxu0 %vm1261_vm1, %v9566_v12  ;;  %v8950_v6 = vld [vmem:[%s12180_s1 + $0x250] sm:$0xff]   ;;  %v1089_v30 = vshrl.u32 %v7545_v3, 16  ;;  %v1092_v31 = vshll.u32 %v7545_v3, 16  ;;  %v9714_v3 = vcombine.high %v9427_v18, %v9457_v60 }
  0x49   : > { %7598 = vmatprep.mubr.msk.bf16.mxu1 %vm1261_vm1, %v1015_v52  ;;  %2166 = vmatpush1.bf16.msra.mxu0 %v8943_v4  ;;  %v1071_v52 = vshrl.u32 %v7543_v35, 16  ;;  %v1068_v4 = vor.u32 %v1067_v50, %v1064_v48  ;;  %v9662_v35 = vcombine.low %v9610_v46, %v9618_v54 }
  0x4a   : > { %2167 = vmatprep.subr.bf16.mxu0 %v9293_v1  ;;  %2563 = vmatpush1.bf16.msra.mxu1 %v8958_v20  ;;  %v1100_v20 = vrot.slane %v1098_v49, 3  ;;  %v1091_v50 = vrot.slane %v1089_v30, 3  ;;  %v7631_v49 = vcombine.low %v1690_v38, %v9427_v18 }
  0x4b   : > { %2564 = vmatprep.subr.bf16.mxu1 %v9293_v1  ;;  %v1073_v9 = vrot.slane %v1071_v52, 3  ;;  %v9658_v25 = vsel %vm963_vm0, %v9588_v28, %v1068_v4  ;;  %v1094_v52 = vrot.slane %v1092_v31, 4  ;;  %v1110_v58 = vshll.u32 %v9662_v35, 16 }
  0x4c   : > { %v9675_v28 = vor.u32 %v1103_v21, %v1100_v20  ;;  %v1835_v21 = vshll.u32 %v7631_v49, 16  ;;  %v9735_v31 = vcombine.low %v9427_v18, %v9457_v60  ;;  %v9755_v60 = vcombine.high %v9484_v13, %v9507_v40 }
  0x4d   : > { %2168 = vmatpush1.bf16.msra.mxu0 %v8945_v29  ;;  %v1086_v29 = vor.u32 %v1085_v0, %v1082_v62  ;;  %v7632_v0 = vcombine.high %v1690_v38, %v9427_v18  ;;  %v9751_v18 = vcombine.low %v9460_v61, %v9474_v7 }
  0x4e   : > { %2169 = vmatprep.subr.bf16.mxu0 %v9293_v1  ;;  %2565 = vmatpush1.bf16.msra.mxu1 %v8960_v32  ;;  %v8968_v32 = vld [vmem:[%s12180_s1 + $0x188] sm:$0xff]   ;;  %v1837_v38 = vrot.slane %v1835_v21, 4  ;;  %v9805_v21 = vcombine.low %v9562_v11, %v9577_v22 }
  0x4f   : > { %1344 = vmatmul.mubr.bf16.gmra.mxu0 %v9604_v42  ;;  %2566 = vmatprep.subr.bf16.mxu1 %v9293_v1  ;;  %v9689_v48 = vsel %vm963_vm0, %v1068_v4, %v1086_v29  ;;  %v1852_v20 = vshll.u32 %v7632_v0, 16 }
  0x50   : > { %1618 = vmatmul.mubr.bf16.gmra.mxu1 %v1006_v5  ;;  %7570 = vmatprep.mubr.msk.bf16.mxu0 %vm1261_vm1, %v9614_v47  ;;  %v7548_v5 = vcombine.high %v9610_v46, %v9618_v54 }
  0x51   : > { %7599 = vmatprep.mubr.msk.bf16.mxu1 %vm1261_vm1, %v9566_v12  ;;  %2170 = vmatpush1.bf16.msra.mxu0 %v8948_v43  ;;  %v9673_v43 = vor.u32 %v1076_v14, %v1073_v9  ;;  %v1832_v9 = vshrl.u32 %v7631_v49, 16  ;;  %v9746_v49 = vor.u32 %v1094_v52, %v1091_v50  ;;  %v9763_v52 = vcombine.low %v9484_v13, %v9507_v40 }
  0x52   : > { %2171 = vmatprep.subr.bf16.mxu0 %v9293_v1  ;;  %2567 = vmatpush1.bf16.msra.mxu1 %v8963_v55  ;;  %v1116_v33 = vshrl.u32 %v7548_v5, 16  ;;  %v1119_v34 = vshll.u32 %v7548_v5, 16  ;;  %v1107_v55 = vshrl.u32 %v9662_v35, 16  ;;  %v8964_v5 = vld [vmem:[%s12180_s1 + $0x298] sm:$0xff]   ;;  %v9780_v13 = vcombine.high %v9546_v2, %v9559_v10 }
  0x53   : > { %2568 = vmatprep.subr.bf16.mxu1 %v9293_v1  ;;  %v9718_v4 = vsel %vm963_vm0, %v1059_v26, %v9673_v43  ;;  %v1152_v26 = vshrl.u32 %v9703_v59, 16  ;;  %v1834_v30 = vrot.slane %v1832_v9, 3  ;;  %v9772_v9 = vcombine.high %v9510_v41, %v9540_v63 }
  0x54   : > { %v9707_v57 = vrot.slane %v1116_v33, 3  ;;  %v9709_v62 = vrot.slane %v1119_v34, 4  ;;  %v1854_v34 = vrot.slane %v1852_v20, 4  ;;  %v9801_v20 = vcombine.high %v9562_v11, %v9577_v22 }
  0x55   : > { %2172 = vmatpush1.bf16.msra.mxu0 %v8950_v6  ;;  %v9722_v6 = vsel %vm963_vm0, %v1086_v29, %v9675_v28  ;;  %v7551_v29 = vcombine.low %v9665_v36, %v9668_v37  ;;  %v1838_v50 = vor.u32 %v1837_v38, %v1834_v30  ;;  %v9828_v11 = vcombine.high %v9644_v16, %v9665_v36 }
  0x56   : > { %2173 = vmatprep.subr.bf16.mxu0 %v9293_v1  ;;  %2569 = vmatpush1.bf16.msra.mxu1 %v8965_v8  ;;  %v9832_v22 = vcombine.low %v9644_v16, %v9665_v36  ;;  %v1154_v30 = vrot.slane %v1152_v26, 3 }
  0x57   : > { %1352 = vmatmul.mubr.bf16.gmra.mxu0 %v9647_v17  ;;  %2570 = vmatprep.subr.bf16.mxu1 %v9293_v1  ;;  %v1146_v40 = vshll.u32 %v7551_v29, 16  ;;  %12199 = vst [vmem:[#allocation4_spill] sm:$0xff] %v9828_v11 }
  0x58   : > { %1626 = vmatmul.mubr.bf16.gmra.mxu1 %v9604_v42  ;;  %7571 = vmatprep.mubr.msk.bf16.mxu0 %vm1261_vm1, %v9658_v25  ;;  %12200 = vst [vmem:[#allocation5_spill] sm:$0xff] %v9832_v22 }
  0x59   : > { %7600 = vmatprep.mubr.msk.bf16.mxu1 %vm1261_vm1, %v9614_v47  ;;  %2174 = vmatpush1.bf16.msra.mxu0 %v8954_v19  ;;  %v1849_v19 = vshrl.u32 %v7632_v0, 16 }
  0x5a   : > { %2175 = vmatprep.subr.bf16.mxu0 %v9293_v1  ;;  %2571 = vmatpush1.bf16.msra.mxu1 %v8968_v32  ;;  %v8973_v32 = vld [vmem:[%s12180_s1 + $0x1d8] sm:$0xff]  }
  0x5b   : > { %2572 = vmatprep.subr.bf16.mxu1 %v9293_v1  ;;  %v1851_v33 = vrot.slane %v1849_v19, 3 }
  0x5d   : > { %2176 = vmatpush1.bf16.msra.mxu0 %v8959_v53  ;;  %v9743_v53 = vcombine.high %v9460_v61, %v9474_v7  ;;  %v1855_v0 = vor.u32 %v1854_v34, %v1851_v33  ;;  %v8969_v61 = vld [vmem:[%s12180_s1 + $0x290] sm:$0xff]   ;;  %v1143_v7 = vshrl.u32 %v7551_v29, 16  ;;  %v9824_v29 = vcombine.low %v9618_v54, %v9641_v15 }
  0x5e   : > { %2185 = vmatprep.subr.bf16.mxu0 %v9293_v1  ;;  %2573 = vmatpush1.bf16.msra.mxu1 %v8970_v51  ;;  %v1155_v51 = vshll.u32 %v9703_v59, 16  ;;  %v9776_v59 = vcombine.low %v9510_v41, %v9540_v63  ;;  %v9792_v41 = vsel %vm963_vm0, %v1838_v50, %v9535_v56  ;;  %v9796_v63 = vcombine.low %v9546_v2, %v9559_v10  ;;  %v9816_v2 = vld [vmem:[%s9411_s12 + $0xc0] sm:$0xff] }
  0x5f   : > { %1360 = vmatmul.mubr.bf16.gmra.mxu0 %v9686_v45  ;;  %2582 = vmatprep.subr.bf16.mxu1 %v9293_v1  ;;  %v9788_v19 = vsel %vm963_vm0, %v1855_v0, %v9504_v39  ;;  %v9809_v39 = vcombine.high %v9585_v27, %v9610_v46  ;;  %v9813_v56 = vcombine.low %v9585_v27, %v9610_v46  ;;  %v9836_v27 = vrot.slane %v1107_v55, 3  ;;  %v8980_v55 = vld [vmem:[%s12180_s1 + $0x1c8] sm:$0xff]  }
  0x60   : > { %1634 = vmatmul.mubr.bf16.gmra.mxu1 %v9647_v17  ;;  %7572 = vmatprep.mubr.msk.bf16.mxu0 %vm1261_vm1, %v9689_v48  ;;  %v9820_v10 = vcombine.high %v9618_v54, %v9641_v15  ;;  %12198 = vst [vmem:[#allocation3_spill] sm:$0xff] %v9824_v29  ;;  %v7549_v46 = vcombine.low %v9641_v15, %v9644_v16  ;;  %v8974_v54 = vld [vmem:[%s12180_s1 + $0x288] sm:$0xff]   ;;  %v1157_v34 = vrot.slane %v1155_v51, 4  ;;  %v1145_v38 = vrot.slane %v1143_v7, 3 }
  0x61   : > { %7601 = vmatprep.mubr.msk.bf16.mxu1 %vm1261_vm1, %v9658_v25  ;;  %2186 = vmatpush2.bf16.msra.mxu0 %v8964_v5  ;;  %v8975_v5 = vld [vmem:[%s12180_s1 + $0x1d0] sm:$0xff]   ;;  %v9846_v33 = vcombine.high %v9668_v37, %v9816_v2  ;;  %v9856_v26 = vcombine.low %v9668_v37, %v9816_v2  ;;  %v1148_v0 = vrot.slane %v1146_v40, 4  ;;  %v7554_v51 = vcombine.high %v9816_v2, %v9816_v2 }
  0x62   : > { %2187 = vmatprep.subr.bf16.mxu0 %v9293_v1  ;;  %2583 = vmatpush2.bf16.msra.mxu1 %v8973_v32  ;;  %v1711_v32 = vld [vmem:[%s9411_s12 + $0xc8] sm:$0xff]  ;;  %v9870_v37 = vsel %vm963_vm0, %v9673_v43, %v9746_v49  ;;  %v1122_v7 = vor.u32 %v9709_v62, %v9707_v57  ;;  %v1112_v40 = vrot.slane %v1110_v58, 4  ;;  %v1125_v14 = vshrl.u32 %v7549_v46, 16 }
  0x63   : > { %2584 = vmatprep.subr.bf16.mxu1 %v9293_v1  ;;  %12201 = vst [vmem:[#allocation6_spill] sm:$0xff] %v9846_v33  ;;  %v7652_v15 = vcombine.high %v9816_v2, %v1711_v32  ;;  %v7651_v16 = vcombine.low %v9816_v2, %v1711_v32  ;;  %12202 = vst [vmem:[#allocation7_spill] sm:$0xff] %v9856_v26  ;;  %v1128_v62 = vshll.u32 %v7549_v46, 16  ;;  %v1170_v58 = vshrl.u32 %v7554_v51, 16 }
  0x64   : > { %v1158_v35 = vor.u32 %v1157_v34, %v1154_v30  ;;  %v1149_v33 = vor.u32 %v1148_v0, %v1145_v38  ;;  %v1173_v22 = vshll.u32 %v7554_v51, 16  ;;  %v12204_v30 = vshll.u32 %v9679_v44, 16 }
  0x65   : > { %2188 = vmatpush2.bf16.msra.mxu0 %v8969_v61  ;;  %v2019_v50 = vshrl.u32 %v7652_v15, 16  ;;  %v2022_v61 = vshll.u32 %v7652_v15, 16  ;;  %v2013_v32 = vshll.u32 %v7651_v16, 16  ;;  %v8981_v15 = vld [vmem:[%s12180_s1 + $0x280] sm:$0xff]   ;;  %v1130_v38 = vrot.slane %v1128_v62, 4 }
  0x66   : > { %2189 = vmatprep.subr.bf16.mxu0 %v9293_v1  ;;  %2585 = vmatpush2.bf16.msra.mxu1 %v8975_v5  ;;  %v2010_v5 = vshrl.u32 %v7651_v16, 16  ;;  %v8982_v16 = vld [vmem:[%s12180_s1 + $0x1c0] sm:$0xff]   ;;  %v1139_v34 = vrot.slane %v12204_v30, 4 }
  0x67   : > { %1368 = vmatmul.mubr.bf16.gmra.mxu0 %v9718_v4  ;;  %2586 = vmatprep.subr.bf16.mxu1 %v9293_v1  ;;  %v2021_v43 = vrot.slane %v2019_v50, 3  ;;  %v2024_v8 = vrot.slane %v2022_v61, 4  ;;  %v2015_v57 = vrot.slane %v2013_v32, 4  ;;  %v12203_v50 = vshrl.u32 %v9679_v44, 16 }
  0x68   : > { %1642 = vmatmul.mubr.bf16.gmra.mxu1 %v9686_v45  ;;  %7573 = vmatprep.mubr.msk.bf16.mxu0 %vm1261_vm1, %v9722_v6  ;;  %v2012_v26 = vrot.slane %v2010_v5, 3  ;;  %v1113_v44 = vor.u32 %v1112_v40, %v9836_v27  ;;  %v1172_v61 = vrot.slane %v1170_v58, 3  ;;  %v1175_v5 = vrot.slane %v1173_v22, 4 }
  0x69   : > { %7602 = vmatprep.mubr.msk.bf16.mxu1 %vm1261_vm1, %v9689_v48  ;;  %2190 = vmatpush2.bf16.msra.mxu0 %v8974_v54  ;;  %v7583_v54 = vcombine.high %v9665_v36, %v9665_v36  ;;  %v9886_v11 = vor.u32 %v2024_v8, %v2021_v43  ;;  %v1136_v46 = vrot.slane %v12203_v50, 3  ;;  %v7582_v43 = vcombine.low %v9665_v36, %v9665_v36 }
  0x6a   : > { %2191 = vmatprep.subr.bf16.mxu0 %v9293_v1  ;;  %2587 = vmatpush2.bf16.msra.mxu1 %v8980_v55  ;;  %v9888_v29 = vor.u32 %v2015_v57, %v2012_v26  ;;  %v9892_v55 = vsel %vm963_vm0, %v9675_v28, %v1122_v7  ;;  %v1127_v28 = vrot.slane %v1125_v14, 3  ;;  %v9917_v14 = vsel %vm963_vm0, %v9746_v49, %v1113_v44 }
  0x6b   : > { %2588 = vmatprep.subr.bf16.mxu1 %v9293_v1  ;;  %v9901_v8 = vsel %vm963_vm0, %v1158_v35, %v9886_v11  ;;  %v1477_v0 = vshrl.u32 %v7583_v54, 16  ;;  %v1480_v51 = vshll.u32 %v7583_v54, 16  ;;  %v1140_v32 = vor.u32 %v1139_v34, %v1136_v46 }
  0x6c   : > { %v9905_v26 = vsel %vm963_vm0, %v1149_v33, %v9888_v29  ;;  %v1131_v27 = vor.u32 %v1130_v38, %v1127_v28  ;;  %v7553_v49 = vcombine.low %v9816_v2, %v9816_v2  ;;  %v1176_v58 = vor.u32 %v1175_v5, %v1172_v61 }
  0x6d   : > { %2192 = vmatpush2.bf16.msra.mxu0 %v8981_v15  ;;  %v9920_v15 = vsel %vm963_vm0, %v1122_v7, %v1140_v32  ;;  %v1479_v22 = vrot.slane %v1477_v0, 3  ;;  %v1482_v40 = vrot.slane %v1480_v51, 4  ;;  %v9934_v7 = vsel %vm963_vm0, %v1140_v32, %v1158_v35 }
  0x6e   : > { %2589 = vmatpush2.bf16.msra.mxu1 %v8982_v16  ;;  %2757 = vmatprep.subr.bf16.mxu0 %v9293_v1  ;;  %v9929_v16 = vsel %vm963_vm0, %v1113_v44, %v1131_v27  ;;  %v1161_v57 = vshrl.u32 %v7553_v49, 16  ;;  %v1164_v62 = vshll.u32 %v7553_v49, 16  ;;  %v1468_v2 = vshrl.u32 %v7582_v43, 16  ;;  %v9015_v49 = vld [vmem:[%s12180_s1 + $0x2b0] sm:$0xff]  }
  0x6f   : > { %1376 = vmatmul.mubr.bf16.gmra.mxu0 %v9870_v37  ;;  %3041 = vmatprep.subr.bf16.mxu1 %v9293_v1  ;;  %v1471_v54 = vshll.u32 %v7582_v43, 16  ;;  %v1483_v50 = vor.u32 %v1482_v40, %v1479_v22  ;;  %v9945_v46 = vsel %vm963_vm0, %v1131_v27, %v1149_v33  ;;  %v1177_v34 = vsel %vm963_vm0, %v1158_v35, %v1176_v58  ;;  %v8987_v35 = vld [vmem:[%s12180_s1 + $0x98] sm:$0xff]   ;;  %v9010_v22 = vld [vmem:[%s12180_s1 + $0x2c0] sm:$0xff]   ;;  %v9000_v40 = vld [vmem:[%s12180_s1 + $0x70] sm:$0xff]  }
  0x70   : > { %1650 = vmatmul.mubr.bf16.gmra.mxu1 %v9718_v4  ;;  %7574 = vmatprep.mubr.msk.bf16.mxu0 %vm1261_vm1, %v9892_v55  ;;  %v1163_v36 = vrot.slane %v1161_v57, 3  ;;  %v1166_v30 = vrot.slane %v1164_v62, 4  ;;  %v1470_v28 = vrot.slane %v1468_v2, 3  ;;  %v9009_v43 = vld [vmem:[%s12180_s1 + $0x60] sm:$0xff]   ;;  %v9014_v57 = vld [vmem:[%s12180_s1 + $0xb8] sm:$0xff]   ;;  %v9019_v62 = vld [vmem:[%s12180_s1 + $0xb0] sm:$0xff]  }
  0x71   : > { %7603 = vmatprep.mubr.msk.bf16.mxu1 %vm1261_vm1, %v9722_v6  ;;  %v1473_v38 = vrot.slane %v1471_v54, 4  ;;  %v1484_v0 = vsel %vm963_vm0, %v1140_v32, %v1483_v50  ;;  %v9003_v32 = vld [vmem:[%s12180_s1 + $0x2d8] sm:$0xff]   ;;  %v9026_v58 = vld [vmem:[%s12180_s1 + $0xa8] sm:$0xff]   ;;  %v9033_v2 = vld [vmem:[%s12180_s1 + $0xa0] sm:$0xff]  }
  0x72   : > { %v1167_v51 = vor.u32 %v1166_v30, %v1163_v36 }
  0x73   : > { %v1474_v44 = vor.u32 %v1473_v38, %v1470_v28  ;;  %v12206_v28 = vld [vmem:[#allocation4_spill] sm:$0xff] }
  0x74   : > { %v1168_v61 = vsel %vm963_vm0, %v1149_v33, %v1167_v51  ;;  %v8990_v33 = vld [vmem:[%s12180_s1 + $0x90] sm:$0xff]  }
  0x75   : > { %v1475_v5 = vsel %vm963_vm0, %v1131_v27, %v1474_v44  ;;  %v9008_v27 = vld [vmem:[%s12180_s1 + $0x2c8] sm:$0xff]  }
  0x77   : > { %1384 = vmatmul.mubr.bf16.gmra.mxu0 %v9917_v14 }
  0x78   : > { %1658 = vmatmul.mubr.bf16.gmra.mxu1 %v9870_v37  ;;  %7575 = vmatprep.mubr.msk.bf16.mxu0 %vm1261_vm1, %v9920_v15 }
  0x79   : > { %7604 = vmatprep.mubr.msk.bf16.mxu1 %vm1261_vm1, %v9892_v55 }
  0x7f   : > { %1392 = vmatmul.mubr.bf16.gmra.mxu0 %v9929_v16 }
  0x80   : > { %1666 = vmatmul.mubr.bf16.gmra.mxu1 %v9917_v14  ;;  %7576 = vmatprep.mubr.msk.bf16.mxu0 %vm1261_vm1, %v9934_v7 }
  0x81   : > { %7605 = vmatprep.mubr.msk.bf16.mxu1 %vm1261_vm1, %v9920_v15 }
  0x87   : > { %1400 = vmatmul.mubr.bf16.gmra.mxu0 %v9945_v46 }
  0x88   : > { %1674 = vmatmul.mubr.bf16.gmra.mxu1 %v9929_v16  ;;  %7577 = vmatprep.mubr.msk.bf16.mxu0 %vm1261_vm1, %v1177_v34  ;;  %v12205_v34 = vld [vmem:[#allocation3_spill] sm:$0xff] }
  0x89   : > { %7606 = vmatprep.mubr.msk.bf16.mxu1 %vm1261_vm1, %v1484_v0 }
  0x8f   : > { %1408 = vmatmul.mubr.bf16.gmra.mxu0 %v1168_v61 }
  0x90   : > { %1682 = vmatmul.mubr.bf16.gmra.mxu1 %v1475_v5  ;;  %7667 = vmatprep.mubr.msk.bf16.mxu0 %vm1261_vm1, %v9788_v19  ;;  %v9005_v19 = vld [vmem:[%s12180_s1 + $0x2d0] sm:$0xff]  }
  0x91   : > { %7760 = vmatprep.mubr.msk.bf16.mxu1 %vm1261_vm1, %v9433_v23  ;;  %v12208_v5 = vld [vmem:[#allocation6_spill] sm:$0xff] }
  0x97   : > { %2194 = vmatmul.mubr.bf16.vlgmr.msra.gmra.mxu0 %v9792_v41  ;;  %v8993_v41 = vld [vmem:[%s12180_s1 + $0x88] sm:$0xff]  }
  0x98   : > { %2591 = vmatmul.mubr.bf16.vlgmr.msra.gmra.mxu1 %v9435_v24  ;;  %2758 = vmatpush1.bf16.msra.mxu0 %v8987_v35  ;;  %v9250_v35 = vld [vmem:[%s9411_s12 + $0x8] sm:$0xff] }
  0x99   : > { %7668 = vmatprep.mubr.msk.bf16.mxu0 %vm1261_vm1, %v9566_v12  ;;  %7761 = vmatprep.mubr.msk.bf16.mxu1 %vm1261_vm1, %v9714_v3  ;;  %v8995_v12 = vld [vmem:[%s12180_s1 + $0x80] sm:$0xff]  }
  0x9a   : > { %2759 = vmatprep.subr.bf16.mxu0 %v9293_v1  ;;  %3042 = vmatpush1.bf16.msra.mxu1 %v9003_v32  ;;  %v9251_v32 = vld [vmem:[%s9411_s12 + $0x10] sm:$0xff] }
  0x9b   : > { %3043 = vmatprep.subr.bf16.mxu1 %v9293_v1 }
  0x9c   : > { %2760 = vmatpush1.bf16.msra.mxu0 %v8990_v33  ;;  %v7772_v33 = vcombine.high %v9250_v35, %v9251_v32 }
  0x9d   : > { %2761 = vmatprep.subr.bf16.mxu0 %v9293_v1 }
  0x9e   : > { %3044 = vmatpush1.bf16.msra.mxu1 %v9005_v19  ;;  %v12209_v19 = vld [vmem:[#allocation7_spill] sm:$0xff] }
  0x9f   : > { %2202 = vmatmul.mubr.bf16.gmra.mxu0 %v9604_v42  ;;  %3045 = vmatprep.subr.bf16.mxu1 %v9293_v1  ;;  %v8998_v42 = vld [vmem:[%s12180_s1 + $0x78] sm:$0xff]  }
  0xa0   : > { %2599 = vmatmul.mubr.bf16.gmra.mxu1 %v9735_v31  ;;  %7669 = vmatprep.mubr.msk.bf16.mxu0 %vm1261_vm1, %v9614_v47  ;;  %v9013_v47 = vld [vmem:[%s12180_s1 + $0x2b8] sm:$0xff]  }
  0xa1   : > { %7762 = vmatprep.mubr.msk.bf16.mxu1 %vm1261_vm1, %v9743_v53  ;;  %2762 = vmatpush1.bf16.msra.mxu0 %v8993_v41  ;;  %v9038_v41 = vld [vmem:[%s12180_s1 + $0x210] sm:$0xff]  }
  0xa2   : > { %2763 = vmatprep.subr.bf16.mxu0 %v9293_v1  ;;  %3046 = vmatpush1.bf16.msra.mxu1 %v9008_v27  ;;  %v9045_v27 = vld [vmem:[%s12180_s1 + $0xf0] sm:$0xff]  }
  0xa3   : > { %3047 = vmatprep.subr.bf16.mxu1 %v9293_v1 }
  0xa5   : > { %2764 = vmatpush1.bf16.msra.mxu0 %v8995_v12  ;;  %v9039_v12 = vld [vmem:[%s12180_s1 + $0x208] sm:$0xff]  }
  0xa6   : > { %2765 = vmatprep.subr.bf16.mxu0 %v9293_v1  ;;  %3048 = vmatpush1.bf16.msra.mxu1 %v9010_v22  ;;  %v9040_v22 = vld [vmem:[%s12180_s1 + $0x200] sm:$0xff]  }
  0xa7   : > { %2210 = vmatmul.mubr.bf16.gmra.mxu0 %v9647_v17  ;;  %3049 = vmatprep.subr.bf16.mxu1 %v9293_v1  ;;  %v9004_v17 = vld [vmem:[%s12180_s1 + $0x68] sm:$0xff]  }
  0xa8   : > { %2607 = vmatmul.mubr.bf16.gmra.mxu1 %v9751_v18  ;;  %7670 = vmatprep.mubr.msk.bf16.mxu0 %vm1261_vm1, %v9658_v25  ;;  %v9018_v25 = vld [vmem:[%s12180_s1 + $0x2a8] sm:$0xff]  }
  0xa9   : > { %7763 = vmatprep.mubr.msk.bf16.mxu1 %vm1261_vm1, %v9755_v60  ;;  %2766 = vmatpush1.bf16.msra.mxu0 %v8998_v42  ;;  %v9049_v42 = vld [vmem:[%s12180_s1 + $0xd8] sm:$0xff]  }
  0xaa   : > { %2767 = vmatprep.subr.bf16.mxu0 %v9293_v1  ;;  %3050 = vmatpush1.bf16.msra.mxu1 %v9013_v47 }
  0xab   : > { %3051 = vmatprep.subr.bf16.mxu1 %v9293_v1 }
  0xad   : > { %2768 = vmatpush1.bf16.msra.mxu0 %v9000_v40 }
  0xae   : > { %2769 = vmatprep.subr.bf16.mxu0 %v9293_v1  ;;  %3052 = vmatpush1.bf16.msra.mxu1 %v9015_v49 }
  0xaf   : > { %2218 = vmatmul.mubr.bf16.gmra.mxu0 %v9686_v45  ;;  %3053 = vmatprep.subr.bf16.mxu1 %v9293_v1  ;;  %v9020_v45 = vld [vmem:[%s12180_s1 + $0x2a0] sm:$0xff]  }
  0xb0   : > { %2615 = vmatmul.mubr.bf16.gmra.mxu1 %v9763_v52  ;;  %7671 = vmatprep.mubr.msk.bf16.mxu0 %vm1261_vm1, %v9689_v48  ;;  %v9025_v48 = vld [vmem:[%s12180_s1 + $0x2f8] sm:$0xff]  }
  0xb1   : > { %7764 = vmatprep.mubr.msk.bf16.mxu1 %vm1261_vm1, %v9772_v9  ;;  %2770 = vmatpush1.bf16.msra.mxu0 %v9004_v17 }
  0xb2   : > { %2771 = vmatprep.subr.bf16.mxu0 %v9293_v1  ;;  %3054 = vmatpush1.bf16.msra.mxu1 %v9018_v25  ;;  %v9042_v25 = vld [vmem:[%s12180_s1 + $0x1f0] sm:$0xff]  }
  0xb3   : > { %3055 = vmatprep.subr.bf16.mxu1 %v9293_v1 }
  0xb5   : > { %2772 = vmatpush1.bf16.msra.mxu0 %v9009_v43  ;;  %v9051_v43 = vld [vmem:[%s12180_s1 + $0xd0] sm:$0xff]  }
  0xb6   : > { %2781 = vmatprep.subr.bf16.mxu0 %v9293_v1  ;;  %3056 = vmatpush1.bf16.msra.mxu1 %v9020_v45 }
  0xb7   : > { %2226 = vmatmul.mubr.bf16.gmra.mxu0 %v9718_v4  ;;  %3065 = vmatprep.subr.bf16.mxu1 %v9293_v1  ;;  %v9027_v4 = vld [vmem:[%s12180_s1 + $0x2f0] sm:$0xff]  }
  0xb8   : > { %2623 = vmatmul.mubr.bf16.gmra.mxu1 %v9776_v59  ;;  %7672 = vmatprep.mubr.msk.bf16.mxu0 %vm1261_vm1, %v9722_v6  ;;  %v9032_v6 = vld [vmem:[%s12180_s1 + $0x2e8] sm:$0xff]  }
  0xb9   : > { %7765 = vmatprep.mubr.msk.bf16.mxu1 %vm1261_vm1, %v9780_v13  ;;  %2782 = vmatpush2.bf16.msra.mxu0 %v9014_v57 }
  0xba   : > { %2783 = vmatprep.subr.bf16.mxu0 %v9293_v1  ;;  %3066 = vmatpush2.bf16.msra.mxu1 %v9025_v48 }
  0xbb   : > { %3067 = vmatprep.subr.bf16.mxu1 %v9293_v1 }
  0xbd   : > { %2784 = vmatpush2.bf16.msra.mxu0 %v9019_v62  ;;  %v9044_v62 = vld [vmem:[%s12180_s1 + $0x1e8] sm:$0xff]  }
  0xbe   : > { %2785 = vmatprep.subr.bf16.mxu0 %v9293_v1  ;;  %3068 = vmatpush2.bf16.msra.mxu1 %v9027_v4 }
  0xbf   : > { %2234 = vmatmul.mubr.bf16.gmra.mxu0 %v9870_v37  ;;  %3069 = vmatprep.subr.bf16.mxu1 %v9293_v1  ;;  %v9034_v37 = vld [vmem:[%s12180_s1 + $0x2e0] sm:$0xff]  }
  0xc0   : > { %2631 = vmatmul.mubr.bf16.gmra.mxu1 %v9796_v63  ;;  %7673 = vmatprep.mubr.msk.bf16.mxu0 %vm1261_vm1, %v9892_v55  ;;  %v10098_v55 = vld [vmem:[%s9411_s12 + $0xd0] sm:$0xff] }
  0xc1   : > { %7766 = vmatprep.mubr.msk.bf16.mxu1 %vm1261_vm1, %v9801_v20  ;;  %2786 = vmatpush2.bf16.msra.mxu0 %v9026_v58  ;;  %v7654_v54 = vcombine.high %v10098_v55, %v10098_v55  ;;  %v7653_v50 = vcombine.low %v10098_v55, %v10098_v55  ;;  %v9052_v58 = vld [vmem:[%s12180_s1 + $0xc8] sm:$0xff]  }
  0xc2   : > { %2787 = vmatprep.subr.bf16.mxu0 %v9293_v1  ;;  %3070 = vmatpush2.bf16.msra.mxu1 %v9032_v6 }
  0xc3   : > { %3071 = vmatprep.subr.bf16.mxu1 %v9293_v1 }
  0xc5   : > { %2788 = vmatpush2.bf16.msra.mxu0 %v9033_v2 }
  0xc6   : > { %3072 = vmatpush2.bf16.msra.mxu1 %v9034_v37  ;;  %3676 = vmatprep.subr.bf16.mxu0 %v9293_v1 }
  0xc7   : > { %2242 = vmatmul.mubr.bf16.gmra.mxu0 %v9917_v14  ;;  %3916 = vmatprep.subr.bf16.mxu1 %v9293_v1  ;;  %v2037_v14 = vshrl.u32 %v7654_v54, 16 }
  0xc8   : > { %2639 = vmatmul.mubr.bf16.gmra.mxu1 %v9805_v21  ;;  %7674 = vmatprep.mubr.msk.bf16.mxu0 %vm1261_vm1, %v9920_v15  ;;  %v2040_v15 = vshll.u32 %v7654_v54, 16 }
  0xc9   : > { %7767 = vmatprep.mubr.msk.bf16.mxu1 %vm1261_vm1, %v9809_v39  ;;  %v2039_v36 = vrot.slane %v2037_v14, 3  ;;  %v9047_v14 = vld [vmem:[%s12180_s1 + $0x1e0] sm:$0xff]  }
  0xca   : > { %v2042_v30 = vrot.slane %v2040_v15, 4  ;;  %v9054_v15 = vld [vmem:[%s12180_s1 + $0xc0] sm:$0xff]  }
  0xcc   : > { %v2043_v38 = vor.u32 %v2042_v30, %v2039_v36 }
  0xce   : > { %v2044_v44 = vsel %vm963_vm0, %v9886_v11, %v2043_v38  ;;  %v7771_v11 = vcombine.low %v9250_v35, %v9251_v32  ;;  %v9055_v38 = vld [vmem:[%s12180_s1 + $0x118] sm:$0xff]   ;;  %v9057_v35 = vld [vmem:[%s12180_s1 + $0x110] sm:$0xff]  }
  0xcf   : > { %2250 = vmatmul.mubr.bf16.gmra.mxu0 %v9929_v16  ;;  %v2028_v16 = vshrl.u32 %v7653_v50, 16 }
  0xd0   : > { %2647 = vmatmul.mubr.bf16.gmra.mxu1 %v9813_v56  ;;  %7675 = vmatprep.mubr.msk.bf16.mxu0 %vm1261_vm1, %v9934_v7  ;;  %v2031_v7 = vshll.u32 %v7653_v50, 16 }
  0xd1   : > { %7768 = vmatprep.mubr.msk.bf16.mxu1 %vm1261_vm1, %v9820_v10  ;;  %v2030_v0 = vrot.slane %v2028_v16, 3  ;;  %v9050_v16 = vld [vmem:[%s12180_s1 + $0x238] sm:$0xff]  }
  0xd2   : > { %v2033_v51 = vrot.slane %v2031_v7, 4 }
  0xd4   : > { %v2034_v61 = vor.u32 %v2033_v51, %v2030_v0 }
  0xd7   : > { %2258 = vmatmul.mubr.bf16.gmra.mxu0 %v9945_v46  ;;  %v12207_v46 = vld [vmem:[#allocation5_spill] sm:$0xff] }
  0xd8   : > { %2655 = vmatmul.mubr.bf16.gmra.mxu1 %v12205_v34  ;;  %7676 = vmatprep.mubr.msk.bf16.mxu0 %vm1261_vm1, %v9901_v8  ;;  %v2035_v8 = vsel %vm963_vm0, %v9888_v29, %v2034_v61  ;;  %v9043_v29 = vld [vmem:[%s12180_s1 + $0xf8] sm:$0xff]  }
  0xd9   : > { %7769 = vmatprep.mubr.msk.bf16.mxu1 %vm1261_vm1, %v12206_v28 }
  0xdf   : > { %2266 = vmatmul.mubr.bf16.gmra.mxu0 %v9905_v26  ;;  %v9037_v26 = vld [vmem:[%s12180_s1 + $0x218] sm:$0xff]  }
  0xe0   : > { %2663 = vmatmul.mubr.bf16.gmra.mxu1 %v12207_v46  ;;  %7677 = vmatprep.mubr.msk.bf16.mxu0 %vm1261_vm1, %v2044_v44 }
  0xe1   : > { %7770 = vmatprep.mubr.msk.bf16.mxu1 %vm1261_vm1, %v12208_v5 }
  0xe7   : > { %2274 = vmatmul.mubr.bf16.gmra.mxu0 %v2035_v8  ;;  %v9053_v8 = vld [vmem:[%s12180_s1 + $0x230] sm:$0xff]  }
  0xe8   : > { %2671 = vmatmul.mubr.bf16.gmra.mxu1 %v12209_v19  ;;  %7785 = vmatprep.mubr.msk.bf16.mxu0 %vm1261_vm1, %v7772_v33 }
  0xe9   : > { %7854 = vmatprep.mubr.msk.bf16.mxu1 %vm1261_vm1, %v9714_v3 }
  0xef   : > { %2790 = vmatmul.mubr.bf16.vlgmr.msra.gmra.mxu0 %v7771_v11 }
  0xf0   : > { %3074 = vmatmul.mubr.bf16.vlgmr.msra.gmra.mxu1 %v9735_v31  ;;  %3677 = vmatpush1.bf16.msra.mxu0 %v9037_v26  ;;  %v9056_v26 = vld [vmem:[%s12180_s1 + $0x228] sm:$0xff]  }
  0xf1   : > { %7786 = vmatprep.mubr.msk.bf16.mxu0 %vm1261_vm1, %v9433_v23  ;;  %7855 = vmatprep.mubr.msk.bf16.mxu1 %vm1261_vm1, %v9743_v53  ;;  %v9046_v23 = vld [vmem:[%s12180_s1 + $0xe8] sm:$0xff]  }
  0xf2   : > { %3678 = vmatprep.subr.bf16.mxu0 %v9293_v1  ;;  %3917 = vmatpush1.bf16.msra.mxu1 %v9043_v29 }
  0xf3   : > { %3918 = vmatprep.subr.bf16.mxu1 %v9293_v1 }
  0xf4   : > { %3679 = vmatpush1.bf16.msra.mxu0 %v9038_v41  ;;  %v9060_v41 = vld [vmem:[%s12180_s1 + $0x108] sm:$0xff]  }
  0xf5   : > { %3680 = vmatprep.subr.bf16.mxu0 %v9293_v1 }
  0xf6   : > { %3919 = vmatpush1.bf16.msra.mxu1 %v9045_v27 }
  0xf7   : > { %2798 = vmatmul.mubr.bf16.gmra.mxu0 %v9435_v24  ;;  %3920 = vmatprep.subr.bf16.mxu1 %v9293_v1  ;;  %v9048_v24 = vld [vmem:[%s12180_s1 + $0xe0] sm:$0xff]  }
  0xf8   : > { %3082 = vmatmul.mubr.bf16.gmra.mxu1 %v9751_v18  ;;  %7787 = vmatprep.mubr.msk.bf16.mxu0 %vm1261_vm1, %v9714_v3  ;;  %v9041_v3 = vld [vmem:[%s12180_s1 + $0x1f8] sm:$0xff]  }
  0xf9   : > { %7856 = vmatprep.mubr.msk.bf16.mxu1 %vm1261_vm1, %v9755_v60  ;;  %3681 = vmatpush1.bf16.msra.mxu0 %v9039_v12 }
  0xfa   : > { %3682 = vmatprep.subr.bf16.mxu0 %v9293_v1  ;;  %3921 = vmatpush1.bf16.msra.mxu1 %v9046_v23 }
  0xfb   : > { %3922 = vmatprep.subr.bf16.mxu1 %v9293_v1 }
  0xfd   : > { %3683 = vmatpush1.bf16.msra.mxu0 %v9040_v22 }
  0xfe   : > { %3684 = vmatprep.subr.bf16.mxu0 %v9293_v1  ;;  %3923 = vmatpush1.bf16.msra.mxu1 %v9048_v24  ;;  %v9061_v24 = vld [vmem:[%s12180_s1 + $0x220] sm:$0xff]  }
  0xff   : > { %v1329_v47 = vpop.f32.mrf.mxu0  ;;  %2806 = vmatmul.mubr.bf16.gmra.mxu0 %v9735_v31  ;;  %3924 = vmatprep.subr.bf16.mxu1 %v9293_v1  ;;  %v1603_v40 = vpop.f32.mrf.mxu1 }
 0x100   : > { %3090 = vmatmul.mubr.bf16.gmra.mxu1 %v9763_v52  ;;  %7788 = vmatprep.mubr.msk.bf16.mxu0 %vm1261_vm1, %v9743_v53  ;;  %v10184_v49 = vadd.f32 %v1603_v40, %v1329_v47 }
 0x101   : > { %v1331_v17 = vpop.f32.mrf.mxu0  ;;  %7857 = vmatprep.mubr.msk.bf16.mxu1 %vm1261_vm1, %v9772_v9  ;;  %3685 = vmatpush1.bf16.msra.mxu0 %v9041_v3  ;;  %v1605_v31 = vpop.f32.mrf.mxu1  ;;  %v9062_v3 = vld [vmem:[%s12180_s1 + $0x100] sm:$0xff]  }
 0x102   : > { %3686 = vmatprep.subr.bf16.mxu0 %v9293_v1  ;;  %3925 = vmatpush1.bf16.msra.mxu1 %v9049_v42 }
 0x103   : > { %v1332_v53 = vpop.f32.mrf.mxu0  ;;  %3926 = vmatprep.subr.bf16.mxu1 %v9293_v1  ;;  %v1606_v45 = vpop.f32.mrf.mxu1 }
 0x104   : > { %v10196_v57 = vadd.f32 %v1606_v45, %v1332_v53 }
 0x105   : > { %v1334_v48 = vpop.f32.mrf.mxu0  ;;  %3687 = vmatpush1.bf16.msra.mxu0 %v9042_v25  ;;  %v1608_v4 = vpop.f32.mrf.mxu1 }
 0x106   : > { %3688 = vmatprep.subr.bf16.mxu0 %v9293_v1  ;;  %3927 = vmatpush1.bf16.msra.mxu1 %v9051_v43 }
 0x107   : > { %v1337_v6 = vpop.f32.mrf.mxu0  ;;  %2814 = vmatmul.mubr.bf16.gmra.mxu0 %v9751_v18  ;;  %3928 = vmatprep.subr.bf16.mxu1 %v9293_v1 }
 0x108   : > { %v1611_v2 = vpop.f32.mrf.mxu1  ;;  %3098 = vmatmul.mubr.bf16.gmra.mxu1 %v9776_v59  ;;  %7789 = vmatprep.mubr.msk.bf16.mxu0 %vm1261_vm1, %v9755_v60 }
 0x109   : > { %v10210_v37 = vadd.f32 %v1611_v2, %v1337_v6  ;;  %v1339_v54 = vpop.f32.mrf.mxu0  ;;  %7858 = vmatprep.mubr.msk.bf16.mxu1 %vm1261_vm1, %v9780_v13  ;;  %3689 = vmatpush1.bf16.msra.mxu0 %v9044_v62 }
 0x10a   : > { %v1613_v18 = vpop.f32.mrf.mxu1  ;;  %3690 = vmatprep.subr.bf16.mxu0 %v9293_v1  ;;  %3929 = vmatpush1.bf16.msra.mxu1 %v9052_v58 }
 0x10b   : > { %v1340_v60 = vpop.f32.mrf.mxu0  ;;  %3930 = vmatprep.subr.bf16.mxu1 %v9293_v1 }
 0x10c   : > { %v1614_v50 = vpop.f32.mrf.mxu1 }
 0x10d   : > { %v10222_v36 = vadd.f32 %v1614_v50, %v1340_v60  ;;  %v1342_v30 = vpop.f32.mrf.mxu0  ;;  %3691 = vmatpush1.bf16.msra.mxu0 %v9047_v14 }
 0x10e   : > { %v1616_v7 = vpop.f32.mrf.mxu1  ;;  %3700 = vmatprep.subr.bf16.mxu0 %v9293_v1  ;;  %3931 = vmatpush1.bf16.msra.mxu1 %v9054_v15 }
 0x10f   : > { %v1345_v0 = vpop.f32.mrf.mxu0  ;;  %2822 = vmatmul.mubr.bf16.gmra.mxu0 %v9763_v52  ;;  %3940 = vmatprep.subr.bf16.mxu1 %v9293_v1 }
 0x110   : > { %v1619_v51 = vpop.f32.mrf.mxu1  ;;  %3106 = vmatmul.mubr.bf16.gmra.mxu1 %v9796_v63  ;;  %7790 = vmatprep.mubr.msk.bf16.mxu0 %vm1261_vm1, %v9772_v9 }
 0x111   : > { %v10236_v44 = vadd.f32 %v1619_v51, %v1345_v0  ;;  %v1347_v61 = vpop.f32.mrf.mxu0  ;;  %7859 = vmatprep.mubr.msk.bf16.mxu1 %vm1261_vm1, %v9801_v20  ;;  %3701 = vmatpush2.bf16.msra.mxu0 %v9050_v16  ;;  %v9071_v16 = vld [vmem:[%s9411_s12 + $0xc] ss:$8 sps:$4 sm:$0xff]  }
 0x112   : > { %v1621_v52 = vpop.f32.mrf.mxu1  ;;  %3702 = vmatprep.subr.bf16.mxu0 %v9293_v1  ;;  %3941 = vmatpush2.bf16.msra.mxu1 %v9055_v38  ;;  %v10308_v51 = vld [vmem:[%s9411_s12 + $0x2c] ss:$8 sps:$4 sm:$0xff]  }
 0x113   : > { %v1348_v9 = vpop.f32.mrf.mxu0  ;;  %3942 = vmatprep.subr.bf16.mxu1 %v9293_v1  ;;  %v3821_v52 = vshll.u32 %v9071_v16, 16 }
 0x114   : > { %v1622_v32 = vpop.f32.mrf.mxu1 }
 0x115   : > { %v10248_v33 = vadd.f32 %v1622_v32, %v1348_v9  ;;  %v1350_v11 = vpop.f32.mrf.mxu0  ;;  %3703 = vmatpush2.bf16.msra.mxu0 %v9053_v8  ;;  %v9252_v9 = vld [vmem:[%s9411_s12 + $0xc8] sm:$0xff] }
 0x116   : > { %v1624_v29 = vpop.f32.mrf.mxu1  ;;  %3704 = vmatprep.subr.bf16.mxu0 %v9293_v1  ;;  %3943 = vmatpush2.bf16.msra.mxu1 %v9057_v35  ;;  %v7841_v32 = vcombine.high %v9252_v9, %v10098_v55  ;;  %v9063_v11 = vld [vmem:[%s9411_s12 + $0x18] ss:$8 sps:$4 sm:$0xff]  }
 0x117   : > { %v1353_v27 = vpop.f32.mrf.mxu0  ;;  %2830 = vmatmul.mubr.bf16.gmra.mxu0 %v9776_v59  ;;  %3944 = vmatprep.subr.bf16.mxu1 %v9293_v1 }
 0x118   : > { %v1627_v12 = vpop.f32.mrf.mxu1  ;;  %3114 = vmatmul.mubr.bf16.gmra.mxu1 %v9805_v21  ;;  %7791 = vmatprep.mubr.msk.bf16.mxu0 %vm1261_vm1, %v9780_v13 }
 0x119   : > { %v10262_v23 = vadd.f32 %v1627_v12, %v1353_v27  ;;  %v1355_v22 = vpop.f32.mrf.mxu0  ;;  %7860 = vmatprep.mubr.msk.bf16.mxu1 %vm1261_vm1, %v9809_v39  ;;  %3705 = vmatpush2.bf16.msra.mxu0 %v9056_v26  ;;  %v3396_v27 = vshll.u32 %v10308_v51, 16 }
 0x11a   : > { %v1629_v59 = vpop.f32.mrf.mxu1  ;;  %3706 = vmatprep.subr.bf16.mxu0 %v9293_v1  ;;  %3945 = vmatpush2.bf16.msra.mxu1 %v9060_v41  ;;  %v3819_v22 = vshrl.u32 %v9071_v16, 16 }
 0x11b   : > { %v1356_v13 = vpop.f32.mrf.mxu0  ;;  %3946 = vmatprep.subr.bf16.mxu1 %v9293_v1 }
 0x11c   : > { %v1630_v42 = vpop.f32.mrf.mxu1 }
 0x11d   : > { %v10274_v47 = vadd.f32 %v1630_v42, %v1356_v13  ;;  %v1358_v40 = vpop.f32.mrf.mxu0  ;;  %3707 = vmatpush2.bf16.msra.mxu0 %v9061_v24  ;;  %v3823_v24 = vrot.slane %v3821_v52, 1  ;;  %v9066_v13 = vld [vmem:[%s9411_s12 + $0x28] ss:$8 sps:$4 sm:$0xff]   ;;  %v3379_v42 = vshll.u32 %v9063_v11, 16 }
 0x11e   : > { %v1632_v17 = vpop.f32.mrf.mxu1  ;;  %3947 = vmatpush2.bf16.msra.mxu1 %v9062_v3  ;;  %4478 = vmatprep.subr.bf16.mxu0 %v9293_v1 }
 0x11f   : > { %v1361_v25 = vpop.f32.mrf.mxu0  ;;  %2838 = vmatmul.mubr.bf16.gmra.mxu0 %v9796_v63 }
 0x120   : > { %v1635_v31 = vpop.f32.mrf.mxu1  ;;  %3122 = vmatmul.mubr.bf16.gmra.mxu1 %v9813_v56  ;;  %7792 = vmatprep.mubr.msk.bf16.mxu0 %vm1261_vm1, %v9801_v20 }
 0x121   : > { %v10281_v43 = vadd.f32 %v1635_v31, %v1361_v25  ;;  %v1363_v53 = vpop.f32.mrf.mxu0  ;;  %7861 = vmatprep.mubr.msk.bf16.mxu1 %vm1261_vm1, %v9820_v10  ;;  %v3398_v31 = vrot.slane %v3396_v27, 1 }
 0x122   : > { %v1637_v45 = vpop.f32.mrf.mxu1 }
 0x123   : > { %v1364_v48 = vpop.f32.mrf.mxu0 }
 0x124   : > { %v1638_v62 = vpop.f32.mrf.mxu1 }
 0x125   : > { %v10285_v4 = vadd.f32 %v1638_v62, %v1364_v48  ;;  %v1366_v58 = vpop.f32.mrf.mxu0  ;;  %v3824_v48 = vor.u32 %v3823_v24, %v3819_v22 }
 0x126   : > { %v1640_v63 = vpop.f32.mrf.mxu1 }
 0x127   : > { %v1369_v6 = vpop.f32.mrf.mxu0  ;;  %2846 = vmatmul.mubr.bf16.gmra.mxu0 %v9805_v21  ;;  %v9065_v21 = vld [vmem:[%s9411_s12 + $0x1c] ss:$8 sps:$4 sm:$0xff]   ;;  %v3377_v63 = vshrl.u32 %v9063_v11, 16 }
 0x128   : > { %v1643_v2 = vpop.f32.mrf.mxu1  ;;  %3130 = vmatmul.mubr.bf16.gmra.mxu1 %v12205_v34  ;;  %7793 = vmatprep.mubr.msk.bf16.mxu0 %vm1261_vm1, %v9809_v39  ;;  %v3391_v61 = vshll.u32 %v9065_v21, 16  ;;  %v3389_v29 = vshrl.u32 %v9065_v21, 16 }
 0x129   : > { %v10291_v20 = vadd.f32 %v1643_v2, %v1369_v6  ;;  %v1371_v54 = vpop.f32.mrf.mxu0  ;;  %7862 = vmatprep.mubr.msk.bf16.mxu1 %vm1261_vm1, %v12206_v28  ;;  %v3384_v6 = vshll.u32 %v9066_v13, 16 }
 0x12a   : > { %v1645_v14 = vpop.f32.mrf.mxu1  ;;  %v3393_v41 = vrot.slane %v3391_v61, 1  ;;  %v9075_v61 = vld [vmem:[%s9411_s12 + $0x38] ss:$8 sps:$4 sm:$0xff]  }
 0x12b   : > { %v1372_v18 = vpop.f32.mrf.mxu0  ;;  %v3404_v27 = vshll.u32 %v9075_v61, 16 }
 0x12c   : > { %v1646_v15 = vpop.f32.mrf.mxu1  ;;  %v3394_v25 = vor.u32 %v3393_v41, %v3389_v29  ;;  %v3825_v21 = vsel %vm3375_vm2, %v3824_v48, %v3393_v41  ;;  %v9072_v29 = vld [vmem:[%s12180_s1 + $0x338] sm:$0xff]   ;;  %v3400_v41 = vshrl.u32 %v9066_v13, 16 }
 0x12d   : > { %v10295_v60 = vadd.f32 %v1646_v15, %v1372_v18  ;;  %v1374_v50 = vpop.f32.mrf.mxu0 }
 0x12e   : > { %v1648_v30 = vpop.f32.mrf.mxu1  ;;  %v3399_v14 = vsel %vm3375_vm2, %v3394_v25, %v3398_v31 }
 0x12f   : > { %v1377_v7 = vpop.f32.mrf.mxu0  ;;  %2854 = vmatmul.mubr.bf16.gmra.mxu0 %v9813_v56  ;;  %v3408_v30 = vshrl.u32 %v10308_v51, 16 }
 0x130   : > { %v1651_v39 = vpop.f32.mrf.mxu1  ;;  %3138 = vmatmul.mubr.bf16.gmra.mxu1 %v12207_v46  ;;  %7794 = vmatprep.mubr.msk.bf16.mxu0 %vm1261_vm1, %v9820_v10 }
 0x131   : > { %v10303_v38 = vadd.f32 %v1651_v39, %v1377_v7  ;;  %v1379_v0 = vpop.f32.mrf.mxu0  ;;  %7863 = vmatprep.mubr.msk.bf16.mxu1 %vm1261_vm1, %v12208_v5  ;;  %v9069_v5 = vld [vmem:[%s9411_s12 + $0x8] ss:$8 sps:$4 sm:$0xff]   ;;  %v3410_v51 = vor.u32 %v3408_v30, %v3398_v31  ;;  %v3406_v31 = vrot.slane %v3404_v27, 1 }
 0x132   : > { %v1653_v8 = vpop.f32.mrf.mxu1  ;;  %v3813_v53 = vshll.u32 %v9069_v5, 16  ;;  %v3811_v18 = vshrl.u32 %v9069_v5, 16  ;;  %v3386_v0 = vrot.slane %v3384_v6, 1  ;;  %v9080_v30 = vld [vmem:[%s12180_s1 + $0x328] sm:$0xff]  }
 0x133   : > { %v1380_v35 = vpop.f32.mrf.mxu0 }
 0x134   : > { %v1654_v56 = vpop.f32.mrf.mxu1  ;;  %v3815_v15 = vrot.slane %v3813_v53, 1  ;;  %v3402_v13 = vor.u32 %v3400_v41, %v3386_v0  ;;  %v9076_v53 = vld [vmem:[%s12180_s1 + $0x330] sm:$0xff]  }
 0x135   : > { %v10313_v10 = vadd.f32 %v1654_v56, %v1380_v35  ;;  %v1382_v26 = vpop.f32.mrf.mxu0  ;;  %v9077_v56 = vld [vmem:[%s9411_s12 + $0x4c] ss:$8 sps:$4 sm:$0xff]  }
 0x136   : > { %v1656_v12 = vpop.f32.mrf.mxu1  ;;  %v3816_v35 = vor.u32 %v3815_v15, %v3811_v18  ;;  %v3416_v18 = vshrl.u32 %v9075_v61, 16 }
 0x137   : > { %v1385_v59 = vpop.f32.mrf.mxu0  ;;  %2862 = vmatmul.mubr.bf16.gmra.mxu0 %v12205_v34  ;;  %v9073_v34 = vld [vmem:[%s9411_s12 + $0x3c] ss:$8 sps:$4 sm:$0xff]  }
 0x138   : > { %v1659_v3 = vpop.f32.mrf.mxu1  ;;  %3146 = vmatmul.mubr.bf16.gmra.mxu1 %v12209_v19  ;;  %7795 = vmatprep.mubr.msk.bf16.mxu0 %vm1261_vm1, %v12206_v28  ;;  %v7840_v19 = vcombine.low %v9252_v9, %v10098_v55  ;;  %v3381_v28 = vrot.slane %v3379_v42, 1  ;;  %v3412_v16 = vshll.u32 %v9073_v34, 16  ;;  %v3424_v24 = vshrl.u32 %v9073_v34, 16 }
 0x139   : > { %v10322_v40 = vadd.f32 %v1659_v3, %v1385_v59  ;;  %v1387_v17 = vpop.f32.mrf.mxu0  ;;  %7864 = vmatprep.mubr.msk.bf16.mxu1 %vm1261_vm1, %v7841_v32  ;;  %v3428_v59 = vshll.u32 %v9077_v56, 16  ;;  %v3418_v61 = vor.u32 %v3416_v18, %v3406_v31  ;;  %v9090_v18 = vld [vmem:[%s9411_s12 + $0x7c] ss:$8 sps:$4 sm:$0xff]  }
 0x13a   : > { %v1661_v45 = vpop.f32.mrf.mxu1  ;;  %v3382_v39 = vor.u32 %v3381_v28, %v3377_v63  ;;  %v3414_v32 = vrot.slane %v3412_v16, 1  ;;  %v3817_v22 = vsel %vm3375_vm2, %v3816_v35, %v3381_v28  ;;  %v3440_v16 = vshrl.u32 %v9077_v56, 16  ;;  %v10379_v35 = vld [vmem:[%s9411_s12 + $0x58] ss:$8 sps:$4 sm:$0xff]  }
 0x13b   : > { %v1388_v62 = vpop.f32.mrf.mxu0  ;;  %v10353_v45 = vld [vmem:[%s9411_s12 + $0x48] ss:$8 sps:$4 sm:$0xff]  }
 0x13c   : > { %v1662_v58 = vpop.f32.mrf.mxu1  ;;  %v10347_v42 = vsel %vm3375_vm2, %v3410_v51, %v3414_v32  ;;  %v3420_v15 = vshll.u32 %v10353_v45, 16 }
 0x13d   : > { %v10327_v2 = vadd.f32 %v1662_v58, %v1388_v62  ;;  %v1390_v54 = vpop.f32.mrf.mxu0  ;;  %v3426_v62 = vor.u32 %v3424_v24, %v3414_v32  ;;  %v3430_v58 = vrot.slane %v3428_v59, 1 }
 0x13e   : > { %v1664_v50 = vpop.f32.mrf.mxu1  ;;  %v10363_v54 = vsel %vm3375_vm2, %v3402_v13, %v3406_v31  ;;  %v9087_v13 = vld [vmem:[%s12180_s1 + $0x318] sm:$0xff]  }
 0x13f   : > { %v1393_v7 = vpop.f32.mrf.mxu0  ;;  %2870 = vmatmul.mubr.bf16.gmra.mxu0 %v12207_v46  ;;  %v3387_v46 = vsel %vm3375_vm2, %v3382_v39, %v3386_v0  ;;  %v3442_v56 = vor.u32 %v3440_v16, %v3430_v58 }
 0x140   : > { %v1667_v55 = vpop.f32.mrf.mxu1  ;;  %3154 = vmatmul.mubr.bf16.gmra.mxu1 %v7840_v19  ;;  %7949 = vmatprep.mubr.msk.bf16.mxu0 %vm1261_vm1, %v3399_v14  ;;  %v9081_v19 = vld [vmem:[%s9411_s12 + $0x5c] ss:$8 sps:$4 sm:$0xff]  }
 0x141   : > { %v10335_v8 = vadd.f32 %v1667_v55, %v1393_v7  ;;  %v1395_v52 = vpop.f32.mrf.mxu0  ;;  %7976 = vmatprep.mubr.msk.bf16.mxu1 %vm1261_vm1, %v3825_v21  ;;  %v3444_v7 = vshll.u32 %v9081_v19, 16 }
 0x142   : > { %v1669_v9 = vpop.f32.mrf.mxu1  ;;  %v3422_v52 = vrot.slane %v3420_v15, 1 }
 0x143   : > { %v1396_v11 = vpop.f32.mrf.mxu0  ;;  %v3446_v32 = vrot.slane %v3444_v7, 1 }
 0x144   : > { %v1670_v26 = vpop.f32.mrf.mxu1  ;;  %v10391_v27 = vsel %vm3375_vm2, %v3418_v61, %v3422_v52 }
 0x145   : > { %v10343_v5 = vadd.f32 %v1670_v26, %v1396_v11  ;;  %v1398_v12 = vpop.f32.mrf.mxu0  ;;  %v9083_v11 = vld [vmem:[%s12180_s1 + $0x320] sm:$0xff]   ;;  %v9085_v26 = vld [vmem:[%s9411_s12 + $0x6c] ss:$8 sps:$4 sm:$0xff]  }
 0x146   : > { %v1672_v3 = vpop.f32.mrf.mxu1  ;;  %v3432_v12 = vshrl.u32 %v10353_v45, 16 }
 0x147   : > { %v1401_v17 = vpop.f32.mrf.mxu0  ;;  %3709 = vmatmul.mubr.bf16.vlgmr.msra.gmra.mxu0 %v3387_v46  ;;  %v10398_v3 = vsel %vm3375_vm2, %v3442_v56, %v3446_v32 }
 0x148   : > { %v1675_v25 = vpop.f32.mrf.mxu1  ;;  %3949 = vmatmul.mubr.bf16.vlgmr.msra.gmra.mxu1 %v3817_v22  ;;  %4479 = vmatpush1.bf16.msra.mxu0 %v9072_v29  ;;  %v3436_v22 = vshll.u32 %v10379_v35, 16 }
 0x149   : > { %v10355_v48 = vadd.f32 %v1675_v25, %v1401_v17  ;;  %v1403_v34 = vpop.f32.mrf.mxu0  ;;  %7950 = vmatprep.mubr.msk.bf16.mxu0 %vm1261_vm1, %v10347_v42  ;;  %7977 = vmatprep.mubr.msk.bf16.mxu1 %vm1261_vm1, %v3399_v14  ;;  %v10369_v14 = vsel %vm3375_vm2, %v3426_v62, %v3430_v58  ;;  %v3456_v17 = vshrl.u32 %v9081_v19, 16  ;;  %v3460_v25 = vshll.u32 %v9085_v26, 16  ;;  %v10414_v19 = vld [vmem:[%s9411_s12 + $0x68] ss:$8 sps:$4 sm:$0xff]  }
 0x14a   : > { %v1677_v63 = vpop.f32.mrf.mxu1  ;;  %4480 = vmatprep.subr.bf16.mxu0 %v9293_v1  ;;  %v3434_v62 = vor.u32 %v3432_v12, %v3422_v52  ;;  %v3438_v58 = vrot.slane %v3436_v22, 1  ;;  %v3472_v52 = vshrl.u32 %v9085_v26, 16 }
 0x14b   : > { %v1404_v28 = vpop.f32.mrf.mxu0 }
 0x14c   : > { %v1678_v6 = vpop.f32.mrf.mxu1  ;;  %4481 = vmatpush1.bf16.msra.mxu0 %v9076_v53  ;;  %v10429_v7 = vsel %vm3375_vm2, %v3434_v62, %v3438_v58  ;;  %v3464_v62 = vshrl.u32 %v10414_v19, 16 }
 0x14d   : > { %v10366_v50 = vadd.f32 %v1678_v6, %v1404_v28  ;;  %v1406_v21 = vpop.f32.mrf.mxu0  ;;  %4482 = vmatprep.subr.bf16.mxu0 %v9293_v1  ;;  %v3458_v28 = vor.u32 %v3456_v17, %v3446_v32  ;;  %v3462_v6 = vrot.slane %v3460_v25, 1 }
 0x14e   : > { %v1680_v55 = vpop.f32.mrf.mxu1 }
 0x14f   : > { %v1409_v39 = vpop.f32.mrf.mxu0  ;;  %3717 = vmatmul.mubr.bf16.gmra.mxu0 %v10363_v54  ;;  %v3448_v55 = vshrl.u32 %v10379_v35, 16  ;;  %v10434_v61 = vsel %vm3375_vm2, %v3458_v28, %v3462_v6  ;;  %v3474_v12 = vor.u32 %v3472_v52, %v3462_v6  ;;  %v3488_v6 = vshrl.u32 %v9090_v18, 16 }
 0x150   : > { %v1683_v0 = vpop.f32.mrf.mxu1  ;;  %3957 = vmatmul.mubr.bf16.gmra.mxu1 %v3387_v46  ;;  %7951 = vmatprep.mubr.msk.bf16.mxu0 %vm1261_vm1, %v10369_v14 }
 0x151   : > { %v10381_v9 = vadd.f32 %v1683_v0, %v1409_v39  ;;  %v1411_v51 = vpop.f32.mrf.mxu0  ;;  %7978 = vmatprep.mubr.msk.bf16.mxu1 %vm1261_vm1, %v10347_v42  ;;  %4483 = vmatpush1.bf16.msra.mxu0 %v9080_v30  ;;  %v3452_v39 = vshll.u32 %v10414_v19, 16  ;;  %v3450_v26 = vor.u32 %v3448_v55, %v3438_v58 }
 0x152   : > { %v1685_v46 = vpop.f32.mrf.mxu1  ;;  %4484 = vmatprep.subr.bf16.mxu0 %v9293_v1  ;;  %v3476_v51 = vshll.u32 %v9090_v18, 16 }
 0x153   : > { %v1412_v29 = vpop.f32.mrf.mxu0  ;;  %v3454_v46 = vrot.slane %v3452_v39, 1 }
 0x154   : > { %v1686_v41 = vpop.f32.mrf.mxu1  ;;  %v3478_v22 = vrot.slane %v3476_v51, 1 }
 0x155   : > { %v10395_v24 = vadd.f32 %v1686_v41, %v1412_v29  ;;  %v1414_v59 = vpop.f32.mrf.mxu0  ;;  %4485 = vmatpush1.bf16.msra.mxu0 %v9083_v11  ;;  %v10450_v29 = vld [vmem:[%s9411_s12 + $0x78] ss:$8 sps:$4 sm:$0xff]   ;;  %v3466_v18 = vor.u32 %v3464_v62, %v3454_v46 }
 0x156   : > { %v1688_v31 = vpop.f32.mrf.mxu1  ;;  %4486 = vmatprep.subr.bf16.mxu0 %v9293_v1  ;;  %v9097_v59 = vld [vmem:[%s12180_s1 + $0x300] sm:$0xff]   ;;  %v3468_v58 = vshll.u32 %v10450_v29, 16  ;;  %v10470_v28 = vsel %vm3375_vm2, %v3474_v12, %v3478_v22  ;;  %v3490_v51 = vor.u32 %v3488_v6, %v3478_v22  ;;  %v3480_v22 = vshrl.u32 %v10450_v29, 16 }
 0x157   : > { %v2195_v53 = vpop.f32.mrf.mxu0  ;;  %3725 = vmatmul.mubr.bf16.gmra.mxu0 %v10391_v27 }
 0x158   : > { %v10406_v45 = vadd.f32 %v2195_v53, %v10184_v49  ;;  %v10408_v34 = vpop.f32.mrf.mxu1  ;;  %3965 = vmatmul.mubr.bf16.gmra.mxu1 %v10363_v54  ;;  %7952 = vmatprep.mubr.msk.bf16.mxu0 %vm1261_vm1, %v10398_v3  ;;  %v9089_v49 = vld [vmem:[%s12180_s1 + $0x310] sm:$0xff]   ;;  %v10465_v53 = vsel %vm3375_vm2, %v3450_v26, %v3454_v46  ;;  %v3470_v39 = vrot.slane %v3468_v58, 1 }
 0x159   : > { %v2197_v63 = vpop.f32.mrf.mxu0  ;;  %7979 = vmatprep.mubr.msk.bf16.mxu1 %vm1261_vm1, %v10369_v14  ;;  %4487 = vmatpush1.bf16.msra.mxu0 %v9087_v13 }
 0x15a   : > { %v2594_v15 = vpop.f32.mrf.mxu1  ;;  %4488 = vmatprep.subr.bf16.mxu0 %v9293_v1  ;;  %v10499_v12 = vsel %vm3375_vm2, %v3466_v18, %v3470_v39 }
 0x15b   : > { %v2198_v21 = vpop.f32.mrf.mxu0 }
 0x15c   : > { %v10424_v30 = vadd.f32 %v2198_v21, %v10196_v57  ;;  %v10426_v16 = vpop.f32.mrf.mxu1  ;;  %v9093_v57 = vld [vmem:[%s12180_s1 + $0x308] sm:$0xff]  }
 0x15d   : > { %v2200_v0 = vpop.f32.mrf.mxu0  ;;  %4489 = vmatpush1.bf16.msra.mxu0 %v9089_v49 }
 0x15e   : > { %v2597_v56 = vpop.f32.mrf.mxu1  ;;  %4490 = vmatprep.subr.bf16.mxu0 %v9293_v1  ;;  %v9096_v0 = vld [vmem:[%s9411_s12 + $0x88] ss:$8 sps:$4 sm:$0xff]  }
 0x15f   : > { %v2203_v32 = vpop.f32.mrf.mxu0  ;;  %3733 = vmatmul.mubr.bf16.gmra.mxu0 %v10429_v7  ;;  %v9098_v56 = vld [vmem:[%s9411_s12 + $0x9c] ss:$8 sps:$4 sm:$0xff]  }
 0x160   : > { %v10442_v35 = vadd.f32 %v2203_v32, %v10210_v37  ;;  %v10444_v11 = vpop.f32.mrf.mxu1  ;;  %3973 = vmatmul.mubr.bf16.gmra.mxu1 %v10391_v27  ;;  %7953 = vmatprep.mubr.msk.bf16.mxu0 %vm1261_vm1, %v10434_v61  ;;  %v9094_v37 = vld [vmem:[%s9411_s12 + $0x8c] ss:$8 sps:$4 sm:$0xff]   ;;  %v3508_v58 = vshll.u32 %v9098_v56, 16 }
 0x161   : > { %v2205_v41 = vpop.f32.mrf.mxu0  ;;  %7980 = vmatprep.mubr.msk.bf16.mxu1 %vm1261_vm1, %v10398_v3  ;;  %4491 = vmatpush1.bf16.msra.mxu0 %v9093_v57  ;;  %v3492_v49 = vshll.u32 %v9094_v37, 16  ;;  %v3504_v62 = vshrl.u32 %v9094_v37, 16  ;;  %v3482_v37 = vor.u32 %v3480_v22, %v3470_v39 }
 0x162   : > { %v2602_v17 = vpop.f32.mrf.mxu1  ;;  %4492 = vmatprep.subr.bf16.mxu0 %v9293_v1 }
 0x163   : > { %v2206_v25 = vpop.f32.mrf.mxu0  ;;  %v3494_v57 = vrot.slane %v3492_v49, 1 }
 0x164   : > { %v10460_v13 = vadd.f32 %v2206_v25, %v10222_v36  ;;  %v10462_v31 = vpop.f32.mrf.mxu1  ;;  %v9101_v36 = vld [vmem:[%s12180_s1 + $0x358] sm:$0xff]  }
 0x165   : > { %v2208_v63 = vpop.f32.mrf.mxu0  ;;  %4493 = vmatpush1.bf16.msra.mxu0 %v9097_v59  ;;  %v3484_v59 = vshll.u32 %v9096_v0, 16  ;;  %v10503_v25 = vsel %vm3375_vm2, %v3490_v51, %v3494_v57  ;;  %v3506_v18 = vor.u32 %v3504_v62, %v3494_v57  ;;  %v9102_v51 = vld [vmem:[%s9411_s12 + $0xac] ss:$8 sps:$4 sm:$0xff]   ;;  %v3496_v57 = vshrl.u32 %v9096_v0, 16 }
 0x166   : > { %v2605_v15 = vpop.f32.mrf.mxu1  ;;  %4502 = vmatprep.subr.bf16.mxu0 %v9293_v1 }
 0x167   : > { %v2211_v21 = vpop.f32.mrf.mxu0  ;;  %3741 = vmatmul.mubr.bf16.gmra.mxu0 %v10465_v53  ;;  %v9100_v15 = vld [vmem:[%s9411_s12 + $0x98] ss:$8 sps:$4 sm:$0xff]  }
 0x168   : > { %v10478_v19 = vadd.f32 %v2211_v21, %v10236_v44  ;;  %v10480_v55 = vpop.f32.mrf.mxu1  ;;  %3981 = vmatmul.mubr.bf16.gmra.mxu1 %v10429_v7  ;;  %7954 = vmatprep.mubr.msk.bf16.mxu0 %vm1261_vm1, %v10470_v28  ;;  %v9105_v44 = vld [vmem:[%s12180_s1 + $0x350] sm:$0xff]  }
 0x169   : > { %v2213_v52 = vpop.f32.mrf.mxu0  ;;  %7981 = vmatprep.mubr.msk.bf16.mxu1 %vm1261_vm1, %v10434_v61  ;;  %4503 = vmatpush2.bf16.msra.mxu0 %v9101_v36  ;;  %v3486_v36 = vrot.slane %v3484_v59, 1  ;;  %v3500_v59 = vshll.u32 %v9100_v15, 16 }
 0x16a   : > { %v2610_v32 = vpop.f32.mrf.mxu1  ;;  %4504 = vmatprep.subr.bf16.mxu0 %v9293_v1  ;;  %v3510_v52 = vrot.slane %v3508_v58, 1  ;;  %v3520_v58 = vshrl.u32 %v9098_v56, 16  ;;  %v9104_v56 = vld [vmem:[%s9411_s12 + $0xa8] ss:$8 sps:$4 sm:$0xff]  }
 0x16b   : > { %v2214_v26 = vpop.f32.mrf.mxu0  ;;  %v10532_v22 = vsel %vm3375_vm2, %v3482_v37, %v3486_v36  ;;  %v3498_v0 = vor.u32 %v3496_v57, %v3486_v36  ;;  %v3502_v37 = vrot.slane %v3500_v59, 1  ;;  %v3512_v57 = vshrl.u32 %v9100_v15, 16 }
 0x16c   : > { %v10494_v46 = vadd.f32 %v2214_v26, %v10248_v33  ;;  %v10496_v41 = vpop.f32.mrf.mxu1  ;;  %v9109_v33 = vld [vmem:[%s12180_s1 + $0x348] sm:$0xff]   ;;  %v10535_v62 = vsel %vm3375_vm2, %v3506_v18, %v3510_v52  ;;  %v3522_v18 = vor.u32 %v3520_v58, %v3510_v52  ;;  %v3516_v59 = vshll.u32 %v9104_v56, 16 }
 0x16d   : > { %v2216_v17 = vpop.f32.mrf.mxu0  ;;  %4505 = vmatpush2.bf16.msra.mxu0 %v9105_v44  ;;  %v10556_v36 = vsel %vm3375_vm2, %v3498_v0, %v3502_v37  ;;  %v3536_v52 = vshrl.u32 %v9102_v51, 16  ;;  %v3514_v15 = vor.u32 %v3512_v57, %v3502_v37  ;;  %v3528_v37 = vshrl.u32 %v9104_v56, 16 }
 0x16e   : > { %v2613_v63 = vpop.f32.mrf.mxu1  ;;  %4506 = vmatprep.subr.bf16.mxu0 %v9293_v1 }
 0x16f   : > { %v2219_v6 = vpop.f32.mrf.mxu0  ;;  %3749 = vmatmul.mubr.bf16.gmra.mxu0 %v10499_v12 }
 0x170   : > { %v10511_v29 = vadd.f32 %v2219_v6, %v10262_v23  ;;  %v10513_v49 = vpop.f32.mrf.mxu1  ;;  %3989 = vmatmul.mubr.bf16.gmra.mxu1 %v10465_v53  ;;  %7955 = vmatprep.mubr.msk.bf16.mxu0 %vm1261_vm1, %v10503_v25  ;;  %v9114_v23 = vld [vmem:[%s12180_s1 + $0x340] sm:$0xff]  }
 0x171   : > { %v2221_v21 = vpop.f32.mrf.mxu0  ;;  %7982 = vmatprep.mubr.msk.bf16.mxu1 %vm1261_vm1, %v10470_v28  ;;  %4507 = vmatpush2.bf16.msra.mxu0 %v9109_v33  ;;  %v3524_v33 = vshll.u32 %v9102_v51, 16  ;;  %v9108_v51 = vld [vmem:[%s9411_s12 + $0xb8] ss:$8 sps:$4 sm:$0xff]  }
 0x172   : > { %v2618_v44 = vpop.f32.mrf.mxu1  ;;  %4508 = vmatprep.subr.bf16.mxu0 %v9293_v1  ;;  %v3532_v57 = vshll.u32 %v9108_v51, 16 }
 0x173   : > { %v2222_v32 = vpop.f32.mrf.mxu0  ;;  %v9106_v44 = vld [vmem:[%s9411_s12 + $0xbc] ss:$8 sps:$4 sm:$0xff]  }
 0x174   : > { %v10527_v39 = vadd.f32 %v2222_v32, %v10274_v47  ;;  %v10529_v26 = vpop.f32.mrf.mxu1  ;;  %v3540_v58 = vshll.u32 %v9106_v44, 16 }
 0x175   : > { %12211 = vst [vmem:[#allocation4_spill] sm:$0xff] %v10529_v26  ;;  %v2224_v17 = vpop.f32.mrf.mxu0  ;;  %4509 = vmatpush2.bf16.msra.mxu0 %v9114_v23  ;;  %v3526_v23 = vrot.slane %v3524_v33, 1 }
 0x176   : > { %12210 = vst [vmem:[#allocation3_spill] sm:$0xff] %v10527_v39  ;;  %v2621_v1 = vpop.f32.mrf.mxu1 }
 0x177   : > { %v2227_v63 = vpop.f32.mrf.mxu0  ;;  %3757 = vmatmul.mubr.bf16.gmra.mxu0 %v10532_v22 }
 0x178   : > { %v10539_v47 = vadd.f32 %v2227_v63, %v10281_v43  ;;  %v10541_v6 = vpop.f32.mrf.mxu1  ;;  %3997 = vmatmul.mubr.bf16.gmra.mxu1 %v10499_v12  ;;  %7956 = vmatprep.mubr.msk.bf16.mxu0 %vm1261_vm1, %v10535_v62 }
 0x179   : > { %12213 = vst [vmem:[#allocation6_spill] sm:$0xff] %v10541_v6  ;;  %v2229_v21 = vpop.f32.mrf.mxu0  ;;  %7983 = vmatprep.mubr.msk.bf16.mxu1 %vm1261_vm1, %v10503_v25 }
 0x17a   : > { %12212 = vst [vmem:[#allocation5_spill] sm:$0xff] %v10539_v47  ;;  %v2626_v43 = vpop.f32.mrf.mxu1  ;;  %v10559_v21 = vsel %vm3375_vm2, %v3522_v18, %v3526_v23  ;;  %v3518_v18 = vrot.slane %v3516_v59, 1 }
 0x17b   : > { %v2230_v32 = vpop.f32.mrf.mxu0  ;;  %v3256_v43 = vld [vmem:[%s9411_s12 + $0xc8] sm:$0x11] }
 0x17c   : > { %v10551_v17 = vadd.f32 %v2230_v32, %v10285_v4  ;;  %v10553_v1 = vpop.f32.mrf.mxu1  ;;  %v3228_v4 = vld [vmem:[%s9411_s12 + $0xb8] sm:$0x11]  ;;  %v10581_v39 = vsel %vm3375_vm2, %v3514_v15, %v3518_v18  ;;  %v3530_v56 = vor.u32 %v3528_v37, %v3518_v18  ;;  %v3534_v15 = vrot.slane %v3532_v57, 1 }
 0x17d   : > { %12215 = vst [vmem:[#allocation8_spill] sm:$0xff] %v10553_v1  ;;  %v2232_v63 = vpop.f32.mrf.mxu0  ;;  %v7936_v1 = vcombine.high %v3256_v43, %v3256_v43 }
 0x17e   : > { %12214 = vst [vmem:[#allocation7_spill] sm:$0xff] %v10551_v17  ;;  %v2629_v33 = vpop.f32.mrf.mxu1  ;;  %v3542_v17 = vrot.slane %v3540_v58, 1  ;;  %v10605_v18 = vsel %vm3375_vm2, %v3530_v56, %v3534_v15 }
 0x17f   : > { %v2235_v47 = vpop.f32.mrf.mxu0  ;;  %3765 = vmatmul.mubr.bf16.gmra.mxu0 %v10556_v36  ;;  %v3538_v33 = vor.u32 %v3536_v52, %v3526_v23  ;;  %v3552_v23 = vshrl.u32 %v9106_v44, 16  ;;  %v3556_v52 = vshll.u32 %v7936_v1, 16 }
 0x180   : > { %v10565_v32 = vadd.f32 %v2235_v47, %v10291_v20  ;;  %v10567_v0 = vpop.f32.mrf.mxu1  ;;  %4005 = vmatmul.mubr.bf16.gmra.mxu1 %v10532_v22  ;;  %7957 = vmatprep.mubr.msk.bf16.mxu0 %vm1261_vm1, %v10559_v21  ;;  %v7963_v20 = vcombine.high %v3228_v4, %v3228_v4 }
 0x181   : > { %12217 = vst [vmem:[#allocation10_spill] sm:$0xff] %v10567_v0  ;;  %v2237_v63 = vpop.f32.mrf.mxu0  ;;  %7984 = vmatprep.mubr.msk.bf16.mxu1 %vm1261_vm1, %v10535_v62  ;;  %v10597_v1 = vor.u32 %v3552_v23, %v3542_v17 }
 0x182   : > { %12216 = vst [vmem:[#allocation9_spill] sm:$0xff] %v10565_v32  ;;  %v2634_v6 = vpop.f32.mrf.mxu1  ;;  %v10584_v63 = vsel %vm3375_vm2, %v3538_v33, %v3542_v17 }
 0x183   : > { %v2238_v47 = vpop.f32.mrf.mxu0  ;;  %v3832_v6 = vshll.u32 %v7963_v20, 16  ;;  %v3558_v20 = vrot.slane %v3556_v52, 1 }
 0x184   : > { %v10576_v32 = vadd.f32 %v2238_v47, %v10295_v60  ;;  %v10578_v0 = vpop.f32.mrf.mxu1 }
 0x185   : > { %v2240_v59 = vpop.f32.mrf.mxu0  ;;  %v3559_v17 = vsel %vm3375_vm2, %v10597_v1, %v3558_v20 }
 0x186   : > { %12218 = vst [vmem:[#allocation11_spill] sm:$0xff] %v10576_v32  ;;  %v2637_v58 = vpop.f32.mrf.mxu1  ;;  %v7935_v59 = vcombine.low %v3256_v43, %v3256_v43  ;;  %v3544_v43 = vshrl.u32 %v9108_v51, 16 }
 0x187   : > { %v2243_v26 = vpop.f32.mrf.mxu0  ;;  %3773 = vmatmul.mubr.bf16.gmra.mxu0 %v10581_v39  ;;  %v7962_v58 = vcombine.low %v3228_v4, %v3228_v4 }
 0x188   : > { %v10588_v60 = vadd.f32 %v2243_v26, %v10303_v38  ;;  %v10590_v47 = vpop.f32.mrf.mxu1  ;;  %4013 = vmatmul.mubr.bf16.gmra.mxu1 %v10556_v36  ;;  %7958 = vmatprep.mubr.msk.bf16.mxu0 %vm1261_vm1, %v10584_v63  ;;  %v3834_v26 = vrot.slane %v3832_v6, 1  ;;  %v3548_v37 = vshll.u32 %v7935_v59, 16  ;;  %v10618_v51 = vor.u32 %v3544_v43, %v3534_v15 }
 0x189   : > { %12220 = vst [vmem:[#allocation13_spill] sm:$0xff] %v10590_v47  ;;  %v2245_v44 = vpop.f32.mrf.mxu0  ;;  %7985 = vmatprep.mubr.msk.bf16.mxu1 %vm1261_vm1, %v10559_v21  ;;  %v3827_v23 = vshll.u32 %v7962_v58, 16 }
 0x18a   : > { %12219 = vst [vmem:[#allocation12_spill] sm:$0xff] %v10588_v60  ;;  %v2642_v38 = vpop.f32.mrf.mxu1  ;;  %v3835_v4 = vsel %vm3375_vm2, %v3538_v33, %v3834_v26  ;;  %v3550_v59 = vrot.slane %v3548_v37, 1 }
 0x18b   : > { %v2246_v60 = vpop.f32.mrf.mxu0  ;;  %v3829_v20 = vrot.slane %v3827_v23, 1 }
 0x18c   : > { %v10600_v47 = vadd.f32 %v2246_v60, %v10313_v10  ;;  %v10602_v32 = vpop.f32.mrf.mxu1  ;;  %v3551_v26 = vsel %vm3375_vm2, %v10618_v51, %v3550_v59 }
 0x18d   : > { %v2248_v57 = vpop.f32.mrf.mxu0 }
 0x18e   : > { %v2645_v52 = vpop.f32.mrf.mxu1 }
 0x18f   : > { %v2251_v6 = vpop.f32.mrf.mxu0  ;;  %3781 = vmatmul.mubr.bf16.gmra.mxu0 %v10605_v18 }
 0x190   : > { %v10612_v10 = vadd.f32 %v2251_v6, %v10322_v40  ;;  %v10614_v60 = vpop.f32.mrf.mxu1  ;;  %4021 = vmatmul.mubr.bf16.gmra.mxu1 %v10581_v39  ;;  %7959 = vmatprep.mubr.msk.bf16.mxu0 %vm1261_vm1, %v3559_v17  ;;  %v3830_v17 = vsel %vm3375_vm2, %v3530_v56, %v3829_v20 }
 0x191   : > { %v2253_v44 = vpop.f32.mrf.mxu0  ;;  %7986 = vmatprep.mubr.msk.bf16.mxu1 %vm1261_vm1, %v3835_v4 }
 0x192   : > { %v2650_v33 = vpop.f32.mrf.mxu1 }
 0x193   : > { %v2254_v58 = vpop.f32.mrf.mxu0 }
 0x194   : > { %v10622_v38 = vadd.f32 %v2254_v58, %v10327_v2  ;;  %v10624_v40 = vpop.f32.mrf.mxu1 }
 0x195   : > { %v2256_v57 = vpop.f32.mrf.mxu0 }
 0x196   : > { %v2653_v15 = vpop.f32.mrf.mxu1 }
 0x197   : > { %v2259_v43 = vpop.f32.mrf.mxu0  ;;  %3789 = vmatmul.mubr.bf16.gmra.mxu0 %v3551_v26 }
 0x198   : > { %v10630_v37 = vadd.f32 %v2259_v43, %v10335_v8  ;;  %v10632_v23 = vpop.f32.mrf.mxu1  ;;  %4029 = vmatmul.mubr.bf16.gmra.mxu1 %v3830_v17  ;;  %8047 = vmatprep.mubr.msk.bf16.mxu0 %vm1261_vm1, %v10347_v42  ;;  %v263_v8 = vlaneseq }
 0x199   : > { %v2261_v2 = vpop.f32.mrf.mxu0 }
 0x19a   : > { %v2658_v52 = vpop.f32.mrf.mxu1  ;;  %v10649_v57 = vshrl.u32 %v263_v8, 7 }
 0x19b   : > { %v2262_v4 = vpop.f32.mrf.mxu0 }
 0x19c   : > { %v10637_v6 = vadd.f32 %v2262_v4, %v10343_v5  ;;  %v10639_v59 = vpop.f32.mrf.mxu1 }
 0x19d   : > { %v2264_v56 = vpop.f32.mrf.mxu0 }
 0x19e   : > { %v2661_v44 = vpop.f32.mrf.mxu1 }
 0x19f   : > { %v2267_v20 = vpop.f32.mrf.mxu0  ;;  %4511 = vmatmul.mubr.bf16.vlgmr.msra.gmra.mxu0 %v10363_v54 }
 0x1a0   : > { %v10643_v33 = vadd.f32 %v2267_v20, %v10355_v48  ;;  %v10645_v58 = vpop.f32.mrf.mxu1  ;;  %8048 = vmatprep.mubr.msk.bf16.mxu0 %vm1261_vm1, %v10369_v14  ;;  %v10658_v48 = vadd.s32 8, %v10649_v57 }
 0x1a1   : > { %v2269_v42 = vpop.f32.mrf.mxu0 }
 0x1a2   : > { %v2666_v26 = vpop.f32.mrf.mxu1  ;;  %12221 = vst [vmem:[#allocation14_spill] sm:$0xff] %v10658_v48  ;;  %v286_v44 = vadd.s32 8, %v10658_v48 }
 0x1a3   : > { %v2270_v5 = vpop.f32.mrf.mxu0 }
 0x1a4   : > { %v10652_v17 = vadd.f32 %v2270_v5, %v10366_v50  ;;  %v10654_v15 = vpop.f32.mrf.mxu1  ;;  %v10675_v5 = vadd.s32 24, %v10649_v57 }
 0x1a5   : > { %v2272_v54 = vpop.f32.mrf.mxu0 }
 0x1a6   : > { %v2669_v43 = vpop.f32.mrf.mxu1 }
 0x1a7   : > { %v2275_v2 = vpop.f32.mrf.mxu0  ;;  %4519 = vmatmul.mubr.bf16.gmra.mxu0 %v10391_v27 }
 0x1a8   : > { %v10661_v14 = vadd.f32 %v2275_v2, %v10381_v9  ;;  %v10663_v52 = vpop.f32.mrf.mxu1  ;;  %8049 = vmatprep.mubr.msk.bf16.mxu0 %vm1261_vm1, %v10398_v3  ;;  %v318_v9 = vand.u32 15, %v286_v44 }
 0x1a9   : > { %v2277_v50 = vpop.f32.mrf.mxu0 }
 0x1aa   : > { %v2674_v4 = vpop.f32.mrf.mxu1  ;;  %vm752_vm3 = vcmp.ne.s32.totalorder %v318_v9, 0 }
 0x1ab   : > { %v2278_v56 = vpop.f32.mrf.mxu0  ;;  %v288_v4 = vadd.s32 8, %v10675_v5 }
 0x1ac   : > { %v10669_v20 = vadd.f32 %v2278_v56, %v10395_v24  ;;  %v10671_v27 = vpop.f32.mrf.mxu1 }
 0x1ad   : > { %v2280_v8 = vpop.f32.mrf.mxu0 }
 0x1ae   : > { %v2677_v42 = vpop.f32.mrf.mxu1 }
 0x1af   : > { %v2791_v26 = vpop.f32.mrf.mxu0  ;;  %4527 = vmatmul.mubr.bf16.gmra.mxu0 %v10429_v7 }
 0x1b0   : > { %v2792_v3 = vadd.f32 %v2791_v26, %v10408_v34  ;;  %v3075_v54 = vpop.f32.mrf.mxu1  ;;  %8050 = vmatprep.mubr.msk.bf16.mxu0 %vm1261_vm1, %v10434_v61  ;;  %v2349_v26 = vsel %vm752_vm3, %v10424_v30, 0.0  ;;  %v332_v61 = vand.u32 15, %v288_v4 }
 0x1b1   : > { %v2793_v43 = vpop.f32.mrf.mxu0 }
 0x1b2   : > { %v3162_v24 = vadd.f32 %v3075_v54, %v2792_v3  ;;  %v3077_v2 = vpop.f32.mrf.mxu1  ;;  %v10688_v3 = vadd.s32 40, %v10649_v57  ;;  %vm754_vm4 = vcmp.ne.s32.totalorder %v332_v61, 0 }
 0x1b3   : > { %v2794_v50 = vpop.f32.mrf.mxu0 }
 0x1b4   : > { %v10682_v56 = vadd.f32 %v3162_v24, %v10406_v45  ;;  %v2795_v7 = vadd.f32 %v2794_v50, %v10426_v16  ;;  %v3078_v44 = vpop.f32.mrf.mxu1  ;;  %v290_v30 = vadd.s32 8, %v10688_v3 }
 0x1b5   : > { %v2796_v8 = vpop.f32.mrf.mxu0 }
 0x1b6   : > { %v3163_v42 = vadd.f32 %v3078_v44, %v2795_v7  ;;  %v3080_v34 = vpop.f32.mrf.mxu1 }
 0x1b7   : > { %v2799_v48 = vpop.f32.mrf.mxu0  ;;  %4535 = vmatmul.mubr.bf16.gmra.mxu0 %v10465_v53 }
 0x1b8   : > { %v10690_v9 = vadd.f32 %v3163_v42, %v2349_v26  ;;  %v2800_v45 = vadd.f32 %v2799_v48, %v10444_v11  ;;  %v3083_v54 = vpop.f32.mrf.mxu1  ;;  %8051 = vmatprep.mubr.msk.bf16.mxu0 %vm1261_vm1, %v10470_v28  ;;  %v2351_v48 = vsel %vm754_vm4, %v10460_v13, 0.0  ;;  %v346_v28 = vand.u32 15, %v290_v30 }
 0x1b9   : > { %v2801_v16 = vpop.f32.mrf.mxu0  ;;  %v10703_v42 = vadd.s32 56, %v10649_v57 }
 0x1ba   : > { %v3164_v43 = vadd.f32 %v3083_v54, %v2800_v45  ;;  %v3085_v24 = vpop.f32.mrf.mxu1  ;;  %vm756_vm5 = vcmp.ne.s32.totalorder %v346_v28, 0  ;;  %v12222_v28 = vld [vmem:[#allocation4_spill] sm:$0xff] }
 0x1bb   : > { %v2802_v2 = vpop.f32.mrf.mxu0  ;;  %v292_v13 = vadd.s32 8, %v10703_v42  ;;  %v2353_v30 = vsel %vm756_vm5, %v10494_v46, 0.0 }
 0x1bc   : > { %v10697_v53 = vadd.f32 %v3164_v43, %v10442_v35  ;;  %v2803_v50 = vadd.f32 %v2802_v2, %v10462_v31  ;;  %v3086_v4 = vpop.f32.mrf.mxu1 }
 0x1bd   : > { %v2804_v7 = vpop.f32.mrf.mxu0 }
 0x1be   : > { %v3165_v44 = vadd.f32 %v3086_v4, %v2803_v50  ;;  %v3088_v11 = vpop.f32.mrf.mxu1  ;;  %v10718_v4 = vadd.s32 72, %v10649_v57 }
 0x1bf   : > { %v2807_v8 = vpop.f32.mrf.mxu0  ;;  %4543 = vmatmul.mubr.bf16.gmra.mxu0 %v10499_v12 }
 0x1c0   : > { %v10705_v34 = vadd.f32 %v3165_v44, %v2351_v48  ;;  %v2808_v35 = vadd.f32 %v2807_v8, %v10480_v55  ;;  %v3091_v26 = vpop.f32.mrf.mxu1  ;;  %8052 = vmatprep.mubr.msk.bf16.mxu0 %vm1261_vm1, %v10503_v25  ;;  %v360_v25 = vand.u32 15, %v292_v13  ;;  %v294_v46 = vadd.s32 8, %v10718_v4 }
 0x1c1   : > { %v2809_v31 = vpop.f32.mrf.mxu0 }
 0x1c2   : > { %v3166_v61 = vadd.f32 %v3091_v26, %v2808_v35  ;;  %v3093_v45 = vpop.f32.mrf.mxu1  ;;  %vm758_vm6 = vcmp.ne.s32.totalorder %v360_v25, 0  ;;  %v374_v13 = vand.u32 15, %v294_v46 }
 0x1c3   : > { %v2810_v54 = vpop.f32.mrf.mxu0  ;;  %v12223_v45 = vld [vmem:[#allocation3_spill] sm:$0xff] }
 0x1c4   : > { %v10712_v12 = vadd.f32 %v3166_v61, %v10478_v19  ;;  %v2811_v16 = vadd.f32 %v2810_v54, %v10496_v41  ;;  %v3094_v43 = vpop.f32.mrf.mxu1  ;;  %v2355_v54 = vsel %vm758_vm6, %v12223_v45, 0.0  ;;  %vm10741_vm7 = vcmp.ne.s32.totalorder %v374_v13, 0 }
 0x1c5   : > { %v2812_v24 = vpop.f32.mrf.mxu0  ;;  %v10755_v45 = vadd.s32 104, %v10649_v57 }
 0x1c6   : > { %v3167_v2 = vadd.f32 %v3094_v43, %v2811_v16  ;;  %v3096_v55 = vpop.f32.mrf.mxu1  ;;  %v10733_v16 = vadd.s32 88, %v10649_v57 }
 0x1c7   : > { %v2815_v50 = vpop.f32.mrf.mxu0  ;;  %4551 = vmatmul.mubr.bf16.gmra.mxu0 %v10532_v22  ;;  %12230 = vst [vmem:[#allocation4_spill] sm:$0xff] %v10755_v45 }
 0x1c8   : > { %v10720_v7 = vadd.f32 %v3167_v2, %v2353_v30  ;;  %v2816_v19 = vadd.f32 %v2815_v50, %v10513_v49  ;;  %v3099_v44 = vpop.f32.mrf.mxu1  ;;  %8053 = vmatprep.mubr.msk.bf16.mxu0 %vm1261_vm1, %v10535_v62  ;;  %v9115_v30 = vld [vmem:[%s9411_s12 + $0xcc] ss:$8 sps:$4 sm:$0xff]  }
 0x1c9   : > { %v2817_v41 = vpop.f32.mrf.mxu0 }
 0x1ca   : > { %v3168_v11 = vadd.f32 %v3099_v44, %v2816_v19  ;;  %v3101_v48 = vpop.f32.mrf.mxu1  ;;  %v296_v44 = vadd.s32 8, %v10733_v16  ;;  %v12227_v41 = vld [vmem:[#allocation5_spill] sm:$0xff] }
 0x1cb   : > { %v2818_v8 = vpop.f32.mrf.mxu0  ;;  %v12228_v48 = vld [vmem:[#allocation8_spill] sm:$0xff] }
 0x1cc   : > { %v10727_v22 = vadd.f32 %v3168_v11, %v10511_v29  ;;  %v2819_v35 = vadd.f32 %v2818_v8, %v12222_v28  ;;  %v3102_v26 = vpop.f32.mrf.mxu1  ;;  %v12224_v29 = vld [vmem:[#allocation6_spill] sm:$0xff]  ;;  %v388_v13 = vand.u32 15, %v296_v44 }
 0x1cd   : > { %v2820_v31 = vpop.f32.mrf.mxu0 }
 0x1ce   : > { %v3169_v49 = vadd.f32 %v3102_v26, %v2819_v35  ;;  %v3104_v61 = vpop.f32.mrf.mxu1  ;;  %v4059_v31 = vld [vmem:[%s9411_s12 + $0xd8] sm:$0x11]  ;;  %vm10771_vm8 = vcmp.ne.s32.totalorder %v388_v13, 0 }
 0x1cf   : > { %v2823_v62 = vpop.f32.mrf.mxu0  ;;  %4559 = vmatmul.mubr.bf16.gmra.mxu0 %v10556_v36  ;;  %v9120_v36 = vld [vmem:[%s12182_s3 + $0xf8] sm:$0xff]  }
 0x1d0   : > { %v10735_v43 = vadd.f32 %v3169_v49, %v2355_v54  ;;  %v2824_v24 = vadd.f32 %v2823_v62, %v12224_v29  ;;  %v3107_v2 = vpop.f32.mrf.mxu1  ;;  %8054 = vmatprep.mubr.msk.bf16.mxu0 %vm1261_vm1, %v10559_v21  ;;  %v4342_v21 = vshll.u32 %v9115_v30, 16  ;;  %v12229_v49 = vld [vmem:[#allocation7_spill] sm:$0xff]  ;;  %v10759_v62 = vld [vmem:[%s9411_s12 + $0xc8] ss:$8 sps:$4 sm:$0xff]   ;;  %8575 = vmatprep.subr.bf16.mxu1 %v9120_v36 }
 0x1d1   : > { %v2825_v55 = vpop.f32.mrf.mxu0  ;;  %v2357_v61 = vsel %vm10741_vm7, %v12229_v49, 0.0  ;;  %8576 = vmatpush3.bf16.msra.mxu1 %v9120_v36 }
 0x1d2   : > { %v3170_v50 = vadd.f32 %v3107_v2, %v2824_v24  ;;  %v3109_v25 = vpop.f32.mrf.mxu1  ;;  %v12231_v24 = vld [vmem:[#allocation10_spill] sm:$0xff] }
 0x1d3   : > { %v2826_v19 = vpop.f32.mrf.mxu0  ;;  %v4344_v25 = vrot.slane %v4342_v21, 1 }
 0x1d4   : > { %v10747_v11 = vadd.f32 %v3170_v50, %v12227_v41  ;;  %v2827_v8 = vadd.f32 %v2826_v19, %v12228_v48  ;;  %v3110_v46 = vpop.f32.mrf.mxu1  ;;  %v8034_v19 = vcombine.high %v4059_v31, %v4059_v31  ;;  %v298_v48 = vadd.s32 8, %v10755_v45 }
 0x1d5   : > { %v2828_v28 = vpop.f32.mrf.mxu0  ;;  %v4345_v49 = vsel %vm3375_vm2, %v10597_v1, %v4344_v25 }
 0x1d6   : > { %v3171_v35 = vadd.f32 %v3110_v46, %v2827_v8  ;;  %v3112_v26 = vpop.f32.mrf.mxu1  ;;  %v4334_v8 = vshll.u32 %v10759_v62, 16 }
 0x1d7   : > { %v2831_v54 = vpop.f32.mrf.mxu0  ;;  %4567 = vmatmul.mubr.bf16.gmra.mxu0 %v10581_v39 }
 0x1d8   : > { %v10761_v29 = vadd.f32 %v3171_v35, %v2357_v61  ;;  %v2832_v2 = vadd.f32 %v2831_v54, %v12231_v24  ;;  %v3115_v55 = vpop.f32.mrf.mxu1  ;;  %8055 = vmatprep.mubr.msk.bf16.mxu0 %vm1261_vm1, %v10584_v63  ;;  %v12234_v63 = vld [vmem:[#allocation9_spill] sm:$0xff]  ;;  %v4354_v61 = vshrl.u32 %v9115_v30, 16  ;;  %v4358_v54 = vshll.u32 %v8034_v19, 16 }
 0x1d9   : > { %v2833_v50 = vpop.f32.mrf.mxu0  ;;  %v8033_v19 = vcombine.low %v4059_v31, %v4059_v31 }
 0x1da   : > { %v3172_v41 = vadd.f32 %v3115_v55, %v2832_v2  ;;  %v3117_v39 = vpop.f32.mrf.mxu1  ;;  %v12235_v55 = vld [vmem:[#allocation11_spill] sm:$0xff]  ;;  %v402_v50 = vand.u32 15, %v298_v48  ;;  %v4360_v46 = vrot.slane %v4358_v54, 1 }
 0x1db   : > { %v2834_v44 = vpop.f32.mrf.mxu0  ;;  %v2359_v13 = vsel %vm10771_vm8, %v12235_v55, 0.0 }
 0x1dc   : > { %v10776_v28 = vadd.f32 %v3172_v41, %v12234_v63  ;;  %v2835_v21 = vadd.f32 %v2834_v44, %v10578_v0  ;;  %v3118_v35 = vpop.f32.mrf.mxu1  ;;  %v10785_v41 = vadd.s32 120, %v10649_v57  ;;  %v4336_v0 = vrot.slane %v4334_v8, 1  ;;  %v12236_v44 = vld [vmem:[#allocation13_spill] sm:$0xff] }
 0x1dd   : > { %v2836_v26 = vpop.f32.mrf.mxu0  ;;  %vm10792_vm9 = vcmp.ne.s32.totalorder %v402_v50, 0 }
 0x1de   : > { %v3173_v24 = vadd.f32 %v3118_v35, %v2835_v21  ;;  %v3120_v2 = vpop.f32.mrf.mxu1  ;;  %v4356_v21 = vor.u32 %v4354_v61, %v4344_v25  ;;  %v4346_v25 = vshrl.u32 %v10759_v62, 16  ;;  %v4350_v61 = vshll.u32 %v8033_v19, 16 }
 0x1df   : > { %v2839_v39 = vpop.f32.mrf.mxu0  ;;  %4575 = vmatmul.mubr.bf16.gmra.mxu0 %v10605_v18  ;;  %v300_v18 = vadd.s32 8, %v10785_v41  ;;  %v12239_v2 = vld [vmem:[#allocation12_spill] sm:$0xff] }
 0x1e0   : > { %v10788_v36 = vadd.f32 %v3173_v24, %v2359_v13  ;;  %v2840_v1 = vadd.f32 %v2839_v39, %v12236_v44  ;;  %v3123_v30 = vpop.f32.mrf.mxu1  ;;  %8056 = vmatprep.mubr.msk.bf16.mxu0 %vm1261_vm1, %v4345_v49  ;;  %v4337_v24 = vsel %vm3375_vm2, %v10618_v51, %v4336_v0  ;;  %v4361_v13 = vsel %vm3375_vm2, %v4356_v21, %v4360_v46 }
 0x1e1   : > { %v2841_v63 = vpop.f32.mrf.mxu0  ;;  %v2361_v44 = vsel %vm10792_vm9, %v10600_v47, 0.0  ;;  %v10809_v51 = vadd.s32 136, %v10649_v57  ;;  %v4352_v21 = vrot.slane %v4350_v61, 1 }
 0x1e2   : > { %v3174_v35 = vadd.f32 %v3123_v30, %v2840_v1  ;;  %v3125_v48 = vpop.f32.mrf.mxu1  ;;  %v416_v1 = vand.u32 15, %v300_v18  ;;  %v4348_v63 = vor.u32 %v4346_v25, %v4336_v0 }
 0x1e3   : > { %v2842_v8 = vpop.f32.mrf.mxu0  ;;  %v302_v18 = vadd.s32 8, %v10809_v51 }
 0x1e4   : > { %v10800_v55 = vadd.f32 %v3174_v35, %v12239_v2  ;;  %v2843_v31 = vadd.f32 %v2842_v8, %v10602_v32  ;;  %v3126_v49 = vpop.f32.mrf.mxu1  ;;  %vm10815_vm10 = vcmp.ne.s32.totalorder %v416_v1, 0  ;;  %v4353_v2 = vsel %vm3375_vm2, %v4348_v63, %v4352_v21 }
 0x1e5   : > { %v2844_v54 = vpop.f32.mrf.mxu0  ;;  %v2363_v25 = vsel %vm10815_vm10, %v10622_v38, 0.0 }
 0x1e6   : > { %v3175_v50 = vadd.f32 %v3126_v49, %v2843_v31  ;;  %v3128_v39 = vpop.f32.mrf.mxu1  ;;  %v9121_v54 = vld [vmem:[%s12182_s3 + $0xf0] sm:$0xff]  }
 0x1e7   : > { %v2847_v30 = vpop.f32.mrf.mxu0  ;;  %4583 = vmatmul.mubr.bf16.gmra.mxu0 %v4337_v24  ;;  %8577 = vmatprep.subr.bf16.mxu1 %v9121_v54 }
 0x1e8   : > { %v10811_v32 = vadd.f32 %v3175_v50, %v2361_v44  ;;  %v2848_v62 = vadd.f32 %v2847_v30, %v10614_v60  ;;  %v3131_v19 = vpop.f32.mrf.mxu1  ;;  %8057 = vmatprep.mubr.msk.bf16.mxu0 %vm1261_vm1, %v4361_v13  ;;  %v10832_v13 = vadd.s32 152, %v10649_v57  ;;  %v9123_v44 = vld [vmem:[%s12182_s3 + $0x138] sm:$0xff]   ;;  %8578 = vmatpush3.bf16.msra.mxu1 %v9121_v54 }
 0x1e9   : > { %v2849_v46 = vpop.f32.mrf.mxu0  ;;  %8671 = vmatprep.subr.bf16.mxu0 %v9123_v44 }
 0x1ea   : > { %v3176_v35 = vadd.f32 %v3131_v19, %v2848_v62  ;;  %v3133_v48 = vpop.f32.mrf.mxu1  ;;  %12242 = vst [vmem:[#allocation3_spill] sm:$0xff] %v10832_v13  ;;  %8672 = vmatpush3.bf16.msra.mxu0 %v9123_v44  ;;  %v304_v63 = vadd.s32 8, %v10832_v13  ;;  %v9127_v44 = vld [vmem:[%s12182_s3 + $0x120] sm:$0xff]  }
 0x1eb   : > { %v2850_v26 = vpop.f32.mrf.mxu0 }
 0x1ec   : > { %v10821_v8 = vadd.f32 %v3176_v35, %v10612_v10  ;;  %v2851_v60 = vadd.f32 %v2850_v26, %v10624_v40  ;;  %v3134_v24 = vpop.f32.mrf.mxu1  ;;  %v430_v10 = vand.u32 15, %v302_v18  ;;  %v9124_v35 = vld [vmem:[%s12182_s3 + $0x130] sm:$0xff]  }
 0x1ed   : > { %v2852_v0 = vpop.f32.mrf.mxu0  ;;  %8673 = vmatprep.subr.bf16.mxu0 %v9124_v35 }
 0x1ee   : > { %v3177_v31 = vadd.f32 %v3134_v24, %v2851_v60  ;;  %v3136_v49 = vpop.f32.mrf.mxu1  ;;  %vm10840_vm11 = vcmp.ne.s32.totalorder %v430_v10, 0  ;;  %8674 = vmatpush3.bf16.msra.mxu0 %v9124_v35  ;;  %v10859_v24 = vadd.s32 168, %v10649_v57 }
 0x1ef   : > { %v2855_v61 = vpop.f32.mrf.mxu0  ;;  %4591 = vmatmul.mubr.bf16.gmra.mxu0 %v4353_v2  ;;  %v2365_v18 = vsel %vm10840_vm11, %v10637_v6, 0.0  ;;  %v9126_v49 = vld [vmem:[%s12182_s3 + $0x128] sm:$0xff]  }
 0x1f0   : > { %v10834_v40 = vadd.f32 %v3177_v31, %v2363_v25  ;;  %v2856_v50 = vadd.f32 %v2855_v61, %v10632_v23  ;;  %v3139_v39 = vpop.f32.mrf.mxu1  ;;  %12245 = vst [vmem:[#allocation6_spill] sm:$0xff] %v10859_v24  ;;  %8675 = vmatprep.subr.bf16.mxu0 %v9126_v49  ;;  %v306_v10 = vadd.s32 8, %v10859_v24 }
 0x1f1   : > { %v2857_v38 = vpop.f32.mrf.mxu0 }
 0x1f2   : > { %v3178_v1 = vadd.f32 %v3139_v39, %v2856_v50  ;;  %v3141_v30 = vpop.f32.mrf.mxu1  ;;  %8676 = vmatpush3.bf16.msra.mxu0 %v9126_v49 }
 0x1f3   : > { %v2858_v62 = vpop.f32.mrf.mxu0  ;;  %8677 = vmatprep.subr.bf16.mxu0 %v9127_v44 }
 0x1f4   : > { %v10846_v23 = vadd.f32 %v3178_v1, %v10630_v37  ;;  %v2859_v21 = vadd.f32 %v2858_v62, %v10639_v59  ;;  %v3142_v46 = vpop.f32.mrf.mxu1  ;;  %v9122_v37 = vld [vmem:[%s12182_s3 + $0xe8] sm:$0xff]   ;;  %v444_v59 = vand.u32 15, %v304_v63  ;;  %v458_v63 = vand.u32 15, %v306_v10 }
 0x1f5   : > { %v2860_v48 = vpop.f32.mrf.mxu0  ;;  %8579 = vmatprep.subr.bf16.mxu1 %v9122_v37 }
 0x1f6   : > { %v3179_v47 = vadd.f32 %v3142_v46, %v2859_v21  ;;  %v3144_v26 = vpop.f32.mrf.mxu1  ;;  %8580 = vmatpush3.bf16.msra.mxu1 %v9122_v37  ;;  %vm770_vm12 = vcmp.ne.s32.totalorder %v444_v59, 0  ;;  %8678 = vmatpush3.bf16.msra.mxu0 %v9127_v44  ;;  %v9125_v48 = vld [vmem:[%s12182_s3 + $0xe0] sm:$0xff]   ;;  %vm772_vm13 = vcmp.ne.s32.totalorder %v458_v63, 0  ;;  %v9130_v37 = vld [vmem:[%s12182_s3 + $0x110] sm:$0xff]   ;;  %v9140_v63 = vld [vmem:[%s12182_s3 + $0xc8] sm:$0xff]  }
 0x1f7   : > { %v2863_v60 = vpop.f32.mrf.mxu0  ;;  %v2367_v62 = vsel %vm770_vm12, %v10652_v17, 0.0  ;;  %8581 = vmatprep.subr.bf16.mxu1 %v9125_v48  ;;  %v2369_v49 = vsel %vm772_vm13, %v10669_v20, 0.0 }
 0x1f8   : > { %v10861_v2 = vadd.f32 %v3179_v47, %v2365_v18  ;;  %v2864_v0 = vadd.f32 %v2863_v60, %v10645_v58  ;;  %v3147_v31 = vpop.f32.mrf.mxu1 }
 0x1f9   : > { %v2865_v6 = vpop.f32.mrf.mxu0 }
 0x1fa   : > { %v3180_v25 = vadd.f32 %v3147_v31, %v2864_v0  ;;  %v3149_v61 = vpop.f32.mrf.mxu1  ;;  %8582 = vmatpush3.bf16.msra.mxu1 %v9125_v48 }
 0x1fb   : > { %v2866_v54 = vpop.f32.mrf.mxu0  ;;  %v9131_v61 = vld [vmem:[%s12182_s3 + $0x108] sm:$0xff]  }
 0x1fc   : > { %v10869_v50 = vadd.f32 %v3180_v25, %v10643_v33  ;;  %v2867_v58 = vadd.f32 %v2866_v54, %v10654_v15  ;;  %v3150_v39 = vpop.f32.mrf.mxu1  ;;  %v9128_v15 = vld [vmem:[%s12182_s3 + $0x118] sm:$0xff]  }
 0x1fd   : > { %v2868_v38 = vpop.f32.mrf.mxu0  ;;  %8679 = vmatprep.subr.bf16.mxu0 %v9128_v15 }
 0x1fe   : > { %12246 = vst [vmem:[#allocation5_spill] sm:$0xff] %v10869_v50  ;;  %v3181_v1 = vadd.f32 %v3150_v39, %v2867_v58  ;;  %v3152_v30 = vpop.f32.mrf.mxu1  ;;  %8680 = vmatpush3.bf16.msra.mxu0 %v9128_v15  ;;  %v9138_v39 = vld [vmem:[%s12182_s3 + $0xd0] sm:$0xff]   ;;  %v9139_v38 = vld [vmem:[%s12182_s3 + $0x100] sm:$0xff]  }
 0x1ff   : > { %v2871_v19 = vpop.f32.mrf.mxu0  ;;  %8681 = vmatprep.subr.bf16.mxu0 %v9130_v37 }
 0x200   : > { %v10876_v21 = vadd.f32 %v3181_v1, %v2367_v62  ;;  %v2872_v33 = vadd.f32 %v2871_v19, %v10663_v52  ;;  %v3155_v46 = vpop.f32.mrf.mxu1 }
 0x201   : > { %v2873_v35 = vpop.f32.mrf.mxu0 }
 0x202   : > { %12247 = vst [vmem:[#allocation8_spill] sm:$0xff] %v10876_v21  ;;  %v3182_v47 = vadd.f32 %v3155_v46, %v2872_v33  ;;  %v3157_v26 = vpop.f32.mrf.mxu1  ;;  %8682 = vmatpush3.bf16.msra.mxu0 %v9130_v37 }
 0x203   : > { %v2874_v17 = vpop.f32.mrf.mxu0  ;;  %8683 = vmatprep.subr.bf16.mxu0 %v9131_v61 }
 0x204   : > { %v10886_v18 = vadd.f32 %v3182_v47, %v10661_v14  ;;  %v2875_v52 = vadd.f32 %v2874_v17, %v10671_v27  ;;  %v3158_v60 = vpop.f32.mrf.mxu1  ;;  %v9129_v14 = vld [vmem:[%s12182_s3 + $0xd8] sm:$0xff]   ;;  %v9141_v47 = vld [vmem:[%s12182_s3 + $0xc0] sm:$0xff]  }
 0x205   : > { %v2876_v59 = vpop.f32.mrf.mxu0  ;;  %8583 = vmatprep.subr.bf16.mxu1 %v9129_v14 }
 0x206   : > { %12248 = vst [vmem:[#allocation7_spill] sm:$0xff] %v10886_v18  ;;  %v3183_v0 = vadd.f32 %v3158_v60, %v2875_v52  ;;  %v3160_v31 = vpop.f32.mrf.mxu1  ;;  %8584 = vmatpush3.bf16.msra.mxu1 %v9129_v14  ;;  %8684 = vmatpush3.bf16.msra.mxu0 %v9131_v61 }
 0x207   : > { %v3710_v6 = vpop.f32.mrf.mxu0  ;;  %8585 = vmatprep.subr.bf16.mxu1 %v9138_v39  ;;  %8685 = vmatprep.subr.bf16.mxu0 %v9139_v38 }
 0x208   : > { %v10896_v25 = vadd.f32 %v3183_v0, %v2369_v49  ;;  %v3950_v27 = vpop.f32.mrf.mxu1 }
 0x209   : > { %v10901_v54 = vadd.f32 %v3950_v27, %v3710_v6  ;;  %v3712_v10 = vpop.f32.mrf.mxu0 }
 0x20a   : > { %12249 = vst [vmem:[#allocation10_spill] sm:$0xff] %v10896_v25  ;;  %v3952_v58 = vpop.f32.mrf.mxu1  ;;  %8586 = vmatpush3.bf16.msra.mxu1 %v9138_v39  ;;  %8686 = vmatpush3.bf16.msra.mxu0 %v9139_v38 }
 0x20b   : > { %v3713_v20 = vpop.f32.mrf.mxu0  ;;  %8587 = vmatprep.subr.bf16.mxu1 %v9140_v63 }
 0x20c   : > { %v3953_v44 = vpop.f32.mrf.mxu1 }
 0x20d   : > { %v10909_v1 = vadd.f32 %v3953_v44, %v3713_v20  ;;  %v3715_v30 = vpop.f32.mrf.mxu0 }
 0x20e   : > { %v3955_v62 = vpop.f32.mrf.mxu1  ;;  %8588 = vmatpush3.bf16.msra.mxu1 %v9140_v63 }
 0x20f   : > { %v3718_v19 = vpop.f32.mrf.mxu0  ;;  %8589 = vmatprep.subr.bf16.mxu1 %v9141_v47 }
 0x210   : > { %v3958_v33 = vpop.f32.mrf.mxu1 }
 0x211   : > { %v10914_v46 = vadd.f32 %v3958_v33, %v3718_v19  ;;  %v3720_v15 = vpop.f32.mrf.mxu0 }
 0x212   : > { %v3960_v35 = vpop.f32.mrf.mxu1  ;;  %8590 = vmatpush3.bf16.msra.mxu1 %v9141_v47 }
 0x213   : > { %v3721_v48 = vpop.f32.mrf.mxu0 }
 0x214   : > { %v3961_v26 = vpop.f32.mrf.mxu1 }
 0x215   : > { %v10919_v17 = vadd.f32 %v3961_v26, %v3721_v48  ;;  %v3723_v52 = vpop.f32.mrf.mxu0  ;;  %v10932_v48 = vld [vmem:[%s12182_s3 + $0x1f8] sm:$0xff]  }
 0x216   : > { %v3963_v60 = vpop.f32.mrf.mxu1  ;;  %8735 = vmatprep.subr.bf16.mxu0 %v10932_v48 }
 0x217   : > { %v3726_v37 = vpop.f32.mrf.mxu0 }
 0x218   : > { %v3966_v59 = vpop.f32.mrf.mxu1 }
 0x219   : > { %v10921_v0 = vadd.f32 %v3966_v59, %v3726_v37  ;;  %v3728_v31 = vpop.f32.mrf.mxu0 }
 0x21a   : > { %v3968_v49 = vpop.f32.mrf.mxu1 }
 0x21b   : > { %v3729_v6 = vpop.f32.mrf.mxu0 }
 0x21c   : > { %v3969_v14 = vpop.f32.mrf.mxu1 }
 0x21d   : > { %v10923_v27 = vadd.f32 %v3969_v14, %v3729_v6  ;;  %v3731_v61 = vpop.f32.mrf.mxu0  ;;  %v10942_v14 = vld [vmem:[%s12182_s3 + $0x38] sm:$0xff]  }
 0x21e   : > { %v3971_v10 = vpop.f32.mrf.mxu1  ;;  %8607 = vmatprep.subr.bf16.mxu1 %v10942_v14 }
 0x21f   : > { %v3734_v58 = vpop.f32.mrf.mxu0 }
 0x220   : > { %v3974_v20 = vpop.f32.mrf.mxu1 }
 0x221   : > { %v10925_v39 = vadd.f32 %v3974_v20, %v3734_v58  ;;  %v3736_v44 = vpop.f32.mrf.mxu0 }
 0x222   : > { %v3976_v38 = vpop.f32.mrf.mxu1 }
 0x223   : > { %v3737_v30 = vpop.f32.mrf.mxu0 }
 0x224   : > { %v3977_v62 = vpop.f32.mrf.mxu1 }
 0x225   : > { %v10927_v19 = vadd.f32 %v3977_v62, %v3737_v30  ;;  %v3739_v63 = vpop.f32.mrf.mxu0 }
 0x226   : > { %v3979_v33 = vpop.f32.mrf.mxu1 }
 0x227   : > { %v3742_v15 = vpop.f32.mrf.mxu0 }
 0x228   : > { %v3982_v35 = vpop.f32.mrf.mxu1 }
 0x229   : > { %v10934_v47 = vadd.f32 %v3982_v35, %v3742_v15  ;;  %v3744_v26 = vpop.f32.mrf.mxu0 }
 0x22a   : > { %v3984_v52 = vpop.f32.mrf.mxu1 }
 0x22b   : > { %v3745_v60 = vpop.f32.mrf.mxu0 }
 0x22c   : > { %v3985_v37 = vpop.f32.mrf.mxu1 }
 0x22d   : > { %v10937_v59 = vadd.f32 %v3985_v37, %v3745_v60  ;;  %v3747_v31 = vpop.f32.mrf.mxu0 }
 0x22e   : > { %v3987_v49 = vpop.f32.mrf.mxu1 }
 0x22f   : > { %v3750_v6 = vpop.f32.mrf.mxu0 }
 0x230   : > { %v3990_v61 = vpop.f32.mrf.mxu1 }
 0x231   : > { %v10944_v10 = vadd.f32 %v3990_v61, %v3750_v6  ;;  %v3752_v58 = vpop.f32.mrf.mxu0 }
 0x232   : > { %v3992_v20 = vpop.f32.mrf.mxu1 }
 0x233   : > { %v3753_v44 = vpop.f32.mrf.mxu0 }
 0x234   : > { %v3993_v38 = vpop.f32.mrf.mxu1 }
 0x235   : > { %v10947_v30 = vadd.f32 %v3993_v38, %v3753_v44  ;;  %v3755_v62 = vpop.f32.mrf.mxu0 }
 0x236   : > { %v3995_v63 = vpop.f32.mrf.mxu1 }
 0x237   : > { %v3758_v33 = vpop.f32.mrf.mxu0 }
 0x238   : > { %v3998_v15 = vpop.f32.mrf.mxu1 }
 0x239   : > { %v10949_v35 = vadd.f32 %v3998_v15, %v3758_v33  ;;  %v3760_v26 = vpop.f32.mrf.mxu0 }
 0x23a   : > { %v4000_v52 = vpop.f32.mrf.mxu1 }
 0x23b   : > { %v3761_v60 = vpop.f32.mrf.mxu0 }
 0x23c   : > { %v4001_v37 = vpop.f32.mrf.mxu1 }
 0x23d   : > { %v10951_v31 = vadd.f32 %v4001_v37, %v3761_v60  ;;  %v3763_v49 = vpop.f32.mrf.mxu0 }
 0x23e   : > { %v4003_v6 = vpop.f32.mrf.mxu1 }
 0x23f   : > { %v3766_v61 = vpop.f32.mrf.mxu0 }
 0x240   : > { %v4006_v58 = vpop.f32.mrf.mxu1 }
 0x241   : > { %v10953_v20 = vadd.f32 %v4006_v58, %v3766_v61  ;;  %v3768_v44 = vpop.f32.mrf.mxu0 }
 0x242   : > { %v4008_v38 = vpop.f32.mrf.mxu1 }
 0x243   : > { %v3769_v62 = vpop.f32.mrf.mxu0 }
 0x244   : > { %v4009_v63 = vpop.f32.mrf.mxu1 }
 0x245   : > { %v10955_v25 = vadd.f32 %v4009_v63, %v3769_v62  ;;  %v3771_v33 = vpop.f32.mrf.mxu0 }
 0x246   : > { %v4011_v15 = vpop.f32.mrf.mxu1 }
 0x247   : > { %v3774_v26 = vpop.f32.mrf.mxu0 }
 0x248   : > { %v4014_v52 = vpop.f32.mrf.mxu1 }
 0x249   : > { %v10957_v18 = vadd.f32 %v4014_v52, %v3774_v26  ;;  %v3776_v60 = vpop.f32.mrf.mxu0 }
 0x24a   : > { %v4016_v37 = vpop.f32.mrf.mxu1 }
 0x24b   : > { %v3777_v49 = vpop.f32.mrf.mxu0 }
 0x24c   : > { %v4017_v6 = vpop.f32.mrf.mxu1 }
 0x24d   : > { %v10959_v24 = vadd.f32 %v4017_v6, %v3777_v49  ;;  %v3779_v61 = vpop.f32.mrf.mxu0 }
 0x24e   : > { %v4019_v58 = vpop.f32.mrf.mxu1 }
 0x24f   : > { %v3782_v44 = vpop.f32.mrf.mxu0  ;;  %v12252_v58 = vld [vmem:[#allocation14_spill] sm:$0xff] }
 0x250   : > { %v4022_v38 = vpop.f32.mrf.mxu1 }
 0x251   : > { %v10961_v21 = vadd.f32 %v4022_v38, %v3782_v44  ;;  %v3784_v62 = vpop.f32.mrf.mxu0  ;;  %v311_v44 = vand.u32 15, %v12252_v58  ;;  %v10970_v38 = vadd.s32 16, %v10649_v57 }
 0x252   : > { %v4024_v63 = vpop.f32.mrf.mxu1 }
 0x253   : > { %v3785_v33 = vpop.f32.mrf.mxu0  ;;  %12253 = vst [vmem:[#allocation13_spill] sm:$0xff] %v10970_v38  ;;  %vm10976_vm14 = vcmp.ne.s32.totalorder %v311_v44, 15 }
 0x254   : > { %v4025_v15 = vpop.f32.mrf.mxu1 }
 0x255   : > { %v10963_v50 = vadd.f32 %v4025_v15, %v3785_v33  ;;  %v3787_v26 = vpop.f32.mrf.mxu0  ;;  %v10974_v15 = vstv %s8060_s25 }
 0x256   : > { %v4027_v52 = vpop.f32.mrf.mxu1  ;;  %v4764_v44 = vadd.s32 %v10974_v15, %v12252_v58 }
 0x257   : > { %12250 = vst [vmem:[#allocation9_spill] sm:$0xff] %v10963_v50  ;;  %v3790_v60 = vpop.f32.mrf.mxu0  ;;  %v12255_v52 = vmov 0 }
 0x258   : > { %v4030_v37 = vpop.f32.mrf.mxu1  ;;  %v12256_v52 = vsel %vm10976_vm14, 4294967295, %v12255_v52  ;;  %vm4786_vm3 = vcmp.ge.s32.totalorder %v4764_v44, 0  ;;  %vm4808_vm4 = vcmp.lt.s32.totalorder %v4764_v44, 256 }
 0x259   : > { %v10966_v13 = vadd.f32 %v4030_v37, %v3790_v60  ;;  %v3792_v49 = vpop.f32.mrf.mxu0  ;;  %12257 = vst [vmem:[#allocation14_spill] sm:$0xff] %v12256_v52  ;;  %v287_v37 = vadd.s32 8, %v10970_v38  ;;  %vm4830_vm7 = vmand %vm4786_vm3, %vm4808_vm4 }
 0x25a   : > { %v4032_v6 = vpop.f32.mrf.mxu1 }
 0x25b   : > { %12251 = vst [vmem:[#allocation11_spill] sm:$0xff] %v10966_v13  ;;  %v3793_v61 = vpop.f32.mrf.mxu0  ;;  %v4763_v6 = vadd.s32 %v10974_v15, %v10649_v57 }
 0x25c   : > { %v4033_v62 = vpop.f32.mrf.mxu1 }
 0x25d   : > { %v10972_v63 = vadd.f32 %v4033_v62, %v3793_v61  ;;  %v3795_v33 = vpop.f32.mrf.mxu0  ;;  %v10989_v62 = vld [vmem:[%s12181_s2] ss:$0 sm:$0xff]  ;;  %vm4785_vm15 = vcmp.ge.s32.totalorder %v4763_v6, 0  ;;  %vm4807_vm1 = vcmp.lt.s32.totalorder %v4763_v6, 256 }
 0x25e   : > { %v4035_v26 = vpop.f32.mrf.mxu1  ;;  %vm4829_vm6 = vmand %vm4785_vm15, %vm4807_vm1 }
 0x25f   : > { %12254 = vst [vmem:[#allocation12_spill] sm:$0xff] %v10972_v63  ;;  %v4512_v60 = vpop.f32.mrf.mxu0  ;;  %v325_v63 = vand.u32 15, %v287_v37 }
 0x260   : > { %v4599_v49 = vadd.f32 %v4512_v60, %v10901_v54  ;;  %v10995_v54 = vadd.s32 32, %v10649_v57 }
 0x261   : > { %v4514_v13 = vpop.f32.mrf.mxu0  ;;  %vm775_vm5 = vcmp.ne.s32.totalorder %v325_v63, 15 }
 0x262   : > { %v4665_v61 = vsel %vm10976_vm14, %v4599_v49, 0.0 }
 0x263   : > { %v4687_v33 = vadd.f32 %v4665_v61, %v10682_v56  ;;  %v4515_v26 = vpop.f32.mrf.mxu0  ;;  %v289_v56 = vadd.s32 8, %v10995_v54 }
 0x264   : > { %v4600_v13 = vadd.f32 %v4515_v26, %v10909_v1  ;;  %v4765_v1 = vadd.s32 %v10974_v15, %v10970_v38 }
 0x265   : > { %v4716_v60 = vadd.f32 %v10989_v62, %v4687_v33  ;;  %v4517_v49 = vpop.f32.mrf.mxu0 }
 0x266   : > { %v4688_v52 = vadd.f32 %v4600_v13, %v10690_v9  ;;  %v4766_v9 = vadd.s32 %v10974_v15, %v10675_v5  ;;  %v339_v13 = vand.u32 15, %v289_v56  ;;  %vm4787_vm8 = vcmp.ge.s32.totalorder %v4765_v1, 0 }
 0x267   : > { %v4520_v58 = vpop.f32.mrf.mxu0  ;;  %v4738_v61 = vmax.f32 %v4716_v60, 0.0  ;;  %v11009_v60 = vadd.s32 48, %v10649_v57  ;;  %vm4809_vm9 = vcmp.lt.s32.totalorder %v4765_v1, 256  ;;  %v4767_v1 = vadd.s32 %v10974_v15, %v10995_v54 }
 0x268   : > { %v4717_v37 = vadd.f32 %v10989_v62, %v4688_v52  ;;  %v4601_v50 = vadd.f32 %v4520_v58, %v10914_v46  ;;  %vm4788_vm10 = vcmp.ge.s32.totalorder %v4766_v9, 0  ;;  %vm4810_vm11 = vcmp.lt.s32.totalorder %v4766_v9, 256  ;;  %vm4831_vm13 = vmand %vm4787_vm8, %vm4809_vm9 }
 0x269   : > { %v4522_v6 = vpop.f32.mrf.mxu0  ;;  %v4895_v52 = vsel %vm4829_vm6, %v4738_v61, 0.0  ;;  %vm777_vm12 = vcmp.ne.s32.totalorder %v339_v13, 15  ;;  %v291_v56 = vadd.s32 8, %v11009_v60  ;;  %vm4832_vm15 = vmand %vm4788_vm10, %vm4810_vm11  ;;  %v4768_v9 = vadd.s32 %v10974_v15, %v10688_v3 }
 0x26a   : > { %v4739_v33 = vmax.f32 %v4717_v37, 0.0  ;;  %v4667_v26 = vsel %vm775_vm5, %v4601_v50, 0.0  ;;  %vm4789_vm1 = vcmp.ge.s32.totalorder %v4767_v1, 0  ;;  %vm4811_vm3 = vcmp.lt.s32.totalorder %v4767_v1, 256 }
 0x26b   : > { %v4689_v63 = vadd.f32 %v4667_v26, %v10697_v53  ;;  %v4523_v44 = vpop.f32.mrf.mxu0  ;;  %v353_v13 = vand.u32 15, %v291_v56  ;;  %vm4790_vm4 = vcmp.ge.s32.totalorder %v4768_v9, 0  ;;  %vm4812_vm5 = vcmp.lt.s32.totalorder %v4768_v9, 256 }
 0x26c   : > { %v4896_v49 = vsel %vm4830_vm7, %v4739_v33, 0.0  ;;  %v4602_v46 = vadd.f32 %v4523_v44, %v10919_v17  ;;  %v4770_v56 = vadd.s32 %v10974_v15, %v10703_v42  ;;  %vm4833_vm7 = vmand %vm4789_vm1, %vm4811_vm3 }
 0x26d   : > { %v8369_v58 = vpack.c.bf16 %v4896_v49, %v4895_v52  ;;  %v4718_v38 = vadd.f32 %v10989_v62, %v4689_v63  ;;  %v4525_v50 = vpop.f32.mrf.mxu0  ;;  %vm779_vm6 = vcmp.ne.s32.totalorder %v353_v13, 15  ;;  %vm4834_vm8 = vmand %vm4790_vm4, %vm4812_vm5 }
 0x26e   : > { %v4690_v37 = vadd.f32 %v4602_v46, %v10705_v34  ;;  %vm4792_vm11 = vcmp.ge.s32.totalorder %v4770_v56, 0 }
 0x26f   : > { %8370 = vst [vmem:[#allocation2] sm:$0xff] %v8369_v58   ;;  %v4528_v53 = vpop.f32.mrf.mxu0  ;;  %v4740_v6 = vmax.f32 %v4718_v38, 0.0  ;;  %v11023_v38 = vadd.s32 64, %v10649_v57 }
 0x270   : > { %v4719_v61 = vadd.f32 %v10989_v62, %v4690_v37  ;;  %v4603_v17 = vadd.f32 %v4528_v53, %v10921_v0 }
 0x271   : > { %v4530_v33 = vpop.f32.mrf.mxu0  ;;  %v4897_v52 = vsel %vm4831_vm13, %v4740_v6, 0.0  ;;  %v11034_v6 = vadd.s32 80, %v10649_v57 }
 0x272   : > { %v4741_v26 = vmax.f32 %v4719_v61, 0.0  ;;  %v4669_v34 = vsel %vm777_vm12, %v4603_v17, 0.0  ;;  %vm4814_vm12 = vcmp.lt.s32.totalorder %v4770_v56, 256 }
 0x273   : > { %v4691_v63 = vadd.f32 %v4669_v34, %v10712_v12  ;;  %v4531_v44 = vpop.f32.mrf.mxu0  ;;  %v4769_v12 = vadd.s32 %v10974_v15, %v11009_v60  ;;  %vm4836_vm1 = vmand %vm4792_vm11, %vm4814_vm12  ;;  %v11083_v56 = vadd.s32 %v10974_v15, %v11034_v6 }
 0x274   : > { %v4898_v49 = vsel %vm4832_vm15, %v4741_v26, 0.0  ;;  %v4604_v0 = vadd.f32 %v4531_v44, %v10923_v27  ;;  %v293_v27 = vadd.s32 8, %v11023_v38  ;;  %v295_v44 = vadd.s32 8, %v11034_v6 }
 0x275   : > { %v8374_v46 = vpack.c.bf16 %v4898_v49, %v4897_v52  ;;  %v4720_v58 = vadd.f32 %v10989_v62, %v4691_v63  ;;  %v4533_v50 = vpop.f32.mrf.mxu0  ;;  %vm4791_vm9 = vcmp.ge.s32.totalorder %v4769_v12, 0  ;;  %vm4813_vm10 = vcmp.lt.s32.totalorder %v4769_v12, 256 }
 0x276   : > { %v4692_v37 = vadd.f32 %v4604_v0, %v10720_v7  ;;  %v367_v63 = vand.u32 15, %v293_v27  ;;  %v11045_v50 = vadd.s32 96, %v10649_v57  ;;  %vm11064_vm15 = vmand %vm4791_vm9, %vm4813_vm10  ;;  %vm4817_vm10 = vcmp.lt.s32.totalorder %v11083_v56, 256 }
 0x277   : > { %8421 = vst [vmem:[#allocation2 + $0x8] sm:$0xff] %v8374_v46   ;;  %v4536_v53 = vpop.f32.mrf.mxu0  ;;  %v4742_v61 = vmax.f32 %v4720_v58, 0.0  ;;  %v4771_v58 = vadd.s32 %v10974_v15, %v11023_v38 }
 0x278   : > { %v4721_v7 = vadd.f32 %v10989_v62, %v4692_v37  ;;  %v4605_v17 = vadd.f32 %v4536_v53, %v10925_v39  ;;  %vm11054_vm13 = vcmp.ne.s32.totalorder %v367_v63, 15  ;;  %v297_v12 = vadd.s32 8, %v11045_v50 }
 0x279   : > { %v4538_v1 = vpop.f32.mrf.mxu0  ;;  %v4899_v13 = vsel %vm4833_vm7, %v4742_v61, 0.0  ;;  %vm4793_vm3 = vcmp.ge.s32.totalorder %v4771_v58, 0  ;;  %vm4815_vm4 = vcmp.lt.s32.totalorder %v4771_v58, 256 }
 0x27a   : > { %v4743_v33 = vmax.f32 %v4721_v7, 0.0  ;;  %v4671_v26 = vsel %vm779_vm6, %v4605_v17, 0.0  ;;  %v4772_v17 = vadd.s32 %v10974_v15, %v10718_v4  ;;  %v381_v1 = vand.u32 15, %v295_v44  ;;  %vm11101_vm9 = vmand %vm4793_vm3, %vm4815_vm4 }
 0x27b   : > { %v4693_v34 = vadd.f32 %v4671_v26, %v10727_v22  ;;  %v4539_v9 = vpop.f32.mrf.mxu0  ;;  %v11047_v22 = vld [vmem:[#allocation2 + $0x4] sm:$0xf] }
 0x27c   : > { %v4900_v52 = vsel %vm4834_vm8, %v4743_v33, 0.0  ;;  %v4606_v49 = vadd.f32 %v4539_v9, %v10927_v19  ;;  %vm4794_vm5 = vcmp.ge.s32.totalorder %v4772_v17, 0  ;;  %vm11077_vm6 = vcmp.ne.s32.totalorder %v381_v1, 15 }
 0x27d   : > { %v8379_v0 = vpack.c.bf16 %v4900_v52, %v4899_v13  ;;  %v4722_v39 = vadd.f32 %v10989_v62, %v4693_v34  ;;  %v4541_v46 = vpop.f32.mrf.mxu0  ;;  %vm4816_vm7 = vcmp.lt.s32.totalorder %v4772_v17, 256  ;;  %v11091_v33 = vadd.s32 112, %v10649_v57 }
 0x27e   : > { %v4694_v37 = vadd.f32 %v4606_v49, %v10735_v43  ;;  %v11050_v53 = vld [vmem:[#allocation2 + $0x8] sm:$0xf]  ;;  %v11052_v27 = vld [vmem:[#allocation2 + $0xc] sm:$0xf]  ;;  %vm4795_vm8 = vcmp.ge.s32.totalorder %v11083_v56, 0  ;;  %vm11110_vm11 = vmand %vm4794_vm5, %vm4816_vm7 }
 0x27f   : > { %v5090_v19 = vld [vmem:[#allocation2 + $0x8] sm:$0x8]  ;;  %8422 = vst [vmem:[#allocation2 + $0x10] sm:$0xff] %v8379_v0   ;;  %v4544_v7 = vpop.f32.mrf.mxu0  ;;  %v4744_v26 = vmax.f32 %v4722_v39, 0.0  ;;  %v299_v17 = vadd.s32 8, %v11091_v33 }
 0x280   : > { %v4723_v34 = vadd.f32 %v10989_v62, %v4694_v37  ;;  %v4607_v9 = vadd.f32 %v4544_v7, %v10934_v47  ;;  %v8099_v44 = vcombine.low %v5090_v19, %v11052_v27 }
 0x281   : > { %v4546_v63 = vpop.f32.mrf.mxu0  ;;  %v4901_v39 = vsel %vm11064_vm15, %v4744_v26, 0.0 }
 0x282   : > { %v4745_v13 = vmax.f32 %v4723_v34, 0.0  ;;  %v4673_v52 = vsel %vm11054_vm13, %v4607_v9, 0.0  ;;  %v5154_v7 = vshrl.u32 %v8099_v44, 16  ;;  %v5157_v1 = vshll.u32 %v8099_v44, 16 }
 0x283   : > { %v4695_v49 = vadd.f32 %v4673_v52, %v10747_v11  ;;  %v4547_v0 = vpop.f32.mrf.mxu0  ;;  %v395_v52 = vand.u32 15, %v297_v12 }
 0x284   : > { %v4902_v46 = vsel %vm4836_vm1, %v4745_v13, 0.0  ;;  %v4608_v37 = vadd.f32 %v4547_v0, %v10937_v59  ;;  %v4774_v13 = vadd.s32 %v10974_v15, %v10733_v16  ;;  %v5156_v58 = vrot.slane %v5154_v7, 3  ;;  %vm11149_vm1 = vmand %vm4795_vm8, %vm4817_vm10 }
 0x285   : > { %v8384_v19 = vpack.c.bf16 %v4902_v46, %v4901_v39  ;;  %v4724_v11 = vadd.f32 %v10989_v62, %v4695_v49  ;;  %v4549_v61 = vpop.f32.mrf.mxu0  ;;  %vm11117_vm12 = vcmp.ne.s32.totalorder %v395_v52, 15  ;;  %v11130_v52 = vadd.s32 %v10974_v15, %v11045_v50 }
 0x286   : > { %v4696_v34 = vadd.f32 %v4608_v37, %v10761_v29  ;;  %v5061_v9 = vld [vmem:[#allocation2 + $0x10] sm:$0xf]  ;;  %v5062_v63 = vld [vmem:[#allocation2 + $0x14] sm:$0xf]  ;;  %vm4796_vm13 = vcmp.ge.s32.totalorder %v4774_v13, 0  ;;  %vm4818_vm15 = vcmp.lt.s32.totalorder %v4774_v13, 256 }
 0x287   : > { %8423 = vst [vmem:[#allocation2 + $0x18] sm:$0xff] %v8384_v19   ;;  %v4552_v26 = vpop.f32.mrf.mxu0  ;;  %v8100_v59 = vcombine.low %v5061_v9, %v5062_v63  ;;  %v11095_v43 = vcombine.low %v11052_v27, %v5061_v9  ;;  %v4746_v44 = vmax.f32 %v4724_v11, 0.0  ;;  %v5159_v19 = vrot.slane %v5157_v1, 4  ;;  %vm11157_vm3 = vmand %vm4796_vm13, %vm4818_vm15 }
 0x288   : > { %v4725_v12 = vadd.f32 %v10989_v62, %v4696_v34  ;;  %v4609_v49 = vadd.f32 %v4552_v26, %v10944_v10  ;;  %v409_v29 = vand.u32 15, %v299_v17  ;;  %vm4797_vm4 = vcmp.ge.s32.totalorder %v11130_v52, 0  ;;  %v9153_v10 = vld [vmem:[%s12182_s3 + $0x1e8] sm:$0xff]  }
 0x289   : > { %v4554_v39 = vpop.f32.mrf.mxu0  ;;  %v5162_v46 = vshrl.u32 %v8100_v59, 16  ;;  %v5165_v37 = vshll.u32 %v8100_v59, 16  ;;  %8687 = vmatprep.mubr.bf16.mxu0 %v11095_v43  ;;  %v4903_v7 = vsel %vm11101_vm9, %v4746_v44, 0.0  ;;  %vm4819_vm5 = vcmp.lt.s32.totalorder %v11130_v52, 256 }
 0x28a   : > { %v4747_v11 = vmax.f32 %v4725_v12, 0.0  ;;  %v4675_v61 = vsel %vm11077_vm6, %v4609_v49, 0.0  ;;  %v5160_v39 = vor.u32 %v5159_v19, %v5156_v58  ;;  %v9149_v58 = vld [vmem:[%s12182_s3 + $0x1f0] sm:$0xff]   ;;  %vm11169_vm6 = vcmp.ne.s32.totalorder %v409_v29, 15  ;;  %vm11211_vm9 = vmand %vm4797_vm4, %vm4819_vm5 }
 0x28b   : > { %v4697_v34 = vadd.f32 %v4675_v61, %v10776_v28  ;;  %v4555_v9 = vpop.f32.mrf.mxu0  ;;  %v5164_v26 = vrot.slane %v5162_v46, 3  ;;  %v5167_v59 = vrot.slane %v5165_v37, 4 }
 0x28c   : > { %v4904_v1 = vsel %vm11110_vm11, %v4747_v11, 0.0  ;;  %v4610_v47 = vadd.f32 %v4555_v9, %v10947_v30 }
 0x28d   : > { %v8389_v12 = vpack.c.bf16 %v4904_v1, %v4903_v7  ;;  %v4726_v49 = vadd.f32 %v10989_v62, %v4697_v34  ;;  %v4557_v28 = vpop.f32.mrf.mxu0  ;;  %v11133_v61 = vor.u32 %v5167_v59, %v5164_v26  ;;  %v4776_v34 = vadd.s32 %v10974_v15, %v10755_v45 }
 0x28e   : > { %v5063_v46 = vld [vmem:[#allocation2 + $0x18] sm:$0xf]  ;;  %v5064_v37 = vld [vmem:[#allocation2 + $0x1c] sm:$0xf]  ;;  %v4698_v44 = vadd.f32 %v4610_v47, %v10788_v36  ;;  %v11164_v1 = vadd.s32 128, %v10649_v57 }
 0x28f   : > { %8424 = vst [vmem:[#allocation2 + $0x20] sm:$0xff] %v8389_v12   ;;  %v8101_v0 = vcombine.low %v5063_v46, %v5064_v37  ;;  %v11136_v30 = vcombine.low %v5062_v63, %v5063_v46  ;;  %v4560_v11 = vpop.f32.mrf.mxu0  ;;  %v5169_v9 = vsel %vm963_vm0, %v5160_v39, %v11133_v61  ;;  %v4748_v19 = vmax.f32 %v4726_v49, 0.0 }
 0x290   : > { %v4727_v63 = vadd.f32 %v10989_v62, %v4698_v44  ;;  %v4611_v17 = vadd.f32 %v4560_v11, %v10949_v35  ;;  %8591 = vmatprep.mubr.bf16.mxu1 %v5169_v9  ;;  %vm4798_vm7 = vcmp.ge.s32.totalorder %v4776_v34, 0  ;;  %vm4820_vm8 = vcmp.lt.s32.totalorder %v4776_v34, 256 }
 0x291   : > { %v5171_v26 = vshrl.u32 %v8101_v0, 16  ;;  %v5174_v59 = vshll.u32 %v8101_v0, 16  ;;  %v4562_v56 = vpop.f32.mrf.mxu0  ;;  %8688 = vmatmul.mubr.bf16.vlgmr.msra.gmra.mxu0 %v11136_v30  ;;  %v4905_v46 = vsel %vm11149_vm1, %v4748_v19, 0.0  ;;  %vm11221_vm11 = vmand %vm4798_vm7, %vm4820_vm8  ;;  %v11231_v34 = vadd.s32 144, %v10649_v57 }
 0x292   : > { %v4749_v47 = vmax.f32 %v4727_v63, 0.0  ;;  %v4677_v35 = vsel %vm11117_vm12, %v4611_v17, 0.0  ;;  %8736 = vmatpush3.bf16.msra.mxu0 %v10932_v48  ;;  %v11185_v48 = vadd.s32 %v10974_v15, %v11091_v33  ;;  %v301_v63 = vadd.s32 8, %v11164_v1 }
 0x293   : > { %v5173_v12 = vrot.slane %v5171_v26, 3  ;;  %v5176_v49 = vrot.slane %v5174_v59, 4  ;;  %v4699_v28 = vadd.f32 %v4677_v35, %v10800_v55  ;;  %v4563_v39 = vpop.f32.mrf.mxu0  ;;  %8737 = vmatprep.subr.bf16.mxu0 %v9149_v58 }
 0x294   : > { %v4906_v44 = vsel %vm11157_vm3, %v4749_v47, 0.0  ;;  %v4612_v29 = vadd.f32 %v4563_v39, %v10951_v31  ;;  %v9154_v31 = vld [vmem:[%s12182_s3 + $0x30] sm:$0xff]   ;;  %vm4799_vm10 = vcmp.ge.s32.totalorder %v11185_v48, 0  ;;  %vm4821_vm12 = vcmp.lt.s32.totalorder %v11185_v48, 256 }
 0x295   : > { %v8394_v55 = vpack.c.bf16 %v4906_v44, %v4905_v46  ;;  %v4728_v0 = vadd.f32 %v10989_v62, %v4699_v28  ;;  %v4565_v11 = vpop.f32.mrf.mxu0  ;;  %v11188_v9 = vor.u32 %v5176_v49, %v5173_v12  ;;  %v423_v46 = vand.u32 15, %v301_v63  ;;  %vm11277_vm3 = vmand %vm4799_vm10, %vm4821_vm12 }
 0x296   : > { %v4700_v36 = vadd.f32 %v4612_v29, %v10811_v32  ;;  %v5065_v19 = vld [vmem:[#allocation2 + $0x20] sm:$0xf]  ;;  %v5066_v17 = vld [vmem:[#allocation2 + $0x24] sm:$0xf]  ;;  %8738 = vmatpush3.bf16.msra.mxu0 %v9149_v58  ;;  %v4778_v32 = vadd.s32 %v10974_v15, %v10785_v41  ;;  %v9156_v29 = vld [vmem:[%s12182_s3 + $0x28] sm:$0xff]   ;;  %v303_v49 = vadd.s32 8, %v11231_v34 }
 0x297   : > { %8425 = vst [vmem:[#allocation2 + $0x28] sm:$0xff] %v8394_v55   ;;  %v4568_v26 = vpop.f32.mrf.mxu0  ;;  %v11198_v59 = vsel %vm963_vm0, %v11133_v61, %v11188_v9  ;;  %v8102_v7 = vcombine.low %v5065_v19, %v5066_v17  ;;  %v11200_v56 = vcombine.low %v5064_v37, %v5065_v19  ;;  %8739 = vmatprep.subr.bf16.mxu0 %v9153_v10  ;;  %v9155_v58 = vld [vmem:[%s12182_s3 + $0x1e0] sm:$0xff]   ;;  %v4750_v47 = vmax.f32 %v4728_v0, 0.0 }
 0x298   : > { %v4729_v37 = vadd.f32 %v10989_v62, %v4700_v36  ;;  %v4613_v12 = vadd.f32 %v4568_v26, %v10953_v20  ;;  %8592 = vmatmul.mubr.bf16.vlgmr.msra.gmra.mxu1 %v11198_v59  ;;  %vm4800_vm13 = vcmp.ge.s32.totalorder %v4778_v32, 0  ;;  %vm4822_vm15 = vcmp.lt.s32.totalorder %v4778_v32, 256  ;;  %v9163_v32 = vld [vmem:[%s12182_s3 + $0x18] sm:$0xff]  }
 0x299   : > { %v4570_v52 = vpop.f32.mrf.mxu0  ;;  %v5180_v28 = vshrl.u32 %v8102_v7, 16  ;;  %v5183_v39 = vshll.u32 %v8102_v7, 16  ;;  %8691 = vmatprep.mubr.bf16.mxu0 %v11200_v56  ;;  %8608 = vmatpush3.bf16.msra.mxu1 %v10942_v14  ;;  %v9160_v14 = vld [vmem:[%s12182_s3 + $0x1d8] sm:$0xff]   ;;  %v4907_v13 = vsel %vm11211_vm9, %v4750_v47, 0.0  ;;  %v11248_v7 = vadd.s32 %v10974_v15, %v11164_v1  ;;  %vm11286_vm4 = vmand %vm4800_vm13, %vm4822_vm15 }
 0x29a   : > { %v4751_v20 = vmax.f32 %v4729_v37, 0.0  ;;  %v4679_v44 = vsel %vm11169_vm6, %v4613_v12, 0.0  ;;  %8740 = vmatpush3.bf16.msra.mxu0 %v9153_v10  ;;  %8609 = vmatprep.subr.bf16.mxu1 %v9154_v31  ;;  %vm11257_vm1 = vcmp.ne.s32.totalorder %v423_v46, 15 }
 0x29b   : > { %v4701_v55 = vadd.f32 %v4679_v44, %v10821_v8  ;;  %v4571_v0 = vpop.f32.mrf.mxu0  ;;  %v5182_v11 = vrot.slane %v5180_v28, 3  ;;  %v5185_v63 = vrot.slane %v5183_v39, 4  ;;  %8741 = vmatprep.subr.bf16.mxu0 %v9155_v58  ;;  %v4780_v39 = vadd.s32 %v10974_v15, %v10809_v51 }
 0x29c   : > { %v4908_v10 = vsel %vm11221_vm11, %v4751_v20, 0.0  ;;  %v4614_v36 = vadd.f32 %v4571_v0, %v10955_v25  ;;  %v9161_v25 = vld [vmem:[%s12182_s3 + $0x20] sm:$0xff]   ;;  %vm4801_vm5 = vcmp.ge.s32.totalorder %v11248_v7, 0  ;;  %vm4823_vm6 = vcmp.lt.s32.totalorder %v11248_v7, 256  ;;  %v9171_v20 = vld [vmem:[%s12182_s3 + $0x10] sm:$0xff]  }
 0x29d   : > { %v8399_v19 = vpack.c.bf16 %v4908_v10, %v4907_v13  ;;  %v4730_v8 = vadd.f32 %v10989_v62, %v4701_v55  ;;  %v4573_v26 = vpop.f32.mrf.mxu0  ;;  %v11250_v37 = vor.u32 %v5185_v63, %v5182_v11  ;;  %8610 = vmatpush3.bf16.msra.mxu1 %v9154_v31  ;;  %v437_v11 = vand.u32 15, %v303_v49  ;;  %vm11340_vm10 = vmand %vm4801_vm5, %vm4823_vm6 }
 0x29e   : > { %v4702_v35 = vadd.f32 %v4614_v36, %v10834_v40  ;;  %v5067_v47 = vld [vmem:[#allocation2 + $0x28] sm:$0xf]  ;;  %v5068_v12 = vld [vmem:[#allocation2 + $0x2c] sm:$0xf]  ;;  %8742 = vmatpush3.bf16.msra.mxu0 %v9155_v58  ;;  %8611 = vmatprep.subr.bf16.mxu1 %v9156_v29  ;;  %v9162_v58 = vld [vmem:[%s12182_s3 + $0x1d0] sm:$0xff]   ;;  %vm4802_vm7 = vcmp.ge.s32.totalorder %v4780_v39, 0 }
 0x29f   : > { %8426 = vst [vmem:[#allocation2 + $0x30] sm:$0xff] %v8399_v19   ;;  %v4576_v1 = vpop.f32.mrf.mxu0  ;;  %v11264_v40 = vsel %vm963_vm0, %v11188_v9, %v11250_v37  ;;  %v8103_v31 = vcombine.low %v5067_v47, %v5068_v12  ;;  %v11266_v28 = vcombine.low %v5066_v17, %v5067_v47  ;;  %8743 = vmatprep.subr.bf16.mxu0 %v9160_v14  ;;  %v4752_v46 = vmax.f32 %v4730_v8, 0.0 }
 0x2a0   : > { %v4731_v9 = vadd.f32 %v10989_v62, %v4702_v35  ;;  %v4615_v17 = vadd.f32 %v4576_v1, %v10957_v18  ;;  %8595 = vmatprep.mubr.bf16.mxu1 %v11264_v40  ;;  %v11300_v19 = vadd.s32 160, %v10649_v57  ;;  %vm4824_vm8 = vcmp.lt.s32.totalorder %v4780_v39, 256  ;;  %v9173_v39 = vld [vmem:[%s12182_s3 + $0x8] sm:$0xff]  }
 0x2a1   : > { %v4578_v51 = vpop.f32.mrf.mxu0  ;;  %8692 = vmatmul.mubr.bf16.gmra.mxu0 %v11266_v28  ;;  %v5189_v48 = vshrl.u32 %v8103_v31, 16  ;;  %v5192_v55 = vshll.u32 %v8103_v31, 16  ;;  %8612 = vmatpush3.bf16.msra.mxu1 %v9156_v29  ;;  %v9166_v29 = vld [vmem:[%s12182_s3 + $0x1c8] sm:$0xff]   ;;  %vm11314_vm9 = vcmp.ne.s32.totalorder %v437_v11, 15  ;;  %v11320_v31 = vadd.s32 %v10974_v15, %v11231_v34  ;;  %vm11351_vm11 = vmand %vm4802_vm7, %vm4824_vm8 }
 0x2a2   : > { %v4753_v0 = vmax.f32 %v4731_v9, 0.0  ;;  %v4681_v18 = vsel %vm11257_vm1, %v4615_v17, 0.0  ;;  %8744 = vmatpush3.bf16.msra.mxu0 %v9160_v14  ;;  %8613 = vmatprep.subr.bf16.mxu1 %v9161_v25  ;;  %v4909_v14 = vsel %vm11277_vm3, %v4752_v46, 0.0  ;;  %v305_v34 = vadd.s32 8, %v11300_v19 }
 0x2a3   : > { %v4703_v63 = vadd.f32 %v4681_v18, %v10846_v23  ;;  %v4579_v13 = vpop.f32.mrf.mxu0  ;;  %v5191_v10 = vrot.slane %v5189_v48, 3  ;;  %v5194_v36 = vrot.slane %v5192_v55, 4  ;;  %8745 = vmatprep.subr.bf16.mxu0 %v9162_v58  ;;  %v12290_v48 = vld [vmem:[#allocation3_spill] sm:$0xff]  ;;  %vm4803_vm12 = vcmp.ge.s32.totalorder %v11320_v31, 0 }
 0x2a4   : > { %v4910_v8 = vsel %vm11286_vm4, %v4753_v0, 0.0  ;;  %v4616_v26 = vadd.f32 %v4579_v13, %v10959_v24  ;;  %v4782_v55 = vadd.s32 %v10974_v15, %v12290_v48  ;;  %v12293_v13 = vld [vmem:[#allocation5_spill] sm:$0xff]  ;;  %vm4825_vm13 = vcmp.lt.s32.totalorder %v11320_v31, 256 }
 0x2a5   : > { %v8404_v23 = vpack.c.bf16 %v4910_v8, %v4909_v14  ;;  %v4732_v35 = vadd.f32 %v10989_v62, %v4703_v63  ;;  %v4581_v47 = vpop.f32.mrf.mxu0  ;;  %v11311_v49 = vor.u32 %v5194_v36, %v5191_v10  ;;  %8614 = vmatpush3.bf16.msra.mxu1 %v9161_v25  ;;  %v451_v14 = vand.u32 15, %v305_v34  ;;  %vm11394_vm4 = vmand %vm4803_vm12, %vm4825_vm13 }
 0x2a6   : > { %v4704_v52 = vadd.f32 %v4616_v26, %v10861_v2  ;;  %v5069_v24 = vld [vmem:[#allocation2 + $0x30] sm:$0xf]  ;;  %v5070_v46 = vld [vmem:[#allocation2 + $0x34] sm:$0xf]  ;;  %8746 = vmatpush3.bf16.msra.mxu0 %v9162_v58  ;;  %8615 = vmatprep.subr.bf16.mxu1 %v9163_v32  ;;  %v9172_v58 = vld [vmem:[%s12182_s3 + $0x1c0] sm:$0xff]   ;;  %vm4804_vm15 = vcmp.ge.s32.totalorder %v4782_v55, 0 }
 0x2a7   : > { %8427 = vst [vmem:[#allocation2 + $0x38] sm:$0xff] %v8404_v23   ;;  %v4584_v25 = vpop.f32.mrf.mxu0  ;;  %v11328_v2 = vsel %vm963_vm0, %v11250_v37, %v11311_v49  ;;  %v8104_v9 = vcombine.low %v5069_v24, %v5070_v46  ;;  %v11330_v17 = vcombine.low %v5068_v12, %v5069_v24  ;;  %8747 = vmatprep.subr.bf16.mxu0 %v9166_v29  ;;  %v4754_v44 = vmax.f32 %v4732_v35, 0.0  ;;  %v12294_v35 = vld [vmem:[#allocation9_spill] sm:$0xff] }
 0x2a8   : > { %v4733_v37 = vadd.f32 %v10989_v62, %v4704_v52  ;;  %v4617_v12 = vadd.f32 %v4584_v25, %v10961_v21  ;;  %8596 = vmatmul.mubr.bf16.gmra.mxu1 %v11328_v2  ;;  %vm4826_vm1 = vcmp.lt.s32.totalorder %v4782_v55, 256  ;;  %vm11379_vm3 = vcmp.ne.s32.totalorder %v451_v14, 15  ;;  %v11417_v55 = vld [vmem:[%s12182_s3 + $0x1b8] sm:$0xff]  }
 0x2a9   : > { %v4586_v7 = vpop.f32.mrf.mxu0  ;;  %v5198_v18 = vshrl.u32 %v8104_v9, 16  ;;  %v5201_v11 = vshll.u32 %v8104_v9, 16  ;;  %8695 = vmatprep.mubr.bf16.mxu0 %v11330_v17  ;;  %8616 = vmatpush3.bf16.msra.mxu1 %v9163_v32  ;;  %v11366_v32 = vld [vmem:[%s12182_s3 + $0xb8] sm:$0xff]   ;;  %v12295_v9 = vld [vmem:[#allocation8_spill] sm:$0xff]  ;;  %vm11405_vm5 = vmand %vm4804_vm15, %vm4826_vm1 }
 0x2aa   : > { %v4755_v63 = vmax.f32 %v4733_v37, 0.0  ;;  %v4683_v21 = vsel %vm11314_vm9, %v4617_v12, 0.0  ;;  %8748 = vmatpush3.bf16.msra.mxu0 %v9166_v29  ;;  %8617 = vmatprep.subr.bf16.mxu1 %v9171_v20  ;;  %v4911_v29 = vsel %vm11340_vm10, %v4754_v44, 0.0  ;;  %v9179_v44 = vld [vmem:[%s12182_s3] sm:$0xff]   ;;  %v12306_v12 = vld [vmem:[#allocation10_spill] sm:$0xff] }
 0x2ab   : > { %v4705_v10 = vadd.f32 %v4683_v21, %v12293_v13  ;;  %v4587_v36 = vpop.f32.mrf.mxu0  ;;  %v5200_v8 = vrot.slane %v5198_v18, 3  ;;  %v5203_v26 = vrot.slane %v5201_v11, 4  ;;  %8749 = vmatprep.subr.bf16.mxu0 %v9172_v58 }
 0x2ac   : > { %v4912_v23 = vsel %vm11351_vm11, %v4755_v63, 0.0  ;;  %v4618_v47 = vadd.f32 %v4587_v36, %v12294_v35  ;;  %v12300_v63 = vld [vmem:[#allocation11_spill] sm:$0xff]  ;;  %v12303_v36 = vld [vmem:[#allocation6_spill] sm:$0xff] }
 0x2ad   : > { %v8409_v52 = vpack.c.bf16 %v4912_v23, %v4911_v29  ;;  %v4734_v1 = vadd.f32 %v10989_v62, %v4705_v10  ;;  %v4589_v24 = vpop.f32.mrf.mxu0  ;;  %v5204_v25 = vor.u32 %v5203_v26, %v5200_v8  ;;  %8618 = vmatpush3.bf16.msra.mxu1 %v9171_v20  ;;  %v4784_v14 = vadd.s32 %v10974_v15, %v12303_v36  ;;  %v12304_v26 = vld [vmem:[#allocation7_spill] sm:$0xff] }
 0x2ae   : > { %v4706_v34 = vadd.f32 %v4618_v47, %v12295_v9  ;;  %v5071_v37 = vld [vmem:[#allocation2 + $0x38] sm:$0xf]  ;;  %v5072_v51 = vld [vmem:[#allocation2 + $0x3c] sm:$0xf]  ;;  %8750 = vmatpush3.bf16.msra.mxu0 %v9172_v58  ;;  %8619 = vmatprep.subr.bf16.mxu1 %v9173_v39 }
 0x2af   : > { %8428 = vst [vmem:[#allocation2 + $0x40] sm:$0xff] %v8409_v52   ;;  %v4592_v48 = vpop.f32.mrf.mxu0  ;;  %v11385_v20 = vsel %vm963_vm0, %v11311_v49, %v5204_v25  ;;  %v8105_v0 = vcombine.low %v5071_v37, %v5072_v51  ;;  %v11387_v7 = vcombine.low %v5070_v46, %v5071_v37  ;;  %8799 = vmatprep.subr.bf16.mxu0 %v11366_v32  ;;  %v4756_v58 = vmax.f32 %v4734_v1, 0.0  ;;  %v12305_v52 = vld [vmem:[#allocation12_spill] sm:$0xff] }
 0x2b0   : > { %v4735_v11 = vadd.f32 %v10989_v62, %v4706_v34  ;;  %v4619_v21 = vadd.f32 %v4592_v48, %v12300_v63  ;;  %v4783_v49 = vadd.s32 %v10974_v15, %v11300_v19  ;;  %8599 = vmatprep.mubr.bf16.mxu1 %v11385_v20  ;;  %vm4806_vm8 = vcmp.ge.s32.totalorder %v4784_v14, 0  ;;  %v5057_v63 = vld [vmem:[#allocation2] sm:$0x8] }
 0x2b1   : > { %v4594_v31 = vpop.f32.mrf.mxu0  ;;  %8696 = vmatmul.mubr.bf16.gmra.mxu0 %v11387_v7  ;;  %v5207_v13 = vshrl.u32 %v8105_v0, 16  ;;  %v5210_v10 = vshll.u32 %v8105_v0, 16  ;;  %8620 = vmatpush3.bf16.msra.mxu1 %v9173_v39  ;;  %v4913_v39 = vsel %vm11394_vm4, %v4756_v58, 0.0  ;;  %vm4828_vm9 = vcmp.lt.s32.totalorder %v4784_v14, 256 }
 0x2b2   : > { %v4757_v8 = vmax.f32 %v4735_v11, 0.0  ;;  %v4685_v19 = vsel %vm11379_vm3, %v4619_v21, 0.0  ;;  %8621 = vmatprep.subr.bf16.mxu1 %v9179_v44  ;;  %vm4805_vm6 = vcmp.ge.s32.totalorder %v4783_v49, 0  ;;  %vm4827_vm7 = vcmp.lt.s32.totalorder %v4783_v49, 256  ;;  %vm4850_vm11 = vmand %vm4806_vm8, %vm4828_vm9 }
 0x2b3   : > { %v4707_v29 = vadd.f32 %v4685_v19, %v12304_v26  ;;  %v4595_v23 = vpop.f32.mrf.mxu0  ;;  %v5209_v35 = vrot.slane %v5207_v13, 3  ;;  %v5212_v47 = vrot.slane %v5210_v10, 4  ;;  %vm4849_vm10 = vmand %vm4805_vm6, %vm4827_vm7 }
 0x2b4   : > { %v4914_v15 = vsel %vm11405_vm5, %v4757_v8, 0.0  ;;  %v4620_v1 = vadd.f32 %v4595_v23, %v12305_v52 }
 0x2b5   : > { %v8414_v24 = vpack.c.bf16 %v4914_v15, %v4913_v39  ;;  %v4736_v9 = vadd.f32 %v10989_v62, %v4707_v29  ;;  %v11426_v34 = vor.u32 %v5212_v47, %v5209_v35  ;;  %8622 = vmatpush3.bf16.msra.mxu1 %v9179_v44  ;;  %v4597_v37 = vpop.f32.mrf.mxu0  ;;  %v8117_v44 = vcombine.low %v11050_v53, %v11052_v27  ;;  %v11449_v35 = vld [vmem:[#allocation2 + $0x18] sm:$0xf] }
 0x2b6   : > { %v4708_v48 = vadd.f32 %v4620_v1, %v12306_v12  ;;  %v11429_v0 = vld [vmem:[#allocation2 + $0x40] sm:$0xf]  ;;  %v5091_v58 = vld [vmem:[#allocation2 + $0x44] sm:$0xf]  ;;  %8639 = vmatprep.subr.bf16.mxu1 %v11417_v55  ;;  %v8116_v27 = vcombine.low %v5057_v63, %v11047_v22  ;;  %v11453_v1 = vld [vmem:[#allocation2 + $0x14] sm:$0xf] }
 0x2b7   : > { %8429 = vst [vmem:[#allocation2 + $0x48] sm:$0xff] %v8414_v24   ;;  %v11434_v18 = vsel %vm963_vm0, %v5204_v25, %v11426_v34  ;;  %v8106_v11 = vcombine.low %v11429_v0, %v5091_v58  ;;  %v4758_v21 = vmax.f32 %v4736_v9, 0.0  ;;  %v11444_v31 = vcombine.low %v5072_v51, %v11429_v0 }
 0x2b8   : > { %v4737_v46 = vadd.f32 %v10989_v62, %v4708_v48  ;;  %8600 = vmatmul.mubr.bf16.gmra.mxu1 %v11434_v18  ;;  %v5404_v26 = vshrl.u32 %v8117_v44, 16  ;;  %v5407_v62 = vshll.u32 %v8117_v44, 16  ;;  %v5396_v14 = vshrl.u32 %v8116_v27, 16 }
 0x2b9   : > { %v5216_v25 = vshrl.u32 %v8106_v11, 16  ;;  %v5219_v13 = vshll.u32 %v8106_v11, 16  ;;  %8699 = vmatprep.mubr.bf16.mxu0 %v11444_v31  ;;  %v4915_v49 = vsel %vm4849_vm10, %v4758_v21, 0.0  ;;  %v5399_v47 = vshll.u32 %v8116_v27, 16 }
 0x2ba   : > { %v4759_v10 = vmax.f32 %v4737_v46, 0.0  ;;  %v8233_v24 = vcombine.low %v11453_v1, %v11449_v35  ;;  %v5406_v9 = vrot.slane %v5404_v26, 3  ;;  %v5409_v37 = vrot.slane %v5407_v62, 4  ;;  %v11457_v46 = vld [vmem:[#allocation2 + $0x20] sm:$0xf] }
 0x2bb   : > { %v5218_v36 = vrot.slane %v5216_v25, 3  ;;  %v5221_v8 = vrot.slane %v5219_v13, 4  ;;  %v5398_v11 = vrot.slane %v5396_v14, 3  ;;  %v5401_v63 = vrot.slane %v5399_v47, 4  ;;  %v11459_v13 = vld [vmem:[#allocation2 + $0x28] sm:$0xf] }
 0x2bc   : > { %v4916_v19 = vsel %vm4850_vm11, %v4759_v10, 0.0  ;;  %v5410_v25 = vor.u32 %v5409_v37, %v5406_v9  ;;  %v5573_v10 = vld [vmem:[#allocation2 + $0x1c] sm:$0xf]  ;;  %v9187_v14 = vld [vmem:[%s12182_s3 + $0x1b0] sm:$0xff]   ;;  %v11482_v47 = vld [vmem:[#allocation2 + $0x2c] sm:$0xf] }
 0x2bd   : > { %v8419_v29 = vpack.c.bf16 %v4916_v19, %v4915_v49  ;;  %v5222_v23 = vor.u32 %v5221_v8, %v5218_v36  ;;  %v5402_v27 = vor.u32 %v5401_v63, %v5398_v11  ;;  %v8234_v36 = vcombine.low %v5573_v10, %v11457_v46  ;;  %v11463_v49 = vld [vmem:[#allocation2 + $0x24] sm:$0xf]  ;;  %v9180_v19 = vld [vmem:[%s12182_s3 + $0xb0] sm:$0xff]   ;;  %v9191_v37 = vld [vmem:[%s12182_s3 + $0x98] sm:$0xff]  }
 0x2be   : > { %v5092_v51 = vld [vmem:[#allocation2 + $0x48] sm:$0xf]  ;;  %v8235_v62 = vcombine.low %v11463_v49, %v11459_v13  ;;  %v8118_v11 = vcombine.low %v11429_v0, %v11429_v0  ;;  %v5570_v63 = vld [vmem:[#allocation2 + $0x10] sm:$0x8] }
 0x2bf   : > { %8430 = vst [vmem:[#allocation2 + $0x50] sm:$0xff] %v8419_v29   ;;  %v5223_v39 = vsel %vm963_vm0, %v11426_v34, %v5222_v23  ;;  %v8107_v15 = vcombine.low %v5092_v51, %v5092_v51  ;;  %v8199_v52 = vcombine.low %v5091_v58, %v5092_v51  ;;  %v5411_v26 = vsel %vm963_vm0, %v5402_v27, %v5410_v25  ;;  %v9183_v29 = vld [vmem:[%s12182_s3 + $0xa8] sm:$0xff]   ;;  %v11477_v51 = vld [vmem:[#allocation2 + $0x38] sm:$0xf]  ;;  %v11520_v27 = vld [vmem:[#allocation2 + $0x44] sm:$0xf] }
 0x2c0   : > { %8603 = vmatprep.mubr.bf16.mxu1 %v5223_v39  ;;  %v5412_v39 = vsel %vm963_vm0, %v5410_v25, %v11133_v61  ;;  %v9189_v61 = vld [vmem:[%s12182_s3 + $0x1a8] sm:$0xff]   ;;  %v8144_v25 = vcombine.low %v11449_v35, %v5573_v10  ;;  %v8143_v35 = vcombine.low %v5570_v63, %v11453_v1  ;;  %v8146_v63 = vcombine.low %v11459_v13, %v11482_v47 }
 0x2c1   : > { %8700 = vmatmul.mubr.bf16.gmra.mxu0 %v8199_v52  ;;  %v5225_v12 = vshrl.u32 %v8107_v15, 16  ;;  %v5228_v48 = vshll.u32 %v8107_v15, 16  ;;  %v11488_v15 = vld [vmem:[#allocation2 + $0x34] sm:$0xf]  ;;  %v9188_v52 = vld [vmem:[%s12182_s3 + $0xa0] sm:$0xff]   ;;  %v9200_v1 = vld [vmem:[%s12182_s3 + $0x88] sm:$0xff]  }
 0x2c2   : > { %8751 = vmatprep.mubr.bf16.mxu0 %v8233_v24  ;;  %v8237_v24 = vcombine.low %v11488_v15, %v11477_v51  ;;  %v9202_v9 = vld [vmem:[#allocation2 + $0x4] sm:$0xff]  }
 0x2c3   : > { %v5227_v44 = vrot.slane %v5225_v12, 3  ;;  %v5230_v21 = vrot.slane %v5228_v48, 4  ;;  %v9195_v12 = vld [vmem:[%s12182_s3 + $0x1a0] sm:$0xff]   ;;  %v11510_v48 = vld [vmem:[#allocation2 + $0xc] sm:$0xff]  }
 0x2c4   : > { %v6594_v10 = vshll.u32 %v11510_v48, 16 }
 0x2c5   : > { %v5231_v58 = vor.u32 %v5230_v21, %v5227_v44  ;;  %v11514_v44 = vld [vmem:[#allocation2 + $0x3c] sm:$0xf]  ;;  %v6823_v21 = vshll.u32 %v9202_v9, 16 }
 0x2c7   : > { %v5232_v8 = vsel %vm963_vm0, %v5222_v23, %v5231_v58  ;;  %v11475_v23 = vld [vmem:[#allocation2 + $0x30] sm:$0xf] }
 0x2c8   : > { %8604 = vmatmul.mubr.bf16.gmra.mxu1 %v5232_v8  ;;  %v6825_v8 = vrot.slane %v6823_v21, 1  ;;  %v11549_v21 = vld [vmem:[#allocation2 + $0x4c] sm:$0xf] }
 0x2c9   : > { %8623 = vmatprep.mubr.bf16.mxu1 %v5411_v26  ;;  %8752 = vmatmul.mubr.bf16.vlgmr.msra.gmra.mxu0 %v8234_v36  ;;  %v9196_v36 = vld [vmem:[%s12182_s3 + $0x90] sm:$0xff]   ;;  %v5417_v26 = vshll.u32 %v8118_v11, 16 }
 0x2ca   : > { %8755 = vmatprep.mubr.bf16.mxu0 %v8235_v62  ;;  %8800 = vmatpush3.bf16.msra.mxu0 %v11366_v32  ;;  %v8236_v32 = vcombine.low %v11482_v47, %v11475_v23  ;;  %v5659_v62 = vshll.u32 %v8144_v25, 16 }
 0x2cb   : > { %8801 = vmatprep.subr.bf16.mxu0 %v9180_v19 }
 0x2ce   : > { %8802 = vmatpush3.bf16.msra.mxu0 %v9180_v19  ;;  %v5414_v19 = vshrl.u32 %v8118_v11, 16  ;;  %v11545_v11 = vld [vmem:[#allocation2 + $0x1c] sm:$0xff]  }
 0x2cf   : > { %8803 = vmatprep.subr.bf16.mxu0 %v9183_v29 }
 0x2d0   : > { %8624 = vmatmul.mubr.bf16.vlgmr.msra.gmra.mxu1 %v5412_v39  ;;  %v11540_v39 = vld [vmem:[#allocation2 + $0x50] sm:$0xf] }
 0x2d1   : > { %8627 = vmatprep.mubr.bf16.mxu1 %v11198_v59  ;;  %8640 = vmatpush3.bf16.msra.mxu1 %v11417_v55  ;;  %v11503_v59 = vld [vmem:[#allocation2 + $0x40] sm:$0xf]  ;;  %v11505_v55 = vld [vmem:[#allocation2 + $0x48] sm:$0xf] }
 0x2d2   : > { %8756 = vmatmul.mubr.bf16.gmra.mxu0 %v8236_v32  ;;  %8641 = vmatprep.subr.bf16.mxu1 %v9187_v14  ;;  %v8238_v58 = vcombine.low %v11514_v44, %v11503_v59  ;;  %v8239_v0 = vcombine.low %v11520_v27, %v11505_v55  ;;  %v6821_v32 = vshrl.u32 %v9202_v9, 16  ;;  %v8240_v9 = vcombine.low %v11549_v21, %v11540_v39 }
 0x2d3   : > { %8759 = vmatprep.mubr.bf16.mxu0 %v8237_v24  ;;  %8804 = vmatpush3.bf16.msra.mxu0 %v9183_v29  ;;  %v11536_v29 = vld [vmem:[#allocation2 + $0x14] sm:$0xff]   ;;  %v5651_v24 = vshll.u32 %v8143_v35, 16 }
 0x2d4   : > { %8805 = vmatprep.subr.bf16.mxu0 %v9188_v52  ;;  %v6599_v13 = vshll.u32 %v11536_v29, 16  ;;  %v6603_v45 = vshrl.u32 %v11536_v29, 16 }
 0x2d5   : > { %8642 = vmatpush3.bf16.msra.mxu1 %v9187_v14  ;;  %v8145_v14 = vcombine.low %v11457_v46, %v11463_v49  ;;  %v6826_v46 = vor.u32 %v6825_v8, %v6821_v32  ;;  %v5416_v49 = vrot.slane %v5414_v19, 3  ;;  %v5653_v8 = vrot.slane %v5651_v24, 4 }
 0x2d6   : > { %8643 = vmatprep.subr.bf16.mxu1 %v9189_v61  ;;  %v6607_v19 = vshll.u32 %v11545_v11, 16 }
 0x2d7   : > { %8806 = vmatpush3.bf16.msra.mxu0 %v9188_v52  ;;  %v5648_v52 = vshrl.u32 %v8143_v35, 16  ;;  %v5665_v47 = vshrl.u32 %v8145_v14, 16  ;;  %v5668_v35 = vshll.u32 %v8145_v14, 16  ;;  %v9210_v14 = vld [vmem:[#allocation2 + $0x24] sm:$0xff]  }
 0x2d8   : > { %8628 = vmatmul.mubr.bf16.gmra.mxu1 %v11264_v40  ;;  %8807 = vmatprep.subr.bf16.mxu0 %v9191_v37  ;;  %v9197_v40 = vld [vmem:[%s12182_s3 + $0x198] sm:$0xff]  }
 0x2d9   : > { %8631 = vmatprep.mubr.bf16.mxu1 %v11328_v2  ;;  %8644 = vmatpush3.bf16.msra.mxu1 %v9189_v61  ;;  %v5656_v2 = vshrl.u32 %v8144_v25, 16  ;;  %v6596_v61 = vrot.slane %v6594_v10, 1  ;;  %v9204_v25 = vld [vmem:[%s12182_s3 + $0x80] sm:$0xff]   ;;  %v5650_v10 = vrot.slane %v5648_v52, 3  ;;  %v5667_v32 = vrot.slane %v5665_v47, 3 }
 0x2da   : > { %8760 = vmatmul.mubr.bf16.gmra.mxu0 %v8238_v58  ;;  %8645 = vmatprep.subr.bf16.mxu1 %v9195_v12  ;;  %v8147_v52 = vcombine.low %v11475_v23, %v11488_v15  ;;  %v8148_v23 = vcombine.low %v11477_v51, %v11514_v44  ;;  %v9209_v51 = vld [vmem:[%s12182_s3 + $0x78] sm:$0xff]  }
 0x2db   : > { %8763 = vmatprep.mubr.bf16.mxu0 %v8239_v0  ;;  %8808 = vmatpush3.bf16.msra.mxu0 %v9191_v37  ;;  %v9203_v37 = vld [vmem:[%s12182_s3 + $0x190] sm:$0xff]   ;;  %v5658_v58 = vrot.slane %v5656_v2, 3  ;;  %v5661_v0 = vrot.slane %v5659_v62, 4  ;;  %v5677_v2 = vshll.u32 %v8146_v63, 16  ;;  %v5654_v24 = vor.u32 %v5653_v8, %v5650_v10 }
 0x2dc   : > { %8809 = vmatprep.subr.bf16.mxu0 %v9196_v36  ;;  %v5686_v44 = vshll.u32 %v8147_v52, 16  ;;  %v9214_v10 = vld [vmem:[#allocation2 + $0x34] sm:$0xff]  }
 0x2dd   : > { %8646 = vmatpush3.bf16.msra.mxu1 %v9195_v12  ;;  %v5419_v12 = vrot.slane %v5417_v26, 4  ;;  %v5674_v26 = vshrl.u32 %v8146_v63, 16  ;;  %v6609_v63 = vrot.slane %v6607_v19, 1  ;;  %v6611_v19 = vshrl.u32 %v11545_v11, 16 }
 0x2de   : > { %8647 = vmatprep.subr.bf16.mxu1 %v9197_v40 }
 0x2df   : > { %8810 = vmatpush3.bf16.msra.mxu0 %v9196_v36  ;;  %v9205_v36 = vld [vmem:[%s12182_s3 + $0x188] sm:$0xff]   ;;  %v5420_v62 = vor.u32 %v5419_v12, %v5416_v49 }
 0x2e0   : > { %8632 = vmatmul.mubr.bf16.gmra.mxu1 %v11385_v20  ;;  %8811 = vmatprep.subr.bf16.mxu0 %v9200_v1  ;;  %v6827_v20 = vsel %vm3375_vm2, %v6826_v46, %v6596_v61  ;;  %v5670_v46 = vrot.slane %v5668_v35, 4  ;;  %v11571_v49 = vld [vmem:[#allocation2 + $0x2c] sm:$0xff]   ;;  %v5692_v35 = vshrl.u32 %v8148_v23, 16 }
 0x2e1   : > { %8635 = vmatprep.mubr.bf16.mxu1 %v11434_v18  ;;  %8648 = vmatpush3.bf16.msra.mxu1 %v9197_v40  ;;  %v5662_v18 = vor.u32 %v5661_v0, %v5658_v58  ;;  %v6601_v40 = vrot.slane %v6599_v13, 1  ;;  %v5679_v58 = vrot.slane %v5677_v2, 4  ;;  %v6615_v0 = vshll.u32 %v9210_v14, 16 }
 0x2e2   : > { %8764 = vmatmul.mubr.bf16.gmra.mxu0 %v8240_v9  ;;  %8649 = vmatprep.subr.bf16.mxu1 %v9203_v37  ;;  %v6592_v9 = vshrl.u32 %v11510_v48, 16  ;;  %v5421_v48 = vsel %vm963_vm0, %v11426_v34, %v5420_v62  ;;  %v5671_v13 = vor.u32 %v5670_v46, %v5667_v32  ;;  %v8149_v2 = vcombine.low %v11503_v59, %v11520_v27  ;;  %v9212_v32 = vld [vmem:[%s12182_s3 + $0x70] sm:$0xff]   ;;  %v9215_v46 = vld [vmem:[#allocation2 + $0x3c] sm:$0xff]  }
 0x2e3   : > { %8812 = vmatpush3.bf16.msra.mxu0 %v9200_v1  ;;  %8815 = vmatprep.mubr.bf16.mxu0 %v6827_v20  ;;  %v9208_v1 = vld [vmem:[%s12182_s3 + $0x180] sm:$0xff]   ;;  %v5663_v15 = vsel %vm963_vm0, %v5654_v24, %v5662_v18  ;;  %v6605_v29 = vor.u32 %v6603_v45, %v6601_v40  ;;  %v6623_v45 = vshll.u32 %v11571_v49, 16  ;;  %v5695_v20 = vshll.u32 %v8148_v23, 16 }
 0x2e4   : > { %8813 = vmatprep.subr.bf16.mxu0 %v9204_v25  ;;  %v6597_v12 = vor.u32 %v6596_v61, %v6592_v9  ;;  %v5683_v61 = vshrl.u32 %v8147_v52, 16  ;;  %v5672_v8 = vsel %vm963_vm0, %v5662_v18, %v5671_v13  ;;  %v6619_v62 = vshrl.u32 %v9210_v14, 16 }
 0x2e5   : > { %8650 = vmatpush3.bf16.msra.mxu1 %v9203_v37  ;;  %v5676_v37 = vrot.slane %v5674_v26, 3  ;;  %v11583_v34 = vsel %vm3375_vm2, %v6605_v29, %v6609_v63  ;;  %v5688_v9 = vrot.slane %v5686_v44, 4  ;;  %v8150_v52 = vcombine.low %v11505_v55, %v11549_v21  ;;  %v9213_v55 = vld [vmem:[%s12182_s3 + $0x68] sm:$0xff]   ;;  %v9216_v44 = vld [vmem:[%s12182_s3 + $0x60] sm:$0xff]  }
 0x2e6   : > { %8651 = vmatprep.subr.bf16.mxu1 %v9205_v36  ;;  %v11579_v47 = vsel %vm3375_vm2, %v6597_v12, %v6601_v40  ;;  %v5685_v26 = vrot.slane %v5683_v61, 3  ;;  %v6625_v40 = vrot.slane %v6623_v45, 1  ;;  %v6613_v24 = vor.u32 %v6611_v19, %v6609_v63 }
 0x2e7   : > { %8814 = vmatpush3.bf16.msra.mxu0 %v9204_v25  ;;  %v5680_v25 = vor.u32 %v5679_v58, %v5676_v37  ;;  %v5697_v12 = vrot.slane %v5695_v20, 4  ;;  %v6631_v59 = vshll.u32 %v9214_v10, 16  ;;  %v5701_v14 = vshrl.u32 %v8149_v2, 16 }
 0x2e8   : > { %8636 = vmatmul.mubr.bf16.gmra.mxu1 %v5421_v48  ;;  %v5704_v48 = vshll.u32 %v8149_v2, 16  ;;  %v6639_v21 = vshll.u32 %v9215_v46, 16  ;;  %v5689_v63 = vor.u32 %v5688_v9, %v5685_v26  ;;  %v5710_v58 = vshrl.u32 %v8150_v52, 16 }
 0x2e9   : > { %8652 = vmatpush3.bf16.msra.mxu1 %v9205_v36  ;;  %8655 = vmatprep.mubr.bf16.mxu1 %v5663_v15  ;;  %v6617_v36 = vrot.slane %v6615_v0, 1  ;;  %v5681_v18 = vsel %vm963_vm0, %v5671_v13, %v5680_v25  ;;  %v5713_v23 = vshll.u32 %v8150_v52, 16  ;;  %v6633_v29 = vrot.slane %v6631_v59, 1 }
 0x2ea   : > { %8816 = vmatmul.mubr.bf16.vlgmr.msra.gmra.mxu0 %v11579_v47  ;;  %8653 = vmatprep.subr.bf16.mxu1 %v9208_v1  ;;  %v6627_v0 = vshrl.u32 %v11571_v49, 16  ;;  %v5703_v13 = vrot.slane %v5701_v14, 3  ;;  %v5706_v61 = vrot.slane %v5704_v48, 4  ;;  %v6641_v45 = vrot.slane %v6639_v21, 1 }
 0x2eb   : > { %8819 = vmatprep.mubr.bf16.mxu0 %v11583_v34  ;;  %v6621_v11 = vor.u32 %v6619_v62, %v6617_v36  ;;  %v11601_v27 = vsel %vm3375_vm2, %v6613_v24, %v6617_v36  ;;  %v5690_v20 = vsel %vm963_vm0, %v5680_v25, %v5689_v63  ;;  %v5712_v26 = vrot.slane %v5710_v58, 3  ;;  %v9217_v25 = vld [vmem:[%s12182_s3 + $0x58] sm:$0xff]  }
 0x2ec   : > { %v6629_v36 = vor.u32 %v6627_v0, %v6625_v40  ;;  %v5715_v2 = vrot.slane %v5713_v23, 4  ;;  %v12307_v23 = vcombine.low %v11047_v22, %v11050_v53  ;;  %v9225_v22 = vld [vmem:[%s12182_s3 + $0x168] sm:$0xff]   ;;  %v9226_v53 = vld [vmem:[%s12182_s3 + $0x160] sm:$0xff]  }
 0x2ed   : > { %8654 = vmatpush3.bf16.msra.mxu1 %v9208_v1  ;;  %v5694_v1 = vrot.slane %v5692_v35, 3  ;;  %v11605_v37 = vsel %vm3375_vm2, %v6621_v11, %v6625_v40  ;;  %v8151_v35 = vcombine.low %v11540_v39, %v11540_v39  ;;  %v5707_v39 = vor.u32 %v5706_v61, %v5703_v13  ;;  %v9219_v11 = vld [vmem:[%s12182_s3 + $0x50] sm:$0xff]   ;;  %v9234_v0 = vld [vmem:[%s12182_s3 + $0x220] sm:$0xff]  }
 0x2ee   : > { %8703 = vmatprep.subr.bf16.mxu1 %v9209_v51  ;;  %v6643_v40 = vshrl.u32 %v9215_v46, 16 }
 0x2ef   : > { %v5698_v15 = vor.u32 %v5697_v12, %v5694_v1  ;;  %v5719_v9 = vshrl.u32 %v8151_v35, 16  ;;  %v5722_v52 = vshll.u32 %v8151_v35, 16 }
 0x2f0   : > { %8656 = vmatmul.mubr.bf16.vlgmr.msra.gmra.mxu1 %v5672_v8  ;;  %v9218_v8 = vld [vmem:[#allocation2 + $0x44] ss:$0 sps:$4 sm:$0x11]   ;;  %v11630_v24 = vor.u32 %v6643_v40, %v6641_v45 }
 0x2f1   : > { %8659 = vmatprep.mubr.bf16.mxu1 %v5681_v18  ;;  %8704 = vmatpush3.bf16.msra.mxu1 %v9209_v51  ;;  %v6635_v51 = vshrl.u32 %v9214_v10, 16  ;;  %v5699_v19 = vsel %vm963_vm0, %v5689_v63, %v5698_v15  ;;  %v11620_v10 = vsel %vm3375_vm2, %v6629_v36, %v6633_v29  ;;  %v5716_v18 = vor.u32 %v5715_v2, %v5712_v26  ;;  %v9222_v63 = vld [vmem:[%s12182_s3 + $0x40] sm:$0xff]  }
 0x2f2   : > { %8820 = vmatmul.mubr.bf16.gmra.mxu0 %v11601_v27  ;;  %8705 = vmatprep.subr.bf16.mxu1 %v9212_v32  ;;  %v5708_v1 = vsel %vm963_vm0, %v5698_v15, %v5707_v39  ;;  %v5721_v59 = vrot.slane %v5719_v9, 3  ;;  %v5724_v14 = vrot.slane %v5722_v52, 4  ;;  %v9223_v15 = vld [vmem:[%s12182_s3 + $0x178] sm:$0xff]   ;;  %v9243_v26 = vld [vmem:[#allocation2 + $0x24] sm:$0xff]  }
 0x2f3   : > { %8823 = vmatprep.mubr.bf16.mxu0 %v11605_v37  ;;  %v6637_v49 = vor.u32 %v6635_v51, %v6633_v29  ;;  %v5717_v46 = vsel %vm963_vm0, %v5707_v39, %v5716_v18  ;;  %v9224_v29 = vld [vmem:[%s12182_s3 + $0x170] sm:$0xff]   ;;  %v9241_v51 = vld [vmem:[#allocation2 + $0x1c] sm:$0xff]   ;;  %v7073_v9 = vshll.u32 %v9243_v26, 16 }
 0x2f4   : > { %v5725_v21 = vor.u32 %v5724_v14, %v5721_v59  ;;  %v7077_v59 = vshrl.u32 %v9243_v26, 16 }
 0x2f5   : > { %8706 = vmatpush3.bf16.msra.mxu1 %v9212_v32  ;;  %v11624_v62 = vsel %vm3375_vm2, %v6637_v49, %v6641_v45  ;;  %v6829_v32 = vshll.u32 %v9218_v8, 16  ;;  %v9238_v45 = vld [vmem:[#allocation2 + $0x4c] ss:$0 sps:$4 sm:$0x11]  }
 0x2f6   : > { %8707 = vmatprep.subr.bf16.mxu1 %v9213_v55  ;;  %v5726_v58 = vsel %vm963_vm0, %v5716_v18, %v5725_v21  ;;  %v6655_v8 = vshll.u32 %v9238_v45, 16 }
 0x2f7   : > { %v6831_v12 = vrot.slane %v6829_v32, 1  ;;  %v9242_v32 = vld [vmem:[%s12182_s3 + $0x200] sm:$0xff]  }
 0x2f8   : > { %8660 = vmatmul.mubr.bf16.gmra.mxu1 %v5690_v20  ;;  %v7065_v20 = vshll.u32 %v9241_v51, 16 }
 0x2f9   : > { %8663 = vmatprep.mubr.bf16.mxu1 %v5699_v19  ;;  %8708 = vmatpush3.bf16.msra.mxu1 %v9213_v55  ;;  %v6832_v48 = vsel %vm3375_vm2, %v11630_v24, %v6831_v12  ;;  %v9220_v55 = vld [vmem:[%s12182_s3 + $0x48] sm:$0xff]   ;;  %v7069_v12 = vshrl.u32 %v9241_v51, 16  ;;  %v9249_v51 = vld [vmem:[#allocation2 + $0x54] ss:$0 sps:$4 sm:$0x11]  }
 0x2fa   : > { %8824 = vmatmul.mubr.bf16.gmra.mxu0 %v11620_v10  ;;  %8709 = vmatprep.subr.bf16.mxu1 %v9216_v44  ;;  %v9239_v19 = vld [vmem:[%s12182_s3 + $0x208] sm:$0xff]   ;;  %v7067_v39 = vrot.slane %v7065_v20, 1 }
 0x2fb   : > { %8827 = vmatprep.mubr.bf16.mxu0 %v11624_v62 }
 0x2fd   : > { %8710 = vmatpush3.bf16.msra.mxu1 %v9216_v44  ;;  %v9237_v44 = vld [vmem:[%s12182_s3 + $0x210] sm:$0xff]  }
 0x2fe   : > { %8711 = vmatprep.subr.bf16.mxu1 %v9217_v25 }
 0x300   : > { %8664 = vmatmul.mubr.bf16.gmra.mxu1 %v5708_v1  ;;  %v9245_v1 = vld [vmem:[#allocation2 + $0x34] sm:$0xff]  }
 0x301   : > { %8667 = vmatprep.mubr.bf16.mxu1 %v5717_v46  ;;  %8712 = vmatpush3.bf16.msra.mxu1 %v9217_v25  ;;  %v9244_v25 = vld [vmem:[#allocation2 + $0x2c] sm:$0xff]   ;;  %v9246_v46 = vld [vmem:[#allocation2 + $0x3c] sm:$0xff]   ;;  %v7089_v21 = vshll.u32 %v9245_v1, 16 }
 0x302   : > { %8828 = vmatmul.mubr.bf16.gmra.mxu0 %v6832_v48  ;;  %8713 = vmatprep.subr.bf16.mxu1 %v9219_v11  ;;  %v7071_v48 = vor.u32 %v7069_v12, %v7067_v39 }
 0x305   : > { %8714 = vmatpush3.bf16.msra.mxu1 %v9219_v11  ;;  %v7075_v11 = vrot.slane %v7073_v9, 1 }
 0x306   : > { %8715 = vmatprep.subr.bf16.mxu1 %v9220_v55 }
 0x308   : > { %8668 = vmatmul.mubr.bf16.gmra.mxu1 %v5726_v58 }
 0x309   : > { %8716 = vmatpush3.bf16.msra.mxu1 %v9220_v55  ;;  %8719 = vmatprep.mubr.bf16.mxu1 %v12307_v23  ;;  %v7079_v55 = vor.u32 %v7077_v59, %v7075_v11  ;;  %v7097_v23 = vshll.u32 %v9246_v46, 16 }
 0x30a   : > { %8717 = vmatprep.subr.bf16.mxu1 %v9222_v63 }
 0x30d   : > { %8718 = vmatpush3.bf16.msra.mxu1 %v9222_v63  ;;  %v7076_v63 = vsel %vm3375_vm2, %v7071_v48, %v7075_v11 }
 0x30e   : > { %8767 = vmatprep.subr.bf16.mxu1 %v9223_v15 }
 0x310   : > { %8720 = vmatmul.mubr.bf16.vlgmr.msra.gmra.mxu1 %v11095_v43  ;;  %v9227_v43 = vld [vmem:[%s12182_s3 + $0x158] sm:$0xff]  }
 0x311   : > { %8723 = vmatprep.mubr.bf16.mxu1 %v11136_v30  ;;  %8768 = vmatpush3.bf16.msra.mxu1 %v9223_v15  ;;  %v9228_v30 = vld [vmem:[%s12182_s3 + $0x150] sm:$0xff]   ;;  %v7091_v15 = vrot.slane %v7089_v21, 1 }
 0x312   : > { %8769 = vmatprep.subr.bf16.mxu1 %v9224_v29 }
 0x315   : > { %8770 = vmatpush3.bf16.msra.mxu1 %v9224_v29  ;;  %v9247_v29 = vld [vmem:[#allocation2 + $0x44] sm:$0xff]  }
 0x316   : > { %8771 = vmatprep.subr.bf16.mxu1 %v9225_v22 }
 0x318   : > { %8724 = vmatmul.mubr.bf16.gmra.mxu1 %v11200_v56  ;;  %v9229_v56 = vld [vmem:[%s12182_s3 + $0x148] sm:$0xff]  }
 0x319   : > { %8727 = vmatprep.mubr.bf16.mxu1 %v11266_v28  ;;  %8772 = vmatpush3.bf16.msra.mxu1 %v9225_v22  ;;  %v9230_v28 = vld [vmem:[%s12182_s3 + $0x140] sm:$0xff]   ;;  %v7085_v22 = vshrl.u32 %v9244_v25, 16 }
 0x31a   : > { %8773 = vmatprep.subr.bf16.mxu1 %v9226_v53 }
 0x31d   : > { %8774 = vmatpush3.bf16.msra.mxu1 %v9226_v53  ;;  %v7093_v53 = vshrl.u32 %v9245_v1, 16 }
 0x31e   : > { %8775 = vmatprep.subr.bf16.mxu1 %v9227_v43 }
 0x320   : > { %8728 = vmatmul.mubr.bf16.gmra.mxu1 %v11330_v17  ;;  %v9231_v17 = vld [vmem:[%s12182_s3 + $0x238] sm:$0xff]  }
 0x321   : > { %8731 = vmatprep.mubr.bf16.mxu1 %v11387_v7  ;;  %8776 = vmatpush3.bf16.msra.mxu1 %v9227_v43  ;;  %v9232_v7 = vld [vmem:[%s12182_s3 + $0x230] sm:$0xff]   ;;  %v7099_v43 = vrot.slane %v7097_v23, 1 }
 0x322   : > { %8777 = vmatprep.subr.bf16.mxu1 %v9228_v30 }
 0x325   : > { %8778 = vmatpush3.bf16.msra.mxu1 %v9228_v30  ;;  %v9248_v30 = vld [vmem:[#allocation2 + $0x4c] sm:$0xff]  }
 0x326   : > { %8779 = vmatprep.subr.bf16.mxu1 %v9229_v56  ;;  %v7117_v20 = vshrl.u32 %v9248_v30, 16 }
 0x328   : > { %8732 = vmatmul.mubr.bf16.gmra.mxu1 %v11444_v31  ;;  %v9233_v31 = vld [vmem:[%s12182_s3 + $0x228] sm:$0xff]  }
 0x329   : > { %8780 = vmatpush3.bf16.msra.mxu1 %v9229_v56  ;;  %8783 = vmatprep.mubr.bf16.mxu1 %v11579_v47  ;;  %v9236_v47 = vld [vmem:[#allocation2 + $0x44] sm:$0xff]  }
 0x32a   : > { %8781 = vmatprep.subr.bf16.mxu1 %v9230_v28  ;;  %v6647_v13 = vshll.u32 %v9236_v47, 16  ;;  %v6651_v36 = vshrl.u32 %v9236_v47, 16  ;;  %v7113_v47 = vshll.u32 %v9248_v30, 16 }
 0x32c   : > { %v6649_v61 = vrot.slane %v6647_v13, 1  ;;  %v7101_v13 = vshrl.u32 %v9246_v46, 16 }
 0x32d   : > { %8782 = vmatpush3.bf16.msra.mxu1 %v9230_v28  ;;  %v7095_v28 = vor.u32 %v7093_v53, %v7091_v15 }
 0x32e   : > { %8831 = vmatprep.subr.bf16.mxu1 %v9231_v17  ;;  %v6650_v35 = vsel %vm3375_vm2, %v11630_v24, %v6649_v61  ;;  %v6653_v2 = vor.u32 %v6651_v36, %v6649_v61  ;;  %v7081_v24 = vshll.u32 %v9244_v25, 16  ;;  %v7103_v61 = vor.u32 %v7101_v13, %v7099_v43 }
 0x32f   : > { %v7121_v36 = vshll.u32 %v9249_v51, 16 }
 0x330   : > { %8784 = vmatmul.mubr.bf16.vlgmr.msra.gmra.mxu1 %v11583_v34  ;;  %v9235_v34 = vld [vmem:[%s12182_s3 + $0x218] sm:$0xff]   ;;  %v7083_v14 = vrot.slane %v7081_v24, 1 }
 0x331   : > { %8787 = vmatprep.mubr.bf16.mxu1 %v11601_v27  ;;  %8832 = vmatpush3.bf16.msra.mxu1 %v9231_v17  ;;  %v9240_v27 = vld [vmem:[#allocation2 + $0x14] sm:$0xff]   ;;  %v7105_v17 = vshll.u32 %v9247_v29, 16 }
 0x332   : > { %8833 = vmatprep.subr.bf16.mxu1 %v9232_v7  ;;  %v7084_v58 = vsel %vm3375_vm2, %v7079_v55, %v7083_v14  ;;  %v7087_v56 = vor.u32 %v7085_v22, %v7083_v14 }
 0x335   : > { %8834 = vmatpush3.bf16.msra.mxu1 %v9232_v7  ;;  %v7092_v7 = vsel %vm3375_vm2, %v7087_v56, %v7091_v15 }
 0x336   : > { %8835 = vmatprep.subr.bf16.mxu1 %v9233_v31 }
 0x338   : > { %8788 = vmatmul.mubr.bf16.gmra.mxu1 %v11605_v37  ;;  %v7060_v37 = vshll.u32 %v9240_v27, 16 }
 0x339   : > { %8791 = vmatprep.mubr.bf16.mxu1 %v11620_v10  ;;  %8836 = vmatpush3.bf16.msra.mxu1 %v9233_v31  ;;  %v7058_v10 = vshrl.u32 %v9240_v27, 16  ;;  %v7100_v31 = vsel %vm3375_vm2, %v7095_v28, %v7099_v43  ;;  %v7115_v27 = vrot.slane %v7113_v47, 1 }
 0x33a   : > { %8837 = vmatprep.subr.bf16.mxu1 %v9234_v0  ;;  %v7062_v49 = vrot.slane %v7060_v37, 1 }
 0x33c   : > { %v7063_v40 = vor.u32 %v7062_v49, %v7058_v10  ;;  %v7123_v49 = vrot.slane %v7121_v36, 1 }
 0x33d   : > { %8838 = vmatpush3.bf16.msra.mxu1 %v9234_v0  ;;  %v7107_v0 = vrot.slane %v7105_v17, 1 }
 0x33e   : > { %8839 = vmatprep.subr.bf16.mxu1 %v9235_v34  ;;  %v7068_v18 = vsel %vm3375_vm2, %v7063_v40, %v7067_v39 }
 0x33f   : > { %v7108_v37 = vsel %vm3375_vm2, %v7103_v61, %v7107_v0 }
 0x340   : > { %8792 = vmatmul.mubr.bf16.gmra.mxu1 %v11624_v62  ;;  %v6657_v62 = vrot.slane %v6655_v8, 1 }
 0x341   : > { %8795 = vmatprep.mubr.bf16.mxu1 %v6650_v35  ;;  %8840 = vmatpush3.bf16.msra.mxu1 %v9235_v34  ;;  %v7109_v34 = vshrl.u32 %v9247_v29, 16 }
 0x342   : > { %8841 = vmatprep.subr.bf16.mxu1 %v9237_v44  ;;  %v6658_v52 = vsel %vm3375_vm2, %v6653_v2, %v6657_v62 }
 0x345   : > { %8842 = vmatpush3.bf16.msra.mxu1 %v9237_v44  ;;  %v7111_v44 = vor.u32 %v7109_v34, %v7107_v0 }
 0x346   : > { %8843 = vmatprep.subr.bf16.mxu1 %v9239_v19 }
 0x347   : > { %v7116_v35 = vsel %vm3375_vm2, %v7111_v44, %v7115_v27 }
 0x348   : > { %8796 = vmatmul.mubr.bf16.gmra.mxu1 %v6658_v52 }
 0x349   : > { %8844 = vmatpush3.bf16.msra.mxu1 %v9239_v19  ;;  %8847 = vmatprep.mubr.bf16.mxu1 %v7068_v18  ;;  %v7119_v19 = vor.u32 %v7117_v20, %v7115_v27 }
 0x34a   : > { %8845 = vmatprep.subr.bf16.mxu1 %v9242_v32 }
 0x34b   : > { %v7124_v2 = vsel %vm3375_vm2, %v7119_v19, %v7123_v49 }
 0x34d   : > { %8846 = vmatpush3.bf16.msra.mxu1 %v9242_v32 }
 0x350   : > { %8848 = vmatmul.mubr.bf16.vlgmr.msra.gmra.mxu1 %v7076_v63 }
 0x351   : > { %8851 = vmatprep.mubr.bf16.mxu1 %v7084_v58  ;;  %v11721_v40 = vpop.f32.mrf.mxu0 }
 0x353   : > { %v11723_v9 = vpop.f32.mrf.mxu0 }
 0x355   : > { %v11725_v18 = vpop.f32.mrf.mxu0 }
 0x357   : > { %v11727_v11 = vpop.f32.mrf.mxu0 }
 0x358   : > { %8852 = vmatmul.mubr.bf16.gmra.mxu1 %v7092_v7  ;;  %v8593_v45 = vpop.f32.mrf.mxu1 }
 0x359   : > { %8855 = vmatprep.mubr.bf16.mxu1 %v7100_v31 }
 0x35a   : > { %v5323_v8 = vpop.f32.mrf.mxu1 }
 0x35c   : > { %v8594_v26 = vpop.f32.mrf.mxu1 }
 0x35e   : > { %v5326_v10 = vpop.f32.mrf.mxu1 }
 0x360   : > { %8856 = vmatmul.mubr.bf16.gmra.mxu1 %v7108_v37 }
 0x361   : > { %8859 = vmatprep.mubr.bf16.mxu1 %v7116_v35  ;;  %v11729_v12 = vpop.f32.mrf.mxu0 }
 0x363   : > { %v11731_v14 = vpop.f32.mrf.mxu0 }
 0x365   : > { %v11733_v55 = vpop.f32.mrf.mxu0 }
 0x367   : > { %v11735_v58 = vpop.f32.mrf.mxu0 }
 0x368   : > { %8860 = vmatmul.mubr.bf16.gmra.mxu1 %v7124_v2  ;;  %v8597_v39 = vpop.f32.mrf.mxu1 }
 0x36a   : > { %v5339_v25 = vpop.f32.mrf.mxu1 }
 0x36c   : > { %v8598_v62 = vpop.f32.mrf.mxu1 }
 0x36e   : > { %v5342_v32 = vpop.f32.mrf.mxu1 }
 0x371   : > { %v11737_v29 = vpop.f32.mrf.mxu0 }
 0x372   : > { %12308 = vst [vmem:[#allocation3_spill] sm:$0xff] %v11737_v29 }
 0x373   : > { %v11739_v56 = vpop.f32.mrf.mxu0 }
 0x374   : > { %12309 = vst [vmem:[#allocation5_spill] sm:$0xff] %v11739_v56 }
 0x375   : > { %v11741_v47 = vpop.f32.mrf.mxu0 }
 0x376   : > { %12310 = vst [vmem:[#allocation9_spill] sm:$0xff] %v11741_v47 }
 0x377   : > { %v11743_v61 = vpop.f32.mrf.mxu0 }
 0x378   : > { %v8601_v52 = vpop.f32.mrf.mxu1  ;;  %12311 = vst [vmem:[#allocation8_spill] sm:$0xff] %v11743_v61 }
 0x37a   : > { %v5355_v24 = vpop.f32.mrf.mxu1 }
 0x37c   : > { %v8602_v1 = vpop.f32.mrf.mxu1 }
 0x37e   : > { %v5358_v59 = vpop.f32.mrf.mxu1 }
 0x381   : > { %v11745_v44 = vpop.f32.mrf.mxu0 }
 0x382   : > { %12312 = vst [vmem:[#allocation11_spill] sm:$0xff] %v11745_v44 }
 0x388   : > { %v8605_v46 = vpop.f32.mrf.mxu1 }
 0x38a   : > { %v5371_v48 = vpop.f32.mrf.mxu1 }
 0x38c   : > { %v8606_v21 = vpop.f32.mrf.mxu1 }
 0x38e   : > { %v5374_v63 = vpop.f32.mrf.mxu1 }
 0x390   : > { %v8625_v23 = vpop.f32.mrf.mxu1 }
 0x391   : > { %v5516_v15 = vadd.f32 %v8625_v23, %v8593_v45 }
 0x392   : > { %v5507_v22 = vpop.f32.mrf.mxu1 }
 0x393   : > { %v5508_v53 = vadd.f32 %v5507_v22, %v5323_v8  ;;  %v11747_v8 = vpop.f32.mrf.mxu0 }
 0x394   : > { %v8626_v43 = vpop.f32.mrf.mxu1  ;;  %12313 = vst [vmem:[#allocation6_spill] sm:$0xff] %v11747_v8 }
 0x395   : > { %v5519_v30 = vadd.f32 %v8626_v43, %v8594_v26 }
 0x396   : > { %v5510_v28 = vpop.f32.mrf.mxu1 }
 0x397   : > { %v5511_v17 = vadd.f32 %v5510_v28, %v5326_v10  ;;  %v11749_v10 = vpop.f32.mrf.mxu0 }
 0x398   : > { %v8629_v7 = vpop.f32.mrf.mxu1  ;;  %12314 = vst [vmem:[#allocation7_spill] sm:$0xff] %v11749_v10 }
 0x399   : > { %v5532_v31 = vadd.f32 %v8629_v7, %v8597_v39  ;;  %v11751_v22 = vpop.f32.mrf.mxu0 }
 0x39a   : > { %v5523_v0 = vpop.f32.mrf.mxu1  ;;  %12315 = vst [vmem:[#allocation12_spill] sm:$0xff] %v11751_v22 }
 0x39b   : > { %v5524_v13 = vadd.f32 %v5523_v0, %v5339_v25  ;;  %v11753_v7 = vpop.f32.mrf.mxu0 }
 0x39c   : > { %v8630_v34 = vpop.f32.mrf.mxu1 }
 0x39d   : > { %v5535_v27 = vadd.f32 %v8630_v34, %v8598_v62 }
 0x39e   : > { %v5526_v51 = vpop.f32.mrf.mxu1 }
 0x39f   : > { %v5527_v45 = vadd.f32 %v5526_v51, %v5342_v32 }
 0x3a0   : > { %v8633_v37 = vpop.f32.mrf.mxu1 }
 0x3a1   : > { %v5548_v35 = vadd.f32 %v8633_v37, %v8601_v52 }
 0x3a2   : > { %v5539_v20 = vpop.f32.mrf.mxu1 }
 0x3a3   : > { %v5540_v36 = vadd.f32 %v5539_v20, %v5355_v24 }
 0x3a4   : > { %v8634_v19 = vpop.f32.mrf.mxu1 }
 0x3a5   : > { %v5551_v49 = vadd.f32 %v8634_v19, %v8602_v1 }
 0x3a6   : > { %v5542_v26 = vpop.f32.mrf.mxu1 }
 0x3a7   : > { %v5543_v2 = vadd.f32 %v5542_v26, %v5358_v59  ;;  %v11759_v59 = vpop.f32.mrf.mxu0 }
 0x3a8   : > { %v8637_v39 = vpop.f32.mrf.mxu1 }
 0x3a9   : > { %v5564_v25 = vadd.f32 %v8637_v39, %v8605_v46  ;;  %v11765_v20 = vpop.f32.mrf.mxu0 }
 0x3aa   : > { %v5555_v62 = vpop.f32.mrf.mxu1 }
 0x3ab   : > { %v5556_v23 = vadd.f32 %v5555_v62, %v5371_v48 }
 0x3ac   : > { %v8638_v32 = vpop.f32.mrf.mxu1 }
 0x3ad   : > { %v5567_v43 = vadd.f32 %v8638_v32, %v8606_v21 }
 0x3ae   : > { %v5558_v28 = vpop.f32.mrf.mxu1 }
 0x3af   : > { %v5559_v52 = vadd.f32 %v5558_v28, %v5374_v63 }
 0x3b0   : > { %v8657_v24 = vpop.f32.mrf.mxu1 }
 0x3b1   : > { %v11755_v0 = vadd.f32 %v8657_v24, %v5516_v15  ;;  %v11771_v15 = vpop.f32.mrf.mxu0 }
 0x3b2   : > { %v5817_v1 = vpop.f32.mrf.mxu1 }
 0x3b3   : > { %v11757_v34 = vadd.f32 %v5817_v1, %v5508_v53 }
 0x3b4   : > { %v8658_v51 = vpop.f32.mrf.mxu1 }
 0x3b5   : > { %v11761_v46 = vadd.f32 %v8658_v51, %v5519_v30  ;;  %v11777_v30 = vpop.f32.mrf.mxu0 }
 0x3b6   : > { %v5820_v48 = vpop.f32.mrf.mxu1 }
 0x3b7   : > { %v11763_v37 = vadd.f32 %v5820_v48, %v5511_v17 }
 0x3b8   : > { %v8661_v21 = vpop.f32.mrf.mxu1 }
 0x3b9   : > { %v11767_v63 = vadd.f32 %v8661_v21, %v5532_v31  ;;  %v11783_v31 = vpop.f32.mrf.mxu0 }
 0x3ba   : > { %v5833_v19 = vpop.f32.mrf.mxu1 }
 0x3bb   : > { %v11769_v26 = vadd.f32 %v5833_v19, %v5524_v13 }
 0x3bc   : > { %v8662_v53 = vpop.f32.mrf.mxu1 }
 0x3bd   : > { %v11773_v39 = vadd.f32 %v8662_v53, %v5535_v27  ;;  %v11789_v27 = vpop.f32.mrf.mxu0 }
 0x3be   : > { %v5836_v62 = vpop.f32.mrf.mxu1 }
 0x3bf   : > { %12316 = vst [vmem:[#allocation10_spill] sm:$0xff] %v11773_v39  ;;  %v11775_v32 = vadd.f32 %v5836_v62, %v5527_v45 }
 0x3c0   : > { %v8665_v17 = vpop.f32.mrf.mxu1 }
 0x3c1   : > { %12317 = vst [vmem:[#allocation15_spill] sm:$0xff] %v11775_v32  ;;  %v11779_v28 = vadd.f32 %v8665_v17, %v5548_v35  ;;  %v11795_v35 = vpop.f32.mrf.mxu0 }
 0x3c2   : > { %v5849_v24 = vpop.f32.mrf.mxu1  ;;  %12321 = vst [vmem:[#allocation19_spill] sm:$0xff] %v11795_v35  ;;  %v596_v35 = vand.u32 15, %v10995_v54 }
 0x3c3   : > { %v11781_v1 = vadd.f32 %v5849_v24, %v5540_v36 }
 0x3c4   : > { %v8666_v13 = vpop.f32.mrf.mxu1  ;;  %vm11915_vm13 = vcmp.ne.s32.totalorder %v596_v35, 0 }
 0x3c5   : > { %v11785_v51 = vadd.f32 %v8666_v13, %v5551_v49  ;;  %v11801_v49 = vpop.f32.mrf.mxu0 }
 0x3c6   : > { %v5852_v48 = vpop.f32.mrf.mxu1  ;;  %12324 = vst [vmem:[#allocation22_spill] sm:$0xff] %v11801_v49 }
 0x3c7   : > { %12318 = vst [vmem:[#allocation16_spill] sm:$0xff] %v11785_v51  ;;  %v11787_v21 = vadd.f32 %v5852_v48, %v5543_v2  ;;  %v11805_v48 = vpop.f32.mrf.mxu0 }
 0x3c8   : > { %v8669_v45 = vpop.f32.mrf.mxu1  ;;  %12325 = vst [vmem:[#allocation23_spill] sm:$0xff] %v11805_v48 }
 0x3c9   : > { %12319 = vst [vmem:[#allocation17_spill] sm:$0xff] %v11787_v21  ;;  %v11791_v19 = vadd.f32 %v8669_v45, %v5564_v25 }
 0x3ca   : > { %v5865_v53 = vpop.f32.mrf.mxu1 }
 0x3cb   : > { %v11793_v62 = vadd.f32 %v5865_v53, %v5556_v23  ;;  %v11811_v23 = vpop.f32.mrf.mxu0 }
 0x3cc   : > { %v8670_v36 = vpop.f32.mrf.mxu1  ;;  %12326 = vst [vmem:[#allocation24_spill] sm:$0xff] %v11811_v23 }
 0x3cd   : > { %12320 = vst [vmem:[#allocation18_spill] sm:$0xff] %v11793_v62  ;;  %v11797_v17 = vadd.f32 %v8670_v36, %v5567_v43  ;;  %v11817_v36 = vpop.f32.mrf.mxu0 }
 0x3ce   : > { %v5868_v24 = vpop.f32.mrf.mxu1  ;;  %12327 = vst [vmem:[#allocation25_spill] sm:$0xff] %v11817_v36 }
 0x3cf   : > { %12322 = vst [vmem:[#allocation20_spill] sm:$0xff] %v11797_v17  ;;  %v11799_v22 = vadd.f32 %v5868_v24, %v5559_v52 }
 0x3d0   : > { %v8721_v2 = vpop.f32.mrf.mxu1 }
 0x3d1   : > { %12323 = vst [vmem:[#allocation21_spill] sm:$0xff] %v11799_v22  ;;  %v11823_v22 = vpop.f32.mrf.mxu0  ;;  %v6230_v54 = vadd.f32 %v8721_v2, %v11721_v40 }
 0x3d2   : > { %v11803_v13 = vpop.f32.mrf.mxu1  ;;  %12328 = vst [vmem:[#allocation26_spill] sm:$0xff] %v11823_v22 }
 0x3d3   : > { %v11829_v21 = vpop.f32.mrf.mxu0 }
 0x3d4   : > { %v11807_v25 = vpop.f32.mrf.mxu1  ;;  %12331 = vst [vmem:[#allocation29_spill] sm:$0xff] %v11829_v21 }
 0x3d5   : > { %v11835_v8 = vpop.f32.mrf.mxu0 }
 0x3d6   : > { %v11809_v45 = vpop.f32.mrf.mxu1  ;;  %12334 = vst [vmem:[#allocation32_spill] sm:$0xff] %v11835_v8 }
 0x3d7   : > { %v11841_v61 = vpop.f32.mrf.mxu0 }
 0x3d8   : > { %v11813_v53 = vpop.f32.mrf.mxu1  ;;  %12337 = vst [vmem:[#allocation35_spill] sm:$0xff] %v11841_v61 }
 0x3d9   : > { %v8817_v48 = vpop.f32.mrf.mxu0 }
 0x3da   : > { %v11815_v43 = vpop.f32.mrf.mxu1 }
 0x3db   : > { %v11849_v32 = vpop.f32.mrf.mxu0 }
 0x3dc   : > { %v11819_v52 = vpop.f32.mrf.mxu1 }
 0x3de   : > { %v11821_v24 = vpop.f32.mrf.mxu1 }
 0x3e0   : > { %v11825_v17 = vpop.f32.mrf.mxu1 }
 0x3e1   : > { %12329 = vst [vmem:[#allocation27_spill] sm:$0xff] %v11825_v17 }
 0x3e2   : > { %v11827_v62 = vpop.f32.mrf.mxu1 }
 0x3e3   : > { %12330 = vst [vmem:[#allocation28_spill] sm:$0xff] %v11827_v62 }
 0x3e4   : > { %v11831_v10 = vpop.f32.mrf.mxu1 }
 0x3e5   : > { %12332 = vst [vmem:[#allocation30_spill] sm:$0xff] %v11831_v10 }
 0x3e6   : > { %v11833_v51 = vpop.f32.mrf.mxu1 }
 0x3e7   : > { %12333 = vst [vmem:[#allocation31_spill] sm:$0xff] %v11833_v51 }
 0x3e8   : > { %v11837_v44 = vpop.f32.mrf.mxu1 }
 0x3e9   : > { %12335 = vst [vmem:[#allocation33_spill] sm:$0xff] %v11837_v44  ;;  %v11855_v44 = vpop.f32.mrf.mxu0 }
 0x3ea   : > { %v11839_v36 = vpop.f32.mrf.mxu1 }
 0x3eb   : > { %12336 = vst [vmem:[#allocation34_spill] sm:$0xff] %v11839_v36 }
 0x3ec   : > { %v11843_v23 = vpop.f32.mrf.mxu1 }
 0x3ed   : > { %12338 = vst [vmem:[#allocation36_spill] sm:$0xff] %v11843_v23  ;;  %v11861_v23 = vpop.f32.mrf.mxu0 }
 0x3ee   : > { %v11845_v22 = vpop.f32.mrf.mxu1 }
 0x3ef   : > { %12339 = vst [vmem:[#allocation37_spill] sm:$0xff] %v11845_v22  ;;  %v11867_v10 = vpop.f32.mrf.mxu0 }
 0x3f0   : > { %v8785_v49 = vpop.f32.mrf.mxu1  ;;  %12344 = vst [vmem:[#allocation42_spill] sm:$0xff] %v11867_v10 }
 0x3f1   : > { %v11873_v56 = vpop.f32.mrf.mxu0  ;;  %v6926_v35 = vadd.f32 %v8817_v48, %v8785_v49 }
 0x3f2   : > { %v11847_v21 = vpop.f32.mrf.mxu1  ;;  %12347 = vst [vmem:[#allocation45_spill] sm:$0xff] %v11873_v56 }
 0x3f3   : > { %v11888_v56 = vpop.f32.mrf.mxu0 }
 0x3f4   : > { %v11851_v51 = vpop.f32.mrf.mxu1 }
 0x3f6   : > { %v11853_v8 = vpop.f32.mrf.mxu1 }
 0x3f8   : > { %v11857_v36 = vpop.f32.mrf.mxu1 }
 0x3f9   : > { %12340 = vst [vmem:[#allocation38_spill] sm:$0xff] %v11857_v36 }
 0x3fa   : > { %v11859_v61 = vpop.f32.mrf.mxu1 }
 0x3fb   : > { %12341 = vst [vmem:[#allocation39_spill] sm:$0xff] %v11859_v61  ;;  %v12349_v61 = vld [vmem:[#allocation13_spill] sm:$0xff] }
 0x3fc   : > { %v11863_v22 = vpop.f32.mrf.mxu1  ;;  %v582_v29 = vand.u32 15, %v12349_v61 }
 0x3fd   : > { %12342 = vst [vmem:[#allocation40_spill] sm:$0xff] %v11863_v22  ;;  %v575_v22 = vand.u32 15, %v10649_v57  ;;  %v589_v57 = vand.u32 15, %v10675_v5 }
 0x3fe   : > { %v11865_v39 = vpop.f32.mrf.mxu1  ;;  %vm11903_vm0 = vcmp.ne.s32.totalorder %v582_v29, 0 }
 0x3ff   : > { %12343 = vst [vmem:[#allocation41_spill] sm:$0xff] %v11865_v39  ;;  %v610_v39 = vand.u32 15, %v11009_v60  ;;  %vm11907_vm2 = vcmp.ne.s32.totalorder %v575_v22, 0  ;;  %v6222_v22 = vadd.f32 %v11803_v13, %v11723_v9  ;;  %vm11944_vm4 = vcmp.ne.s32.totalorder %v589_v57, 15  ;;  %v12368_v13 = vld [vmem:[#allocation4_spill] sm:$0xff] }
 0x400   : > { %v11869_v47 = vpop.f32.mrf.mxu1  ;;  %v603_v9 = vand.u32 15, %v10688_v3  ;;  %v6246_v57 = vadd.f32 %v11813_v53, %v11729_v12  ;;  %v5926_v3 = vsel %vm11907_vm2, %v11757_v34, 0.0  ;;  %v659_v60 = vand.u32 15, %v12368_v13 }
 0x401   : > { %12345 = vst [vmem:[#allocation43_spill] sm:$0xff] %v11869_v47  ;;  %v624_v47 = vand.u32 15, %v11023_v38  ;;  %vm11911_vm12 = vcmp.ne.s32.totalorder %v610_v39, 0  ;;  %v11935_v39 = vpop.f32.mrf.mxu0  ;;  %v5930_v12 = vsel %vm11915_vm13, %v11769_v26, 0.0  ;;  %v6238_v34 = vadd.f32 %v11815_v43, %v11731_v14  ;;  %v11997_v38 = vld [vmem:[%s12183_s4] ss:$0 sm:$0xff] }
 0x402   : > { %v11871_v62 = vpop.f32.mrf.mxu1  ;;  %v6468_v14 = vadd.f32 %v11777_v30, %v6246_v57  ;;  %v6249_v43 = vadd.f32 %v11819_v52, %v11733_v55  ;;  %v6241_v52 = vadd.f32 %v11821_v24, %v11735_v58  ;;  %vm12027_vm6 = vcmp.ne.s32.totalorder %v603_v9, 15 }
 0x403   : > { %12346 = vst [vmem:[#allocation44_spill] sm:$0xff] %v11871_v62  ;;  %v638_v62 = vand.u32 15, %v11034_v6  ;;  %vm11925_vm1 = vcmp.ne.s32.totalorder %v624_v47, 0  ;;  %v6466_v30 = vadd.f32 %v11783_v31, %v6238_v34  ;;  %v12371_v31 = vld [vmem:[#allocation38_spill] sm:$0xff]  ;;  %v12375_v34 = vld [vmem:[#allocation19_spill] sm:$0xff]  ;;  %vm5054_vm10 = vcmp.ne.s32.totalorder %v659_v60, 15 }
 0x404   : > { %v11875_v17 = vpop.f32.mrf.mxu1 }
 0x405   : > { %12348 = vst [vmem:[#allocation46_spill] sm:$0xff] %v11875_v17  ;;  %v666_v17 = vand.u32 15, %v11091_v33  ;;  %vm11921_vm15 = vcmp.ne.s32.totalorder %v638_v62, 0  ;;  %v6233_v62 = vadd.f32 %v11807_v25, %v11725_v18  ;;  %v5928_v18 = vsel %vm11903_vm0, %v11755_v0, 0.0  ;;  %v11972_v0 = vpop.f32.mrf.mxu0 }
 0x406   : > { %v11883_v10 = vpop.f32.mrf.mxu1  ;;  %v6225_v25 = vadd.f32 %v11809_v45, %v11727_v11  ;;  %v5932_v11 = vsel %vm11911_vm12, %v11767_v63, 0.0  ;;  %v5936_v49 = vsel %vm11921_vm15, %v11779_v28, 0.0  ;;  %v6918_v63 = vadd.f32 %v11849_v32, %v11847_v21 }
 0x407   : > { %vm11929_vm3 = vcmp.ne.s32.totalorder %v666_v17, 0  ;;  %v617_v17 = vand.u32 15, %v10703_v42  ;;  %v6465_v45 = vadd.f32 %v11765_v20, %v6233_v62  ;;  %v5934_v20 = vsel %vm11925_vm1, %v11781_v1, 0.0 }
 0x408   : > { %v11890_v36 = vpop.f32.mrf.mxu1  ;;  %v6463_v26 = vadd.f32 %v11771_v15, %v6225_v25  ;;  %v6929_v32 = vadd.f32 %v11855_v44, %v11851_v51  ;;  %v5940_v15 = vsel %vm11929_vm3, %v11791_v19, 0.0  ;;  %v6921_v51 = vadd.f32 %v11861_v23, %v11853_v8 }
 0x409   : > { %v6481_v55 = vadd.f32 %v6465_v45, %v11761_v46  ;;  %vm12011_vm5 = vcmp.ne.s32.totalorder %v617_v17, 15  ;;  %v6469_v46 = vadd.f32 %v11789_v27, %v6249_v43  ;;  %v6484_v24 = vadd.f32 %v6468_v14, %v5932_v11  ;;  %v12378_v14 = vld [vmem:[#allocation39_spill] sm:$0xff]  ;;  %v12379_v43 = vld [vmem:[#allocation45_spill] sm:$0xff] }
 0x40a   : > { %v11919_v33 = vpop.f32.mrf.mxu1  ;;  %v6479_v57 = vadd.f32 %v6463_v26, %v11763_v37  ;;  %v6482_v9 = vadd.f32 %v6466_v30, %v5930_v12  ;;  %v12385_v12 = vld [vmem:[#allocation10_spill] sm:$0xff] }
 0x40b   : > { %12359 = vst [vmem:[#allocation13_spill] sm:$0xff] %v11919_v33  ;;  %v6464_v33 = vadd.f32 %v11753_v7, %v6230_v54  ;;  %v673_v7 = vand.u32 15, %v10785_v41  ;;  %v6462_v54 = vadd.f32 %v11759_v59, %v6222_v22  ;;  %v12002_v22 = vpop.f32.mrf.mxu0  ;;  %v6485_v30 = vadd.f32 %v6469_v46, %v12385_v12  ;;  %v12404_v12 = vld [vmem:[#allocation11_spill] sm:$0xff] }
 0x40c   : > { %v11940_v2 = vpop.f32.mrf.mxu1 }
 0x40d   : > { %v6480_v48 = vadd.f32 %v6464_v33, %v5928_v18  ;;  %v6478_v5 = vadd.f32 %v6462_v54, %v5926_v3  ;;  %v12372_v3 = vld [vmem:[#allocation42_spill] sm:$0xff]  ;;  %v8826_v45 = vpop.f32.mrf.mxu0  ;;  %vm12143_vm9 = vcmp.ne.s32.totalorder %v673_v7, 15 }
 0x40e   : > { %v11961_v42 = vpop.f32.mrf.mxu1  ;;  %v6942_v54 = vadd.f32 %v12372_v3, %v12371_v31  ;;  %v12386_v3 = vld [vmem:[#allocation40_spill] sm:$0xff] }
 0x410   : > { %v8849_v59 = vpop.f32.mrf.mxu1 }
 0x411   : > { %v7280_v53 = vadd.f32 %v8849_v59, %v6926_v35  ;;  %v6467_v59 = vadd.f32 %v12375_v34, %v6241_v52  ;;  %v12383_v52 = vld [vmem:[#allocation9_spill] sm:$0xff]  ;;  %v12388_v34 = vld [vmem:[#allocation22_spill] sm:$0xff] }
 0x412   : > { %v7215_v6 = vpop.f32.mrf.mxu1 }
 0x413   : > { %v7342_v21 = vadd.f32 %v7280_v53, %v6480_v48  ;;  %v7278_v33 = vadd.f32 %v7215_v6, %v6918_v63  ;;  %v12376_v63 = vld [vmem:[#allocation3_spill] sm:$0xff]  ;;  %v6934_v6 = vadd.f32 %v12379_v43, %v12378_v14 }
 0x414   : > { %v8850_v35 = vpop.f32.mrf.mxu1  ;;  %v12377_v48 = vld [vmem:[#allocation27_spill] sm:$0xff] }
 0x415   : > { %v7365_v62 = vadd.f32 %v11997_v38, %v7342_v21  ;;  %v7340_v18 = vadd.f32 %v7278_v33, %v6478_v5  ;;  %v7281_v25 = vadd.f32 %v8850_v35, %v6929_v32  ;;  %v6262_v53 = vadd.f32 %v12377_v48, %v12376_v63  ;;  %v12381_v33 = vld [vmem:[#allocation5_spill] sm:$0xff]  ;;  %v12382_v35 = vld [vmem:[#allocation28_spill] sm:$0xff] }
 0x416   : > { %v7218_v58 = vpop.f32.mrf.mxu1 }
 0x417   : > { %v7381_v23 = vmax.f32 %v7365_v62, 0.0  ;;  %v7363_v37 = vadd.f32 %v11997_v38, %v7340_v18  ;;  %v7327_v27 = vsel %vm11944_vm4, %v7281_v25, 0.0  ;;  %v7279_v17 = vadd.f32 %v7218_v58, %v6921_v51  ;;  %v12384_v62 = vld [vmem:[#allocation30_spill] sm:$0xff] }
 0x418   : > { %v7343_v26 = vadd.f32 %v7327_v27, %v6481_v55  ;;  %v8853_v11 = vpop.f32.mrf.mxu1  ;;  %v6254_v51 = vadd.f32 %v12382_v35, %v12381_v33  ;;  %v6265_v18 = vadd.f32 %v12384_v62, %v12383_v52  ;;  %v6945_v58 = vadd.f32 %v11888_v56, %v12386_v3  ;;  %v12387_v27 = vld [vmem:[#allocation15_spill] sm:$0xff]  ;;  %v12392_v56 = vld [vmem:[#allocation41_spill] sm:$0xff] }
 0x419   : > { %7397 = vst [vmem:[%s12025_s9 + $0x10] sm:$0xff] %v7381_v23  ;;  %v7379_v32 = vmax.f32 %v7363_v37, 0.0  ;;  %v7325_v47 = vsel %vm10976_vm14, %v7279_v17, 0.0  ;;  %v7284_v5 = vadd.f32 %v8853_v11, %v6942_v54  ;;  %v6952_v54 = vpop.f32.mrf.mxu0  ;;  %v6483_v17 = vadd.f32 %v6467_v59, %v12387_v27  ;;  %v12393_v59 = vld [vmem:[#allocation23_spill] sm:$0xff]  ;;  %v12405_v3 = vld [vmem:[#allocation33_spill] sm:$0xff]  ;;  %v12406_v27 = vld [vmem:[#allocation44_spill] sm:$0xff] }
 0x41a   : > { %v7366_v25 = vadd.f32 %v11997_v38, %v7343_v26  ;;  %v7341_v55 = vadd.f32 %v7325_v47, %v6479_v57  ;;  %v7231_v31 = vpop.f32.mrf.mxu1  ;;  %v6472_v63 = vadd.f32 %v12388_v34, %v6262_v53  ;;  %v12389_v57 = vand.u32 15, %v10733_v16  ;;  %v12395_v47 = vld [vmem:[#allocation43_spill] sm:$0xff] }
 0x41b   : > { %7395 = vst [vmem:[%s12025_s9] sm:$0xff] %v7379_v32  ;;  %v7346_v23 = vadd.f32 %v7284_v5, %v6484_v24  ;;  %v7282_v37 = vadd.f32 %v7231_v31, %v6934_v6  ;;  %v6937_v24 = vadd.f32 %v11935_v39, %v12392_v56  ;;  %v6470_v53 = vadd.f32 %v12393_v59, %v6254_v51  ;;  %v12394_v32 = vld [vmem:[#allocation24_spill] sm:$0xff]  ;;  %v12411_v59 = vld [vmem:[#allocation25_spill] sm:$0xff] }
 0x41c   : > { %v7382_v48 = vmax.f32 %v7366_v25, 0.0  ;;  %v7364_v11 = vadd.f32 %v11997_v38, %v7341_v55  ;;  %v8854_v26 = vpop.f32.mrf.mxu1  ;;  %vm12056_vm14 = vcmp.ne.s32.totalorder %v12389_v57, 15  ;;  %v6473_v21 = vadd.f32 %v12394_v32, %v6265_v18  ;;  %v8829_v25 = vpop.f32.mrf.mxu0  ;;  %v12402_v55 = vld [vmem:[#allocation8_spill] sm:$0xff]  ;;  %v12408_v57 = vld [vmem:[#allocation34_spill] sm:$0xff] }
 0x41d   : > { %v7369_v14 = vadd.f32 %v11997_v38, %v7346_v23  ;;  %v7344_v43 = vadd.f32 %v7282_v37, %v6482_v9  ;;  %v7285_v6 = vadd.f32 %v8854_v26, %v6945_v58  ;;  %v6958_v5 = vadd.f32 %v11972_v0, %v12395_v47  ;;  %v12407_v26 = vld [vmem:[#allocation6_spill] sm:$0xff] }
 0x41e   : > { %7398 = vst [vmem:[%s12025_s9 + $0x18] sm:$0xff] %v7382_v48  ;;  %v7380_v16 = vmax.f32 %v7364_v11, 0.0  ;;  %v7234_v33 = vpop.f32.mrf.mxu1  ;;  %v12396_v35 = vand.u32 15, %v10718_v4  ;;  %v12399_v9 = vand.u32 15, %v11045_v50  ;;  %v12403_v4 = vld [vmem:[#allocation31_spill] sm:$0xff]  ;;  %v6278_v58 = vadd.f32 %v12405_v3, %v12404_v12  ;;  %v12412_v47 = vld [vmem:[#allocation26_spill] sm:$0xff] }
 0x41f   : > { %v7385_v51 = vmax.f32 %v7369_v14, 0.0  ;;  %v7367_v62 = vadd.f32 %v11997_v38, %v7344_v43  ;;  %v7331_v0 = vsel %vm12011_vm5, %v7285_v6, 0.0  ;;  %v7283_v18 = vadd.f32 %v7234_v33, %v6937_v24  ;;  %v6965_v6 = vpop.f32.mrf.mxu0  ;;  %v12416_v12 = vld [vmem:[#allocation17_spill] sm:$0xff] }
 0x420   : > { %vm12070_vm7 = vcmp.ne.s32.totalorder %v12396_v35, 15  ;;  %vm12076_vm8 = vcmp.ne.s32.totalorder %v12399_v9, 0  ;;  %v6257_v31 = vadd.f32 %v12403_v4, %v12402_v55  ;;  %7396 = vst [vmem:[%s12025_s9 + $0x8] sm:$0xff] %v7380_v16  ;;  %v7347_v50 = vadd.f32 %v7331_v0, %v6485_v30  ;;  %v8857_v37 = vpop.f32.mrf.mxu1  ;;  %v12414_v35 = vld [vmem:[#allocation7_spill] sm:$0xff]  ;;  %v12415_v9 = vld [vmem:[#allocation36_spill] sm:$0xff] }
 0x421   : > { %v6488_v23 = vadd.f32 %v6472_v63, %v5936_v49  ;;  %v6950_v44 = vadd.f32 %v12002_v22, %v12406_v27  ;;  %7401 = vst [vmem:[%s12025_s9 + $0x30] sm:$0xff] %v7385_v51  ;;  %v7383_v34 = vmax.f32 %v7367_v62, 0.0  ;;  %v7329_v48 = vsel %vm12027_vm6, %v7283_v18, 0.0  ;;  %v12409_v49 = vld [vmem:[#allocation16_spill] sm:$0xff]  ;;  %v12410_v63 = vld [vmem:[#allocation46_spill] sm:$0xff]  ;;  %v12419_v27 = vld [vmem:[#allocation13_spill] sm:$0xff] }
 0x422   : > { %v7288_v11 = vadd.f32 %v8857_v37, %v6958_v5  ;;  %v6270_v56 = vadd.f32 %v12408_v57, %v12407_v26  ;;  %v7370_v30 = vadd.f32 %v11997_v38, %v7347_v50  ;;  %v7345_v24 = vadd.f32 %v7329_v48, %v6483_v17  ;;  %v7247_v40 = vpop.f32.mrf.mxu1  ;;  %v12418_v50 = vld [vmem:[#allocation37_spill] sm:$0xff]  ;;  %v12421_v57 = vld [vmem:[#allocation32_spill] sm:$0xff] }
 0x423   : > { %v6486_v28 = vadd.f32 %v6470_v53, %v5934_v20  ;;  %v6489_v22 = vadd.f32 %v6473_v21, %v12409_v49  ;;  %v6961_v14 = vadd.f32 %v8826_v45, %v12410_v63  ;;  %7399 = vst [vmem:[%s12025_s9 + $0x20] sm:$0xff] %v7383_v34  ;;  %v7286_v43 = vadd.f32 %v7247_v40, %v6950_v44  ;;  %v12413_v21 = vld [vmem:[#allocation29_spill] sm:$0xff]  ;;  %v12422_v49 = vld [vmem:[#allocation35_spill] sm:$0xff] }
 0x424   : > { %v7350_v8 = vadd.f32 %v7288_v11, %v6488_v23  ;;  %v6471_v32 = vadd.f32 %v12411_v59, %v6257_v31  ;;  %v6476_v5 = vadd.f32 %v12412_v47, %v6278_v58  ;;  %v7386_v17 = vmax.f32 %v7370_v30, 0.0  ;;  %v8858_v16 = vpop.f32.mrf.mxu1  ;;  %v8830_v31 = vpop.f32.mrf.mxu0  ;;  %v12417_v58 = vld [vmem:[#allocation12_spill] sm:$0xff]  ;;  %v12420_v11 = vld [vmem:[#allocation18_spill] sm:$0xff] }
 0x425   : > { %v7368_v29 = vadd.f32 %v11997_v38, %v7345_v24  ;;  %v6953_v1 = vadd.f32 %v6952_v54, %v11883_v10  ;;  %v7348_v53 = vadd.f32 %v7286_v43, %v6486_v28  ;;  %v7289_v45 = vadd.f32 %v8858_v16, %v6961_v14  ;;  %v12426_v16 = vld [vmem:[#allocation21_spill] sm:$0xff] }
 0x426   : > { %v7373_v20 = vadd.f32 %v11997_v38, %v7350_v8  ;;  %v6474_v33 = vadd.f32 %v12413_v21, %v6270_v56  ;;  %v6281_v51 = vadd.f32 %v12415_v9, %v12414_v35  ;;  %v6974_v62 = vadd.f32 %v8829_v25, %v11890_v36  ;;  %7402 = vst [vmem:[%s12025_s9 + $0x38] sm:$0xff] %v7386_v17  ;;  %v7250_v18 = vpop.f32.mrf.mxu1  ;;  %v6968_v39 = vpop.f32.mrf.mxu0 }
 0x427   : > { %v7384_v0 = vmax.f32 %v7368_v29, 0.0  ;;  %v7371_v4 = vadd.f32 %v11997_v38, %v7348_v53  ;;  %v7335_v10 = vsel %vm12056_vm14, %v7289_v45, 0.0  ;;  %v7287_v54 = vadd.f32 %v7250_v18, %v6953_v1 }
 0x428   : > { %v7389_v55 = vmax.f32 %v7373_v20, 0.0  ;;  %v6487_v3 = vadd.f32 %v6471_v32, %v12416_v12  ;;  %v6273_v23 = vadd.f32 %v12418_v50, %v12417_v58  ;;  %v7351_v36 = vadd.f32 %v7335_v10, %v6489_v22  ;;  %v8861_v37 = vpop.f32.mrf.mxu1  ;;  %v12425_v32 = vld [vmem:[#allocation20_spill] sm:$0xff] }
 0x429   : > { %7400 = vst [vmem:[%s12025_s9 + $0x28] sm:$0xff] %v7384_v0  ;;  %v6492_v25 = vadd.f32 %v6476_v5, %v5940_v15  ;;  %v6966_v44 = vadd.f32 %v6965_v6, %v12419_v27  ;;  %v7387_v46 = vmax.f32 %v7371_v4, 0.0  ;;  %v7333_v34 = vsel %vm12070_vm7, %v7287_v54, 0.0 }
 0x42a   : > { %7405 = vst [vmem:[%s12025_s9 + $0x50] sm:$0xff] %v7389_v55  ;;  %v7292_v48 = vadd.f32 %v8861_v37, %v6974_v62  ;;  %v5938_v26 = vsel %vm12076_vm8, %v12420_v11, 0.0  ;;  %v6477_v56 = vadd.f32 %v12421_v57, %v6281_v51  ;;  %v7374_v61 = vadd.f32 %v11997_v38, %v7351_v36  ;;  %v7263_v19 = vpop.f32.mrf.mxu1 }
 0x42b   : > { %v7349_v30 = vadd.f32 %v7333_v34, %v6487_v3  ;;  %v6977_v15 = vadd.f32 %v8830_v31, %v11940_v2  ;;  %7403 = vst [vmem:[%s12025_s9 + $0x40] sm:$0xff] %v7387_v46  ;;  %v6490_v28 = vadd.f32 %v6474_v33, %v5938_v26  ;;  %v7290_v40 = vadd.f32 %v7263_v19, %v6966_v44 }
 0x42c   : > { %v7354_v24 = vadd.f32 %v7292_v48, %v6492_v25  ;;  %v6475_v22 = vadd.f32 %v12422_v49, %v6273_v23  ;;  %v7390_v63 = vmax.f32 %v7374_v61, 0.0  ;;  %v8862_v8 = vpop.f32.mrf.mxu1  ;;  %v6969_v2 = vadd.f32 %v6968_v39, %v11961_v42 }
 0x42d   : > { %v7372_v52 = vadd.f32 %v11997_v38, %v7349_v30  ;;  %v7352_v6 = vadd.f32 %v7290_v40, %v6490_v28  ;;  %v7293_v59 = vadd.f32 %v8862_v8, %v6977_v15  ;;  %v6493_v47 = vadd.f32 %v6477_v56, %v12425_v32 }
 0x42e   : > { %v7377_v43 = vadd.f32 %v11997_v38, %v7354_v24  ;;  %7406 = vst [vmem:[%s12025_s9 + $0x58] sm:$0xff] %v7390_v63  ;;  %v7266_v41 = vpop.f32.mrf.mxu1  ;;  %v6491_v1 = vadd.f32 %v6475_v22, %v12426_v16 }
 0x42f   : > { %v7388_v5 = vmax.f32 %v7372_v52, 0.0  ;;  %v7375_v17 = vadd.f32 %v11997_v38, %v7352_v6  ;;  %v7339_v42 = vsel %vm12143_vm9, %v7293_v59, 0.0  ;;  %v7291_v29 = vadd.f32 %v7266_v41, %v6969_v2 }
 0x430   : > { %v7393_v7 = vmax.f32 %v7377_v43, 0.0  ;;  %v7355_v20 = vadd.f32 %v7339_v42, %v6493_v47 }
 0x431   : > { %7404 = vst [vmem:[%s12025_s9 + $0x48] sm:$0xff] %v7388_v5  ;;  %v7391_v53 = vmax.f32 %v7375_v17, 0.0  ;;  %v7337_v45 = vsel %vm5054_vm10, %v7291_v29, 0.0 }
 0x432   : > { %7409 = vst [vmem:[%s12025_s9 + $0x70] sm:$0xff] %v7393_v7  ;;  %v7378_v13 = vadd.f32 %v11997_v38, %v7355_v20  ;;  %v7353_v60 = vadd.f32 %v7337_v45, %v6491_v1 }
 0x433   : > { %7407 = vst [vmem:[%s12025_s9 + $0x60] sm:$0xff] %v7391_v53 }
 0x434   : > { %v7394_v21 = vmax.f32 %v7378_v13, 0.0  ;;  %v7376_v33 = vadd.f32 %v11997_v38, %v7353_v60 }
 0x436   : > { %7410 = vst [vmem:[%s12025_s9 + $0x78] sm:$0xff] %v7394_v21  ;;  %v7392_v35 = vmax.f32 %v7376_v33, 0.0 }
 0x438   : > { %7408 = vst [vmem:[%s12025_s9 + $0x68] sm:$0xff] %v7392_v35 }
 0x439 PF: > { %s15_s22 = sadd.s32 1, %s9291_s22   ;;  %s12427_s18 = smov %s9283_s20 }
 0x43a   : > { %p12_p8 = scmp.ge.s32.totalorder %s15_s22, 6   ;;  %s12428_s19 = smov %s9287_s21 }
 0x43b   : > { %s12429_s20 = smov %s12432_s23  ;;  %s12430_s21 = smov %s12436_s24 }
 0x43c   :  { %14 = sbr.rel (!%p12_p8) target bundleno = 3 (0x3), region = 86 }

</bundles_post_ra>
